<compile_context>
chip_gen: v7x
topology: tpu7x:2x2x1
jax: 0.10.0
libtpu: 0.0.40
codegen_flags: <defaults>
</compile_context>

<pallas_src>
import functools
from dataclasses import dataclass

import jax
import jax.numpy as jnp
from jax.experimental import pallas as pl
from jax.experimental.pallas import tpu as pltpu


def _round_up(x, m):
    return ((x + m - 1) // m) * m


def _choose_tile_n(n):
    np_ = _round_up(max(n, 128), 128)
    tn = 256 if np_ % 256 == 0 else 128
    return tn, np_


def _choose_tile_k(k):
    kp = _round_up(max(k, 128), 128)
    best = 128
    for t in range(128, 513, 128):
        if kp % t == 0:
            best = t
    return best, kp


# ----------------------------------------------------------------------------
# Pallas kernels: tiled matmul with f32 accumulator + fused epilogue
# ----------------------------------------------------------------------------
def _matmul_kernel(apply_relu, x_ref, w_ref, b_ref, o_ref, acc_ref):
    @pl.when(pl.program_id(2) == 0)
    def _():
        acc_ref[...] = jnp.zeros_like(acc_ref)

    acc_ref[...] += jnp.dot(x_ref[...], w_ref[...],
                            preferred_element_type=jnp.float32)

    @pl.when(pl.program_id(2) == pl.num_programs(2) - 1)
    def _():
        out = acc_ref[...] + b_ref[...]
        if apply_relu:
            out = jnp.maximum(out, 0.0)
        o_ref[...] = out.astype(o_ref.dtype)


def _matmul_res_kernel(apply_relu, x_ref, w_ref, b_ref, r_ref, o_ref, acc_ref):
    @pl.when(pl.program_id(2) == 0)
    def _():
        acc_ref[...] = jnp.zeros_like(acc_ref)

    acc_ref[...] += jnp.dot(x_ref[...], w_ref[...],
                            preferred_element_type=jnp.float32)

    @pl.when(pl.program_id(2) == pl.num_programs(2) - 1)
    def _():
        out = acc_ref[...] + b_ref[...] + r_ref[...]
        if apply_relu:
            out = jnp.maximum(out, 0.0)
        o_ref[...] = out.astype(o_ref.dtype)


def fused_matmul(patches, layer, res2d, relu):
    """patches: [M, K] f32, layer.w: [Kp, Np] bf16 (BN folded, pre-padded)."""
    wm, bias = layer.w, layer.b
    K, N, tk, tn = layer.k, layer.cout, layer.tk, layer.tn
    Kp, Np = wm.shape
    M = patches.shape[0]
    if M >= 256:
        tm, Mp = 256, _round_up(M, 256)
    else:
        tm = Mp = _round_up(M, 8)

    xp = patches.astype(jnp.bfloat16)
    if (Mp, Kp) != (M, K):
        xp = jnp.pad(xp, ((0, Mp - M), (0, Kp - K)))

    grid = (Mp // tm, Np // tn, Kp // tk)
    in_specs = [
        pl.BlockSpec((tm, tk), lambda i, j, k: (i, k)),
        pl.BlockSpec((tk, tn), lambda i, j, k: (k, j)),
        pl.BlockSpec((1, tn), lambda i, j, k: (0, j)),
    ]
    args = [xp, wm, bias]
    bytes_accessed = 2 * M * K + 2 * K * N + 4 * M * N + 4 * N
    if res2d is None:
        kernel = functools.partial(_matmul_kernel, relu)
    else:
        rp = res2d.astype(jnp.float32)
        if (Mp, Np) != (M, N):
            rp = jnp.pad(rp, ((0, Mp - M), (0, Np - N)))
        in_specs.append(pl.BlockSpec((tm, tn), lambda i, j, k: (i, j)))
        args.append(rp)
        bytes_accessed += 4 * M * N
        kernel = functools.partial(_matmul_res_kernel, relu)

    out = pl.pallas_call(
        kernel,
        out_shape=jax.ShapeDtypeStruct((Mp, Np), jnp.float32),
        grid_spec=pltpu.PrefetchScalarGridSpec(
            num_scalar_prefetch=0,
            grid=grid,
            in_specs=in_specs,
            out_specs=pl.BlockSpec((tm, tn), lambda i, j, k: (i, j)),
            scratch_shapes=[pltpu.VMEM((tm, tn), jnp.float32)],
        ),
        compiler_params=pltpu.CompilerParams(
            dimension_semantics=("parallel", "parallel", "arbitrary")),
        cost_estimate=pl.CostEstimate(
            flops=2 * M * K * N, transcendentals=0,
            bytes_accessed=bytes_accessed),
    )(*args)
    if (Mp, Np) != (M, N):
        out = out[:M, :N]
    return out


# ----------------------------------------------------------------------------
# JAX glue: NHWC im2col, conv wrapper, maxpool
# ----------------------------------------------------------------------------
def im2col_nhwc(x, kh, kw, stride, padding, dilation):
    """x: [N, H, W, C] -> ([N*OH*OW, kh*kw*C], OH, OW); K ordered (kh, kw, C)."""
    N, H, W, C = x.shape
    OH = (H + 2 * padding - dilation * (kh - 1) - 1) // stride + 1
    OW = (W + 2 * padding - dilation * (kw - 1) - 1) // stride + 1
    xp = jnp.pad(x, ((0, 0), (padding, padding), (padding, padding), (0, 0)))
    cols = []
    for i in range(kh):
        for j in range(kw):
            r0, c0 = i * dilation, j * dilation
            cols.append(
                xp[:, r0:r0 + (OH - 1) * stride + 1:stride,
                      c0:c0 + (OW - 1) * stride + 1:stride, :])
    # TODO(synk): im2col still materializes kh*kw copies of the activation in HBM;
    # streaming tap offsets via a (kh*kw) grid axis inside the kernel would keep
    # input traffic at ~1x for large spatial sizes.
    pats = jnp.stack(cols, axis=3)                        # [N, OH, OW, kh*kw, C]
    return pats.reshape(N * OH * OW, kh * kw * C), OH, OW


def conv_apply(x, layer, stride=1, padding=0, dilation=1, relu=True,
               residual=None):
    """Conv2d(bias=False) + folded BN + optional residual + optional ReLU (NHWC)."""
    Nb, H, W, C = x.shape
    kh, kw = layer.kh, layer.kw
    if kh == 1 and kw == 1 and padding == 0:
        xs = x[:, ::stride, ::stride, :]
        OH, OW = xs.shape[1], xs.shape[2]
        patches = xs.reshape(Nb * OH * OW, C)
    else:
        patches, OH, OW = im2col_nhwc(x, kh, kw, stride, padding, dilation)
    M = patches.shape[0]
    res2d = None if residual is None else residual.reshape(M, layer.cout)
    out2d = fused_matmul(patches, layer, res2d, relu)
    return out2d.reshape(Nb, OH, OW, layer.cout)


def maxpool2d_nhwc(x, k=3, stride=2, padding=1):
    # TODO(synk): small windowed max kept in plain JAX glue (not the hot path).
    N, H, W, C = x.shape
    OH = (H + 2 * padding - k) // stride + 1
    OW = (W + 2 * padding - k) // stride + 1
    xp = jnp.pad(x, ((0, 0), (padding, padding), (padding, padding), (0, 0)),
                 constant_values=-jnp.inf)
    out = jnp.full((N, OH, OW, C), -jnp.inf, jnp.float32)
    for i in range(k):
        for j in range(k):
            out = jnp.maximum(
                out, xp[:, i:i + (OH - 1) * stride + 1:stride,
                           j:j + (OW - 1) * stride + 1:stride, :])
    return out


# ----------------------------------------------------------------------------
# Parameters (synthetic, shapes follow resnet34 + DeepLabV3 ASPP decoder)
# ----------------------------------------------------------------------------
@jax.tree_util.register_pytree_node_class
@dataclass
class ConvParams:
    w: jnp.ndarray       # [Kp, Np] bf16, BN scale folded, pre-padded
    b: jnp.ndarray       # [1, Np] f32 folded BN bias
    kh: int
    kw: int
    cout: int
    k: int
    tk: int
    tn: int

    def tree_flatten(self):
        return (self.w, self.b), (self.kh, self.kw, self.cout,
                                  self.k, self.tk, self.tn)

    @classmethod
    def tree_unflatten(cls, aux, children):
        w, b = children
        return cls(w, b, *aux)


class ParamGen:
    def __init__(self, seed=0):
        self.key = jax.random.PRNGKey(seed)

    def _next(self):
        self.key, k = jax.random.split(self.key)
        return k

    def conv(self, cout, cin, kh, kw):
        fan_in = cin * kh * kw
        return (jax.random.normal(self._next(), (cout, cin, kh, kw), jnp.float32)
                * (1.0 / jnp.sqrt(float(fan_in))))

    def bn(self, c):
        eps = 1e-5
        gamma = 1.0 + 0.1 * jax.random.normal(self._next(), (c,), jnp.float32)
        beta = 0.1 * jax.random.normal(self._next(), (c,), jnp.float32)
        mean = 0.05 * jax.random.normal(self._next(), (c,), jnp.float32)
        var = jnp.abs(1.0 + 0.1 * jax.random.normal(self._next(), (c,), jnp.float32))
        scale = gamma / jnp.sqrt(var + eps)
        bias = beta - mean * scale
        return scale, bias


def _prep(pg, cout, cin, kh, kw):
    """Conv weight + eval-mode BN, folded into a matmul-ready padded bf16 weight."""
    w = pg.conv(cout, cin, kh, kw)
    scale, bias = pg.bn(cout)
    wf = w * scale[:, None, None, None]                    # fold BN scale
    K = kh * kw * cin
    wm = jnp.transpose(wf, (2, 3, 1, 0)).reshape(K, cout)  # K ordered (kh, kw, cin)
    tk, Kp = _choose_tile_k(K)
    tn, Np = _choose_tile_n(cout)
    wm_p = jnp.pad(wm, ((0, Kp - K), (0, Np - cout))).astype(jnp.bfloat16)
    b_p = jnp.pad(bias.reshape(1, cout), ((0, 0), (0, Np - cout))).astype(jnp.float32)
    return ConvParams(wm_p, b_p, kh, kw, cout, K, tk, tn)


def _make_layer_params(pg, cin, cout, nblocks):
    blocks = []
    for b in range(nblocks):
        in_c = cin if b == 0 else cout
        blk = {"c1": _prep(pg, cout, in_c, 3, 3),
               "c2": _prep(pg, cout, cout, 3, 3)}
        if b == 0 and in_c != cout:            # torchvision downsample condition
            blk["down"] = _prep(pg, cout, in_c, 1, 1)
        blocks.append(blk)
    return blocks


def build_params(seed=0, in_channels=5, decoder_channels=256):
    pg = ParamGen(seed)
    p = {"conv1": _prep(pg, 64, in_channels, 7, 7)}
    p["layer1"] = _make_layer_params(pg, 64, 64, 3)
    p["layer2"] = _make_layer_params(pg, 64, 128, 4)
    p["layer3"] = _make_layer_params(pg, 128, 256, 6)
    p["layer4"] = _make_layer_params(pg, 256, 512, 3)
    a = {"b0": _prep(pg, decoder_channels, 512, 1, 1)}
    for i in range(3):
        a[f"b{i + 1}"] = _prep(pg, decoder_channels, 512, 3, 3)
    a["pool"] = _prep(pg, decoder_channels, 512, 1, 1)
    a["proj"] = _prep(pg, decoder_channels, 5 * decoder_channels, 1, 1)
    p["aspp"] = a
    p["head"] = _prep(pg, decoder_channels, decoder_channels, 3, 3)
    return p


# (name, first-block stride, dilation) -- output_stride=8: layer3/4 dilated, stride 1
_LAYER_CFG = (("layer1", 1, 1), ("layer2", 2, 1), ("layer3", 1, 2), ("layer4", 1, 4))
_ATROUS_RATES = (12, 24, 36)


# ----------------------------------------------------------------------------
# Forward pass (encoder -> ASPP decoder), eval semantics. NCHW at the boundary,
# NHWC internally.
# ----------------------------------------------------------------------------
def forward(x, params):
    f = jnp.transpose(x, (0, 2, 3, 1))                     # NCHW -> NHWC

    # --- encoder stem ---
    f = conv_apply(f, params["conv1"], stride=2, padding=3, relu=True)
    f = maxpool2d_nhwc(f, k=3, stride=2, padding=1)

    # --- resnet34 BasicBlock stages (layer3/4 dilated per output_stride=8) ---
    for name, stride0, dil in _LAYER_CFG:
        for b, blk in enumerate(params[name]):
            s = stride0 if b == 0 else 1
            identity = f
            out = conv_apply(f, blk["c1"], stride=s, padding=dil, dilation=dil,
                             relu=True)
            if "down" in blk:
                identity = conv_apply(f, blk["down"], stride=s, relu=False)
            f = conv_apply(out, blk["c2"], padding=dil, dilation=dil, relu=True,
                           residual=identity)

    # --- ASPP decoder on the last encoder feature ---
    a = params["aspp"]
    Nb, H, W, _ = f.shape
    branches = [conv_apply(f, a["b0"], relu=True)]
    for i, r in enumerate(_ATROUS_RATES):
        branches.append(conv_apply(f, a[f"b{i + 1}"], padding=r, dilation=r,
                                   relu=True))
    pooled = jnp.mean(f, axis=(1, 2), keepdims=True)       # AdaptiveAvgPool2d(1)
    bp = conv_apply(pooled, a["pool"], relu=True)
    bp = jnp.broadcast_to(bp, (Nb, H, W, bp.shape[-1]))    # bilinear 1x1 -> HxW
    branches.append(bp)
    # TODO(synk): the concat + 1x1 projection could be fused as 5 K-steps in one
    # kernel call to avoid materializing the 5x-wide concatenated activation.
    cat = jnp.concatenate(branches, axis=-1)
    proj = conv_apply(cat, a["proj"], relu=True)
    # nn.Dropout(0.5): identity in eval mode.

    # --- decoder tail: Conv3x3 + BN + ReLU ---
    out = conv_apply(proj, params["head"], padding=1, relu=True)
    return jnp.transpose(out, (0, 3, 1, 2))                # NHWC -> NCHW


if __name__ == "__main__":
    key = jax.random.PRNGKey(0)
    # in_channels=5 per the module signature; spatial 16 divisible by output_stride=8
    x = jax.random.normal(key, (2, 5, 16, 16), jnp.float32)
    params = build_params(seed=0)

    fwd = jax.jit(forward)
    out = fwd(x, params)
    out = jax.block_until_ready(out)

    assert out.shape == (2, 256, 2, 2), out.shape
    assert jnp.all(jnp.isfinite(out))
    print("KERNEL_OK")
</pallas_src>

<mosaic_0001>
module attributes {stable_mosaic.version = 11 : i64} {
  func.func @_matmul_kernel(%arg0: i32, %arg1: i32, %arg2: i32, %arg3: memref<128x256xbf16, #tpu.memory_space<vmem>>, %arg4: memref<256x128xbf16, #tpu.memory_space<vmem>>, %arg5: memref<1x128xf32, #tpu.memory_space<vmem>>, %arg6: memref<128x128xf32, #tpu.memory_space<vmem>>, %arg7: memref<128x128xf32, #tpu.memory_space<vmem>>) attributes {dimension_semantics = [#tpu.dimension_semantics<parallel>, #tpu.dimension_semantics<parallel>, #tpu.dimension_semantics<arbitrary>], iteration_bounds = array<i64: 1, 1, 1>, scalar_prefetch = 0 : i64, scratch_operands = 1 : i64, tpu.core_type = #tpu.core_type<tc>, window_params = [{transform_indices = @transform_0, window_bounds = array<i64: 128, 256>}, {transform_indices = @transform_1, window_bounds = array<i64: 256, 128>}, {transform_indices = @transform_2, window_bounds = array<i64: 1, 128>}, {transform_indices = @transform_3, window_bounds = array<i64: 128, 128>}]} {
    %c0_i32 = arith.constant 0 : i32
    %0 = arith.cmpi eq, %arg2, %c0_i32 : i32
    %1 = arith.extui %0 : i1 to i32
    %c0_i32_0 = arith.constant 0 : i32
    %2 = arith.cmpi ne, %1, %c0_i32_0 : i32
    scf.if %2 {
      %cst_10 = arith.constant 0.000000e+00 : f32
      %12 = vector.broadcast %cst_10 : f32 to vector<128x128xf32>
      %c0_11 = arith.constant 0 : index
      %c0_12 = arith.constant 0 : index
      %13 = vector.load %arg7[%c0_11, %c0_12] : memref<128x128xf32, #tpu.memory_space<vmem>>, vector<128x128xf32>
      tpu.vector_store %arg7[%c0_11, %c0_12], %12 {strides = array<i32>} : memref<128x128xf32, #tpu.memory_space<vmem>>, vector<128x128xf32>,
    } else {
    }
    %c0 = arith.constant 0 : index
    %c0_1 = arith.constant 0 : index
    %3 = vector.load %arg7[%c0, %c0_1] : memref<128x128xf32, #tpu.memory_space<vmem>>, vector<128x128xf32>
    %c0_2 = arith.constant 0 : index
    %c0_3 = arith.constant 0 : index
    %4 = vector.load %arg3[%c0_2, %c0_3] : memref<128x256xbf16, #tpu.memory_space<vmem>>, vector<128x256xbf16>
    %c0_4 = arith.constant 0 : index
    %c0_5 = arith.constant 0 : index
    %5 = vector.load %arg4[%c0_4, %c0_5] : memref<256x128xbf16, #tpu.memory_space<vmem>>, vector<256x128xbf16>
    %cst = arith.constant dense<0.000000e+00> : vector<128x128xf32>
    %6 = tpu.matmul %4, %5, %cst {dimension_numbers = #tpu.dot_dimension_numbers<[1], [0], [0], [1], [0, 0, 1, 1], [], []>} : vector<128x256xbf16>, vector<256x128xbf16>, vector<128x128xf32> -> vector<128x128xf32>
    %7 = arith.addf %3, %6 : vector<128x128xf32>
    %c0_6 = arith.constant 0 : index
    %c0_7 = arith.constant 0 : index
    %8 = vector.load %arg7[%c0_6, %c0_7] : memref<128x128xf32, #tpu.memory_space<vmem>>, vector<128x128xf32>
    tpu.vector_store %arg7[%c0_6, %c0_7], %7 {strides = array<i32>} : memref<128x128xf32, #tpu.memory_space<vmem>>, vector<128x128xf32>,
    %c0_i32_8 = arith.constant 0 : i32
    %9 = arith.cmpi eq, %arg2, %c0_i32_8 : i32
    %10 = arith.extui %9 : i1 to i32
    %c0_i32_9 = arith.constant 0 : i32
    %11 = arith.cmpi ne, %10, %c0_i32_9 : i32
    scf.if %11 {
      %c0_10 = arith.constant 0 : index
      %c0_11 = arith.constant 0 : index
      %12 = vector.load %arg7[%c0_10, %c0_11] : memref<128x128xf32, #tpu.memory_space<vmem>>, vector<128x128xf32>
      %c0_12 = arith.constant 0 : index
      %c0_13 = arith.constant 0 : index
      %13 = vector.load %arg5[%c0_12, %c0_13] : memref<1x128xf32, #tpu.memory_space<vmem>>, vector<1x128xf32>
      %14 = vector.broadcast %13 : vector<1x128xf32> to vector<128x128xf32>
      %15 = arith.addf %12, %14 : vector<128x128xf32>
      %cst_14 = arith.constant 0.000000e+00 : f32
      %16 = vector.broadcast %cst_14 : f32 to vector<128x128xf32>
      %17 = arith.maximumf %15, %16 : vector<128x128xf32>
      %c0_15 = arith.constant 0 : index
      %c0_16 = arith.constant 0 : index
      %18 = vector.load %arg6[%c0_15, %c0_16] : memref<128x128xf32, #tpu.memory_space<vmem>>, vector<128x128xf32>
      tpu.vector_store %arg6[%c0_15, %c0_16], %17 {strides = array<i32>} : memref<128x128xf32, #tpu.memory_space<vmem>>, vector<128x128xf32>,
    } else {
    }
    return
  }
  func.func @transform_0(%arg0: i32, %arg1: i32, %arg2: i32) -> (i32, i32) {
    %c0_i32 = arith.constant 0 : i32
    return %arg0, %arg2 : i32, i32
  }
  func.func @transform_1(%arg0: i32, %arg1: i32, %arg2: i32) -> (i32, i32) {
    %c0_i32 = arith.constant 0 : i32
    return %arg2, %arg1 : i32, i32
  }
  func.func @transform_2(%arg0: i32, %arg1: i32, %arg2: i32) -> (i32, i32) {
    %c0_i32 = arith.constant 0 : i32
    %c0_i32_0 = arith.constant 0 : i32
    return %c0_i32, %arg1 : i32, i32
  }
  func.func @transform_3(%arg0: i32, %arg1: i32, %arg2: i32) -> (i32, i32) {
    %c0_i32 = arith.constant 0 : i32
    return %arg0, %arg1 : i32, i32
  }
}

module attributes {stable_mosaic.version = 11 : i64} {
  func.func @_matmul_kernel(%arg0: i32, %arg1: i32, %arg2: i32, %arg3: memref<32x128xbf16, #tpu.memory_space<vmem>>, %arg4: memref<128x128xbf16, #tpu.memory_space<vmem>>, %arg5: memref<1x128xf32, #tpu.memory_space<vmem>>, %arg6: memref<32x128xf32, #tpu.memory_space<vmem>>, %arg7: memref<32x128xf32, #tpu.memory_space<vmem>>) attributes {dimension_semantics = [#tpu.dimension_semantics<parallel>, #tpu.dimension_semantics<parallel>, #tpu.dimension_semantics<arbitrary>], iteration_bounds = array<i64: 1, 1, 5>, scalar_prefetch = 0 : i64, scratch_operands = 1 : i64, tpu.core_type = #tpu.core_type<tc>, window_params = [{transform_indices = @transform_0, window_bounds = array<i64: 32, 128>}, {transform_indices = @transform_1, window_bounds = array<i64: 128, 128>}, {transform_indices = @transform_2, window_bounds = array<i64: 1, 128>}, {transform_indices = @transform_3, window_bounds = array<i64: 32, 128>}]} {
    %c0_i32 = arith.constant 0 : i32
    %0 = arith.cmpi eq, %arg2, %c0_i32 : i32
    %1 = arith.extui %0 : i1 to i32
    %c0_i32_0 = arith.constant 0 : i32
    %2 = arith.cmpi ne, %1, %c0_i32_0 : i32
    scf.if %2 {
      %cst_9 = arith.constant 0.000000e+00 : f32
      %12 = vector.broadcast %cst_9 : f32 to vector<32x128xf32>
      %c0_10 = arith.constant 0 : index
      %c0_11 = arith.constant 0 : index
      %13 = vector.load %arg7[%c0_10, %c0_11] : memref<32x128xf32, #tpu.memory_space<vmem>>, vector<32x128xf32>
      tpu.vector_store %arg7[%c0_10, %c0_11], %12 {strides = array<i32>} : memref<32x128xf32, #tpu.memory_space<vmem>>, vector<32x128xf32>,
    } else {
    }
    %c0 = arith.constant 0 : index
    %c0_1 = arith.constant 0 : index
    %3 = vector.load %arg7[%c0, %c0_1] : memref<32x128xf32, #tpu.memory_space<vmem>>, vector<32x128xf32>
    %c0_2 = arith.constant 0 : index
    %c0_3 = arith.constant 0 : index
    %4 = vector.load %arg3[%c0_2, %c0_3] : memref<32x128xbf16, #tpu.memory_space<vmem>>, vector<32x128xbf16>
    %c0_4 = arith.constant 0 : index
    %c0_5 = arith.constant 0 : index
    %5 = vector.load %arg4[%c0_4, %c0_5] : memref<128x128xbf16, #tpu.memory_space<vmem>>, vector<128x128xbf16>
    %cst = arith.constant dense<0.000000e+00> : vector<32x128xf32>
    %6 = tpu.matmul %4, %5, %cst {dimension_numbers = #tpu.dot_dimension_numbers<[1], [0], [0], [1], [0, 0, 1, 1], [], []>} : vector<32x128xbf16>, vector<128x128xbf16>, vector<32x128xf32> -> vector<32x128xf32>
    %7 = arith.addf %3, %6 : vector<32x128xf32>
    %c0_6 = arith.constant 0 : index
    %c0_7 = arith.constant 0 : index
    %8 = vector.load %arg7[%c0_6, %c0_7] : memref<32x128xf32, #tpu.memory_space<vmem>>, vector<32x128xf32>
    tpu.vector_store %arg7[%c0_6, %c0_7], %7 {strides = array<i32>} : memref<32x128xf32, #tpu.memory_space<vmem>>, vector<32x128xf32>,
    %c4_i32 = arith.constant 4 : i32
    %9 = arith.cmpi eq, %arg2, %c4_i32 : i32
    %10 = arith.extui %9 : i1 to i32
    %c0_i32_8 = arith.constant 0 : i32
    %11 = arith.cmpi ne, %10, %c0_i32_8 : i32
    scf.if %11 {
      %c0_9 = arith.constant 0 : index
      %c0_10 = arith.constant 0 : index
      %12 = vector.load %arg7[%c0_9, %c0_10] : memref<32x128xf32, #tpu.memory_space<vmem>>, vector<32x128xf32>
      %c0_11 = arith.constant 0 : index
      %c0_12 = arith.constant 0 : index
      %13 = vector.load %arg5[%c0_11, %c0_12] : memref<1x128xf32, #tpu.memory_space<vmem>>, vector<1x128xf32>
      %14 = vector.broadcast %13 : vector<1x128xf32> to vector<32x128xf32>
      %15 = arith.addf %12, %14 : vector<32x128xf32>
      %cst_13 = arith.constant 0.000000e+00 : f32
      %16 = vector.broadcast %cst_13 : f32 to vector<32x128xf32>
      %17 = arith.maximumf %15, %16 : vector<32x128xf32>
      %c0_14 = arith.constant 0 : index
      %c0_15 = arith.constant 0 : index
      %18 = vector.load %arg6[%c0_14, %c0_15] : memref<32x128xf32, #tpu.memory_space<vmem>>, vector<32x128xf32>
      tpu.vector_store %arg6[%c0_14, %c0_15], %17 {strides = array<i32>} : memref<32x128xf32, #tpu.memory_space<vmem>>, vector<32x128xf32>,
    } else {
    }
    return
  }
  func.func @transform_0(%arg0: i32, %arg1: i32, %arg2: i32) -> (i32, i32) {
    %c0_i32 = arith.constant 0 : i32
    return %arg0, %arg2 : i32, i32
  }
  func.func @transform_1(%arg0: i32, %arg1: i32, %arg2: i32) -> (i32, i32) {
    %c0_i32 = arith.constant 0 : i32
    return %arg2, %arg1 : i32, i32
  }
  func.func @transform_2(%arg0: i32, %arg1: i32, %arg2: i32) -> (i32, i32) {
    %c0_i32 = arith.constant 0 : i32
    %c0_i32_0 = arith.constant 0 : i32
    return %c0_i32, %arg1 : i32, i32
  }
  func.func @transform_3(%arg0: i32, %arg1: i32, %arg2: i32) -> (i32, i32) {
    %c0_i32 = arith.constant 0 : i32
    return %arg0, %arg1 : i32, i32
  }
}

module attributes {stable_mosaic.version = 11 : i64} {
  func.func @_matmul_res_kernel(%arg0: i32, %arg1: i32, %arg2: i32, %arg3: memref<32x128xbf16, #tpu.memory_space<vmem>>, %arg4: memref<128x128xbf16, #tpu.memory_space<vmem>>, %arg5: memref<1x128xf32, #tpu.memory_space<vmem>>, %arg6: memref<32x128xf32, #tpu.memory_space<vmem>>, %arg7: memref<32x128xf32, #tpu.memory_space<vmem>>, %arg8: memref<32x128xf32, #tpu.memory_space<vmem>>) attributes {dimension_semantics = [#tpu.dimension_semantics<parallel>, #tpu.dimension_semantics<parallel>, #tpu.dimension_semantics<arbitrary>], iteration_bounds = array<i64: 1, 1, 5>, scalar_prefetch = 0 : i64, scratch_operands = 1 : i64, tpu.core_type = #tpu.core_type<tc>, window_params = [{transform_indices = @transform_0, window_bounds = array<i64: 32, 128>}, {transform_indices = @transform_1, window_bounds = array<i64: 128, 128>}, {transform_indices = @transform_2, window_bounds = array<i64: 1, 128>}, {transform_indices = @transform_3, window_bounds = array<i64: 32, 128>}, {transform_indices = @transform_4, window_bounds = array<i64: 32, 128>}]} {
    %c0_i32 = arith.constant 0 : i32
    %0 = arith.cmpi eq, %arg2, %c0_i32 : i32
    %1 = arith.extui %0 : i1 to i32
    %c0_i32_0 = arith.constant 0 : i32
    %2 = arith.cmpi ne, %1, %c0_i32_0 : i32
    scf.if %2 {
      %cst_9 = arith.constant 0.000000e+00 : f32
      %12 = vector.broadcast %cst_9 : f32 to vector<32x128xf32>
      %c0_10 = arith.constant 0 : index
      %c0_11 = arith.constant 0 : index
      %13 = vector.load %arg8[%c0_10, %c0_11] : memref<32x128xf32, #tpu.memory_space<vmem>>, vector<32x128xf32>
      tpu.vector_store %arg8[%c0_10, %c0_11], %12 {strides = array<i32>} : memref<32x128xf32, #tpu.memory_space<vmem>>, vector<32x128xf32>,
    } else {
    }
    %c0 = arith.constant 0 : index
    %c0_1 = arith.constant 0 : index
    %3 = vector.load %arg8[%c0, %c0_1] : memref<32x128xf32, #tpu.memory_space<vmem>>, vector<32x128xf32>
    %c0_2 = arith.constant 0 : index
    %c0_3 = arith.constant 0 : index
    %4 = vector.load %arg3[%c0_2, %c0_3] : memref<32x128xbf16, #tpu.memory_space<vmem>>, vector<32x128xbf16>
    %c0_4 = arith.constant 0 : index
    %c0_5 = arith.constant 0 : index
    %5 = vector.load %arg4[%c0_4, %c0_5] : memref<128x128xbf16, #tpu.memory_space<vmem>>, vector<128x128xbf16>
    %cst = arith.constant dense<0.000000e+00> : vector<32x128xf32>
    %6 = tpu.matmul %4, %5, %cst {dimension_numbers = #tpu.dot_dimension_numbers<[1], [0], [0], [1], [0, 0, 1, 1], [], []>} : vector<32x128xbf16>, vector<128x128xbf16>, vector<32x128xf32> -> vector<32x128xf32>
    %7 = arith.addf %3, %6 : vector<32x128xf32>
    %c0_6 = arith.constant 0 : index
    %c0_7 = arith.constant 0 : index
    %8 = vector.load %arg8[%c0_6, %c0_7] : memref<32x128xf32, #tpu.memory_space<vmem>>, vector<32x128xf32>
    tpu.vector_store %arg8[%c0_6, %c0_7], %7 {strides = array<i32>} : memref<32x128xf32, #tpu.memory_space<vmem>>, vector<32x128xf32>,
    %c4_i32 = arith.constant 4 : i32
    %9 = arith.cmpi eq, %arg2, %c4_i32 : i32
    %10 = arith.extui %9 : i1 to i32
    %c0_i32_8 = arith.constant 0 : i32
    %11 = arith.cmpi ne, %10, %c0_i32_8 : i32
    scf.if %11 {
      %c0_9 = arith.constant 0 : index
      %c0_10 = arith.constant 0 : index
      %12 = vector.load %arg8[%c0_9, %c0_10] : memref<32x128xf32, #tpu.memory_space<vmem>>, vector<32x128xf32>
      %c0_11 = arith.constant 0 : index
      %c0_12 = arith.constant 0 : index
      %13 = vector.load %arg5[%c0_11, %c0_12] : memref<1x128xf32, #tpu.memory_space<vmem>>, vector<1x128xf32>
      %14 = vector.broadcast %13 : vector<1x128xf32> to vector<32x128xf32>
      %15 = arith.addf %12, %14 : vector<32x128xf32>
      %c0_13 = arith.constant 0 : index
      %c0_14 = arith.constant 0 : index
      %16 = vector.load %arg6[%c0_13, %c0_14] : memref<32x128xf32, #tpu.memory_space<vmem>>, vector<32x128xf32>
      %17 = arith.addf %15, %16 : vector<32x128xf32>
      %cst_15 = arith.constant 0.000000e+00 : f32
      %18 = vector.broadcast %cst_15 : f32 to vector<32x128xf32>
      %19 = arith.maximumf %17, %18 : vector<32x128xf32>
      %c0_16 = arith.constant 0 : index
      %c0_17 = arith.constant 0 : index
      %20 = vector.load %arg7[%c0_16, %c0_17] : memref<32x128xf32, #tpu.memory_space<vmem>>, vector<32x128xf32>
      tpu.vector_store %arg7[%c0_16, %c0_17], %19 {strides = array<i32>} : memref<32x128xf32, #tpu.memory_space<vmem>>, vector<32x128xf32>,
    } else {
    }
    return
  }
  func.func @transform_0(%arg0: i32, %arg1: i32, %arg2: i32) -> (i32, i32) {
    %c0_i32 = arith.constant 0 : i32
    return %arg0, %arg2 : i32, i32
  }
  func.func @transform_1(%arg0: i32, %arg1: i32, %arg2: i32) -> (i32, i32) {
    %c0_i32 = arith.constant 0 : i32
    return %arg2, %arg1 : i32, i32
  }
  func.func @transform_2(%arg0: i32, %arg1: i32, %arg2: i32) -> (i32, i32) {
    %c0_i32 = arith.constant 0 : i32
    %c0_i32_0 = arith.constant 0 : i32
    return %c0_i32, %arg1 : i32, i32
  }
  func.func @transform_3(%arg0: i32, %arg1: i32, %arg2: i32) -> (i32, i32) {
    %c0_i32 = arith.constant 0 : i32
    return %arg0, %arg1 : i32, i32
  }
  func.func @transform_4(%arg0: i32, %arg1: i32, %arg2: i32) -> (i32, i32) {
    %c0_i32 = arith.constant 0 : i32
    return %arg0, %arg1 : i32, i32
  }
}

module attributes {stable_mosaic.version = 11 : i64} {
  func.func @_matmul_kernel(%arg0: i32, %arg1: i32, %arg2: i32, %arg3: memref<8x128xbf16, #tpu.memory_space<vmem>>, %arg4: memref<128x128xbf16, #tpu.memory_space<vmem>>, %arg5: memref<1x128xf32, #tpu.memory_space<vmem>>, %arg6: memref<8x128xf32, #tpu.memory_space<vmem>>, %arg7: memref<8x128xf32, #tpu.memory_space<vmem>>) attributes {dimension_semantics = [#tpu.dimension_semantics<parallel>, #tpu.dimension_semantics<parallel>, #tpu.dimension_semantics<arbitrary>], iteration_bounds = array<i64: 1, 1, 5>, scalar_prefetch = 0 : i64, scratch_operands = 1 : i64, tpu.core_type = #tpu.core_type<tc>, window_params = [{transform_indices = @transform_0, window_bounds = array<i64: 8, 128>}, {transform_indices = @transform_1, window_bounds = array<i64: 128, 128>}, {transform_indices = @transform_2, window_bounds = array<i64: 1, 128>}, {transform_indices = @transform_3, window_bounds = array<i64: 8, 128>}]} {
    %c0_i32 = arith.constant 0 : i32
    %0 = arith.cmpi eq, %arg2, %c0_i32 : i32
    %1 = arith.extui %0 : i1 to i32
    %c0_i32_0 = arith.constant 0 : i32
    %2 = arith.cmpi ne, %1, %c0_i32_0 : i32
    scf.if %2 {
      %cst_9 = arith.constant 0.000000e+00 : f32
      %12 = vector.broadcast %cst_9 : f32 to vector<8x128xf32>
      %c0_10 = arith.constant 0 : index
      %c0_11 = arith.constant 0 : index
      %13 = vector.load %arg7[%c0_10, %c0_11] : memref<8x128xf32, #tpu.memory_space<vmem>>, vector<8x128xf32>
      tpu.vector_store %arg7[%c0_10, %c0_11], %12 {strides = array<i32>} : memref<8x128xf32, #tpu.memory_space<vmem>>, vector<8x128xf32>,
    } else {
    }
    %c0 = arith.constant 0 : index
    %c0_1 = arith.constant 0 : index
    %3 = vector.load %arg7[%c0, %c0_1] : memref<8x128xf32, #tpu.memory_space<vmem>>, vector<8x128xf32>
    %c0_2 = arith.constant 0 : index
    %c0_3 = arith.constant 0 : index
    %4 = vector.load %arg3[%c0_2, %c0_3] : memref<8x128xbf16, #tpu.memory_space<vmem>>, vector<8x128xbf16>
    %c0_4 = arith.constant 0 : index
    %c0_5 = arith.constant 0 : index
    %5 = vector.load %arg4[%c0_4, %c0_5] : memref<128x128xbf16, #tpu.memory_space<vmem>>, vector<128x128xbf16>
    %cst = arith.constant dense<0.000000e+00> : vector<8x128xf32>
    %6 = tpu.matmul %4, %5, %cst {dimension_numbers = #tpu.dot_dimension_numbers<[1], [0], [0], [1], [0, 0, 1, 1], [], []>} : vector<8x128xbf16>, vector<128x128xbf16>, vector<8x128xf32> -> vector<8x128xf32>
    %7 = arith.addf %3, %6 : vector<8x128xf32>
    %c0_6 = arith.constant 0 : index
    %c0_7 = arith.constant 0 : index
    %8 = vector.load %arg7[%c0_6, %c0_7] : memref<8x128xf32, #tpu.memory_space<vmem>>, vector<8x128xf32>
    tpu.vector_store %arg7[%c0_6, %c0_7], %7 {strides = array<i32>} : memref<8x128xf32, #tpu.memory_space<vmem>>, vector<8x128xf32>,
    %c4_i32 = arith.constant 4 : i32
    %9 = arith.cmpi eq, %arg2, %c4_i32 : i32
    %10 = arith.extui %9 : i1 to i32
    %c0_i32_8 = arith.constant 0 : i32
    %11 = arith.cmpi ne, %10, %c0_i32_8 : i32
    scf.if %11 {
      %c0_9 = arith.constant 0 : index
      %c0_10 = arith.constant 0 : index
      %12 = vector.load %arg7[%c0_9, %c0_10] : memref<8x128xf32, #tpu.memory_space<vmem>>, vector<8x128xf32>
      %c0_11 = arith.constant 0 : index
      %c0_12 = arith.constant 0 : index
      %13 = vector.load %arg5[%c0_11, %c0_12] : memref<1x128xf32, #tpu.memory_space<vmem>>, vector<1x128xf32>
      %14 = vector.broadcast %13 : vector<1x128xf32> to vector<8x128xf32>
      %15 = arith.addf %12, %14 : vector<8x128xf32>
      %cst_13 = arith.constant 0.000000e+00 : f32
      %16 = vector.broadcast %cst_13 : f32 to vector<8x128xf32>
      %17 = arith.maximumf %15, %16 : vector<8x128xf32>
      %c0_14 = arith.constant 0 : index
      %c0_15 = arith.constant 0 : index
      %18 = vector.load %arg6[%c0_14, %c0_15] : memref<8x128xf32, #tpu.memory_space<vmem>>, vector<8x128xf32>
      tpu.vector_store %arg6[%c0_14, %c0_15], %17 {strides = array<i32>} : memref<8x128xf32, #tpu.memory_space<vmem>>, vector<8x128xf32>,
    } else {
    }
    return
  }
  func.func @transform_0(%arg0: i32, %arg1: i32, %arg2: i32) -> (i32, i32) {
    %c0_i32 = arith.constant 0 : i32
    return %arg0, %arg2 : i32, i32
  }
  func.func @transform_1(%arg0: i32, %arg1: i32, %arg2: i32) -> (i32, i32) {
    %c0_i32 = arith.constant 0 : i32
    return %arg2, %arg1 : i32, i32
  }
  func.func @transform_2(%arg0: i32, %arg1: i32, %arg2: i32) -> (i32, i32) {
    %c0_i32 = arith.constant 0 : i32
    %c0_i32_0 = arith.constant 0 : i32
    return %c0_i32, %arg1 : i32, i32
  }
  func.func @transform_3(%arg0: i32, %arg1: i32, %arg2: i32) -> (i32, i32) {
    %c0_i32 = arith.constant 0 : i32
    return %arg0, %arg1 : i32, i32
  }
}

module attributes {stable_mosaic.version = 11 : i64} {
  func.func @_matmul_res_kernel(%arg0: i32, %arg1: i32, %arg2: i32, %arg3: memref<8x384xbf16, #tpu.memory_space<vmem>>, %arg4: memref<384x128xbf16, #tpu.memory_space<vmem>>, %arg5: memref<1x128xf32, #tpu.memory_space<vmem>>, %arg6: memref<8x128xf32, #tpu.memory_space<vmem>>, %arg7: memref<8x128xf32, #tpu.memory_space<vmem>>, %arg8: memref<8x128xf32, #tpu.memory_space<vmem>>) attributes {dimension_semantics = [#tpu.dimension_semantics<parallel>, #tpu.dimension_semantics<parallel>, #tpu.dimension_semantics<arbitrary>], iteration_bounds = array<i64: 1, 1, 3>, scalar_prefetch = 0 : i64, scratch_operands = 1 : i64, tpu.core_type = #tpu.core_type<tc>, window_params = [{transform_indices = @transform_0, window_bounds = array<i64: 8, 384>}, {transform_indices = @transform_1, window_bounds = array<i64: 384, 128>}, {transform_indices = @transform_2, window_bounds = array<i64: 1, 128>}, {transform_indices = @transform_3, window_bounds = array<i64: 8, 128>}, {transform_indices = @transform_4, window_bounds = array<i64: 8, 128>}]} {
    %c0_i32 = arith.constant 0 : i32
    %0 = arith.cmpi eq, %arg2, %c0_i32 : i32
    %1 = arith.extui %0 : i1 to i32
    %c0_i32_0 = arith.constant 0 : i32
    %2 = arith.cmpi ne, %1, %c0_i32_0 : i32
    scf.if %2 {
      %cst_9 = arith.constant 0.000000e+00 : f32
      %12 = vector.broadcast %cst_9 : f32 to vector<8x128xf32>
      %c0_10 = arith.constant 0 : index
      %c0_11 = arith.constant 0 : index
      %13 = vector.load %arg8[%c0_10, %c0_11] : memref<8x128xf32, #tpu.memory_space<vmem>>, vector<8x128xf32>
      tpu.vector_store %arg8[%c0_10, %c0_11], %12 {strides = array<i32>} : memref<8x128xf32, #tpu.memory_space<vmem>>, vector<8x128xf32>,
    } else {
    }
    %c0 = arith.constant 0 : index
    %c0_1 = arith.constant 0 : index
    %3 = vector.load %arg8[%c0, %c0_1] : memref<8x128xf32, #tpu.memory_space<vmem>>, vector<8x128xf32>
    %c0_2 = arith.constant 0 : index
    %c0_3 = arith.constant 0 : index
    %4 = vector.load %arg3[%c0_2, %c0_3] : memref<8x384xbf16, #tpu.memory_space<vmem>>, vector<8x384xbf16>
    %c0_4 = arith.constant 0 : index
    %c0_5 = arith.constant 0 : index
    %5 = vector.load %arg4[%c0_4, %c0_5] : memref<384x128xbf16, #tpu.memory_space<vmem>>, vector<384x128xbf16>
    %cst = arith.constant dense<0.000000e+00> : vector<8x128xf32>
    %6 = tpu.matmul %4, %5, %cst {dimension_numbers = #tpu.dot_dimension_numbers<[1], [0], [0], [1], [0, 0, 1, 1], [], []>} : vector<8x384xbf16>, vector<384x128xbf16>, vector<8x128xf32> -> vector<8x128xf32>
    %7 = arith.addf %3, %6 : vector<8x128xf32>
    %c0_6 = arith.constant 0 : index
    %c0_7 = arith.constant 0 : index
    %8 = vector.load %arg8[%c0_6, %c0_7] : memref<8x128xf32, #tpu.memory_space<vmem>>, vector<8x128xf32>
    tpu.vector_store %arg8[%c0_6, %c0_7], %7 {strides = array<i32>} : memref<8x128xf32, #tpu.memory_space<vmem>>, vector<8x128xf32>,
    %c2_i32 = arith.constant 2 : i32
    %9 = arith.cmpi eq, %arg2, %c2_i32 : i32
    %10 = arith.extui %9 : i1 to i32
    %c0_i32_8 = arith.constant 0 : i32
    %11 = arith.cmpi ne, %10, %c0_i32_8 : i32
    scf.if %11 {
      %c0_9 = arith.constant 0 : index
      %c0_10 = arith.constant 0 : index
      %12 = vector.load %arg8[%c0_9, %c0_10] : memref<8x128xf32, #tpu.memory_space<vmem>>, vector<8x128xf32>
      %c0_11 = arith.constant 0 : index
      %c0_12 = arith.constant 0 : index
      %13 = vector.load %arg5[%c0_11, %c0_12] : memref<1x128xf32, #tpu.memory_space<vmem>>, vector<1x128xf32>
      %14 = vector.broadcast %13 : vector<1x128xf32> to vector<8x128xf32>
      %15 = arith.addf %12, %14 : vector<8x128xf32>
      %c0_13 = arith.constant 0 : index
      %c0_14 = arith.constant 0 : index
      %16 = vector.load %arg6[%c0_13, %c0_14] : memref<8x128xf32, #tpu.memory_space<vmem>>, vector<8x128xf32>
      %17 = arith.addf %15, %16 : vector<8x128xf32>
      %cst_15 = arith.constant 0.000000e+00 : f32
      %18 = vector.broadcast %cst_15 : f32 to vector<8x128xf32>
      %19 = arith.maximumf %17, %18 : vector<8x128xf32>
      %c0_16 = arith.constant 0 : index
      %c0_17 = arith.constant 0 : index
      %20 = vector.load %arg7[%c0_16, %c0_17] : memref<8x128xf32, #tpu.memory_space<vmem>>, vector<8x128xf32>
      tpu.vector_store %arg7[%c0_16, %c0_17], %19 {strides = array<i32>} : memref<8x128xf32, #tpu.memory_space<vmem>>, vector<8x128xf32>,
    } else {
    }
    return
  }
  func.func @transform_0(%arg0: i32, %arg1: i32, %arg2: i32) -> (i32, i32) {
    %c0_i32 = arith.constant 0 : i32
    return %arg0, %arg2 : i32, i32
  }
  func.func @transform_1(%arg0: i32, %arg1: i32, %arg2: i32) -> (i32, i32) {
    %c0_i32 = arith.constant 0 : i32
    return %arg2, %arg1 : i32, i32
  }
  func.func @transform_2(%arg0: i32, %arg1: i32, %arg2: i32) -> (i32, i32) {
    %c0_i32 = arith.constant 0 : i32
    %c0_i32_0 = arith.constant 0 : i32
    return %c0_i32, %arg1 : i32, i32
  }
  func.func @transform_3(%arg0: i32, %arg1: i32, %arg2: i32) -> (i32, i32) {
    %c0_i32 = arith.constant 0 : i32
    return %arg0, %arg1 : i32, i32
  }
  func.func @transform_4(%arg0: i32, %arg1: i32, %arg2: i32) -> (i32, i32) {
    %c0_i32 = arith.constant 0 : i32
    return %arg0, %arg1 : i32, i32
  }
}

module attributes {stable_mosaic.version = 11 : i64} {
  func.func @_matmul_kernel(%arg0: i32, %arg1: i32, %arg2: i32, %arg3: memref<8x128xbf16, #tpu.memory_space<vmem>>, %arg4: memref<128x128xbf16, #tpu.memory_space<vmem>>, %arg5: memref<1x128xf32, #tpu.memory_space<vmem>>, %arg6: memref<8x128xf32, #tpu.memory_space<vmem>>, %arg7: memref<8x128xf32, #tpu.memory_space<vmem>>) attributes {dimension_semantics = [#tpu.dimension_semantics<parallel>, #tpu.dimension_semantics<parallel>, #tpu.dimension_semantics<arbitrary>], iteration_bounds = array<i64: 1, 1, 1>, scalar_prefetch = 0 : i64, scratch_operands = 1 : i64, tpu.core_type = #tpu.core_type<tc>, window_params = [{transform_indices = @transform_0, window_bounds = array<i64: 8, 128>}, {transform_indices = @transform_1, window_bounds = array<i64: 128, 128>}, {transform_indices = @transform_2, window_bounds = array<i64: 1, 128>}, {transform_indices = @transform_3, window_bounds = array<i64: 8, 128>}]} {
    %c0_i32 = arith.constant 0 : i32
    %0 = arith.cmpi eq, %arg2, %c0_i32 : i32
    %1 = arith.extui %0 : i1 to i32
    %c0_i32_0 = arith.constant 0 : i32
    %2 = arith.cmpi ne, %1, %c0_i32_0 : i32
    scf.if %2 {
      %cst_10 = arith.constant 0.000000e+00 : f32
      %12 = vector.broadcast %cst_10 : f32 to vector<8x128xf32>
      %c0_11 = arith.constant 0 : index
      %c0_12 = arith.constant 0 : index
      %13 = vector.load %arg7[%c0_11, %c0_12] : memref<8x128xf32, #tpu.memory_space<vmem>>, vector<8x128xf32>
      tpu.vector_store %arg7[%c0_11, %c0_12], %12 {strides = array<i32>} : memref<8x128xf32, #tpu.memory_space<vmem>>, vector<8x128xf32>,
    } else {
    }
    %c0 = arith.constant 0 : index
    %c0_1 = arith.constant 0 : index
    %3 = vector.load %arg7[%c0, %c0_1] : memref<8x128xf32, #tpu.memory_space<vmem>>, vector<8x128xf32>
    %c0_2 = arith.constant 0 : index
    %c0_3 = arith.constant 0 : index
    %4 = vector.load %arg3[%c0_2, %c0_3] : memref<8x128xbf16, #tpu.memory_space<vmem>>, vector<8x128xbf16>
    %c0_4 = arith.constant 0 : index
    %c0_5 = arith.constant 0 : index
    %5 = vector.load %arg4[%c0_4, %c0_5] : memref<128x128xbf16, #tpu.memory_space<vmem>>, vector<128x128xbf16>
    %cst = arith.constant dense<0.000000e+00> : vector<8x128xf32>
    %6 = tpu.matmul %4, %5, %cst {dimension_numbers = #tpu.dot_dimension_numbers<[1], [0], [0], [1], [0, 0, 1, 1], [], []>} : vector<8x128xbf16>, vector<128x128xbf16>, vector<8x128xf32> -> vector<8x128xf32>
    %7 = arith.addf %3, %6 : vector<8x128xf32>
    %c0_6 = arith.constant 0 : index
    %c0_7 = arith.constant 0 : index
    %8 = vector.load %arg7[%c0_6, %c0_7] : memref<8x128xf32, #tpu.memory_space<vmem>>, vector<8x128xf32>
    tpu.vector_store %arg7[%c0_6, %c0_7], %7 {strides = array<i32>} : memref<8x128xf32, #tpu.memory_space<vmem>>, vector<8x128xf32>,
    %c0_i32_8 = arith.constant 0 : i32
    %9 = arith.cmpi eq, %arg2, %c0_i32_8 : i32
    %10 = arith.extui %9 : i1 to i32
    %c0_i32_9 = arith.constant 0 : i32
    %11 = arith.cmpi ne, %10, %c0_i32_9 : i32
    scf.if %11 {
      %c0_10 = arith.constant 0 : index
      %c0_11 = arith.constant 0 : index
      %12 = vector.load %arg7[%c0_10, %c0_11] : memref<8x128xf32, #tpu.memory_space<vmem>>, vector<8x128xf32>
      %c0_12 = arith.constant 0 : index
      %c0_13 = arith.constant 0 : index
      %13 = vector.load %arg5[%c0_12, %c0_13] : memref<1x128xf32, #tpu.memory_space<vmem>>, vector<1x128xf32>
      %14 = vector.broadcast %13 : vector<1x128xf32> to vector<8x128xf32>
      %15 = arith.addf %12, %14 : vector<8x128xf32>
      %c0_14 = arith.constant 0 : index
      %c0_15 = arith.constant 0 : index
      %16 = vector.load %arg6[%c0_14, %c0_15] : memref<8x128xf32, #tpu.memory_space<vmem>>, vector<8x128xf32>
      tpu.vector_store %arg6[%c0_14, %c0_15], %15 {strides = array<i32>} : memref<8x128xf32, #tpu.memory_space<vmem>>, vector<8x128xf32>,
    } else {
    }
    return
  }
  func.func @transform_0(%arg0: i32, %arg1: i32, %arg2: i32) -> (i32, i32) {
    %c0_i32 = arith.constant 0 : i32
    return %arg0, %arg2 : i32, i32
  }
  func.func @transform_1(%arg0: i32, %arg1: i32, %arg2: i32) -> (i32, i32) {
    %c0_i32 = arith.constant 0 : i32
    return %arg2, %arg1 : i32, i32
  }
  func.func @transform_2(%arg0: i32, %arg1: i32, %arg2: i32) -> (i32, i32) {
    %c0_i32 = arith.constant 0 : i32
    %c0_i32_0 = arith.constant 0 : i32
    return %c0_i32, %arg1 : i32, i32
  }
  func.func @transform_3(%arg0: i32, %arg1: i32, %arg2: i32) -> (i32, i32) {
    %c0_i32 = arith.constant 0 : i32
    return %arg0, %arg1 : i32, i32
  }
}

module attributes {stable_mosaic.version = 11 : i64} {
  func.func @_matmul_kernel(%arg0: i32, %arg1: i32, %arg2: i32, %arg3: memref<8x384xbf16, #tpu.memory_space<vmem>>, %arg4: memref<384x128xbf16, #tpu.memory_space<vmem>>, %arg5: memref<1x128xf32, #tpu.memory_space<vmem>>, %arg6: memref<8x128xf32, #tpu.memory_space<vmem>>, %arg7: memref<8x128xf32, #tpu.memory_space<vmem>>) attributes {dimension_semantics = [#tpu.dimension_semantics<parallel>, #tpu.dimension_semantics<parallel>, #tpu.dimension_semantics<arbitrary>], iteration_bounds = array<i64: 1, 1, 3>, scalar_prefetch = 0 : i64, scratch_operands = 1 : i64, tpu.core_type = #tpu.core_type<tc>, window_params = [{transform_indices = @transform_0, window_bounds = array<i64: 8, 384>}, {transform_indices = @transform_1, window_bounds = array<i64: 384, 128>}, {transform_indices = @transform_2, window_bounds = array<i64: 1, 128>}, {transform_indices = @transform_3, window_bounds = array<i64: 8, 128>}]} {
    %c0_i32 = arith.constant 0 : i32
    %0 = arith.cmpi eq, %arg2, %c0_i32 : i32
    %1 = arith.extui %0 : i1 to i32
    %c0_i32_0 = arith.constant 0 : i32
    %2 = arith.cmpi ne, %1, %c0_i32_0 : i32
    scf.if %2 {
      %cst_9 = arith.constant 0.000000e+00 : f32
      %12 = vector.broadcast %cst_9 : f32 to vector<8x128xf32>
      %c0_10 = arith.constant 0 : index
      %c0_11 = arith.constant 0 : index
      %13 = vector.load %arg7[%c0_10, %c0_11] : memref<8x128xf32, #tpu.memory_space<vmem>>, vector<8x128xf32>
      tpu.vector_store %arg7[%c0_10, %c0_11], %12 {strides = array<i32>} : memref<8x128xf32, #tpu.memory_space<vmem>>, vector<8x128xf32>,
    } else {
    }
    %c0 = arith.constant 0 : index
    %c0_1 = arith.constant 0 : index
    %3 = vector.load %arg7[%c0, %c0_1] : memref<8x128xf32, #tpu.memory_space<vmem>>, vector<8x128xf32>
    %c0_2 = arith.constant 0 : index
    %c0_3 = arith.constant 0 : index
    %4 = vector.load %arg3[%c0_2, %c0_3] : memref<8x384xbf16, #tpu.memory_space<vmem>>, vector<8x384xbf16>
    %c0_4 = arith.constant 0 : index
    %c0_5 = arith.constant 0 : index
    %5 = vector.load %arg4[%c0_4, %c0_5] : memref<384x128xbf16, #tpu.memory_space<vmem>>, vector<384x128xbf16>
    %cst = arith.constant dense<0.000000e+00> : vector<8x128xf32>
    %6 = tpu.matmul %4, %5, %cst {dimension_numbers = #tpu.dot_dimension_numbers<[1], [0], [0], [1], [0, 0, 1, 1], [], []>} : vector<8x384xbf16>, vector<384x128xbf16>, vector<8x128xf32> -> vector<8x128xf32>
    %7 = arith.addf %3, %6 : vector<8x128xf32>
    %c0_6 = arith.constant 0 : index
    %c0_7 = arith.constant 0 : index
    %8 = vector.load %arg7[%c0_6, %c0_7] : memref<8x128xf32, #tpu.memory_space<vmem>>, vector<8x128xf32>
    tpu.vector_store %arg7[%c0_6, %c0_7], %7 {strides = array<i32>} : memref<8x128xf32, #tpu.memory_space<vmem>>, vector<8x128xf32>,
    %c2_i32 = arith.constant 2 : i32
    %9 = arith.cmpi eq, %arg2, %c2_i32 : i32
    %10 = arith.extui %9 : i1 to i32
    %c0_i32_8 = arith.constant 0 : i32
    %11 = arith.cmpi ne, %10, %c0_i32_8 : i32
    scf.if %11 {
      %c0_9 = arith.constant 0 : index
      %c0_10 = arith.constant 0 : index
      %12 = vector.load %arg7[%c0_9, %c0_10] : memref<8x128xf32, #tpu.memory_space<vmem>>, vector<8x128xf32>
      %c0_11 = arith.constant 0 : index
      %c0_12 = arith.constant 0 : index
      %13 = vector.load %arg5[%c0_11, %c0_12] : memref<1x128xf32, #tpu.memory_space<vmem>>, vector<1x128xf32>
      %14 = vector.broadcast %13 : vector<1x128xf32> to vector<8x128xf32>
      %15 = arith.addf %12, %14 : vector<8x128xf32>
      %cst_13 = arith.constant 0.000000e+00 : f32
      %16 = vector.broadcast %cst_13 : f32 to vector<8x128xf32>
      %17 = arith.maximumf %15, %16 : vector<8x128xf32>
      %c0_14 = arith.constant 0 : index
      %c0_15 = arith.constant 0 : index
      %18 = vector.load %arg6[%c0_14, %c0_15] : memref<8x128xf32, #tpu.memory_space<vmem>>, vector<8x128xf32>
      tpu.vector_store %arg6[%c0_14, %c0_15], %17 {strides = array<i32>} : memref<8x128xf32, #tpu.memory_space<vmem>>, vector<8x128xf32>,
    } else {
    }
    return
  }
  func.func @transform_0(%arg0: i32, %arg1: i32, %arg2: i32) -> (i32, i32) {
    %c0_i32 = arith.constant 0 : i32
    return %arg0, %arg2 : i32, i32
  }
  func.func @transform_1(%arg0: i32, %arg1: i32, %arg2: i32) -> (i32, i32) {
    %c0_i32 = arith.constant 0 : i32
    return %arg2, %arg1 : i32, i32
  }
  func.func @transform_2(%arg0: i32, %arg1: i32, %arg2: i32) -> (i32, i32) {
    %c0_i32 = arith.constant 0 : i32
    %c0_i32_0 = arith.constant 0 : i32
    return %c0_i32, %arg1 : i32, i32
  }
  func.func @transform_3(%arg0: i32, %arg1: i32, %arg2: i32) -> (i32, i32) {
    %c0_i32 = arith.constant 0 : i32
    return %arg0, %arg1 : i32, i32
  }
}

module attributes {stable_mosaic.version = 11 : i64} {
  func.func @_matmul_kernel(%arg0: i32, %arg1: i32, %arg2: i32, %arg3: memref<8x384xbf16, #tpu.memory_space<vmem>>, %arg4: memref<384x256xbf16, #tpu.memory_space<vmem>>, %arg5: memref<1x256xf32, #tpu.memory_space<vmem>>, %arg6: memref<8x256xf32, #tpu.memory_space<vmem>>, %arg7: memref<8x256xf32, #tpu.memory_space<vmem>>) attributes {dimension_semantics = [#tpu.dimension_semantics<parallel>, #tpu.dimension_semantics<parallel>, #tpu.dimension_semantics<arbitrary>], iteration_bounds = array<i64: 1, 1, 3>, scalar_prefetch = 0 : i64, scratch_operands = 1 : i64, tpu.core_type = #tpu.core_type<tc>, window_params = [{transform_indices = @transform_0, window_bounds = array<i64: 8, 384>}, {transform_indices = @transform_1, window_bounds = array<i64: 384, 256>}, {transform_indices = @transform_2, window_bounds = array<i64: 1, 256>}, {transform_indices = @transform_3, window_bounds = array<i64: 8, 256>}]} {
    %c0_i32 = arith.constant 0 : i32
    %0 = arith.cmpi eq, %arg2, %c0_i32 : i32
    %1 = arith.extui %0 : i1 to i32
    %c0_i32_0 = arith.constant 0 : i32
    %2 = arith.cmpi ne, %1, %c0_i32_0 : i32
    scf.if %2 {
      %cst_9 = arith.constant 0.000000e+00 : f32
      %12 = vector.broadcast %cst_9 : f32 to vector<8x256xf32>
      %c0_10 = arith.constant 0 : index
      %c0_11 = arith.constant 0 : index
      %13 = vector.load %arg7[%c0_10, %c0_11] : memref<8x256xf32, #tpu.memory_space<vmem>>, vector<8x256xf32>
      tpu.vector_store %arg7[%c0_10, %c0_11], %12 {strides = array<i32>} : memref<8x256xf32, #tpu.memory_space<vmem>>, vector<8x256xf32>,
    } else {
    }
    %c0 = arith.constant 0 : index
    %c0_1 = arith.constant 0 : index
    %3 = vector.load %arg7[%c0, %c0_1] : memref<8x256xf32, #tpu.memory_space<vmem>>, vector<8x256xf32>
    %c0_2 = arith.constant 0 : index
    %c0_3 = arith.constant 0 : index
    %4 = vector.load %arg3[%c0_2, %c0_3] : memref<8x384xbf16, #tpu.memory_space<vmem>>, vector<8x384xbf16>
    %c0_4 = arith.constant 0 : index
    %c0_5 = arith.constant 0 : index
    %5 = vector.load %arg4[%c0_4, %c0_5] : memref<384x256xbf16, #tpu.memory_space<vmem>>, vector<384x256xbf16>
    %cst = arith.constant dense<0.000000e+00> : vector<8x256xf32>
    %6 = tpu.matmul %4, %5, %cst {dimension_numbers = #tpu.dot_dimension_numbers<[1], [0], [0], [1], [0, 0, 1, 1], [], []>} : vector<8x384xbf16>, vector<384x256xbf16>, vector<8x256xf32> -> vector<8x256xf32>
    %7 = arith.addf %3, %6 : vector<8x256xf32>
    %c0_6 = arith.constant 0 : index
    %c0_7 = arith.constant 0 : index
    %8 = vector.load %arg7[%c0_6, %c0_7] : memref<8x256xf32, #tpu.memory_space<vmem>>, vector<8x256xf32>
    tpu.vector_store %arg7[%c0_6, %c0_7], %7 {strides = array<i32>} : memref<8x256xf32, #tpu.memory_space<vmem>>, vector<8x256xf32>,
    %c2_i32 = arith.constant 2 : i32
    %9 = arith.cmpi eq, %arg2, %c2_i32 : i32
    %10 = arith.extui %9 : i1 to i32
    %c0_i32_8 = arith.constant 0 : i32
    %11 = arith.cmpi ne, %10, %c0_i32_8 : i32
    scf.if %11 {
      %c0_9 = arith.constant 0 : index
      %c0_10 = arith.constant 0 : index
      %12 = vector.load %arg7[%c0_9, %c0_10] : memref<8x256xf32, #tpu.memory_space<vmem>>, vector<8x256xf32>
      %c0_11 = arith.constant 0 : index
      %c0_12 = arith.constant 0 : index
      %13 = vector.load %arg5[%c0_11, %c0_12] : memref<1x256xf32, #tpu.memory_space<vmem>>, vector<1x256xf32>
      %14 = vector.broadcast %13 : vector<1x256xf32> to vector<8x256xf32>
      %15 = arith.addf %12, %14 : vector<8x256xf32>
      %cst_13 = arith.constant 0.000000e+00 : f32
      %16 = vector.broadcast %cst_13 : f32 to vector<8x256xf32>
      %17 = arith.maximumf %15, %16 : vector<8x256xf32>
      %c0_14 = arith.constant 0 : index
      %c0_15 = arith.constant 0 : index
      %18 = vector.load %arg6[%c0_14, %c0_15] : memref<8x256xf32, #tpu.memory_space<vmem>>, vector<8x256xf32>
      tpu.vector_store %arg6[%c0_14, %c0_15], %17 {strides = array<i32>} : memref<8x256xf32, #tpu.memory_space<vmem>>, vector<8x256xf32>,
    } else {
    }
    return
  }
  func.func @transform_0(%arg0: i32, %arg1: i32, %arg2: i32) -> (i32, i32) {
    %c0_i32 = arith.constant 0 : i32
    return %arg0, %arg2 : i32, i32
  }
  func.func @transform_1(%arg0: i32, %arg1: i32, %arg2: i32) -> (i32, i32) {
    %c0_i32 = arith.constant 0 : i32
    return %arg2, %arg1 : i32, i32
  }
  func.func @transform_2(%arg0: i32, %arg1: i32, %arg2: i32) -> (i32, i32) {
    %c0_i32 = arith.constant 0 : i32
    %c0_i32_0 = arith.constant 0 : i32
    return %c0_i32, %arg1 : i32, i32
  }
  func.func @transform_3(%arg0: i32, %arg1: i32, %arg2: i32) -> (i32, i32) {
    %c0_i32 = arith.constant 0 : i32
    return %arg0, %arg1 : i32, i32
  }
}

module attributes {stable_mosaic.version = 11 : i64} {
  func.func @_matmul_kernel(%arg0: i32, %arg1: i32, %arg2: i32, %arg3: memref<8x128xbf16, #tpu.memory_space<vmem>>, %arg4: memref<128x256xbf16, #tpu.memory_space<vmem>>, %arg5: memref<1x256xf32, #tpu.memory_space<vmem>>, %arg6: memref<8x256xf32, #tpu.memory_space<vmem>>, %arg7: memref<8x256xf32, #tpu.memory_space<vmem>>) attributes {dimension_semantics = [#tpu.dimension_semantics<parallel>, #tpu.dimension_semantics<parallel>, #tpu.dimension_semantics<arbitrary>], iteration_bounds = array<i64: 1, 1, 1>, scalar_prefetch = 0 : i64, scratch_operands = 1 : i64, tpu.core_type = #tpu.core_type<tc>, window_params = [{transform_indices = @transform_0, window_bounds = array<i64: 8, 128>}, {transform_indices = @transform_1, window_bounds = array<i64: 128, 256>}, {transform_indices = @transform_2, window_bounds = array<i64: 1, 256>}, {transform_indices = @transform_3, window_bounds = array<i64: 8, 256>}]} {
    %c0_i32 = arith.constant 0 : i32
    %0 = arith.cmpi eq, %arg2, %c0_i32 : i32
    %1 = arith.extui %0 : i1 to i32
    %c0_i32_0 = arith.constant 0 : i32
    %2 = arith.cmpi ne, %1, %c0_i32_0 : i32
    scf.if %2 {
      %cst_10 = arith.constant 0.000000e+00 : f32
      %12 = vector.broadcast %cst_10 : f32 to vector<8x256xf32>
      %c0_11 = arith.constant 0 : index
      %c0_12 = arith.constant 0 : index
      %13 = vector.load %arg7[%c0_11, %c0_12] : memref<8x256xf32, #tpu.memory_space<vmem>>, vector<8x256xf32>
      tpu.vector_store %arg7[%c0_11, %c0_12], %12 {strides = array<i32>} : memref<8x256xf32, #tpu.memory_space<vmem>>, vector<8x256xf32>,
    } else {
    }
    %c0 = arith.constant 0 : index
    %c0_1 = arith.constant 0 : index
    %3 = vector.load %arg7[%c0, %c0_1] : memref<8x256xf32, #tpu.memory_space<vmem>>, vector<8x256xf32>
    %c0_2 = arith.constant 0 : index
    %c0_3 = arith.constant 0 : index
    %4 = vector.load %arg3[%c0_2, %c0_3] : memref<8x128xbf16, #tpu.memory_space<vmem>>, vector<8x128xbf16>
    %c0_4 = arith.constant 0 : index
    %c0_5 = arith.constant 0 : index
    %5 = vector.load %arg4[%c0_4, %c0_5] : memref<128x256xbf16, #tpu.memory_space<vmem>>, vector<128x256xbf16>
    %cst = arith.constant dense<0.000000e+00> : vector<8x256xf32>
    %6 = tpu.matmul %4, %5, %cst {dimension_numbers = #tpu.dot_dimension_numbers<[1], [0], [0], [1], [0, 0, 1, 1], [], []>} : vector<8x128xbf16>, vector<128x256xbf16>, vector<8x256xf32> -> vector<8x256xf32>
    %7 = arith.addf %3, %6 : vector<8x256xf32>
    %c0_6 = arith.constant 0 : index
    %c0_7 = arith.constant 0 : index
    %8 = vector.load %arg7[%c0_6, %c0_7] : memref<8x256xf32, #tpu.memory_space<vmem>>, vector<8x256xf32>
    tpu.vector_store %arg7[%c0_6, %c0_7], %7 {strides = array<i32>} : memref<8x256xf32, #tpu.memory_space<vmem>>, vector<8x256xf32>,
    %c0_i32_8 = arith.constant 0 : i32
    %9 = arith.cmpi eq, %arg2, %c0_i32_8 : i32
    %10 = arith.extui %9 : i1 to i32
    %c0_i32_9 = arith.constant 0 : i32
    %11 = arith.cmpi ne, %10, %c0_i32_9 : i32
    scf.if %11 {
      %c0_10 = arith.constant 0 : index
      %c0_11 = arith.constant 0 : index
      %12 = vector.load %arg7[%c0_10, %c0_11] : memref<8x256xf32, #tpu.memory_space<vmem>>, vector<8x256xf32>
      %c0_12 = arith.constant 0 : index
      %c0_13 = arith.constant 0 : index
      %13 = vector.load %arg5[%c0_12, %c0_13] : memref<1x256xf32, #tpu.memory_space<vmem>>, vector<1x256xf32>
      %14 = vector.broadcast %13 : vector<1x256xf32> to vector<8x256xf32>
      %15 = arith.addf %12, %14 : vector<8x256xf32>
      %c0_14 = arith.constant 0 : index
      %c0_15 = arith.constant 0 : index
      %16 = vector.load %arg6[%c0_14, %c0_15] : memref<8x256xf32, #tpu.memory_space<vmem>>, vector<8x256xf32>
      tpu.vector_store %arg6[%c0_14, %c0_15], %15 {strides = array<i32>} : memref<8x256xf32, #tpu.memory_space<vmem>>, vector<8x256xf32>,
    } else {
    }
    return
  }
  func.func @transform_0(%arg0: i32, %arg1: i32, %arg2: i32) -> (i32, i32) {
    %c0_i32 = arith.constant 0 : i32
    return %arg0, %arg2 : i32, i32
  }
  func.func @transform_1(%arg0: i32, %arg1: i32, %arg2: i32) -> (i32, i32) {
    %c0_i32 = arith.constant 0 : i32
    return %arg2, %arg1 : i32, i32
  }
  func.func @transform_2(%arg0: i32, %arg1: i32, %arg2: i32) -> (i32, i32) {
    %c0_i32 = arith.constant 0 : i32
    %c0_i32_0 = arith.constant 0 : i32
    return %c0_i32, %arg1 : i32, i32
  }
  func.func @transform_3(%arg0: i32, %arg1: i32, %arg2: i32) -> (i32, i32) {
    %c0_i32 = arith.constant 0 : i32
    return %arg0, %arg1 : i32, i32
  }
}

module attributes {stable_mosaic.version = 11 : i64} {
  func.func @_matmul_res_kernel(%arg0: i32, %arg1: i32, %arg2: i32, %arg3: memref<8x384xbf16, #tpu.memory_space<vmem>>, %arg4: memref<384x256xbf16, #tpu.memory_space<vmem>>, %arg5: memref<1x256xf32, #tpu.memory_space<vmem>>, %arg6: memref<8x256xf32, #tpu.memory_space<vmem>>, %arg7: memref<8x256xf32, #tpu.memory_space<vmem>>, %arg8: memref<8x256xf32, #tpu.memory_space<vmem>>) attributes {dimension_semantics = [#tpu.dimension_semantics<parallel>, #tpu.dimension_semantics<parallel>, #tpu.dimension_semantics<arbitrary>], iteration_bounds = array<i64: 1, 1, 6>, scalar_prefetch = 0 : i64, scratch_operands = 1 : i64, tpu.core_type = #tpu.core_type<tc>, window_params = [{transform_indices = @transform_0, window_bounds = array<i64: 8, 384>}, {transform_indices = @transform_1, window_bounds = array<i64: 384, 256>}, {transform_indices = @transform_2, window_bounds = array<i64: 1, 256>}, {transform_indices = @transform_3, window_bounds = array<i64: 8, 256>}, {transform_indices = @transform_4, window_bounds = array<i64: 8, 256>}]} {
    %c0_i32 = arith.constant 0 : i32
    %0 = arith.cmpi eq, %arg2, %c0_i32 : i32
    %1 = arith.extui %0 : i1 to i32
    %c0_i32_0 = arith.constant 0 : i32
    %2 = arith.cmpi ne, %1, %c0_i32_0 : i32
    scf.if %2 {
      %cst_9 = arith.constant 0.000000e+00 : f32
      %12 = vector.broadcast %cst_9 : f32 to vector<8x256xf32>
      %c0_10 = arith.constant 0 : index
      %c0_11 = arith.constant 0 : index
      %13 = vector.load %arg8[%c0_10, %c0_11] : memref<8x256xf32, #tpu.memory_space<vmem>>, vector<8x256xf32>
      tpu.vector_store %arg8[%c0_10, %c0_11], %12 {strides = array<i32>} : memref<8x256xf32, #tpu.memory_space<vmem>>, vector<8x256xf32>,
    } else {
    }
    %c0 = arith.constant 0 : index
    %c0_1 = arith.constant 0 : index
    %3 = vector.load %arg8[%c0, %c0_1] : memref<8x256xf32, #tpu.memory_space<vmem>>, vector<8x256xf32>
    %c0_2 = arith.constant 0 : index
    %c0_3 = arith.constant 0 : index
    %4 = vector.load %arg3[%c0_2, %c0_3] : memref<8x384xbf16, #tpu.memory_space<vmem>>, vector<8x384xbf16>
    %c0_4 = arith.constant 0 : index
    %c0_5 = arith.constant 0 : index
    %5 = vector.load %arg4[%c0_4, %c0_5] : memref<384x256xbf16, #tpu.memory_space<vmem>>, vector<384x256xbf16>
    %cst = arith.constant dense<0.000000e+00> : vector<8x256xf32>
    %6 = tpu.matmul %4, %5, %cst {dimension_numbers = #tpu.dot_dimension_numbers<[1], [0], [0], [1], [0, 0, 1, 1], [], []>} : vector<8x384xbf16>, vector<384x256xbf16>, vector<8x256xf32> -> vector<8x256xf32>
    %7 = arith.addf %3, %6 : vector<8x256xf32>
    %c0_6 = arith.constant 0 : index
    %c0_7 = arith.constant 0 : index
    %8 = vector.load %arg8[%c0_6, %c0_7] : memref<8x256xf32, #tpu.memory_space<vmem>>, vector<8x256xf32>
    tpu.vector_store %arg8[%c0_6, %c0_7], %7 {strides = array<i32>} : memref<8x256xf32, #tpu.memory_space<vmem>>, vector<8x256xf32>,
    %c5_i32 = arith.constant 5 : i32
    %9 = arith.cmpi eq, %arg2, %c5_i32 : i32
    %10 = arith.extui %9 : i1 to i32
    %c0_i32_8 = arith.constant 0 : i32
    %11 = arith.cmpi ne, %10, %c0_i32_8 : i32
    scf.if %11 {
      %c0_9 = arith.constant 0 : index
      %c0_10 = arith.constant 0 : index
      %12 = vector.load %arg8[%c0_9, %c0_10] : memref<8x256xf32, #tpu.memory_space<vmem>>, vector<8x256xf32>
      %c0_11 = arith.constant 0 : index
      %c0_12 = arith.constant 0 : index
      %13 = vector.load %arg5[%c0_11, %c0_12] : memref<1x256xf32, #tpu.memory_space<vmem>>, vector<1x256xf32>
      %14 = vector.broadcast %13 : vector<1x256xf32> to vector<8x256xf32>
      %15 = arith.addf %12, %14 : vector<8x256xf32>
      %c0_13 = arith.constant 0 : index
      %c0_14 = arith.constant 0 : index
      %16 = vector.load %arg6[%c0_13, %c0_14] : memref<8x256xf32, #tpu.memory_space<vmem>>, vector<8x256xf32>
      %17 = arith.addf %15, %16 : vector<8x256xf32>
      %cst_15 = arith.constant 0.000000e+00 : f32
      %18 = vector.broadcast %cst_15 : f32 to vector<8x256xf32>
      %19 = arith.maximumf %17, %18 : vector<8x256xf32>
      %c0_16 = arith.constant 0 : index
      %c0_17 = arith.constant 0 : index
      %20 = vector.load %arg7[%c0_16, %c0_17] : memref<8x256xf32, #tpu.memory_space<vmem>>, vector<8x256xf32>
      tpu.vector_store %arg7[%c0_16, %c0_17], %19 {strides = array<i32>} : memref<8x256xf32, #tpu.memory_space<vmem>>, vector<8x256xf32>,
    } else {
    }
    return
  }
  func.func @transform_0(%arg0: i32, %arg1: i32, %arg2: i32) -> (i32, i32) {
    %c0_i32 = arith.constant 0 : i32
    return %arg0, %arg2 : i32, i32
  }
  func.func @transform_1(%arg0: i32, %arg1: i32, %arg2: i32) -> (i32, i32) {
    %c0_i32 = arith.constant 0 : i32
    return %arg2, %arg1 : i32, i32
  }
  func.func @transform_2(%arg0: i32, %arg1: i32, %arg2: i32) -> (i32, i32) {
    %c0_i32 = arith.constant 0 : i32
    %c0_i32_0 = arith.constant 0 : i32
    return %c0_i32, %arg1 : i32, i32
  }
  func.func @transform_3(%arg0: i32, %arg1: i32, %arg2: i32) -> (i32, i32) {
    %c0_i32 = arith.constant 0 : i32
    return %arg0, %arg1 : i32, i32
  }
  func.func @transform_4(%arg0: i32, %arg1: i32, %arg2: i32) -> (i32, i32) {
    %c0_i32 = arith.constant 0 : i32
    return %arg0, %arg1 : i32, i32
  }
}

module attributes {stable_mosaic.version = 11 : i64} {
  func.func @_matmul_kernel(%arg0: i32, %arg1: i32, %arg2: i32, %arg3: memref<8x384xbf16, #tpu.memory_space<vmem>>, %arg4: memref<384x256xbf16, #tpu.memory_space<vmem>>, %arg5: memref<1x256xf32, #tpu.memory_space<vmem>>, %arg6: memref<8x256xf32, #tpu.memory_space<vmem>>, %arg7: memref<8x256xf32, #tpu.memory_space<vmem>>) attributes {dimension_semantics = [#tpu.dimension_semantics<parallel>, #tpu.dimension_semantics<parallel>, #tpu.dimension_semantics<arbitrary>], iteration_bounds = array<i64: 1, 1, 6>, scalar_prefetch = 0 : i64, scratch_operands = 1 : i64, tpu.core_type = #tpu.core_type<tc>, window_params = [{transform_indices = @transform_0, window_bounds = array<i64: 8, 384>}, {transform_indices = @transform_1, window_bounds = array<i64: 384, 256>}, {transform_indices = @transform_2, window_bounds = array<i64: 1, 256>}, {transform_indices = @transform_3, window_bounds = array<i64: 8, 256>}]} {
    %c0_i32 = arith.constant 0 : i32
    %0 = arith.cmpi eq, %arg2, %c0_i32 : i32
    %1 = arith.extui %0 : i1 to i32
    %c0_i32_0 = arith.constant 0 : i32
    %2 = arith.cmpi ne, %1, %c0_i32_0 : i32
    scf.if %2 {
      %cst_9 = arith.constant 0.000000e+00 : f32
      %12 = vector.broadcast %cst_9 : f32 to vector<8x256xf32>
      %c0_10 = arith.constant 0 : index
      %c0_11 = arith.constant 0 : index
      %13 = vector.load %arg7[%c0_10, %c0_11] : memref<8x256xf32, #tpu.memory_space<vmem>>, vector<8x256xf32>
      tpu.vector_store %arg7[%c0_10, %c0_11], %12 {strides = array<i32>} : memref<8x256xf32, #tpu.memory_space<vmem>>, vector<8x256xf32>,
    } else {
    }
    %c0 = arith.constant 0 : index
    %c0_1 = arith.constant 0 : index
    %3 = vector.load %arg7[%c0, %c0_1] : memref<8x256xf32, #tpu.memory_space<vmem>>, vector<8x256xf32>
    %c0_2 = arith.constant 0 : index
    %c0_3 = arith.constant 0 : index
    %4 = vector.load %arg3[%c0_2, %c0_3] : memref<8x384xbf16, #tpu.memory_space<vmem>>, vector<8x384xbf16>
    %c0_4 = arith.constant 0 : index
    %c0_5 = arith.constant 0 : index
    %5 = vector.load %arg4[%c0_4, %c0_5] : memref<384x256xbf16, #tpu.memory_space<vmem>>, vector<384x256xbf16>
    %cst = arith.constant dense<0.000000e+00> : vector<8x256xf32>
    %6 = tpu.matmul %4, %5, %cst {dimension_numbers = #tpu.dot_dimension_numbers<[1], [0], [0], [1], [0, 0, 1, 1], [], []>} : vector<8x384xbf16>, vector<384x256xbf16>, vector<8x256xf32> -> vector<8x256xf32>
    %7 = arith.addf %3, %6 : vector<8x256xf32>
    %c0_6 = arith.constant 0 : index
    %c0_7 = arith.constant 0 : index
    %8 = vector.load %arg7[%c0_6, %c0_7] : memref<8x256xf32, #tpu.memory_space<vmem>>, vector<8x256xf32>
    tpu.vector_store %arg7[%c0_6, %c0_7], %7 {strides = array<i32>} : memref<8x256xf32, #tpu.memory_space<vmem>>, vector<8x256xf32>,
    %c5_i32 = arith.constant 5 : i32
    %9 = arith.cmpi eq, %arg2, %c5_i32 : i32
    %10 = arith.extui %9 : i1 to i32
    %c0_i32_8 = arith.constant 0 : i32
    %11 = arith.cmpi ne, %10, %c0_i32_8 : i32
    scf.if %11 {
      %c0_9 = arith.constant 0 : index
      %c0_10 = arith.constant 0 : index
      %12 = vector.load %arg7[%c0_9, %c0_10] : memref<8x256xf32, #tpu.memory_space<vmem>>, vector<8x256xf32>
      %c0_11 = arith.constant 0 : index
      %c0_12 = arith.constant 0 : index
      %13 = vector.load %arg5[%c0_11, %c0_12] : memref<1x256xf32, #tpu.memory_space<vmem>>, vector<1x256xf32>
      %14 = vector.broadcast %13 : vector<1x256xf32> to vector<8x256xf32>
      %15 = arith.addf %12, %14 : vector<8x256xf32>
      %cst_13 = arith.constant 0.000000e+00 : f32
      %16 = vector.broadcast %cst_13 : f32 to vector<8x256xf32>
      %17 = arith.maximumf %15, %16 : vector<8x256xf32>
      %c0_14 = arith.constant 0 : index
      %c0_15 = arith.constant 0 : index
      %18 = vector.load %arg6[%c0_14, %c0_15] : memref<8x256xf32, #tpu.memory_space<vmem>>, vector<8x256xf32>
      tpu.vector_store %arg6[%c0_14, %c0_15], %17 {strides = array<i32>} : memref<8x256xf32, #tpu.memory_space<vmem>>, vector<8x256xf32>,
    } else {
    }
    return
  }
  func.func @transform_0(%arg0: i32, %arg1: i32, %arg2: i32) -> (i32, i32) {
    %c0_i32 = arith.constant 0 : i32
    return %arg0, %arg2 : i32, i32
  }
  func.func @transform_1(%arg0: i32, %arg1: i32, %arg2: i32) -> (i32, i32) {
    %c0_i32 = arith.constant 0 : i32
    return %arg2, %arg1 : i32, i32
  }
  func.func @transform_2(%arg0: i32, %arg1: i32, %arg2: i32) -> (i32, i32) {
    %c0_i32 = arith.constant 0 : i32
    %c0_i32_0 = arith.constant 0 : i32
    return %c0_i32, %arg1 : i32, i32
  }
  func.func @transform_3(%arg0: i32, %arg1: i32, %arg2: i32) -> (i32, i32) {
    %c0_i32 = arith.constant 0 : i32
    return %arg0, %arg1 : i32, i32
  }
}

module attributes {stable_mosaic.version = 11 : i64} {
  func.func @_matmul_kernel(%arg0: i32, %arg1: i32, %arg2: i32, %arg3: memref<8x384xbf16, #tpu.memory_space<vmem>>, %arg4: memref<384x256xbf16, #tpu.memory_space<vmem>>, %arg5: memref<1x256xf32, #tpu.memory_space<vmem>>, %arg6: memref<8x256xf32, #tpu.memory_space<vmem>>, %arg7: memref<8x256xf32, #tpu.memory_space<vmem>>) attributes {dimension_semantics = [#tpu.dimension_semantics<parallel>, #tpu.dimension_semantics<parallel>, #tpu.dimension_semantics<arbitrary>], iteration_bounds = array<i64: 1, 2, 6>, scalar_prefetch = 0 : i64, scratch_operands = 1 : i64, tpu.core_type = #tpu.core_type<tc>, window_params = [{transform_indices = @transform_0, window_bounds = array<i64: 8, 384>}, {transform_indices = @transform_1, window_bounds = array<i64: 384, 256>}, {transform_indices = @transform_2, window_bounds = array<i64: 1, 256>}, {transform_indices = @transform_3, window_bounds = array<i64: 8, 256>}]} {
    %c0_i32 = arith.constant 0 : i32
    %0 = arith.cmpi eq, %arg2, %c0_i32 : i32
    %1 = arith.extui %0 : i1 to i32
    %c0_i32_0 = arith.constant 0 : i32
    %2 = arith.cmpi ne, %1, %c0_i32_0 : i32
    scf.if %2 {
      %cst_9 = arith.constant 0.000000e+00 : f32
      %12 = vector.broadcast %cst_9 : f32 to vector<8x256xf32>
      %c0_10 = arith.constant 0 : index
      %c0_11 = arith.constant 0 : index
      %13 = vector.load %arg7[%c0_10, %c0_11] : memref<8x256xf32, #tpu.memory_space<vmem>>, vector<8x256xf32>
      tpu.vector_store %arg7[%c0_10, %c0_11], %12 {strides = array<i32>} : memref<8x256xf32, #tpu.memory_space<vmem>>, vector<8x256xf32>,
    } else {
    }
    %c0 = arith.constant 0 : index
    %c0_1 = arith.constant 0 : index
    %3 = vector.load %arg7[%c0, %c0_1] : memref<8x256xf32, #tpu.memory_space<vmem>>, vector<8x256xf32>
    %c0_2 = arith.constant 0 : index
    %c0_3 = arith.constant 0 : index
    %4 = vector.load %arg3[%c0_2, %c0_3] : memref<8x384xbf16, #tpu.memory_space<vmem>>, vector<8x384xbf16>
    %c0_4 = arith.constant 0 : index
    %c0_5 = arith.constant 0 : index
    %5 = vector.load %arg4[%c0_4, %c0_5] : memref<384x256xbf16, #tpu.memory_space<vmem>>, vector<384x256xbf16>
    %cst = arith.constant dense<0.000000e+00> : vector<8x256xf32>
    %6 = tpu.matmul %4, %5, %cst {dimension_numbers = #tpu.dot_dimension_numbers<[1], [0], [0], [1], [0, 0, 1, 1], [], []>} : vector<8x384xbf16>, vector<384x256xbf16>, vector<8x256xf32> -> vector<8x256xf32>
    %7 = arith.addf %3, %6 : vector<8x256xf32>
    %c0_6 = arith.constant 0 : index
    %c0_7 = arith.constant 0 : index
    %8 = vector.load %arg7[%c0_6, %c0_7] : memref<8x256xf32, #tpu.memory_space<vmem>>, vector<8x256xf32>
    tpu.vector_store %arg7[%c0_6, %c0_7], %7 {strides = array<i32>} : memref<8x256xf32, #tpu.memory_space<vmem>>, vector<8x256xf32>,
    %c5_i32 = arith.constant 5 : i32
    %9 = arith.cmpi eq, %arg2, %c5_i32 : i32
    %10 = arith.extui %9 : i1 to i32
    %c0_i32_8 = arith.constant 0 : i32
    %11 = arith.cmpi ne, %10, %c0_i32_8 : i32
    scf.if %11 {
      %c0_9 = arith.constant 0 : index
      %c0_10 = arith.constant 0 : index
      %12 = vector.load %arg7[%c0_9, %c0_10] : memref<8x256xf32, #tpu.memory_space<vmem>>, vector<8x256xf32>
      %c0_11 = arith.constant 0 : index
      %c0_12 = arith.constant 0 : index
      %13 = vector.load %arg5[%c0_11, %c0_12] : memref<1x256xf32, #tpu.memory_space<vmem>>, vector<1x256xf32>
      %14 = vector.broadcast %13 : vector<1x256xf32> to vector<8x256xf32>
      %15 = arith.addf %12, %14 : vector<8x256xf32>
      %cst_13 = arith.constant 0.000000e+00 : f32
      %16 = vector.broadcast %cst_13 : f32 to vector<8x256xf32>
      %17 = arith.maximumf %15, %16 : vector<8x256xf32>
      %c0_14 = arith.constant 0 : index
      %c0_15 = arith.constant 0 : index
      %18 = vector.load %arg6[%c0_14, %c0_15] : memref<8x256xf32, #tpu.memory_space<vmem>>, vector<8x256xf32>
      tpu.vector_store %arg6[%c0_14, %c0_15], %17 {strides = array<i32>} : memref<8x256xf32, #tpu.memory_space<vmem>>, vector<8x256xf32>,
    } else {
    }
    return
  }
  func.func @transform_0(%arg0: i32, %arg1: i32, %arg2: i32) -> (i32, i32) {
    %c0_i32 = arith.constant 0 : i32
    return %arg0, %arg2 : i32, i32
  }
  func.func @transform_1(%arg0: i32, %arg1: i32, %arg2: i32) -> (i32, i32) {
    %c0_i32 = arith.constant 0 : i32
    return %arg2, %arg1 : i32, i32
  }
  func.func @transform_2(%arg0: i32, %arg1: i32, %arg2: i32) -> (i32, i32) {
    %c0_i32 = arith.constant 0 : i32
    %c0_i32_0 = arith.constant 0 : i32
    return %c0_i32, %arg1 : i32, i32
  }
  func.func @transform_3(%arg0: i32, %arg1: i32, %arg2: i32) -> (i32, i32) {
    %c0_i32 = arith.constant 0 : i32
    return %arg0, %arg1 : i32, i32
  }
}

module attributes {stable_mosaic.version = 11 : i64} {
  func.func @_matmul_res_kernel(%arg0: i32, %arg1: i32, %arg2: i32, %arg3: memref<8x512xbf16, #tpu.memory_space<vmem>>, %arg4: memref<512x256xbf16, #tpu.memory_space<vmem>>, %arg5: memref<1x256xf32, #tpu.memory_space<vmem>>, %arg6: memref<8x256xf32, #tpu.memory_space<vmem>>, %arg7: memref<8x256xf32, #tpu.memory_space<vmem>>, %arg8: memref<8x256xf32, #tpu.memory_space<vmem>>) attributes {dimension_semantics = [#tpu.dimension_semantics<parallel>, #tpu.dimension_semantics<parallel>, #tpu.dimension_semantics<arbitrary>], iteration_bounds = array<i64: 1, 2, 9>, scalar_prefetch = 0 : i64, scratch_operands = 1 : i64, tpu.core_type = #tpu.core_type<tc>, window_params = [{transform_indices = @transform_0, window_bounds = array<i64: 8, 512>}, {transform_indices = @transform_1, window_bounds = array<i64: 512, 256>}, {transform_indices = @transform_2, window_bounds = array<i64: 1, 256>}, {transform_indices = @transform_3, window_bounds = array<i64: 8, 256>}, {transform_indices = @transform_4, window_bounds = array<i64: 8, 256>}]} {
    %c0_i32 = arith.constant 0 : i32
    %0 = arith.cmpi eq, %arg2, %c0_i32 : i32
    %1 = arith.extui %0 : i1 to i32
    %c0_i32_0 = arith.constant 0 : i32
    %2 = arith.cmpi ne, %1, %c0_i32_0 : i32
    scf.if %2 {
      %cst_9 = arith.constant 0.000000e+00 : f32
      %12 = vector.broadcast %cst_9 : f32 to vector<8x256xf32>
      %c0_10 = arith.constant 0 : index
      %c0_11 = arith.constant 0 : index
      %13 = vector.load %arg8[%c0_10, %c0_11] : memref<8x256xf32, #tpu.memory_space<vmem>>, vector<8x256xf32>
      tpu.vector_store %arg8[%c0_10, %c0_11], %12 {strides = array<i32>} : memref<8x256xf32, #tpu.memory_space<vmem>>, vector<8x256xf32>,
    } else {
    }
    %c0 = arith.constant 0 : index
    %c0_1 = arith.constant 0 : index
    %3 = vector.load %arg8[%c0, %c0_1] : memref<8x256xf32, #tpu.memory_space<vmem>>, vector<8x256xf32>
    %c0_2 = arith.constant 0 : index
    %c0_3 = arith.constant 0 : index
    %4 = vector.load %arg3[%c0_2, %c0_3] : memref<8x512xbf16, #tpu.memory_space<vmem>>, vector<8x512xbf16>
    %c0_4 = arith.constant 0 : index
    %c0_5 = arith.constant 0 : index
    %5 = vector.load %arg4[%c0_4, %c0_5] : memref<512x256xbf16, #tpu.memory_space<vmem>>, vector<512x256xbf16>
    %cst = arith.constant dense<0.000000e+00> : vector<8x256xf32>
    %6 = tpu.matmul %4, %5, %cst {dimension_numbers = #tpu.dot_dimension_numbers<[1], [0], [0], [1], [0, 0, 1, 1], [], []>} : vector<8x512xbf16>, vector<512x256xbf16>, vector<8x256xf32> -> vector<8x256xf32>
    %7 = arith.addf %3, %6 : vector<8x256xf32>
    %c0_6 = arith.constant 0 : index
    %c0_7 = arith.constant 0 : index
    %8 = vector.load %arg8[%c0_6, %c0_7] : memref<8x256xf32, #tpu.memory_space<vmem>>, vector<8x256xf32>
    tpu.vector_store %arg8[%c0_6, %c0_7], %7 {strides = array<i32>} : memref<8x256xf32, #tpu.memory_space<vmem>>, vector<8x256xf32>,
    %c8_i32 = arith.constant 8 : i32
    %9 = arith.cmpi eq, %arg2, %c8_i32 : i32
    %10 = arith.extui %9 : i1 to i32
    %c0_i32_8 = arith.constant 0 : i32
    %11 = arith.cmpi ne, %10, %c0_i32_8 : i32
    scf.if %11 {
      %c0_9 = arith.constant 0 : index
      %c0_10 = arith.constant 0 : index
      %12 = vector.load %arg8[%c0_9, %c0_10] : memref<8x256xf32, #tpu.memory_space<vmem>>, vector<8x256xf32>
      %c0_11 = arith.constant 0 : index
      %c0_12 = arith.constant 0 : index
      %13 = vector.load %arg5[%c0_11, %c0_12] : memref<1x256xf32, #tpu.memory_space<vmem>>, vector<1x256xf32>
      %14 = vector.broadcast %13 : vector<1x256xf32> to vector<8x256xf32>
      %15 = arith.addf %12, %14 : vector<8x256xf32>
      %c0_13 = arith.constant 0 : index
      %c0_14 = arith.constant 0 : index
      %16 = vector.load %arg6[%c0_13, %c0_14] : memref<8x256xf32, #tpu.memory_space<vmem>>, vector<8x256xf32>
      %17 = arith.addf %15, %16 : vector<8x256xf32>
      %cst_15 = arith.constant 0.000000e+00 : f32
      %18 = vector.broadcast %cst_15 : f32 to vector<8x256xf32>
      %19 = arith.maximumf %17, %18 : vector<8x256xf32>
      %c0_16 = arith.constant 0 : index
      %c0_17 = arith.constant 0 : index
      %20 = vector.load %arg7[%c0_16, %c0_17] : memref<8x256xf32, #tpu.memory_space<vmem>>, vector<8x256xf32>
      tpu.vector_store %arg7[%c0_16, %c0_17], %19 {strides = array<i32>} : memref<8x256xf32, #tpu.memory_space<vmem>>, vector<8x256xf32>,
    } else {
    }
    return
  }
  func.func @transform_0(%arg0: i32, %arg1: i32, %arg2: i32) -> (i32, i32) {
    %c0_i32 = arith.constant 0 : i32
    return %arg0, %arg2 : i32, i32
  }
  func.func @transform_1(%arg0: i32, %arg1: i32, %arg2: i32) -> (i32, i32) {
    %c0_i32 = arith.constant 0 : i32
    return %arg2, %arg1 : i32, i32
  }
  func.func @transform_2(%arg0: i32, %arg1: i32, %arg2: i32) -> (i32, i32) {
    %c0_i32 = arith.constant 0 : i32
    %c0_i32_0 = arith.constant 0 : i32
    return %c0_i32, %arg1 : i32, i32
  }
  func.func @transform_3(%arg0: i32, %arg1: i32, %arg2: i32) -> (i32, i32) {
    %c0_i32 = arith.constant 0 : i32
    return %arg0, %arg1 : i32, i32
  }
  func.func @transform_4(%arg0: i32, %arg1: i32, %arg2: i32) -> (i32, i32) {
    %c0_i32 = arith.constant 0 : i32
    return %arg0, %arg1 : i32, i32
  }
}

module attributes {stable_mosaic.version = 11 : i64} {
  func.func @_matmul_kernel(%arg0: i32, %arg1: i32, %arg2: i32, %arg3: memref<8x256xbf16, #tpu.memory_space<vmem>>, %arg4: memref<256x256xbf16, #tpu.memory_space<vmem>>, %arg5: memref<1x256xf32, #tpu.memory_space<vmem>>, %arg6: memref<8x256xf32, #tpu.memory_space<vmem>>, %arg7: memref<8x256xf32, #tpu.memory_space<vmem>>) attributes {dimension_semantics = [#tpu.dimension_semantics<parallel>, #tpu.dimension_semantics<parallel>, #tpu.dimension_semantics<arbitrary>], iteration_bounds = array<i64: 1, 2, 1>, scalar_prefetch = 0 : i64, scratch_operands = 1 : i64, tpu.core_type = #tpu.core_type<tc>, window_params = [{transform_indices = @transform_0, window_bounds = array<i64: 8, 256>}, {transform_indices = @transform_1, window_bounds = array<i64: 256, 256>}, {transform_indices = @transform_2, window_bounds = array<i64: 1, 256>}, {transform_indices = @transform_3, window_bounds = array<i64: 8, 256>}]} {
    %c0_i32 = arith.constant 0 : i32
    %0 = arith.cmpi eq, %arg2, %c0_i32 : i32
    %1 = arith.extui %0 : i1 to i32
    %c0_i32_0 = arith.constant 0 : i32
    %2 = arith.cmpi ne, %1, %c0_i32_0 : i32
    scf.if %2 {
      %cst_10 = arith.constant 0.000000e+00 : f32
      %12 = vector.broadcast %cst_10 : f32 to vector<8x256xf32>
      %c0_11 = arith.constant 0 : index
      %c0_12 = arith.constant 0 : index
      %13 = vector.load %arg7[%c0_11, %c0_12] : memref<8x256xf32, #tpu.memory_space<vmem>>, vector<8x256xf32>
      tpu.vector_store %arg7[%c0_11, %c0_12], %12 {strides = array<i32>} : memref<8x256xf32, #tpu.memory_space<vmem>>, vector<8x256xf32>,
    } else {
    }
    %c0 = arith.constant 0 : index
    %c0_1 = arith.constant 0 : index
    %3 = vector.load %arg7[%c0, %c0_1] : memref<8x256xf32, #tpu.memory_space<vmem>>, vector<8x256xf32>
    %c0_2 = arith.constant 0 : index
    %c0_3 = arith.constant 0 : index
    %4 = vector.load %arg3[%c0_2, %c0_3] : memref<8x256xbf16, #tpu.memory_space<vmem>>, vector<8x256xbf16>
    %c0_4 = arith.constant 0 : index
    %c0_5 = arith.constant 0 : index
    %5 = vector.load %arg4[%c0_4, %c0_5] : memref<256x256xbf16, #tpu.memory_space<vmem>>, vector<256x256xbf16>
    %cst = arith.constant dense<0.000000e+00> : vector<8x256xf32>
    %6 = tpu.matmul %4, %5, %cst {dimension_numbers = #tpu.dot_dimension_numbers<[1], [0], [0], [1], [0, 0, 1, 1], [], []>} : vector<8x256xbf16>, vector<256x256xbf16>, vector<8x256xf32> -> vector<8x256xf32>
    %7 = arith.addf %3, %6 : vector<8x256xf32>
    %c0_6 = arith.constant 0 : index
    %c0_7 = arith.constant 0 : index
    %8 = vector.load %arg7[%c0_6, %c0_7] : memref<8x256xf32, #tpu.memory_space<vmem>>, vector<8x256xf32>
    tpu.vector_store %arg7[%c0_6, %c0_7], %7 {strides = array<i32>} : memref<8x256xf32, #tpu.memory_space<vmem>>, vector<8x256xf32>,
    %c0_i32_8 = arith.constant 0 : i32
    %9 = arith.cmpi eq, %arg2, %c0_i32_8 : i32
    %10 = arith.extui %9 : i1 to i32
    %c0_i32_9 = arith.constant 0 : i32
    %11 = arith.cmpi ne, %10, %c0_i32_9 : i32
    scf.if %11 {
      %c0_10 = arith.constant 0 : index
      %c0_11 = arith.constant 0 : index
      %12 = vector.load %arg7[%c0_10, %c0_11] : memref<8x256xf32, #tpu.memory_space<vmem>>, vector<8x256xf32>
      %c0_12 = arith.constant 0 : index
      %c0_13 = arith.constant 0 : index
      %13 = vector.load %arg5[%c0_12, %c0_13] : memref<1x256xf32, #tpu.memory_space<vmem>>, vector<1x256xf32>
      %14 = vector.broadcast %13 : vector<1x256xf32> to vector<8x256xf32>
      %15 = arith.addf %12, %14 : vector<8x256xf32>
      %c0_14 = arith.constant 0 : index
      %c0_15 = arith.constant 0 : index
      %16 = vector.load %arg6[%c0_14, %c0_15] : memref<8x256xf32, #tpu.memory_space<vmem>>, vector<8x256xf32>
      tpu.vector_store %arg6[%c0_14, %c0_15], %15 {strides = array<i32>} : memref<8x256xf32, #tpu.memory_space<vmem>>, vector<8x256xf32>,
    } else {
    }
    return
  }
  func.func @transform_0(%arg0: i32, %arg1: i32, %arg2: i32) -> (i32, i32) {
    %c0_i32 = arith.constant 0 : i32
    return %arg0, %arg2 : i32, i32
  }
  func.func @transform_1(%arg0: i32, %arg1: i32, %arg2: i32) -> (i32, i32) {
    %c0_i32 = arith.constant 0 : i32
    return %arg2, %arg1 : i32, i32
  }
  func.func @transform_2(%arg0: i32, %arg1: i32, %arg2: i32) -> (i32, i32) {
    %c0_i32 = arith.constant 0 : i32
    %c0_i32_0 = arith.constant 0 : i32
    return %c0_i32, %arg1 : i32, i32
  }
  func.func @transform_3(%arg0: i32, %arg1: i32, %arg2: i32) -> (i32, i32) {
    %c0_i32 = arith.constant 0 : i32
    return %arg0, %arg1 : i32, i32
  }
}

module attributes {stable_mosaic.version = 11 : i64} {
  func.func @_matmul_kernel(%arg0: i32, %arg1: i32, %arg2: i32, %arg3: memref<8x512xbf16, #tpu.memory_space<vmem>>, %arg4: memref<512x256xbf16, #tpu.memory_space<vmem>>, %arg5: memref<1x256xf32, #tpu.memory_space<vmem>>, %arg6: memref<8x256xf32, #tpu.memory_space<vmem>>, %arg7: memref<8x256xf32, #tpu.memory_space<vmem>>) attributes {dimension_semantics = [#tpu.dimension_semantics<parallel>, #tpu.dimension_semantics<parallel>, #tpu.dimension_semantics<arbitrary>], iteration_bounds = array<i64: 1, 2, 9>, scalar_prefetch = 0 : i64, scratch_operands = 1 : i64, tpu.core_type = #tpu.core_type<tc>, window_params = [{transform_indices = @transform_0, window_bounds = array<i64: 8, 512>}, {transform_indices = @transform_1, window_bounds = array<i64: 512, 256>}, {transform_indices = @transform_2, window_bounds = array<i64: 1, 256>}, {transform_indices = @transform_3, window_bounds = array<i64: 8, 256>}]} {
    %c0_i32 = arith.constant 0 : i32
    %0 = arith.cmpi eq, %arg2, %c0_i32 : i32
    %1 = arith.extui %0 : i1 to i32
    %c0_i32_0 = arith.constant 0 : i32
    %2 = arith.cmpi ne, %1, %c0_i32_0 : i32
    scf.if %2 {
      %cst_9 = arith.constant 0.000000e+00 : f32
      %12 = vector.broadcast %cst_9 : f32 to vector<8x256xf32>
      %c0_10 = arith.constant 0 : index
      %c0_11 = arith.constant 0 : index
      %13 = vector.load %arg7[%c0_10, %c0_11] : memref<8x256xf32, #tpu.memory_space<vmem>>, vector<8x256xf32>
      tpu.vector_store %arg7[%c0_10, %c0_11], %12 {strides = array<i32>} : memref<8x256xf32, #tpu.memory_space<vmem>>, vector<8x256xf32>,
    } else {
    }
    %c0 = arith.constant 0 : index
    %c0_1 = arith.constant 0 : index
    %3 = vector.load %arg7[%c0, %c0_1] : memref<8x256xf32, #tpu.memory_space<vmem>>, vector<8x256xf32>
    %c0_2 = arith.constant 0 : index
    %c0_3 = arith.constant 0 : index
    %4 = vector.load %arg3[%c0_2, %c0_3] : memref<8x512xbf16, #tpu.memory_space<vmem>>, vector<8x512xbf16>
    %c0_4 = arith.constant 0 : index
    %c0_5 = arith.constant 0 : index
    %5 = vector.load %arg4[%c0_4, %c0_5] : memref<512x256xbf16, #tpu.memory_space<vmem>>, vector<512x256xbf16>
    %cst = arith.constant dense<0.000000e+00> : vector<8x256xf32>
    %6 = tpu.matmul %4, %5, %cst {dimension_numbers = #tpu.dot_dimension_numbers<[1], [0], [0], [1], [0, 0, 1, 1], [], []>} : vector<8x512xbf16>, vector<512x256xbf16>, vector<8x256xf32> -> vector<8x256xf32>
    %7 = arith.addf %3, %6 : vector<8x256xf32>
    %c0_6 = arith.constant 0 : index
    %c0_7 = arith.constant 0 : index
    %8 = vector.load %arg7[%c0_6, %c0_7] : memref<8x256xf32, #tpu.memory_space<vmem>>, vector<8x256xf32>
    tpu.vector_store %arg7[%c0_6, %c0_7], %7 {strides = array<i32>} : memref<8x256xf32, #tpu.memory_space<vmem>>, vector<8x256xf32>,
    %c8_i32 = arith.constant 8 : i32
    %9 = arith.cmpi eq, %arg2, %c8_i32 : i32
    %10 = arith.extui %9 : i1 to i32
    %c0_i32_8 = arith.constant 0 : i32
    %11 = arith.cmpi ne, %10, %c0_i32_8 : i32
    scf.if %11 {
      %c0_9 = arith.constant 0 : index
      %c0_10 = arith.constant 0 : index
      %12 = vector.load %arg7[%c0_9, %c0_10] : memref<8x256xf32, #tpu.memory_space<vmem>>, vector<8x256xf32>
      %c0_11 = arith.constant 0 : index
      %c0_12 = arith.constant 0 : index
      %13 = vector.load %arg5[%c0_11, %c0_12] : memref<1x256xf32, #tpu.memory_space<vmem>>, vector<1x256xf32>
      %14 = vector.broadcast %13 : vector<1x256xf32> to vector<8x256xf32>
      %15 = arith.addf %12, %14 : vector<8x256xf32>
      %cst_13 = arith.constant 0.000000e+00 : f32
      %16 = vector.broadcast %cst_13 : f32 to vector<8x256xf32>
      %17 = arith.maximumf %15, %16 : vector<8x256xf32>
      %c0_14 = arith.constant 0 : index
      %c0_15 = arith.constant 0 : index
      %18 = vector.load %arg6[%c0_14, %c0_15] : memref<8x256xf32, #tpu.memory_space<vmem>>, vector<8x256xf32>
      tpu.vector_store %arg6[%c0_14, %c0_15], %17 {strides = array<i32>} : memref<8x256xf32, #tpu.memory_space<vmem>>, vector<8x256xf32>,
    } else {
    }
    return
  }
  func.func @transform_0(%arg0: i32, %arg1: i32, %arg2: i32) -> (i32, i32) {
    %c0_i32 = arith.constant 0 : i32
    return %arg0, %arg2 : i32, i32
  }
  func.func @transform_1(%arg0: i32, %arg1: i32, %arg2: i32) -> (i32, i32) {
    %c0_i32 = arith.constant 0 : i32
    return %arg2, %arg1 : i32, i32
  }
  func.func @transform_2(%arg0: i32, %arg1: i32, %arg2: i32) -> (i32, i32) {
    %c0_i32 = arith.constant 0 : i32
    %c0_i32_0 = arith.constant 0 : i32
    return %c0_i32, %arg1 : i32, i32
  }
  func.func @transform_3(%arg0: i32, %arg1: i32, %arg2: i32) -> (i32, i32) {
    %c0_i32 = arith.constant 0 : i32
    return %arg0, %arg1 : i32, i32
  }
}

module attributes {stable_mosaic.version = 11 : i64} {
  func.func @_matmul_kernel(%arg0: i32, %arg1: i32, %arg2: i32, %arg3: memref<8x512xbf16, #tpu.memory_space<vmem>>, %arg4: memref<512x256xbf16, #tpu.memory_space<vmem>>, %arg5: memref<1x256xf32, #tpu.memory_space<vmem>>, %arg6: memref<8x256xf32, #tpu.memory_space<vmem>>, %arg7: memref<8x256xf32, #tpu.memory_space<vmem>>) attributes {dimension_semantics = [#tpu.dimension_semantics<parallel>, #tpu.dimension_semantics<parallel>, #tpu.dimension_semantics<arbitrary>], iteration_bounds = array<i64: 1, 1, 9>, scalar_prefetch = 0 : i64, scratch_operands = 1 : i64, tpu.core_type = #tpu.core_type<tc>, window_params = [{transform_indices = @transform_0, window_bounds = array<i64: 8, 512>}, {transform_indices = @transform_1, window_bounds = array<i64: 512, 256>}, {transform_indices = @transform_2, window_bounds = array<i64: 1, 256>}, {transform_indices = @transform_3, window_bounds = array<i64: 8, 256>}]} {
    %c0_i32 = arith.constant 0 : i32
    %0 = arith.cmpi eq, %arg2, %c0_i32 : i32
    %1 = arith.extui %0 : i1 to i32
    %c0_i32_0 = arith.constant 0 : i32
    %2 = arith.cmpi ne, %1, %c0_i32_0 : i32
    scf.if %2 {
      %cst_9 = arith.constant 0.000000e+00 : f32
      %12 = vector.broadcast %cst_9 : f32 to vector<8x256xf32>
      %c0_10 = arith.constant 0 : index
      %c0_11 = arith.constant 0 : index
      %13 = vector.load %arg7[%c0_10, %c0_11] : memref<8x256xf32, #tpu.memory_space<vmem>>, vector<8x256xf32>
      tpu.vector_store %arg7[%c0_10, %c0_11], %12 {strides = array<i32>} : memref<8x256xf32, #tpu.memory_space<vmem>>, vector<8x256xf32>,
    } else {
    }
    %c0 = arith.constant 0 : index
    %c0_1 = arith.constant 0 : index
    %3 = vector.load %arg7[%c0, %c0_1] : memref<8x256xf32, #tpu.memory_space<vmem>>, vector<8x256xf32>
    %c0_2 = arith.constant 0 : index
    %c0_3 = arith.constant 0 : index
    %4 = vector.load %arg3[%c0_2, %c0_3] : memref<8x512xbf16, #tpu.memory_space<vmem>>, vector<8x512xbf16>
    %c0_4 = arith.constant 0 : index
    %c0_5 = arith.constant 0 : index
    %5 = vector.load %arg4[%c0_4, %c0_5] : memref<512x256xbf16, #tpu.memory_space<vmem>>, vector<512x256xbf16>
    %cst = arith.constant dense<0.000000e+00> : vector<8x256xf32>
    %6 = tpu.matmul %4, %5, %cst {dimension_numbers = #tpu.dot_dimension_numbers<[1], [0], [0], [1], [0, 0, 1, 1], [], []>} : vector<8x512xbf16>, vector<512x256xbf16>, vector<8x256xf32> -> vector<8x256xf32>
    %7 = arith.addf %3, %6 : vector<8x256xf32>
    %c0_6 = arith.constant 0 : index
    %c0_7 = arith.constant 0 : index
    %8 = vector.load %arg7[%c0_6, %c0_7] : memref<8x256xf32, #tpu.memory_space<vmem>>, vector<8x256xf32>
    tpu.vector_store %arg7[%c0_6, %c0_7], %7 {strides = array<i32>} : memref<8x256xf32, #tpu.memory_space<vmem>>, vector<8x256xf32>,
    %c8_i32 = arith.constant 8 : i32
    %9 = arith.cmpi eq, %arg2, %c8_i32 : i32
    %10 = arith.extui %9 : i1 to i32
    %c0_i32_8 = arith.constant 0 : i32
    %11 = arith.cmpi ne, %10, %c0_i32_8 : i32
    scf.if %11 {
      %c0_9 = arith.constant 0 : index
      %c0_10 = arith.constant 0 : index
      %12 = vector.load %arg7[%c0_9, %c0_10] : memref<8x256xf32, #tpu.memory_space<vmem>>, vector<8x256xf32>
      %c0_11 = arith.constant 0 : index
      %c0_12 = arith.constant 0 : index
      %13 = vector.load %arg5[%c0_11, %c0_12] : memref<1x256xf32, #tpu.memory_space<vmem>>, vector<1x256xf32>
      %14 = vector.broadcast %13 : vector<1x256xf32> to vector<8x256xf32>
      %15 = arith.addf %12, %14 : vector<8x256xf32>
      %cst_13 = arith.constant 0.000000e+00 : f32
      %16 = vector.broadcast %cst_13 : f32 to vector<8x256xf32>
      %17 = arith.maximumf %15, %16 : vector<8x256xf32>
      %c0_14 = arith.constant 0 : index
      %c0_15 = arith.constant 0 : index
      %18 = vector.load %arg6[%c0_14, %c0_15] : memref<8x256xf32, #tpu.memory_space<vmem>>, vector<8x256xf32>
      tpu.vector_store %arg6[%c0_14, %c0_15], %17 {strides = array<i32>} : memref<8x256xf32, #tpu.memory_space<vmem>>, vector<8x256xf32>,
    } else {
    }
    return
  }
  func.func @transform_0(%arg0: i32, %arg1: i32, %arg2: i32) -> (i32, i32) {
    %c0_i32 = arith.constant 0 : i32
    return %arg0, %arg2 : i32, i32
  }
  func.func @transform_1(%arg0: i32, %arg1: i32, %arg2: i32) -> (i32, i32) {
    %c0_i32 = arith.constant 0 : i32
    return %arg2, %arg1 : i32, i32
  }
  func.func @transform_2(%arg0: i32, %arg1: i32, %arg2: i32) -> (i32, i32) {
    %c0_i32 = arith.constant 0 : i32
    %c0_i32_0 = arith.constant 0 : i32
    return %c0_i32, %arg1 : i32, i32
  }
  func.func @transform_3(%arg0: i32, %arg1: i32, %arg2: i32) -> (i32, i32) {
    %c0_i32 = arith.constant 0 : i32
    return %arg0, %arg1 : i32, i32
  }
}

module attributes {stable_mosaic.version = 11 : i64} {
  func.func @_matmul_kernel(%arg0: i32, %arg1: i32, %arg2: i32, %arg3: memref<8x512xbf16, #tpu.memory_space<vmem>>, %arg4: memref<512x256xbf16, #tpu.memory_space<vmem>>, %arg5: memref<1x256xf32, #tpu.memory_space<vmem>>, %arg6: memref<8x256xf32, #tpu.memory_space<vmem>>, %arg7: memref<8x256xf32, #tpu.memory_space<vmem>>) attributes {dimension_semantics = [#tpu.dimension_semantics<parallel>, #tpu.dimension_semantics<parallel>, #tpu.dimension_semantics<arbitrary>], iteration_bounds = array<i64: 1, 1, 1>, scalar_prefetch = 0 : i64, scratch_operands = 1 : i64, tpu.core_type = #tpu.core_type<tc>, window_params = [{transform_indices = @transform_0, window_bounds = array<i64: 8, 512>}, {transform_indices = @transform_1, window_bounds = array<i64: 512, 256>}, {transform_indices = @transform_2, window_bounds = array<i64: 1, 256>}, {transform_indices = @transform_3, window_bounds = array<i64: 8, 256>}]} {
    %c0_i32 = arith.constant 0 : i32
    %0 = arith.cmpi eq, %arg2, %c0_i32 : i32
    %1 = arith.extui %0 : i1 to i32
    %c0_i32_0 = arith.constant 0 : i32
    %2 = arith.cmpi ne, %1, %c0_i32_0 : i32
    scf.if %2 {
      %cst_10 = arith.constant 0.000000e+00 : f32
      %12 = vector.broadcast %cst_10 : f32 to vector<8x256xf32>
      %c0_11 = arith.constant 0 : index
      %c0_12 = arith.constant 0 : index
      %13 = vector.load %arg7[%c0_11, %c0_12] : memref<8x256xf32, #tpu.memory_space<vmem>>, vector<8x256xf32>
      tpu.vector_store %arg7[%c0_11, %c0_12], %12 {strides = array<i32>} : memref<8x256xf32, #tpu.memory_space<vmem>>, vector<8x256xf32>,
    } else {
    }
    %c0 = arith.constant 0 : index
    %c0_1 = arith.constant 0 : index
    %3 = vector.load %arg7[%c0, %c0_1] : memref<8x256xf32, #tpu.memory_space<vmem>>, vector<8x256xf32>
    %c0_2 = arith.constant 0 : index
    %c0_3 = arith.constant 0 : index
    %4 = vector.load %arg3[%c0_2, %c0_3] : memref<8x512xbf16, #tpu.memory_space<vmem>>, vector<8x512xbf16>
    %c0_4 = arith.constant 0 : index
    %c0_5 = arith.constant 0 : index
    %5 = vector.load %arg4[%c0_4, %c0_5] : memref<512x256xbf16, #tpu.memory_space<vmem>>, vector<512x256xbf16>
    %cst = arith.constant dense<0.000000e+00> : vector<8x256xf32>
    %6 = tpu.matmul %4, %5, %cst {dimension_numbers = #tpu.dot_dimension_numbers<[1], [0], [0], [1], [0, 0, 1, 1], [], []>} : vector<8x512xbf16>, vector<512x256xbf16>, vector<8x256xf32> -> vector<8x256xf32>
    %7 = arith.addf %3, %6 : vector<8x256xf32>
    %c0_6 = arith.constant 0 : index
    %c0_7 = arith.constant 0 : index
    %8 = vector.load %arg7[%c0_6, %c0_7] : memref<8x256xf32, #tpu.memory_space<vmem>>, vector<8x256xf32>
    tpu.vector_store %arg7[%c0_6, %c0_7], %7 {strides = array<i32>} : memref<8x256xf32, #tpu.memory_space<vmem>>, vector<8x256xf32>,
    %c0_i32_8 = arith.constant 0 : i32
    %9 = arith.cmpi eq, %arg2, %c0_i32_8 : i32
    %10 = arith.extui %9 : i1 to i32
    %c0_i32_9 = arith.constant 0 : i32
    %11 = arith.cmpi ne, %10, %c0_i32_9 : i32
    scf.if %11 {
      %c0_10 = arith.constant 0 : index
      %c0_11 = arith.constant 0 : index
      %12 = vector.load %arg7[%c0_10, %c0_11] : memref<8x256xf32, #tpu.memory_space<vmem>>, vector<8x256xf32>
      %c0_12 = arith.constant 0 : index
      %c0_13 = arith.constant 0 : index
      %13 = vector.load %arg5[%c0_12, %c0_13] : memref<1x256xf32, #tpu.memory_space<vmem>>, vector<1x256xf32>
      %14 = vector.broadcast %13 : vector<1x256xf32> to vector<8x256xf32>
      %15 = arith.addf %12, %14 : vector<8x256xf32>
      %cst_14 = arith.constant 0.000000e+00 : f32
      %16 = vector.broadcast %cst_14 : f32 to vector<8x256xf32>
      %17 = arith.maximumf %15, %16 : vector<8x256xf32>
      %c0_15 = arith.constant 0 : index
      %c0_16 = arith.constant 0 : index
      %18 = vector.load %arg6[%c0_15, %c0_16] : memref<8x256xf32, #tpu.memory_space<vmem>>, vector<8x256xf32>
      tpu.vector_store %arg6[%c0_15, %c0_16], %17 {strides = array<i32>} : memref<8x256xf32, #tpu.memory_space<vmem>>, vector<8x256xf32>,
    } else {
    }
    return
  }
  func.func @transform_0(%arg0: i32, %arg1: i32, %arg2: i32) -> (i32, i32) {
    %c0_i32 = arith.constant 0 : i32
    return %arg0, %arg2 : i32, i32
  }
  func.func @transform_1(%arg0: i32, %arg1: i32, %arg2: i32) -> (i32, i32) {
    %c0_i32 = arith.constant 0 : i32
    return %arg2, %arg1 : i32, i32
  }
  func.func @transform_2(%arg0: i32, %arg1: i32, %arg2: i32) -> (i32, i32) {
    %c0_i32 = arith.constant 0 : i32
    %c0_i32_0 = arith.constant 0 : i32
    return %c0_i32, %arg1 : i32, i32
  }
  func.func @transform_3(%arg0: i32, %arg1: i32, %arg2: i32) -> (i32, i32) {
    %c0_i32 = arith.constant 0 : i32
    return %arg0, %arg1 : i32, i32
  }
}

module attributes {stable_mosaic.version = 11 : i64} {
  func.func @_matmul_kernel(%arg0: i32, %arg1: i32, %arg2: i32, %arg3: memref<8x512xbf16, #tpu.memory_space<vmem>>, %arg4: memref<512x256xbf16, #tpu.memory_space<vmem>>, %arg5: memref<1x256xf32, #tpu.memory_space<vmem>>, %arg6: memref<8x256xf32, #tpu.memory_space<vmem>>, %arg7: memref<8x256xf32, #tpu.memory_space<vmem>>) attributes {dimension_semantics = [#tpu.dimension_semantics<parallel>, #tpu.dimension_semantics<parallel>, #tpu.dimension_semantics<arbitrary>], iteration_bounds = array<i64: 1, 1, 1>, scalar_prefetch = 0 : i64, scratch_operands = 1 : i64, tpu.core_type = #tpu.core_type<tc>, window_params = [{transform_indices = @transform_0, window_bounds = array<i64: 8, 512>}, {transform_indices = @transform_1, window_bounds = array<i64: 512, 256>}, {transform_indices = @transform_2, window_bounds = array<i64: 1, 256>}, {transform_indices = @transform_3, window_bounds = array<i64: 8, 256>}]} {
    %c0_i32 = arith.constant 0 : i32
    %0 = arith.cmpi eq, %arg2, %c0_i32 : i32
    %1 = arith.extui %0 : i1 to i32
    %c0_i32_0 = arith.constant 0 : i32
    %2 = arith.cmpi ne, %1, %c0_i32_0 : i32
    scf.if %2 {
      %cst_10 = arith.constant 0.000000e+00 : f32
      %12 = vector.broadcast %cst_10 : f32 to vector<8x256xf32>
      %c0_11 = arith.constant 0 : index
      %c0_12 = arith.constant 0 : index
      %13 = vector.load %arg7[%c0_11, %c0_12] : memref<8x256xf32, #tpu.memory_space<vmem>>, vector<8x256xf32>
      tpu.vector_store %arg7[%c0_11, %c0_12], %12 {strides = array<i32>} : memref<8x256xf32, #tpu.memory_space<vmem>>, vector<8x256xf32>,
    } else {
    }
    %c0 = arith.constant 0 : index
    %c0_1 = arith.constant 0 : index
    %3 = vector.load %arg7[%c0, %c0_1] : memref<8x256xf32, #tpu.memory_space<vmem>>, vector<8x256xf32>
    %c0_2 = arith.constant 0 : index
    %c0_3 = arith.constant 0 : index
    %4 = vector.load %arg3[%c0_2, %c0_3] : memref<8x512xbf16, #tpu.memory_space<vmem>>, vector<8x512xbf16>
    %c0_4 = arith.constant 0 : index
    %c0_5 = arith.constant 0 : index
    %5 = vector.load %arg4[%c0_4, %c0_5] : memref<512x256xbf16, #tpu.memory_space<vmem>>, vector<512x256xbf16>
    %cst = arith.constant dense<0.000000e+00> : vector<8x256xf32>
    %6 = tpu.matmul %4, %5, %cst {dimension_numbers = #tpu.dot_dimension_numbers<[1], [0], [0], [1], [0, 0, 1, 1], [], []>} : vector<8x512xbf16>, vector<512x256xbf16>, vector<8x256xf32> -> vector<8x256xf32>
    %7 = arith.addf %3, %6 : vector<8x256xf32>
    %c0_6 = arith.constant 0 : index
    %c0_7 = arith.constant 0 : index
    %8 = vector.load %arg7[%c0_6, %c0_7] : memref<8x256xf32, #tpu.memory_space<vmem>>, vector<8x256xf32>
    tpu.vector_store %arg7[%c0_6, %c0_7], %7 {strides = array<i32>} : memref<8x256xf32, #tpu.memory_space<vmem>>, vector<8x256xf32>,
    %c0_i32_8 = arith.constant 0 : i32
    %9 = arith.cmpi eq, %arg2, %c0_i32_8 : i32
    %10 = arith.extui %9 : i1 to i32
    %c0_i32_9 = arith.constant 0 : i32
    %11 = arith.cmpi ne, %10, %c0_i32_9 : i32
    scf.if %11 {
      %c0_10 = arith.constant 0 : index
      %c0_11 = arith.constant 0 : index
      %12 = vector.load %arg7[%c0_10, %c0_11] : memref<8x256xf32, #tpu.memory_space<vmem>>, vector<8x256xf32>
      %c0_12 = arith.constant 0 : index
      %c0_13 = arith.constant 0 : index
      %13 = vector.load %arg5[%c0_12, %c0_13] : memref<1x256xf32, #tpu.memory_space<vmem>>, vector<1x256xf32>
      %14 = vector.broadcast %13 : vector<1x256xf32> to vector<8x256xf32>
      %15 = arith.addf %12, %14 : vector<8x256xf32>
      %cst_14 = arith.constant 0.000000e+00 : f32
      %16 = vector.broadcast %cst_14 : f32 to vector<8x256xf32>
      %17 = arith.maximumf %15, %16 : vector<8x256xf32>
      %c0_15 = arith.constant 0 : index
      %c0_16 = arith.constant 0 : index
      %18 = vector.load %arg6[%c0_15, %c0_16] : memref<8x256xf32, #tpu.memory_space<vmem>>, vector<8x256xf32>
      tpu.vector_store %arg6[%c0_15, %c0_16], %17 {strides = array<i32>} : memref<8x256xf32, #tpu.memory_space<vmem>>, vector<8x256xf32>,
    } else {
    }
    return
  }
  func.func @transform_0(%arg0: i32, %arg1: i32, %arg2: i32) -> (i32, i32) {
    %c0_i32 = arith.constant 0 : i32
    return %arg0, %arg2 : i32, i32
  }
  func.func @transform_1(%arg0: i32, %arg1: i32, %arg2: i32) -> (i32, i32) {
    %c0_i32 = arith.constant 0 : i32
    return %arg2, %arg1 : i32, i32
  }
  func.func @transform_2(%arg0: i32, %arg1: i32, %arg2: i32) -> (i32, i32) {
    %c0_i32 = arith.constant 0 : i32
    %c0_i32_0 = arith.constant 0 : i32
    return %c0_i32, %arg1 : i32, i32
  }
  func.func @transform_3(%arg0: i32, %arg1: i32, %arg2: i32) -> (i32, i32) {
    %c0_i32 = arith.constant 0 : i32
    return %arg0, %arg1 : i32, i32
  }
}

module attributes {stable_mosaic.version = 11 : i64} {
  func.func @_matmul_kernel(%arg0: i32, %arg1: i32, %arg2: i32, %arg3: memref<8x256xbf16, #tpu.memory_space<vmem>>, %arg4: memref<256x256xbf16, #tpu.memory_space<vmem>>, %arg5: memref<1x256xf32, #tpu.memory_space<vmem>>, %arg6: memref<8x256xf32, #tpu.memory_space<vmem>>, %arg7: memref<8x256xf32, #tpu.memory_space<vmem>>) attributes {dimension_semantics = [#tpu.dimension_semantics<parallel>, #tpu.dimension_semantics<parallel>, #tpu.dimension_semantics<arbitrary>], iteration_bounds = array<i64: 1, 1, 5>, scalar_prefetch = 0 : i64, scratch_operands = 1 : i64, tpu.core_type = #tpu.core_type<tc>, window_params = [{transform_indices = @transform_0, window_bounds = array<i64: 8, 256>}, {transform_indices = @transform_1, window_bounds = array<i64: 256, 256>}, {transform_indices = @transform_2, window_bounds = array<i64: 1, 256>}, {transform_indices = @transform_3, window_bounds = array<i64: 8, 256>}]} {
    %c0_i32 = arith.constant 0 : i32
    %0 = arith.cmpi eq, %arg2, %c0_i32 : i32
    %1 = arith.extui %0 : i1 to i32
    %c0_i32_0 = arith.constant 0 : i32
    %2 = arith.cmpi ne, %1, %c0_i32_0 : i32
    scf.if %2 {
      %cst_9 = arith.constant 0.000000e+00 : f32
      %12 = vector.broadcast %cst_9 : f32 to vector<8x256xf32>
      %c0_10 = arith.constant 0 : index
      %c0_11 = arith.constant 0 : index
      %13 = vector.load %arg7[%c0_10, %c0_11] : memref<8x256xf32, #tpu.memory_space<vmem>>, vector<8x256xf32>
      tpu.vector_store %arg7[%c0_10, %c0_11], %12 {strides = array<i32>} : memref<8x256xf32, #tpu.memory_space<vmem>>, vector<8x256xf32>,
    } else {
    }
    %c0 = arith.constant 0 : index
    %c0_1 = arith.constant 0 : index
    %3 = vector.load %arg7[%c0, %c0_1] : memref<8x256xf32, #tpu.memory_space<vmem>>, vector<8x256xf32>
    %c0_2 = arith.constant 0 : index
    %c0_3 = arith.constant 0 : index
    %4 = vector.load %arg3[%c0_2, %c0_3] : memref<8x256xbf16, #tpu.memory_space<vmem>>, vector<8x256xbf16>
    %c0_4 = arith.constant 0 : index
    %c0_5 = arith.constant 0 : index
    %5 = vector.load %arg4[%c0_4, %c0_5] : memref<256x256xbf16, #tpu.memory_space<vmem>>, vector<256x256xbf16>
    %cst = arith.constant dense<0.000000e+00> : vector<8x256xf32>
    %6 = tpu.matmul %4, %5, %cst {dimension_numbers = #tpu.dot_dimension_numbers<[1], [0], [0], [1], [0, 0, 1, 1], [], []>} : vector<8x256xbf16>, vector<256x256xbf16>, vector<8x256xf32> -> vector<8x256xf32>
    %7 = arith.addf %3, %6 : vector<8x256xf32>
    %c0_6 = arith.constant 0 : index
    %c0_7 = arith.constant 0 : index
    %8 = vector.load %arg7[%c0_6, %c0_7] : memref<8x256xf32, #tpu.memory_space<vmem>>, vector<8x256xf32>
    tpu.vector_store %arg7[%c0_6, %c0_7], %7 {strides = array<i32>} : memref<8x256xf32, #tpu.memory_space<vmem>>, vector<8x256xf32>,
    %c4_i32 = arith.constant 4 : i32
    %9 = arith.cmpi eq, %arg2, %c4_i32 : i32
    %10 = arith.extui %9 : i1 to i32
    %c0_i32_8 = arith.constant 0 : i32
    %11 = arith.cmpi ne, %10, %c0_i32_8 : i32
    scf.if %11 {
      %c0_9 = arith.constant 0 : index
      %c0_10 = arith.constant 0 : index
      %12 = vector.load %arg7[%c0_9, %c0_10] : memref<8x256xf32, #tpu.memory_space<vmem>>, vector<8x256xf32>
      %c0_11 = arith.constant 0 : index
      %c0_12 = arith.constant 0 : index
      %13 = vector.load %arg5[%c0_11, %c0_12] : memref<1x256xf32, #tpu.memory_space<vmem>>, vector<1x256xf32>
      %14 = vector.broadcast %13 : vector<1x256xf32> to vector<8x256xf32>
      %15 = arith.addf %12, %14 : vector<8x256xf32>
      %cst_13 = arith.constant 0.000000e+00 : f32
      %16 = vector.broadcast %cst_13 : f32 to vector<8x256xf32>
      %17 = arith.maximumf %15, %16 : vector<8x256xf32>
      %c0_14 = arith.constant 0 : index
      %c0_15 = arith.constant 0 : index
      %18 = vector.load %arg6[%c0_14, %c0_15] : memref<8x256xf32, #tpu.memory_space<vmem>>, vector<8x256xf32>
      tpu.vector_store %arg6[%c0_14, %c0_15], %17 {strides = array<i32>} : memref<8x256xf32, #tpu.memory_space<vmem>>, vector<8x256xf32>,
    } else {
    }
    return
  }
  func.func @transform_0(%arg0: i32, %arg1: i32, %arg2: i32) -> (i32, i32) {
    %c0_i32 = arith.constant 0 : i32
    return %arg0, %arg2 : i32, i32
  }
  func.func @transform_1(%arg0: i32, %arg1: i32, %arg2: i32) -> (i32, i32) {
    %c0_i32 = arith.constant 0 : i32
    return %arg2, %arg1 : i32, i32
  }
  func.func @transform_2(%arg0: i32, %arg1: i32, %arg2: i32) -> (i32, i32) {
    %c0_i32 = arith.constant 0 : i32
    %c0_i32_0 = arith.constant 0 : i32
    return %c0_i32, %arg1 : i32, i32
  }
  func.func @transform_3(%arg0: i32, %arg1: i32, %arg2: i32) -> (i32, i32) {
    %c0_i32 = arith.constant 0 : i32
    return %arg0, %arg1 : i32, i32
  }
}

</mosaic_0001>

<bundles_post_ra>
// kernel: forward.43
= control target key start
LH: loop header
LB: loop body
LE: loop exit
PB: predicated region body
PF: predicated region fallthrough
CT: control target
= control target key end

     0   :  { %s820_s1 = inlined_call_operand.vmem [shape: bf16[256,128], index: 1, kind: input, shape index: {}]   ;;  %s821_s0 = inlined_call_operand.vmem [shape: bf16[128,256], index: 0, kind: input, shape index: {}]   ;;  %s822_s2 = inlined_call_operand.vmem [shape: f32[1,128], index: 2, kind: input, shape index: {}]   ;;  %s823_s3 = inlined_call_operand.vmem [shape: f32[128,128], index: 3, kind: output, shape index: {}]  }
   0x1   :  { %v595_v0 = vld [vmem:[%s820_s1 + $0x40] sm:$0xff]   ;;  %v597_v2 = vld [vmem:[%s820_s1 + $0x48] sm:$0xff]   ;;  %v599_v4 = vld [vmem:[%s820_s1 + $0x50] sm:$0xff]  }
   0x2   :  { %v596_v1 = vld [vmem:[%s820_s1] sm:$0xff]   ;;  %515 = vmatprep.subr.bf16.mxu0 %v595_v0  ;;  %579 = vmatprep.subr.bf16.mxu1 %v595_v0  ;;  %v598_v3 = vld [vmem:[%s820_s1 + $0x8] sm:$0xff]   ;;  %v600_v5 = vld [vmem:[%s820_s1 + $0x10] sm:$0xff]  }
   0x3   :  { %516 = vmatpush3.bf16.msra.mxu0 %v596_v1  ;;  %587 = vmatpush3.bf16.msra.mxu1 %v596_v1  ;;  %v601_v6 = vld [vmem:[%s820_s1 + $0x58] sm:$0xff]   ;;  %v603_v8 = vld [vmem:[%s820_s1 + $0x60] sm:$0xff]   ;;  %v605_v10 = vld [vmem:[%s820_s1 + $0x68] sm:$0xff]  }
   0x4   :  { %517 = vmatprep.subr.bf16.mxu0 %v597_v2  ;;  %580 = vmatprep.subr.bf16.mxu1 %v597_v2  ;;  %v602_v7 = vld [vmem:[%s820_s1 + $0x18] sm:$0xff]   ;;  %v604_v9 = vld [vmem:[%s820_s1 + $0x20] sm:$0xff]   ;;  %v606_v13 = vld [vmem:[%s820_s1 + $0x28] sm:$0xff]  }
   0x5   :  { %v613_v11 = vld [vmem:[%s821_s0 + $0x4] ss:$8 sps:$4 sm:$0xff]   ;;  %v607_v14 = vld [vmem:[%s820_s1 + $0x70] sm:$0xff]   ;;  %v609_v16 = vld [vmem:[%s820_s1 + $0x78] sm:$0xff]  }
   0x6   :  { %v616_v12 = vld [vmem:[%s821_s0 + $0x44] ss:$8 sps:$4 sm:$0xff]   ;;  %307 = vmatprep.mubr.bf16.mxu0 %v613_v11  ;;  %v608_v15 = vld [vmem:[%s820_s1 + $0x30] sm:$0xff]   ;;  %v610_v17 = vld [vmem:[%s820_s1 + $0x38] sm:$0xff]  }
   0x7   :  { %518 = vmatpush3.bf16.msra.mxu0 %v598_v3  ;;  %588 = vmatpush3.bf16.msra.mxu1 %v598_v3  ;;  %v611_v18 = vld [vmem:[%s821_s0] ss:$8 sps:$4 sm:$0xff]   ;;  %v617_v20 = vld [vmem:[%s821_s0 + $0x14] ss:$8 sps:$4 sm:$0xff]   ;;  %v621_v22 = vld [vmem:[%s821_s0 + $0x10] ss:$8 sps:$4 sm:$0xff]  }
   0x8   :  { %519 = vmatprep.subr.bf16.mxu0 %v599_v4  ;;  %581 = vmatprep.subr.bf16.mxu1 %v599_v4  ;;  %v614_v19 = vld [vmem:[%s821_s0 + $0x40] ss:$8 sps:$4 sm:$0xff]   ;;  %v619_v21 = vld [vmem:[%s821_s0 + $0x54] ss:$8 sps:$4 sm:$0xff]   ;;  %v622_v23 = vld [vmem:[%s821_s0 + $0x50] ss:$8 sps:$4 sm:$0xff]  }
   0x9   :  { %339 = vmatprep.mubr.bf16.mxu1 %v616_v12  ;;  %v623_v24 = vld [vmem:[%s821_s0 + $0x24] ss:$8 sps:$4 sm:$0xff]   ;;  %v627_v26 = vld [vmem:[%s821_s0 + $0x20] ss:$8 sps:$4 sm:$0xff]   ;;  %v629_v28 = vld [vmem:[%s821_s0 + $0x34] ss:$8 sps:$4 sm:$0xff]  }
   0xa   :  { %v625_v25 = vld [vmem:[%s821_s0 + $0x64] ss:$8 sps:$4 sm:$0xff]   ;;  %v628_v27 = vld [vmem:[%s821_s0 + $0x60] ss:$8 sps:$4 sm:$0xff]   ;;  %v631_v29 = vld [vmem:[%s821_s0 + $0x74] ss:$8 sps:$4 sm:$0xff]  }
   0xb   :  { %520 = vmatpush3.bf16.msra.mxu0 %v600_v5  ;;  %589 = vmatpush3.bf16.msra.mxu1 %v600_v5  ;;  %v633_v30 = vld [vmem:[%s821_s0 + $0x30] ss:$8 sps:$4 sm:$0xff]   ;;  %v754_v35 = vld [vmem:[%s822_s2] ss:$0 sm:$0xff] }
   0xc   :  { %521 = vmatprep.subr.bf16.mxu0 %v601_v6  ;;  %582 = vmatprep.subr.bf16.mxu1 %v601_v6  ;;  %v634_v31 = vld [vmem:[%s821_s0 + $0x70] ss:$8 sps:$4 sm:$0xff]  }
   0xf   :  { %522 = vmatpush3.bf16.msra.mxu0 %v602_v7  ;;  %590 = vmatpush3.bf16.msra.mxu1 %v602_v7 }
  0x10   :  { %523 = vmatprep.subr.bf16.mxu0 %v603_v8  ;;  %583 = vmatprep.subr.bf16.mxu1 %v603_v8 }
  0x13   :  { %524 = vmatpush3.bf16.msra.mxu0 %v604_v9  ;;  %591 = vmatpush3.bf16.msra.mxu1 %v604_v9 }
  0x14   :  { %525 = vmatprep.subr.bf16.mxu0 %v605_v10  ;;  %584 = vmatprep.subr.bf16.mxu1 %v605_v10 }
  0x17   :  { %526 = vmatpush3.bf16.msra.mxu0 %v606_v13  ;;  %592 = vmatpush3.bf16.msra.mxu1 %v606_v13 }
  0x18   :  { %527 = vmatprep.subr.bf16.mxu0 %v607_v14  ;;  %585 = vmatprep.subr.bf16.mxu1 %v607_v14 }
  0x1b   :  { %528 = vmatpush3.bf16.msra.mxu0 %v608_v15  ;;  %593 = vmatpush3.bf16.msra.mxu1 %v608_v15 }
  0x1c   :  { %529 = vmatprep.subr.bf16.mxu0 %v609_v16  ;;  %586 = vmatprep.subr.bf16.mxu1 %v609_v16 }
  0x1f   :  { %530 = vmatpush3.bf16.msra.mxu0 %v610_v17  ;;  %594 = vmatpush3.bf16.msra.mxu1 %v610_v17 }
  0x22   :  { %308 = vmatmul.mubr.bf16.vlgmr.msra.gmra.mrb[0].mxu0 %v611_v18  ;;  %340 = vmatmul.mubr.bf16.vlgmr.msra.gmra.mrb[0].mxu1 %v614_v19 }
  0x23   :  { %315 = vmatprep.mubr.bf16.mxu0 %v617_v20  ;;  %347 = vmatprep.mubr.bf16.mxu1 %v619_v21 }
  0x2a   :  { %316 = vmatmul.mubr.bf16.gmra.mrb[4].mxu0 %v621_v22  ;;  %348 = vmatmul.mubr.bf16.gmra.mrb[4].mxu1 %v622_v23 }
  0x2b   :  { %323 = vmatprep.mubr.bf16.mxu0 %v623_v24  ;;  %355 = vmatprep.mubr.bf16.mxu1 %v625_v25 }
  0x32   :  { %324 = vmatmul.mubr.bf16.gmra.mrb[8].mxu0 %v627_v26  ;;  %356 = vmatmul.mubr.bf16.gmra.mrb[8].mxu1 %v628_v27 }
  0x33   :  { %331 = vmatprep.mubr.bf16.mxu0 %v629_v28  ;;  %363 = vmatprep.mubr.bf16.mxu1 %v631_v29 }
  0x3a   :  { %332 = vmatmul.mubr.bf16.gmra.mrb[12].mxu0 %v633_v30  ;;  %364 = vmatmul.mubr.bf16.gmra.mrb[12].mxu1 %v634_v31 }
  0xf5   :  { %v531_v32 = vpop.f32.mrb[0].mxu0  ;;  %v555_v33 = vpop.f32.mrb[0].mxu1 }
  0xf6   :  { %v532_v34 = vpop.f32.mrb[1].mxu0  ;;  %v556_v36 = vpop.f32.mrb[1].mxu1 }
  0xf7   :  { %v533_v37 = vadd.f32 %v532_v34, %v531_v32  ;;  %v557_v38 = vadd.f32 %v556_v36, %v555_v33  ;;  %v534_v39 = vpop.f32.mrb[2].mxu0  ;;  %v558_v40 = vpop.f32.mrb[2].mxu1 }
  0xf8   :  { %v535_v41 = vpop.f32.mrb[3].mxu0  ;;  %v559_v42 = vpop.f32.mrb[3].mxu1 }
  0xf9   :  { %v430_v43 = vadd.f32 %v533_v37, %v754_v35  ;;  %v438_v44 = vadd.f32 %v557_v38, %v754_v35  ;;  %v536_v45 = vadd.f32 %v535_v41, %v534_v39  ;;  %v560_v46 = vadd.f32 %v559_v42, %v558_v40 }
  0xfb   :  { %v446_v47 = vmax.f32 %v430_v43, 0.0  ;;  %v454_v48 = vmax.f32 %v438_v44, 0.0  ;;  %v431_v49 = vadd.f32 %v536_v45, %v754_v35  ;;  %v439_v50 = vadd.f32 %v560_v46, %v754_v35 }
  0xfd   :  { %462 = vst [vmem:[%s823_s3] sm:$0xff] %v446_v47  ;;  %470 = vst [vmem:[%s823_s3 + $0x40] sm:$0xff] %v454_v48  ;;  %v447_v51 = vmax.f32 %v431_v49, 0.0  ;;  %v455_v52 = vmax.f32 %v439_v50, 0.0  ;;  %v537_v53 = vpop.f32.mrb[4].mxu0  ;;  %v561_v54 = vpop.f32.mrb[4].mxu1 }
  0xfe   :  { %v538_v55 = vpop.f32.mrb[5].mxu0  ;;  %v562_v56 = vpop.f32.mrb[5].mxu1 }
  0xff   :  { %463 = vst [vmem:[%s823_s3 + $0x8] sm:$0xff] %v447_v51  ;;  %471 = vst [vmem:[%s823_s3 + $0x48] sm:$0xff] %v455_v52  ;;  %v539_v57 = vadd.f32 %v538_v55, %v537_v53  ;;  %v563_v58 = vadd.f32 %v562_v56, %v561_v54  ;;  %v540_v59 = vpop.f32.mrb[6].mxu0  ;;  %v564_v60 = vpop.f32.mrb[6].mxu1 }
 0x100   :  { %v541_v61 = vpop.f32.mrb[7].mxu0  ;;  %v565_v62 = vpop.f32.mrb[7].mxu1 }
 0x101   :  { %v432_v63 = vadd.f32 %v539_v57, %v754_v35  ;;  %v440_v0 = vadd.f32 %v563_v58, %v754_v35  ;;  %v542_v1 = vadd.f32 %v541_v61, %v540_v59  ;;  %v566_v2 = vadd.f32 %v565_v62, %v564_v60 }
 0x103   :  { %v448_v3 = vmax.f32 %v432_v63, 0.0  ;;  %v456_v4 = vmax.f32 %v440_v0, 0.0  ;;  %v433_v5 = vadd.f32 %v542_v1, %v754_v35  ;;  %v441_v6 = vadd.f32 %v566_v2, %v754_v35 }
 0x105   :  { %464 = vst [vmem:[%s823_s3 + $0x10] sm:$0xff] %v448_v3  ;;  %472 = vst [vmem:[%s823_s3 + $0x50] sm:$0xff] %v456_v4  ;;  %v449_v7 = vmax.f32 %v433_v5, 0.0  ;;  %v457_v8 = vmax.f32 %v441_v6, 0.0  ;;  %v543_v9 = vpop.f32.mrb[8].mxu0  ;;  %v567_v10 = vpop.f32.mrb[8].mxu1 }
 0x106   :  { %v544_v11 = vpop.f32.mrb[9].mxu0  ;;  %v568_v12 = vpop.f32.mrb[9].mxu1 }
 0x107   :  { %465 = vst [vmem:[%s823_s3 + $0x18] sm:$0xff] %v449_v7  ;;  %473 = vst [vmem:[%s823_s3 + $0x58] sm:$0xff] %v457_v8  ;;  %v545_v13 = vadd.f32 %v544_v11, %v543_v9  ;;  %v569_v14 = vadd.f32 %v568_v12, %v567_v10  ;;  %v546_v15 = vpop.f32.mrb[10].mxu0  ;;  %v570_v16 = vpop.f32.mrb[10].mxu1 }
 0x108   :  { %v547_v17 = vpop.f32.mrb[11].mxu0  ;;  %v571_v18 = vpop.f32.mrb[11].mxu1 }
 0x109   :  { %v434_v19 = vadd.f32 %v545_v13, %v754_v35  ;;  %v442_v20 = vadd.f32 %v569_v14, %v754_v35  ;;  %v548_v21 = vadd.f32 %v547_v17, %v546_v15  ;;  %v572_v22 = vadd.f32 %v571_v18, %v570_v16 }
 0x10b   :  { %v450_v23 = vmax.f32 %v434_v19, 0.0  ;;  %v458_v24 = vmax.f32 %v442_v20, 0.0  ;;  %v435_v25 = vadd.f32 %v548_v21, %v754_v35  ;;  %v443_v26 = vadd.f32 %v572_v22, %v754_v35 }
 0x10d   :  { %466 = vst [vmem:[%s823_s3 + $0x20] sm:$0xff] %v450_v23  ;;  %474 = vst [vmem:[%s823_s3 + $0x60] sm:$0xff] %v458_v24  ;;  %v451_v27 = vmax.f32 %v435_v25, 0.0  ;;  %v459_v28 = vmax.f32 %v443_v26, 0.0  ;;  %v549_v29 = vpop.f32.mrb[12].mxu0  ;;  %v573_v30 = vpop.f32.mrb[12].mxu1 }
 0x10e   :  { %v550_v31 = vpop.f32.mrb[13].mxu0  ;;  %v574_v32 = vpop.f32.mrb[13].mxu1 }
 0x10f   :  { %467 = vst [vmem:[%s823_s3 + $0x28] sm:$0xff] %v451_v27  ;;  %475 = vst [vmem:[%s823_s3 + $0x68] sm:$0xff] %v459_v28  ;;  %v551_v33 = vadd.f32 %v550_v31, %v549_v29  ;;  %v575_v34 = vadd.f32 %v574_v32, %v573_v30  ;;  %v552_v36 = vpop.f32.mrb[14].mxu0  ;;  %v576_v37 = vpop.f32.mrb[14].mxu1 }
 0x110   :  { %v553_v38 = vpop.f32.mrb[15].mxu0  ;;  %v577_v39 = vpop.f32.mrb[15].mxu1 }
 0x111   :  { %v436_v40 = vadd.f32 %v551_v33, %v754_v35  ;;  %v444_v41 = vadd.f32 %v575_v34, %v754_v35  ;;  %v554_v42 = vadd.f32 %v553_v38, %v552_v36  ;;  %v578_v43 = vadd.f32 %v577_v39, %v576_v37 }
 0x113   :  { %v452_v44 = vmax.f32 %v436_v40, 0.0  ;;  %v460_v45 = vmax.f32 %v444_v41, 0.0  ;;  %v437_v46 = vadd.f32 %v554_v42, %v754_v35  ;;  %v445_v47 = vadd.f32 %v578_v43, %v754_v35 }
 0x115   :  { %468 = vst [vmem:[%s823_s3 + $0x30] sm:$0xff] %v452_v44  ;;  %476 = vst [vmem:[%s823_s3 + $0x70] sm:$0xff] %v460_v45  ;;  %v453_v48 = vmax.f32 %v437_v46, 0.0  ;;  %v461_v49 = vmax.f32 %v445_v47, 0.0 }
 0x117   :  { %469 = vst [vmem:[%s823_s3 + $0x38] sm:$0xff] %v453_v48  ;;  %477 = vst [vmem:[%s823_s3 + $0x78] sm:$0xff] %v461_v49 }

// kernel: forward.44
= control target key start
LH: loop header
LB: loop body
LE: loop exit
PB: predicated region body
PF: predicated region fallthrough
CT: control target
= control target key end

     0   :  { %s761_s12 = smov 0   ;;  %s763_s13 = smov 0   ;;  %s860_s0 = inlined_call_operand.vmem [shape: bf16[32,640], index: 0, kind: input, shape index: {}]   ;;  %s861_s1 = inlined_call_operand.vmem [shape: bf16[640,128], index: 1, kind: input, shape index: {}]   ;;  %s862_s2 = inlined_call_operand.vmem [shape: f32[1,128], index: 2, kind: input, shape index: {}]   ;;  %s863_s3 = inlined_call_operand.vmem [shape: f32[32,128], index: 3, kind: output, shape index: {}]  }
   0x1   :  { %s765_s14 = smov 0   ;;  %s767_s15 = smov 0  }
   0x2   :  { %s769_s16 = smov 0  }
   0x3 LB: > { %s25_s17 = sadd.s32 1, %s734_s15  ;;  %p48_p1 = scmp.ne.s32.totalorder %s726_s13, %s722_s12  ;;  %s738_s16 = sphi %s769_s16, %s13_s16   ;;  %s734_s15 = sphi %s767_s15, %s867_s15   ;;  %s730_s14 = sphi %s765_s14, %s866_s14   ;;  %s726_s13 = sphi %s763_s13, %s865_s13   ;;  %s722_s12 = sphi %s761_s12, %s864_s12  }
   0x4   : > { %p26_p0 = scmp.ge.s32.totalorder %s25_s17, 5  ;;  %p49_p2 = scmp.eq.s32.totalorder %s738_s16, 0 }
   0x5   : > { %s41_s19 = sadd.s32 1, %s726_s13  ;;  %p595_p5 = scmp.ge.s32.totalorder %s738_s16, 5 }
   0x6   : > { %s869_s17 = smov (%p26_p0, %s25_s17), 0  ;;  %p50_p3 = por %p49_p2, %p48_p1 }
   0x7   : > { %s37_s18 = ssub.s32 %s734_s15, %s869_s17  ;;  %162 = sbr.rel (%p595_p5) target bundleno = 21 (0x15), region = 20 }
   0x8   : > { %p39_p4 = scmp.eq.s32.totalorder %s37_s18, 0 }
   0xa   : > { %s796_s20 = scalar_select %p39_p4, %s726_s13, %s41_s19  }
   0xe   : > { %165 = sbr.rel (!%p50_p3) target bundleno = 21 (0x15), region = 24  ;;  %s167_s21 = sand.u32 (%p50_p3), 1, %s726_s13  }
   0xf   : > { %s597_s22 = sshll.u32 (%p50_p3), %s734_s15, 2  ;;  %s596_s23 = sshll.u32 (%p50_p3), %s167_s21, 4 }
  0x10   : > { %s174_s26 = scalar_lea.vmem (%p50_p3), %s860_s0, %s597_s22  ;;  %s169_s27 = scalar_lea.vmem (%p50_p3), [#allocation3], %s596_s23 }
  0x11   : > { %v190_v0 = vld [vmem:[%s174_s26] sm:$0xf] (%p50_p3)  ;;  %v192_v1 = vld [vmem:[%s174_s26 + $0x14] sm:$0xf] (%p50_p3)  ;;  %v194_v2 = vld [vmem:[%s174_s26 + $0x28] sm:$0xf] (%p50_p3) }
  0x12   : > { %191 = vst [vmem:[%s169_s27] sm:$0xf] (%p50_p3), %v190_v0  ;;  %193 = vst [vmem:[%s169_s27 + $0x4] sm:$0xf] (%p50_p3), %v192_v1  ;;  %v196_v3 = vld [vmem:[%s174_s26 + $0x3c] sm:$0xf] (%p50_p3) }
  0x13   : > { %195 = vst [vmem:[%s169_s27 + $0x8] sm:$0xf] (%p50_p3), %v194_v2  ;;  %197 = vst [vmem:[%s169_s27 + $0xc] sm:$0xf] (%p50_p3), %v196_v3 }
  0x15 PF: > { %p598_p6 = scmp.ge.s32.totalorder %s738_s16, 1  ;;  %p239_p7 = scmp.lt.s32.totalorder %s738_s16, 6 }
  0x17   : > { %p240_p8 = pnand %p598_p6, %p239_p7 }
  0x18   : > { %s246_s28 = sand.u32 (!%p240_p8), 1, %s722_s12   ;;  %s600_s29 = sshll.u32 (!%p240_p8), %s730_s14, 4 }
  0x19   : > { %243 = sbr.rel (%p240_p8) target bundleno = 302 (0x12e), region = 69  ;;  %s808_s30 = sshll.u32 (!%p240_p8), %s246_s28, 4 }
  0x1a   : > { %p285_p9 = scmp.lt.s32.totalorder (!%p240_p8), %s600_s29, 79  ;;  %s248_s8 = scalar_lea.vmem (!%p240_p8), [#allocation3], %s808_s30 }
  0x1b   : > { %p602_p10 = scmp.ne.s32.totalorder (!%p240_p8), %s730_s14, 0 }
  0x20   : > { %s871_s29 = smov (!%p285_p9, %s600_s29), 79  ;;  %309 = sbr.rel (%p602_p10) target bundleno = 39 (0x27), region = 77 }
  0x21   : > { %s601_s4 = sshll.u32 %s871_s29, 2  ;;  %v740_v4 = vmov (!%p602_p10), 0.0  }
  0x22   : > { %s813_s7 = scalar_lea.vmem %s861_s1, %s601_s4  ;;  %310 = vst [vmem:[#allocation2] sm:$0xff] (!%p602_p10), %v740_v4  ;;  %311 = vst [vmem:[#allocation2 + $0x8] sm:$0xff] (!%p602_p10), %v740_v4 }
  0x23   : > { %312 = vst [vmem:[#allocation2 + $0x10] sm:$0xff] (!%p602_p10), %v740_v4  ;;  %313 = vst [vmem:[#allocation2 + $0x18] sm:$0xff] (!%p602_p10), %v740_v4 }
  0x27 PF: > { %v690_v5 = vld [vmem:[%s813_s7] sm:$0xff]   ;;  %v691_v6 = vld [vmem:[%s813_s7 + $0x8] sm:$0xff]   ;;  %v692_v7 = vld [vmem:[%s813_s7 + $0x10] sm:$0xff]   ;;  %p613_p11 = scmp.ne.s32.totalorder %s730_s14, 4 }
  0x28   : > { %629 = vmatprep.subr.bf16.mxu0 %v690_v5  ;;  %v693_v8 = vld [vmem:[%s813_s7 + $0x18] sm:$0xff]   ;;  %v698_v9 = vld [vmem:[%s248_s8] sm:$0xff]   ;;  %v695_v11 = vld [vmem:[%s813_s7 + $0x28] sm:$0xff]  }
  0x29   : > { %630 = vmatpush3.bf16.msra.mxu0 %v690_v5  ;;  %645 = vmatprep.mubr.bf16.mxu0 %v698_v9  ;;  %v694_v10 = vld [vmem:[%s813_s7 + $0x20] sm:$0xff]   ;;  %v696_v12 = vld [vmem:[%s813_s7 + $0x30] sm:$0xff]   ;;  %v697_v13 = vld [vmem:[%s813_s7 + $0x38] sm:$0xff]  }
  0x2a   : > { %631 = vmatprep.subr.bf16.mxu0 %v691_v6  ;;  %v699_v14 = vld [vmem:[%s248_s8 + $0x8] sm:$0xff]   ;;  %v316_v15 = vld [vmem:[#allocation2 + $0x10] sm:$0xff]  ;;  %v314_v16 = vld [vmem:[#allocation2] sm:$0xff] }
  0x2b   : > { %v317_v18 = vld [vmem:[#allocation2 + $0x18] sm:$0xff]  ;;  %v315_v21 = vld [vmem:[#allocation2 + $0x8] sm:$0xff]  ;;  %v614_v28 = vld [vmem:[%s862_s2] ss:$0 sm:$0xff] (!%p613_p11) }
  0x2d   : > { %632 = vmatpush3.bf16.msra.mxu0 %v691_v6 }
  0x2e   : > { %633 = vmatprep.subr.bf16.mxu0 %v692_v7 }
  0x31   : > { %634 = vmatpush3.bf16.msra.mxu0 %v692_v7 }
  0x32   : > { %635 = vmatprep.subr.bf16.mxu0 %v693_v8 }
  0x35   : > { %636 = vmatpush3.bf16.msra.mxu0 %v693_v8 }
  0x36   : > { %637 = vmatprep.subr.bf16.mxu0 %v694_v10 }
  0x39   : > { %638 = vmatpush3.bf16.msra.mxu0 %v694_v10 }
  0x3a   : > { %639 = vmatprep.subr.bf16.mxu0 %v695_v11 }
  0x3d   : > { %640 = vmatpush3.bf16.msra.mxu0 %v695_v11 }
  0x3e   : > { %641 = vmatprep.subr.bf16.mxu0 %v696_v12 }
  0x41   : > { %642 = vmatpush3.bf16.msra.mxu0 %v696_v12 }
  0x42   : > { %643 = vmatprep.subr.bf16.mxu0 %v697_v13 }
  0x45   : > { %644 = vmatpush3.bf16.msra.mxu0 %v697_v13 }
  0x48   : > { %646 = vmatmul.mubr.bf16.vlgmr.msra.gmra.mrb[0].mxu0 %v699_v14 }
 0x11b   : > { %v647_v17 = vpop.f32.mrb[0].mxu0  ;;  %458 = sbr.rel (%p613_p11) target bundleno = 302 (0x12e), region = 81 }
 0x11c   : > { %v449_v19 = vadd.f32 %v647_v17, %v316_v15  ;;  %v432_v20 = vpop.f32.mrb[1].mxu0 }
 0x11d   : > { %v447_v22 = vadd.f32 %v432_v20, %v314_v16  ;;  %v648_v23 = vpop.f32.mrb[2].mxu0 }
 0x11e   : > { %453 = vst [vmem:[#allocation2 + $0x10] sm:$0xff] %v449_v19  ;;  %v450_v24 = vadd.f32 %v648_v23, %v317_v18  ;;  %v435_v25 = vpop.f32.mrb[3].mxu0 }
 0x11f   : > { %451 = vst [vmem:[#allocation2] sm:$0xff] %v447_v22  ;;  %v448_v26 = vadd.f32 %v435_v25, %v315_v21 }
 0x120   : > { %454 = vst [vmem:[#allocation2 + $0x18] sm:$0xff] %v450_v24 }
 0x121   : > { %452 = vst [vmem:[#allocation2 + $0x8] sm:$0xff] %v448_v26 }
 0x125   : > { %v461_v32 = vld [vmem:[#allocation2 + $0x10] sm:$0xff] }
 0x126   : > { %v459_v27 = vld [vmem:[#allocation2] sm:$0xff]  ;;  %v472_v34 = vadd.f32 %v614_v28, %v461_v32 }
 0x127   : > { %v470_v30 = vadd.f32 %v614_v28, %v459_v27  ;;  %v462_v33 = vld [vmem:[#allocation2 + $0x18] sm:$0xff] }
 0x128   : > { %v460_v29 = vld [vmem:[#allocation2 + $0x8] sm:$0xff]  ;;  %v473_v35 = vadd.f32 %v614_v28, %v462_v33  ;;  %v476_v38 = vmax.f32 %v472_v34, 0.0 }
 0x129   : > { %v471_v31 = vadd.f32 %v614_v28, %v460_v29  ;;  %v474_v36 = vmax.f32 %v470_v30, 0.0 }
 0x12a   : > { %v477_v39 = vmax.f32 %v473_v35, 0.0  ;;  %480 = vst [vmem:[%s863_s3 + $0x10] sm:$0xff] %v476_v38 }
 0x12b   : > { %v475_v37 = vmax.f32 %v471_v31, 0.0  ;;  %478 = vst [vmem:[%s863_s3] sm:$0xff] %v474_v36 }
 0x12c   : > { %481 = vst [vmem:[%s863_s3 + $0x18] sm:$0xff] %v477_v39 }
 0x12d   : > { %479 = vst [vmem:[%s863_s3 + $0x8] sm:$0xff] %v475_v37 }
 0x12e PF: > { %s13_s16 = sadd.s32 1, %s738_s16   ;;  %s864_s12 = smov %s726_s13 }
 0x12f   : > { %p10_p12 = scmp.ge.s32.totalorder %s13_s16, 7   ;;  %s865_s13 = smov %s796_s20 }
 0x130   : > { %s866_s14 = smov %s734_s15  ;;  %s867_s15 = smov %s869_s17 }
 0x131   :  { %12 = sbr.rel (!%p10_p12) target bundleno = 3 (0x3), region = 122 }

// kernel: forward.45
= control target key start
LH: loop header
LB: loop body
LE: loop exit
PB: predicated region body
PF: predicated region fallthrough
CT: control target
= control target key end

     0   :  { %s853_s15 = smov 0   ;;  %s855_s16 = smov 0   ;;  %s964_s0 = inlined_call_operand.vmem [shape: bf16[32,640], index: 0, kind: input, shape index: {}]   ;;  %s965_s1 = inlined_call_operand.vmem [shape: bf16[640,128], index: 1, kind: input, shape index: {}]   ;;  %s966_s2 = inlined_call_operand.vmem [shape: f32[1,128], index: 2, kind: input, shape index: {}]   ;;  %s967_s3 = inlined_call_operand.vmem [shape: f32[32,128], index: 3, kind: input, shape index: {}]   ;;  %s968_s4 = inlined_call_operand.vmem [shape: f32[32,128], index: 4, kind: output, shape index: {}]  }
   0x1   :  { %s857_s17 = smov 0   ;;  %s859_s18 = smov 0  }
   0x2   :  { %s861_s19 = smov 0  }
   0x3 LB: > { %s26_s20 = sadd.s32 1, %s821_s18  ;;  %p49_p1 = scmp.ne.s32.totalorder %s813_s16, %s809_s15  ;;  %s825_s19 = sphi %s861_s19, %s14_s19   ;;  %s821_s18 = sphi %s859_s18, %s972_s18   ;;  %s817_s17 = sphi %s857_s17, %s971_s17   ;;  %s813_s16 = sphi %s855_s16, %s970_s16   ;;  %s809_s15 = sphi %s853_s15, %s969_s15  }
   0x4   : > { %p27_p0 = scmp.ge.s32.totalorder %s26_s20, 5  ;;  %p50_p2 = scmp.eq.s32.totalorder %s825_s19, 0 }
   0x5   : > { %s42_s22 = sadd.s32 1, %s813_s16  ;;  %p682_p5 = scmp.ge.s32.totalorder %s825_s19, 5 }
   0x6   : > { %s974_s20 = smov (%p27_p0, %s26_s20), 0  ;;  %p51_p3 = por %p50_p2, %p49_p1 }
   0x7   : > { %s38_s21 = ssub.s32 %s821_s18, %s974_s20  ;;  %203 = sbr.rel (%p682_p5) target bundleno = 21 (0x15), region = 24 }
   0x8   : > { %p40_p4 = scmp.eq.s32.totalorder %s38_s21, 0 }
   0xa   : > { %s888_s23 = scalar_select %p40_p4, %s813_s16, %s42_s22  }
   0xe   : > { %206 = sbr.rel (!%p51_p3) target bundleno = 21 (0x15), region = 28  ;;  %s208_s24 = sand.u32 (%p51_p3), 1, %s813_s16  }
   0xf   : > { %s684_s25 = sshll.u32 (%p51_p3), %s821_s18, 2  ;;  %s683_s26 = sshll.u32 (%p51_p3), %s208_s24, 4 }
  0x10   : > { %s215_s29 = scalar_lea.vmem (%p51_p3), %s964_s0, %s684_s25  ;;  %s210_s30 = scalar_lea.vmem (%p51_p3), [#allocation3], %s683_s26 }
  0x11   : > { %v231_v0 = vld [vmem:[%s215_s29] sm:$0xf] (%p51_p3)  ;;  %v233_v1 = vld [vmem:[%s215_s29 + $0x14] sm:$0xf] (%p51_p3)  ;;  %v235_v2 = vld [vmem:[%s215_s29 + $0x28] sm:$0xf] (%p51_p3) }
  0x12   : > { %232 = vst [vmem:[%s210_s30] sm:$0xf] (%p51_p3), %v231_v0  ;;  %234 = vst [vmem:[%s210_s30 + $0x4] sm:$0xf] (%p51_p3), %v233_v1  ;;  %v237_v3 = vld [vmem:[%s215_s29 + $0x3c] sm:$0xf] (%p51_p3) }
  0x13   : > { %236 = vst [vmem:[%s210_s30 + $0x8] sm:$0xf] (%p51_p3), %v235_v2  ;;  %238 = vst [vmem:[%s210_s30 + $0xc] sm:$0xf] (%p51_p3), %v237_v3 }
  0x15 PF: > { %p685_p6 = scmp.ge.s32.totalorder %s825_s19, 1  ;;  %p280_p7 = scmp.lt.s32.totalorder %s825_s19, 6 }
  0x17   : > { %p281_p8 = pnand %p685_p6, %p280_p7 }
  0x18   : > { %s287_s5 = sand.u32 (!%p281_p8), 1, %s809_s15   ;;  %s687_s6 = sshll.u32 (!%p281_p8), %s817_s17, 4 }
  0x19   : > { %284 = sbr.rel (%p281_p8) target bundleno = 304 (0x130), region = 73  ;;  %s900_s7 = sshll.u32 (!%p281_p8), %s287_s5, 4 }
  0x1a   : > { %p336_p9 = scmp.lt.s32.totalorder (!%p281_p8), %s687_s6, 79  ;;  %s289_s12 = scalar_lea.vmem (!%p281_p8), [#allocation3], %s900_s7 }
  0x1b   : > { %p689_p10 = scmp.ne.s32.totalorder (!%p281_p8), %s817_s17, 0 }
  0x20   : > { %s976_s6 = smov (!%p336_p9, %s687_s6), 79  ;;  %369 = sbr.rel (%p689_p10) target bundleno = 39 (0x27), region = 81 }
  0x21   : > { %s688_s8 = sshll.u32 %s976_s6, 2  ;;  %v827_v4 = vmov (!%p689_p10), 0.0  }
  0x22   : > { %s905_s11 = scalar_lea.vmem %s965_s1, %s688_s8  ;;  %370 = vst [vmem:[#allocation2] sm:$0xff] (!%p689_p10), %v827_v4  ;;  %371 = vst [vmem:[#allocation2 + $0x8] sm:$0xff] (!%p689_p10), %v827_v4 }
  0x23   : > { %372 = vst [vmem:[#allocation2 + $0x10] sm:$0xff] (!%p689_p10), %v827_v4  ;;  %373 = vst [vmem:[#allocation2 + $0x18] sm:$0xff] (!%p689_p10), %v827_v4 }
  0x27 PF: > { %v777_v5 = vld [vmem:[%s905_s11] sm:$0xff]   ;;  %v778_v6 = vld [vmem:[%s905_s11 + $0x8] sm:$0xff]   ;;  %v779_v7 = vld [vmem:[%s905_s11 + $0x10] sm:$0xff]   ;;  %p700_p11 = scmp.ne.s32.totalorder %s817_s17, 4 }
  0x28   : > { %716 = vmatprep.subr.bf16.mxu0 %v777_v5  ;;  %v780_v8 = vld [vmem:[%s905_s11 + $0x18] sm:$0xff]   ;;  %v785_v9 = vld [vmem:[%s289_s12] sm:$0xff]   ;;  %v782_v11 = vld [vmem:[%s905_s11 + $0x28] sm:$0xff]  }
  0x29   : > { %717 = vmatpush3.bf16.msra.mxu0 %v777_v5  ;;  %732 = vmatprep.mubr.bf16.mxu0 %v785_v9  ;;  %v781_v10 = vld [vmem:[%s905_s11 + $0x20] sm:$0xff]   ;;  %v783_v12 = vld [vmem:[%s905_s11 + $0x30] sm:$0xff]   ;;  %v784_v13 = vld [vmem:[%s905_s11 + $0x38] sm:$0xff]  }
  0x2a   : > { %718 = vmatprep.subr.bf16.mxu0 %v778_v6  ;;  %v786_v14 = vld [vmem:[%s289_s12 + $0x8] sm:$0xff]   ;;  %v376_v15 = vld [vmem:[#allocation2 + $0x10] sm:$0xff]  ;;  %v374_v16 = vld [vmem:[#allocation2] sm:$0xff] }
  0x2b   : > { %v377_v18 = vld [vmem:[#allocation2 + $0x18] sm:$0xff]  ;;  %v375_v21 = vld [vmem:[#allocation2 + $0x8] sm:$0xff]  ;;  %v701_v28 = vld [vmem:[%s966_s2] ss:$0 sm:$0xff] (!%p700_p11) }
  0x2c   : > { %v534_v29 = vld [vmem:[%s967_s3] sm:$0xff] (!%p700_p11)  ;;  %v535_v32 = vld [vmem:[%s967_s3 + $0x8] sm:$0xff] (!%p700_p11)  ;;  %v536_v36 = vld [vmem:[%s967_s3 + $0x10] sm:$0xff] (!%p700_p11) }
  0x2d   : > { %719 = vmatpush3.bf16.msra.mxu0 %v778_v6  ;;  %v537_v38 = vld [vmem:[%s967_s3 + $0x18] sm:$0xff] (!%p700_p11) }
  0x2e   : > { %720 = vmatprep.subr.bf16.mxu0 %v779_v7 }
  0x31   : > { %721 = vmatpush3.bf16.msra.mxu0 %v779_v7 }
  0x32   : > { %722 = vmatprep.subr.bf16.mxu0 %v780_v8 }
  0x35   : > { %723 = vmatpush3.bf16.msra.mxu0 %v780_v8 }
  0x36   : > { %724 = vmatprep.subr.bf16.mxu0 %v781_v10 }
  0x39   : > { %725 = vmatpush3.bf16.msra.mxu0 %v781_v10 }
  0x3a   : > { %726 = vmatprep.subr.bf16.mxu0 %v782_v11 }
  0x3d   : > { %727 = vmatpush3.bf16.msra.mxu0 %v782_v11 }
  0x3e   : > { %728 = vmatprep.subr.bf16.mxu0 %v783_v12 }
  0x41   : > { %729 = vmatpush3.bf16.msra.mxu0 %v783_v12 }
  0x42   : > { %730 = vmatprep.subr.bf16.mxu0 %v784_v13 }
  0x45   : > { %731 = vmatpush3.bf16.msra.mxu0 %v784_v13 }
  0x48   : > { %733 = vmatmul.mubr.bf16.vlgmr.msra.gmra.mrb[0].mxu0 %v786_v14 }
 0x11b   : > { %v734_v17 = vpop.f32.mrb[0].mxu0  ;;  %518 = sbr.rel (%p700_p11) target bundleno = 304 (0x130), region = 85 }
 0x11c   : > { %v509_v19 = vadd.f32 %v734_v17, %v376_v15  ;;  %v492_v20 = vpop.f32.mrb[1].mxu0 }
 0x11d   : > { %v507_v22 = vadd.f32 %v492_v20, %v374_v16  ;;  %v735_v23 = vpop.f32.mrb[2].mxu0 }
 0x11e   : > { %513 = vst [vmem:[#allocation2 + $0x10] sm:$0xff] %v509_v19  ;;  %v510_v24 = vadd.f32 %v735_v23, %v377_v18  ;;  %v495_v25 = vpop.f32.mrb[3].mxu0 }
 0x11f   : > { %511 = vst [vmem:[#allocation2] sm:$0xff] %v507_v22  ;;  %v508_v26 = vadd.f32 %v495_v25, %v375_v21 }
 0x120   : > { %514 = vst [vmem:[#allocation2 + $0x18] sm:$0xff] %v510_v24 }
 0x121   : > { %512 = vst [vmem:[#allocation2 + $0x8] sm:$0xff] %v508_v26 }
 0x125   : > { %v521_v33 = vld [vmem:[#allocation2 + $0x10] sm:$0xff] }
 0x126   : > { %v519_v27 = vld [vmem:[#allocation2] sm:$0xff]  ;;  %v532_v35 = vadd.f32 %v701_v28, %v521_v33 }
 0x127   : > { %v530_v30 = vadd.f32 %v701_v28, %v519_v27  ;;  %v522_v37 = vld [vmem:[#allocation2 + $0x18] sm:$0xff] }
 0x128   : > { %v520_v31 = vld [vmem:[#allocation2 + $0x8] sm:$0xff]  ;;  %v533_v40 = vadd.f32 %v701_v28, %v522_v37  ;;  %v540_v42 = vadd.f32 %v536_v36, %v532_v35 }
 0x129   : > { %v531_v34 = vadd.f32 %v701_v28, %v520_v31  ;;  %v538_v39 = vadd.f32 %v534_v29, %v530_v30 }
 0x12a   : > { %v541_v44 = vadd.f32 %v537_v38, %v533_v40  ;;  %v544_v46 = vmax.f32 %v540_v42, 0.0 }
 0x12b   : > { %v539_v41 = vadd.f32 %v535_v32, %v531_v34  ;;  %v542_v43 = vmax.f32 %v538_v39, 0.0 }
 0x12c   : > { %v545_v47 = vmax.f32 %v541_v44, 0.0  ;;  %548 = vst [vmem:[%s968_s4 + $0x10] sm:$0xff] %v544_v46 }
 0x12d   : > { %v543_v45 = vmax.f32 %v539_v41, 0.0  ;;  %546 = vst [vmem:[%s968_s4] sm:$0xff] %v542_v43 }
 0x12e   : > { %549 = vst [vmem:[%s968_s4 + $0x18] sm:$0xff] %v545_v47 }
 0x12f   : > { %547 = vst [vmem:[%s968_s4 + $0x8] sm:$0xff] %v543_v45 }
 0x130 PF: > { %s14_s19 = sadd.s32 1, %s825_s19   ;;  %s969_s15 = smov %s813_s16 }
 0x131   : > { %p11_p12 = scmp.ge.s32.totalorder %s14_s19, 7   ;;  %s970_s16 = smov %s888_s23 }
 0x132   : > { %s971_s17 = smov %s821_s18  ;;  %s972_s18 = smov %s974_s20 }
 0x133   :  { %13 = sbr.rel (!%p11_p12) target bundleno = 3 (0x3), region = 129 }

// kernel: forward.50
= control target key start
LH: loop header
LB: loop body
LE: loop exit
PB: predicated region body
PF: predicated region fallthrough
CT: control target
= control target key end

     0   :  { %s621_s12 = smov 0   ;;  %s623_s13 = smov 0   ;;  %s670_s0 = inlined_call_operand.vmem [shape: bf16[8,640], index: 0, kind: input, shape index: {}]   ;;  %s671_s1 = inlined_call_operand.vmem [shape: bf16[640,128], index: 1, kind: input, shape index: {}]   ;;  %s672_s2 = inlined_call_operand.vmem [shape: f32[1,128], index: 2, kind: input, shape index: {}]   ;;  %s673_s3 = inlined_call_operand.vmem [shape: f32[8,128], index: 3, kind: output, shape index: {}]  }
   0x1   :  { %s625_s14 = smov 0  }
   0x2 LB: > { %s25_s15 = sadd.s32 1, %s592_s13  ;;  %p492_p0 = scmp.ge.s32.totalorder %s596_s14, 1  ;;  %s596_s14 = sphi %s625_s14, %s13_s14   ;;  %s592_s13 = sphi %s623_s13, %s675_s13   ;;  %s588_s12 = sphi %s621_s12, %s674_s12  }
   0x3   : > { %p26_p1 = scmp.ge.s32.totalorder %s25_s15, 5  ;;  %p187_p2 = scmp.lt.s32.totalorder %s596_s14, 6 }
   0x5   : > { %s677_s15 = smov (%p26_p1, %s25_s15), 0  ;;  %p188_p3 = pnand %p492_p0, %p187_p2 }
   0x6   : > { %p229_p4 = scmp.lt.s32.totalorder (!%p188_p3), %s588_s12, 4  ;;  %s494_s16 = sshll.u32 (!%p188_p3), %s588_s12, 4 }
   0x7   : > { %191 = sbr.rel (%p188_p3) target bundleno = 282 (0x11a), region = 32  ;;  %p236_p5 = scmp.lt.s32.totalorder (!%p188_p3), %s494_s16, 79 }
   0x8   : > { %p496_p6 = scmp.ne.s32.totalorder (!%p188_p3), %s588_s12, 0 }
   0xe   : > { %s230_s17 = scalar_select %p229_p4, %s588_s12, 4 }
   0xf   : > { %s679_s16 = smov (!%p236_p5, %s494_s16), 79  ;;  %258 = sbr.rel (%p496_p6) target bundleno = 22 (0x16), region = 36 }
  0x10   : > { %s493_s18 = sshll.u32 %s230_s17, 2  ;;  %s495_s22 = sshll.u32 %s679_s16, 2  ;;  %v598_v0 = vmov (!%p496_p6), 0.0  }
  0x11   : > { %s647_s21 = scalar_lea.vmem %s670_s0, %s493_s18  ;;  %s242_s25 = scalar_lea.vmem %s671_s1, %s495_s22  ;;  %259 = vst [vmem:[#allocation2] sm:$0xff] (!%p496_p6), %v598_v0 }
  0x16 PF: > { %v566_v1 = vld [vmem:[%s242_s25] sm:$0xff]   ;;  %v599_v2 = vmov 0.0   ;;  %v567_v3 = vld [vmem:[%s242_s25 + $0x8] sm:$0xff]   ;;  %vm600_vm0 = vmmov 0   ;;  %v568_v4 = vld [vmem:[%s242_s25 + $0x10] sm:$0xff]   ;;  %p505_p7 = scmp.ne.s32.totalorder %s588_s12, 4 }
  0x17   : > { %519 = vmatprep.subr.bf16.mxu0 %v599_v2  ;;  %535 = vmatprep.mubr.msk.bf16.mxu0 %vm600_vm0, %v599_v2  ;;  %v569_v5 = vld [vmem:[%s242_s25 + $0x18] sm:$0xff]   ;;  %v570_v6 = vld [vmem:[%s242_s25 + $0x20] sm:$0xff]   ;;  %v571_v7 = vld [vmem:[%s242_s25 + $0x28] sm:$0xff]  }
  0x18   : > { %520 = vmatpush3.bf16.msra.mxu0 %v566_v1  ;;  %v572_v8 = vld [vmem:[%s242_s25 + $0x30] sm:$0xff]   ;;  %v573_v9 = vld [vmem:[%s242_s25 + $0x38] sm:$0xff]   ;;  %v261_v10 = vld [vmem:[%s647_s21] sm:$0xf] }
  0x19   : > { %521 = vmatprep.subr.bf16.mxu0 %v599_v2  ;;  %v260_v11 = vld [vmem:[#allocation2] sm:$0xff] }
  0x1a   : > { %v506_v18 = vld [vmem:[%s672_s2] ss:$0 sm:$0xff] (!%p505_p7) }
  0x1c   : > { %522 = vmatpush3.bf16.msra.mxu0 %v567_v3 }
  0x1d   : > { %523 = vmatprep.subr.bf16.mxu0 %v599_v2 }
  0x20   : > { %524 = vmatpush3.bf16.msra.mxu0 %v568_v4 }
  0x21   : > { %525 = vmatprep.subr.bf16.mxu0 %v599_v2 }
  0x24   : > { %526 = vmatpush3.bf16.msra.mxu0 %v569_v5 }
  0x25   : > { %527 = vmatprep.subr.bf16.mxu0 %v599_v2 }
  0x28   : > { %528 = vmatpush3.bf16.msra.mxu0 %v570_v6 }
  0x29   : > { %529 = vmatprep.subr.bf16.mxu0 %v599_v2 }
  0x2c   : > { %530 = vmatpush3.bf16.msra.mxu0 %v571_v7 }
  0x2d   : > { %531 = vmatprep.subr.bf16.mxu0 %v599_v2 }
  0x30   : > { %532 = vmatpush3.bf16.msra.mxu0 %v572_v8 }
  0x31   : > { %533 = vmatprep.subr.bf16.mxu0 %v599_v2 }
  0x34   : > { %534 = vmatpush3.bf16.msra.mxu0 %v573_v9 }
  0x37   : > { %536 = vmatmul.mubr.bf16.vlgmr.msra.gmra.mrb[0].mxu0 %v261_v10 }
 0x107   : > { %371 = sbr.rel (%p505_p7) target bundleno = 282 (0x11a), region = 40 }
 0x10a   : > { %v360_v12 = vpop.f32.mrb[0].mxu0 }
 0x10b   : > { %v366_v13 = vadd.f32 %v360_v12, %v260_v11  ;;  %v537_v14 = vpop.f32.mrb[1].mxu0 }
 0x10c   : > { %v363_v15 = vpop.f32.mrb[2].mxu0 }
 0x10d   : > { %367 = vst [vmem:[#allocation2] sm:$0xff] %v366_v13  ;;  %v538_v16 = vpop.f32.mrb[3].mxu0 }
 0x114   : > { %v372_v17 = vld [vmem:[#allocation2] sm:$0xff] }
 0x115   : > { %v380_v19 = vadd.f32 %v506_v18, %v372_v17 }
 0x117   : > { %v381_v20 = vmax.f32 %v380_v19, 0.0 }
 0x119   : > { %382 = vst [vmem:[%s673_s3] sm:$0xff] %v381_v20 }
 0x11a PF: > { %s13_s14 = sadd.s32 1, %s596_s14   ;;  %s674_s12 = smov %s592_s13 }
 0x11b   : > { %p10_p8 = scmp.ge.s32.totalorder %s13_s14, 7   ;;  %s675_s13 = smov %s677_s15 }
 0x11d   :  { %12 = sbr.rel (!%p10_p8) target bundleno = 2 (0x2), region = 76 }

// kernel: forward.51
= control target key start
LH: loop header
LB: loop body
LE: loop exit
PB: predicated region body
PF: predicated region fallthrough
CT: control target
= control target key end

     0   :  { %v193_v0 = vmov 0.0   ;;  %vm194_vm0 = vmmov 0   ;;  %s248_s1 = inlined_call_operand.vmem [shape: bf16[128,128], index: 1, kind: input, shape index: {}]   ;;  %s249_s0 = inlined_call_operand.vmem [shape: bf16[8,128], index: 0, kind: input, shape index: {}]   ;;  %s250_s2 = inlined_call_operand.vmem [shape: f32[1,128], index: 2, kind: input, shape index: {}]   ;;  %s251_s3 = inlined_call_operand.vmem [shape: f32[8,128], index: 3, kind: output, shape index: {}]  }
   0x1   :  { %163 = vmatprep.subr.bf16.mxu0 %v193_v0  ;;  %v185_v1 = vld [vmem:[%s248_s1] sm:$0xff]   ;;  %179 = vmatprep.mubr.msk.bf16.mxu0 %vm194_vm0, %v193_v0  ;;  %v186_v2 = vld [vmem:[%s248_s1 + $0x8] sm:$0xff]   ;;  %v187_v3 = vld [vmem:[%s248_s1 + $0x10] sm:$0xff]  }
   0x2   :  { %164 = vmatpush3.bf16.msra.mxu0 %v185_v1  ;;  %v188_v4 = vld [vmem:[%s248_s1 + $0x18] sm:$0xff]   ;;  %v189_v5 = vld [vmem:[%s248_s1 + $0x20] sm:$0xff]   ;;  %v190_v6 = vld [vmem:[%s248_s1 + $0x28] sm:$0xff]  }
   0x3   :  { %165 = vmatprep.subr.bf16.mxu0 %v193_v0  ;;  %v191_v7 = vld [vmem:[%s248_s1 + $0x30] sm:$0xff]   ;;  %v192_v8 = vld [vmem:[%s248_s1 + $0x38] sm:$0xff]   ;;  %v21_v9 = vld [vmem:[%s249_s0] sm:$0xf] }
   0x4   :  { %v153_v10 = vld [vmem:[%s250_s2] ss:$0 sm:$0xff] }
   0x6   :  { %166 = vmatpush3.bf16.msra.mxu0 %v186_v2 }
   0x7   :  { %167 = vmatprep.subr.bf16.mxu0 %v193_v0 }
   0xa   :  { %168 = vmatpush3.bf16.msra.mxu0 %v187_v3 }
   0xb   :  { %169 = vmatprep.subr.bf16.mxu0 %v193_v0 }
   0xe   :  { %170 = vmatpush3.bf16.msra.mxu0 %v188_v4 }
   0xf   :  { %171 = vmatprep.subr.bf16.mxu0 %v193_v0 }
  0x12   :  { %172 = vmatpush3.bf16.msra.mxu0 %v189_v5 }
  0x13   :  { %173 = vmatprep.subr.bf16.mxu0 %v193_v0 }
  0x16   :  { %174 = vmatpush3.bf16.msra.mxu0 %v190_v6 }
  0x17   :  { %175 = vmatprep.subr.bf16.mxu0 %v193_v0 }
  0x1a   :  { %176 = vmatpush3.bf16.msra.mxu0 %v191_v7 }
  0x1b   :  { %177 = vmatprep.subr.bf16.mxu0 %v193_v0 }
  0x1e   :  { %178 = vmatpush3.bf16.msra.mxu0 %v192_v8 }
  0x21   :  { %180 = vmatmul.mubr.bf16.vlgmr.msra.gmra.mrb[0].mxu0 %v21_v9 }
  0xf4   :  { %v120_v11 = vpop.f32.mrb[0].mxu0 }
  0xf5   :  { %v139_v12 = vadd.f32 %v153_v10, %v120_v11  ;;  %v181_v13 = vpop.f32.mrb[1].mxu0 }
  0xf6   :  { %v123_v14 = vpop.f32.mrb[2].mxu0 }
  0xf7   :  { %140 = vst [vmem:[%s251_s3] sm:$0xff] %v139_v12  ;;  %v182_v15 = vpop.f32.mrb[3].mxu0 }

// kernel: forward.52
= control target key start
LH: loop header
LB: loop body
LE: loop exit
PB: predicated region body
PF: predicated region fallthrough
CT: control target
= control target key end

     0   :  { %s946_s15 = smov 0   ;;  %s948_s16 = smov 0   ;;  %s1024_s0 = inlined_call_operand.vmem [shape: bf16[8,1152], index: 0, kind: input, shape index: {}]   ;;  %s1025_s1 = inlined_call_operand.vmem [shape: bf16[1152,128], index: 1, kind: input, shape index: {}]   ;;  %s1026_s2 = inlined_call_operand.vmem [shape: f32[1,128], index: 2, kind: input, shape index: {}]   ;;  %s1027_s3 = inlined_call_operand.vmem [shape: f32[8,128], index: 3, kind: input, shape index: {}]   ;;  %s1028_s4 = inlined_call_operand.vmem [shape: f32[8,128], index: 4, kind: output, shape index: {}]  }
   0x1   :  { %s950_s17 = smov 0  }
   0x2 LB: > { %s26_s18 = sadd.s32 1, %s912_s16  ;;  %p753_p0 = scmp.ge.s32.totalorder %s916_s17, 1  ;;  %s916_s17 = sphi %s950_s17, %s14_s17   ;;  %s912_s16 = sphi %s948_s16, %s1030_s16   ;;  %s908_s15 = sphi %s946_s15, %s1029_s15  }
   0x3   : > { %p27_p1 = scmp.ge.s32.totalorder %s26_s18, 3  ;;  %p228_p2 = scmp.lt.s32.totalorder %s916_s17, 4 }
   0x5   : > { %s1032_s18 = smov (%p27_p1, %s26_s18), 0  ;;  %p229_p3 = pnand %p753_p0, %p228_p2 }
   0x6   : > { %s278_s19 = smul.u32 (!%p229_p3), 3, %s908_s15  ;;  %p756_p6 = scmp.ne.s32.totalorder (!%p229_p3), %s908_s15, 0 }
   0x7   : > { %232 = sbr.rel (%p229_p3) target bundleno = 291 (0x123), region = 36 }
   0x8   : > { %s288_s20 = smul.u32 (!%p229_p3), 48, %s908_s15  ;;  %p281_p4 = scmp.lt.s32.totalorder (!%p229_p3), %s278_s19, 8 }
   0xa   : > { %p289_p5 = scmp.lt.s32.totalorder (!%p229_p3), %s288_s20, 143 }
   0xe   : > { %s1034_s19 = smov (!%p281_p4, %s278_s19), 8  ;;  %s1036_s20 = smov (!%p289_p5, %s288_s20), 143 }
   0xf   : > { %s754_s21 = sshll.u32 %s1034_s19, 2  ;;  %s755_s25 = sshll.u32 %s1036_s20, 2  ;;  %v918_v0 = vmov (!%p756_p6), 0.0  }
  0x10   : > { %s971_s24 = scalar_lea.vmem %s1024_s0, %s754_s21  ;;  %s976_s28 = scalar_lea.vmem %s1025_s1, %s755_s25  ;;  %319 = vst [vmem:[#allocation2] sm:$0xff] (!%p756_p6), %v918_v0 }
  0x11   : > { %318 = sbr.rel (%p756_p6) target bundleno = 24 (0x18), region = 40 }
  0x18 PF: > { %v867_v1 = vld [vmem:[%s976_s28 + $0x40] sm:$0xff]   ;;  %v919_v2 = vmov 0.0   ;;  %vm920_vm0 = vmmov 0   ;;  %v870_v5 = vld [vmem:[%s976_s28 + $0x48] sm:$0xff]   ;;  %v873_v8 = vld [vmem:[%s976_s28 + $0x50] sm:$0xff]   ;;  %p784_p7 = scmp.ne.s32.totalorder %s908_s15, 2 }
  0x19   : > { %820 = vmatprep.subr.bf16.mxu1 %v919_v2  ;;  %v868_v3 = vld [vmem:[%s976_s28] sm:$0xff]   ;;  %789 = vmatprep.subr.bf16.mxu0 %v867_v1  ;;  %v871_v6 = vld [vmem:[%s976_s28 + $0x8] sm:$0xff]   ;;  %v874_v9 = vld [vmem:[%s976_s28 + $0x10] sm:$0xff]  }
  0x1a   : > { %v869_v4 = vld [vmem:[%s976_s28 + $0x80] sm:$0xff]   ;;  %836 = vmatprep.mubr.msk.bf16.mxu1 %vm920_vm0, %v919_v2  ;;  %790 = vmatpush3.bf16.msra.mxu0 %v868_v3  ;;  %v872_v7 = vld [vmem:[%s976_s28 + $0x88] sm:$0xff]   ;;  %v875_v10 = vld [vmem:[%s976_s28 + $0x90] sm:$0xff]  }
  0x1b   : > { %821 = vmatpush3.bf16.msra.mxu1 %v869_v4  ;;  %791 = vmatprep.subr.bf16.mxu0 %v870_v5  ;;  %v876_v11 = vld [vmem:[%s976_s28 + $0x58] sm:$0xff]   ;;  %v879_v14 = vld [vmem:[%s976_s28 + $0x60] sm:$0xff]   ;;  %v882_v17 = vld [vmem:[%s976_s28 + $0x68] sm:$0xff]  }
  0x1c   : > { %822 = vmatprep.subr.bf16.mxu1 %v919_v2  ;;  %v877_v12 = vld [vmem:[%s976_s28 + $0x18] sm:$0xff]   ;;  %v880_v15 = vld [vmem:[%s976_s28 + $0x20] sm:$0xff]   ;;  %v883_v18 = vld [vmem:[%s976_s28 + $0x28] sm:$0xff]  }
  0x1d   : > { %v878_v13 = vld [vmem:[%s976_s28 + $0x98] sm:$0xff]   ;;  %v881_v16 = vld [vmem:[%s976_s28 + $0xa0] sm:$0xff]   ;;  %v884_v19 = vld [vmem:[%s976_s28 + $0xa8] sm:$0xff]  }
  0x1e   : > { %792 = vmatpush3.bf16.msra.mxu0 %v871_v6  ;;  %v885_v20 = vld [vmem:[%s976_s28 + $0x70] sm:$0xff]   ;;  %v888_v23 = vld [vmem:[%s976_s28 + $0x78] sm:$0xff]   ;;  %v321_v24 = vld [vmem:[%s971_s24] sm:$0xff] }
  0x1f   : > { %823 = vmatpush3.bf16.msra.mxu1 %v872_v7  ;;  %793 = vmatprep.subr.bf16.mxu0 %v873_v8  ;;  %v886_v21 = vld [vmem:[%s976_s28 + $0x30] sm:$0xff]   ;;  %v758_v25 = vcombine.high %v321_v24, %v321_v24  ;;  %v889_v26 = vld [vmem:[%s976_s28 + $0x38] sm:$0xff]   ;;  %v757_v28 = vcombine.low %v321_v24, %v321_v24  ;;  %v893_v29 = vld [vmem:[%s971_s24 + $0x8] ss:$0 sps:$4 sm:$0xff]  }
  0x20   : > { %824 = vmatprep.subr.bf16.mxu1 %v919_v2  ;;  %v887_v22 = vld [vmem:[%s976_s28 + $0xb0] sm:$0xff]   ;;  %v890_v27 = vld [vmem:[%s976_s28 + $0xb8] sm:$0xff]   ;;  %v320_v36 = vld [vmem:[#allocation2] sm:$0xff] }
  0x21   : > { %558 = vmatprep.mubr.bf16.mxu0 %v758_v25  ;;  %v785_v43 = vld [vmem:[%s1026_s2] ss:$0 sm:$0xff] (!%p784_p7) }
  0x22   : > { %794 = vmatpush3.bf16.msra.mxu0 %v874_v9  ;;  %v621_v44 = vld [vmem:[%s1027_s3] sm:$0xff] (!%p784_p7) }
  0x23   : > { %825 = vmatpush3.bf16.msra.mxu1 %v875_v10  ;;  %795 = vmatprep.subr.bf16.mxu0 %v876_v11 }
  0x24   : > { %826 = vmatprep.subr.bf16.mxu1 %v919_v2 }
  0x26   : > { %796 = vmatpush3.bf16.msra.mxu0 %v877_v12 }
  0x27   : > { %827 = vmatpush3.bf16.msra.mxu1 %v878_v13  ;;  %797 = vmatprep.subr.bf16.mxu0 %v879_v14 }
  0x28   : > { %828 = vmatprep.subr.bf16.mxu1 %v919_v2 }
  0x2a   : > { %798 = vmatpush3.bf16.msra.mxu0 %v880_v15 }
  0x2b   : > { %829 = vmatpush3.bf16.msra.mxu1 %v881_v16  ;;  %799 = vmatprep.subr.bf16.mxu0 %v882_v17 }
  0x2c   : > { %830 = vmatprep.subr.bf16.mxu1 %v919_v2 }
  0x2e   : > { %800 = vmatpush3.bf16.msra.mxu0 %v883_v18 }
  0x2f   : > { %831 = vmatpush3.bf16.msra.mxu1 %v884_v19  ;;  %801 = vmatprep.subr.bf16.mxu0 %v885_v20 }
  0x30   : > { %832 = vmatprep.subr.bf16.mxu1 %v919_v2 }
  0x32   : > { %802 = vmatpush3.bf16.msra.mxu0 %v886_v21 }
  0x33   : > { %833 = vmatpush3.bf16.msra.mxu1 %v887_v22  ;;  %803 = vmatprep.subr.bf16.mxu0 %v888_v23 }
  0x34   : > { %834 = vmatprep.subr.bf16.mxu1 %v919_v2 }
  0x36   : > { %804 = vmatpush3.bf16.msra.mxu0 %v889_v26 }
  0x37   : > { %835 = vmatpush3.bf16.msra.mxu1 %v890_v27 }
  0x39   : > { %559 = vmatmul.mubr.bf16.vlgmr.msra.gmra.mrb[0].mxu0 %v757_v28 }
  0x3a   : > { %837 = vmatmul.mubr.bf16.vlgmr.msra.gmra.mrb[0].mxu1 %v893_v29 }
 0x10c   : > { %v805_v30 = vpop.f32.mrb[0].mxu0 }
 0x10d   : > { %v600_v31 = vpop.f32.mrb[0].mxu1  ;;  %v806_v32 = vpop.f32.mrb[1].mxu0 }
 0x10e   : > { %v807_v33 = vadd.f32 %v806_v32, %v805_v30  ;;  %v838_v34 = vpop.f32.mrb[1].mxu1  ;;  %v808_v35 = vpop.f32.mrb[2].mxu0  ;;  %611 = sbr.rel (%p784_p7) target bundleno = 291 (0x123), region = 44 }
 0x10f   : > { %v603_v37 = vpop.f32.mrb[2].mxu1  ;;  %v809_v38 = vpop.f32.mrb[3].mxu0 }
 0x110   : > { %v601_v39 = vadd.f32 %v807_v33, %v600_v31  ;;  %v839_v40 = vpop.f32.mrb[3].mxu1 }
 0x112   : > { %v606_v41 = vadd.f32 %v601_v39, %v320_v36 }
 0x114   : > { %607 = vst [vmem:[#allocation2] sm:$0xff] %v606_v41 }
 0x11b   : > { %v612_v42 = vld [vmem:[#allocation2] sm:$0xff] }
 0x11c   : > { %v620_v45 = vadd.f32 %v785_v43, %v612_v42 }
 0x11e   : > { %v622_v46 = vadd.f32 %v621_v44, %v620_v45 }
 0x120   : > { %v623_v47 = vmax.f32 %v622_v46, 0.0 }
 0x122   : > { %624 = vst [vmem:[%s1028_s4] sm:$0xff] %v623_v47 }
 0x123 PF: > { %s14_s17 = sadd.s32 1, %s916_s17   ;;  %s1029_s15 = smov %s912_s16 }
 0x124   : > { %p11_p8 = scmp.ge.s32.totalorder %s14_s17, 5   ;;  %s1030_s16 = smov %s1032_s18 }
 0x126   :  { %13 = sbr.rel (!%p11_p8) target bundleno = 2 (0x2), region = 83 }

// kernel: forward.53
= control target key start
LH: loop header
LB: loop body
LE: loop exit
PB: predicated region body
PF: predicated region fallthrough
CT: control target
= control target key end

     0   :  { %s865_s12 = smov 0   ;;  %s867_s13 = smov 0   ;;  %s940_s0 = inlined_call_operand.vmem [shape: bf16[8,1152], index: 0, kind: input, shape index: {}]   ;;  %s941_s1 = inlined_call_operand.vmem [shape: bf16[1152,128], index: 1, kind: input, shape index: {}]   ;;  %s942_s2 = inlined_call_operand.vmem [shape: f32[1,128], index: 2, kind: input, shape index: {}]   ;;  %s943_s3 = inlined_call_operand.vmem [shape: f32[8,128], index: 3, kind: output, shape index: {}]  }
   0x1   :  { %s869_s14 = smov 0  }
   0x2 LB: > { %s25_s15 = sadd.s32 1, %s836_s13  ;;  %p677_p0 = scmp.ge.s32.totalorder %s840_s14, 1  ;;  %s840_s14 = sphi %s869_s14, %s13_s14   ;;  %s836_s13 = sphi %s867_s13, %s945_s13   ;;  %s832_s12 = sphi %s865_s12, %s944_s12  }
   0x3   : > { %p26_p1 = scmp.ge.s32.totalorder %s25_s15, 3  ;;  %p189_p2 = scmp.lt.s32.totalorder %s840_s14, 4 }
   0x5   : > { %s947_s15 = smov (%p26_p1, %s25_s15), 0  ;;  %p190_p3 = pnand %p677_p0, %p189_p2 }
   0x6   : > { %s230_s16 = smul.u32 (!%p190_p3), 3, %s832_s12  ;;  %p680_p6 = scmp.ne.s32.totalorder (!%p190_p3), %s832_s12, 0 }
   0x7   : > { %193 = sbr.rel (%p190_p3) target bundleno = 289 (0x121), region = 32 }
   0x8   : > { %s240_s17 = smul.u32 (!%p190_p3), 48, %s832_s12  ;;  %p233_p4 = scmp.lt.s32.totalorder (!%p190_p3), %s230_s16, 8 }
   0xa   : > { %p241_p5 = scmp.lt.s32.totalorder (!%p190_p3), %s240_s17, 143 }
   0xe   : > { %s949_s16 = smov (!%p233_p4, %s230_s16), 8  ;;  %s951_s17 = smov (!%p241_p5, %s240_s17), 143 }
   0xf   : > { %s678_s18 = sshll.u32 %s949_s16, 2  ;;  %s679_s22 = sshll.u32 %s951_s17, 2  ;;  %v842_v0 = vmov (!%p680_p6), 0.0  }
  0x10   : > { %s890_s21 = scalar_lea.vmem %s940_s0, %s678_s18  ;;  %s895_s25 = scalar_lea.vmem %s941_s1, %s679_s22  ;;  %264 = vst [vmem:[#allocation2] sm:$0xff] (!%p680_p6), %v842_v0 }
  0x11   : > { %263 = sbr.rel (%p680_p6) target bundleno = 24 (0x18), region = 36 }
  0x18 PF: > { %v791_v1 = vld [vmem:[%s895_s25 + $0x40] sm:$0xff]   ;;  %v843_v2 = vmov 0.0   ;;  %vm844_vm0 = vmmov 0   ;;  %v794_v5 = vld [vmem:[%s895_s25 + $0x48] sm:$0xff]   ;;  %v797_v8 = vld [vmem:[%s895_s25 + $0x50] sm:$0xff]   ;;  %p708_p7 = scmp.ne.s32.totalorder %s832_s12, 2 }
  0x19   : > { %744 = vmatprep.subr.bf16.mxu1 %v843_v2  ;;  %v792_v3 = vld [vmem:[%s895_s25] sm:$0xff]   ;;  %713 = vmatprep.subr.bf16.mxu0 %v791_v1  ;;  %v795_v6 = vld [vmem:[%s895_s25 + $0x8] sm:$0xff]   ;;  %v798_v9 = vld [vmem:[%s895_s25 + $0x10] sm:$0xff]  }
  0x1a   : > { %v793_v4 = vld [vmem:[%s895_s25 + $0x80] sm:$0xff]   ;;  %760 = vmatprep.mubr.msk.bf16.mxu1 %vm844_vm0, %v843_v2  ;;  %714 = vmatpush3.bf16.msra.mxu0 %v792_v3  ;;  %v796_v7 = vld [vmem:[%s895_s25 + $0x88] sm:$0xff]   ;;  %v799_v10 = vld [vmem:[%s895_s25 + $0x90] sm:$0xff]  }
  0x1b   : > { %745 = vmatpush3.bf16.msra.mxu1 %v793_v4  ;;  %715 = vmatprep.subr.bf16.mxu0 %v794_v5  ;;  %v800_v11 = vld [vmem:[%s895_s25 + $0x58] sm:$0xff]   ;;  %v803_v14 = vld [vmem:[%s895_s25 + $0x60] sm:$0xff]   ;;  %v806_v17 = vld [vmem:[%s895_s25 + $0x68] sm:$0xff]  }
  0x1c   : > { %746 = vmatprep.subr.bf16.mxu1 %v843_v2  ;;  %v801_v12 = vld [vmem:[%s895_s25 + $0x18] sm:$0xff]   ;;  %v804_v15 = vld [vmem:[%s895_s25 + $0x20] sm:$0xff]   ;;  %v807_v18 = vld [vmem:[%s895_s25 + $0x28] sm:$0xff]  }
  0x1d   : > { %v802_v13 = vld [vmem:[%s895_s25 + $0x98] sm:$0xff]   ;;  %v805_v16 = vld [vmem:[%s895_s25 + $0xa0] sm:$0xff]   ;;  %v808_v19 = vld [vmem:[%s895_s25 + $0xa8] sm:$0xff]  }
  0x1e   : > { %716 = vmatpush3.bf16.msra.mxu0 %v795_v6  ;;  %v809_v20 = vld [vmem:[%s895_s25 + $0x70] sm:$0xff]   ;;  %v812_v23 = vld [vmem:[%s895_s25 + $0x78] sm:$0xff]   ;;  %v266_v24 = vld [vmem:[%s890_s21] sm:$0xff] }
  0x1f   : > { %747 = vmatpush3.bf16.msra.mxu1 %v796_v7  ;;  %717 = vmatprep.subr.bf16.mxu0 %v797_v8  ;;  %v810_v21 = vld [vmem:[%s895_s25 + $0x30] sm:$0xff]   ;;  %v682_v25 = vcombine.high %v266_v24, %v266_v24  ;;  %v813_v26 = vld [vmem:[%s895_s25 + $0x38] sm:$0xff]   ;;  %v681_v28 = vcombine.low %v266_v24, %v266_v24  ;;  %v817_v29 = vld [vmem:[%s890_s21 + $0x8] ss:$0 sps:$4 sm:$0xff]  }
  0x20   : > { %748 = vmatprep.subr.bf16.mxu1 %v843_v2  ;;  %v811_v22 = vld [vmem:[%s895_s25 + $0xb0] sm:$0xff]   ;;  %v814_v27 = vld [vmem:[%s895_s25 + $0xb8] sm:$0xff]   ;;  %v265_v36 = vld [vmem:[#allocation2] sm:$0xff] }
  0x21   : > { %503 = vmatprep.mubr.bf16.mxu0 %v682_v25  ;;  %v709_v43 = vld [vmem:[%s942_s2] ss:$0 sm:$0xff] (!%p708_p7) }
  0x22   : > { %718 = vmatpush3.bf16.msra.mxu0 %v798_v9 }
  0x23   : > { %749 = vmatpush3.bf16.msra.mxu1 %v799_v10  ;;  %719 = vmatprep.subr.bf16.mxu0 %v800_v11 }
  0x24   : > { %750 = vmatprep.subr.bf16.mxu1 %v843_v2 }
  0x26   : > { %720 = vmatpush3.bf16.msra.mxu0 %v801_v12 }
  0x27   : > { %751 = vmatpush3.bf16.msra.mxu1 %v802_v13  ;;  %721 = vmatprep.subr.bf16.mxu0 %v803_v14 }
  0x28   : > { %752 = vmatprep.subr.bf16.mxu1 %v843_v2 }
  0x2a   : > { %722 = vmatpush3.bf16.msra.mxu0 %v804_v15 }
  0x2b   : > { %753 = vmatpush3.bf16.msra.mxu1 %v805_v16  ;;  %723 = vmatprep.subr.bf16.mxu0 %v806_v17 }
  0x2c   : > { %754 = vmatprep.subr.bf16.mxu1 %v843_v2 }
  0x2e   : > { %724 = vmatpush3.bf16.msra.mxu0 %v807_v18 }
  0x2f   : > { %755 = vmatpush3.bf16.msra.mxu1 %v808_v19  ;;  %725 = vmatprep.subr.bf16.mxu0 %v809_v20 }
  0x30   : > { %756 = vmatprep.subr.bf16.mxu1 %v843_v2 }
  0x32   : > { %726 = vmatpush3.bf16.msra.mxu0 %v810_v21 }
  0x33   : > { %757 = vmatpush3.bf16.msra.mxu1 %v811_v22  ;;  %727 = vmatprep.subr.bf16.mxu0 %v812_v23 }
  0x34   : > { %758 = vmatprep.subr.bf16.mxu1 %v843_v2 }
  0x36   : > { %728 = vmatpush3.bf16.msra.mxu0 %v813_v26 }
  0x37   : > { %759 = vmatpush3.bf16.msra.mxu1 %v814_v27 }
  0x39   : > { %504 = vmatmul.mubr.bf16.vlgmr.msra.gmra.mrb[0].mxu0 %v681_v28 }
  0x3a   : > { %761 = vmatmul.mubr.bf16.vlgmr.msra.gmra.mrb[0].mxu1 %v817_v29 }
 0x10c   : > { %v729_v30 = vpop.f32.mrb[0].mxu0 }
 0x10d   : > { %v545_v31 = vpop.f32.mrb[0].mxu1  ;;  %v730_v32 = vpop.f32.mrb[1].mxu0 }
 0x10e   : > { %v731_v33 = vadd.f32 %v730_v32, %v729_v30  ;;  %v762_v34 = vpop.f32.mrb[1].mxu1  ;;  %v732_v35 = vpop.f32.mrb[2].mxu0  ;;  %556 = sbr.rel (%p708_p7) target bundleno = 289 (0x121), region = 40 }
 0x10f   : > { %v548_v37 = vpop.f32.mrb[2].mxu1  ;;  %v733_v38 = vpop.f32.mrb[3].mxu0 }
 0x110   : > { %v546_v39 = vadd.f32 %v731_v33, %v545_v31  ;;  %v763_v40 = vpop.f32.mrb[3].mxu1 }
 0x112   : > { %v551_v41 = vadd.f32 %v546_v39, %v265_v36 }
 0x114   : > { %552 = vst [vmem:[#allocation2] sm:$0xff] %v551_v41 }
 0x11b   : > { %v557_v42 = vld [vmem:[#allocation2] sm:$0xff] }
 0x11c   : > { %v565_v44 = vadd.f32 %v709_v43, %v557_v42 }
 0x11e   : > { %v566_v45 = vmax.f32 %v565_v44, 0.0 }
 0x120   : > { %567 = vst [vmem:[%s943_s3] sm:$0xff] %v566_v45 }
 0x121 PF: > { %s13_s14 = sadd.s32 1, %s840_s14   ;;  %s944_s12 = smov %s836_s13 }
 0x122   : > { %p10_p8 = scmp.ge.s32.totalorder %s13_s14, 5   ;;  %s945_s13 = smov %s947_s15 }
 0x124   :  { %12 = sbr.rel (!%p10_p8) target bundleno = 2 (0x2), region = 76 }

// kernel: forward.59
= control target key start
LH: loop header
LB: loop body
LE: loop exit
PB: predicated region body
PF: predicated region fallthrough
CT: control target
= control target key end

     0   :  { %s1027_s12 = smov 0   ;;  %s1029_s13 = smov 0   ;;  %s1129_s0 = inlined_call_operand.vmem [shape: bf16[8,1152], index: 0, kind: input, shape index: {}]   ;;  %s1130_s1 = inlined_call_operand.vmem [shape: bf16[1152,256], index: 1, kind: input, shape index: {}]   ;;  %s1131_s2 = inlined_call_operand.vmem [shape: f32[1,256], index: 2, kind: input, shape index: {}]   ;;  %s1132_s3 = inlined_call_operand.vmem [shape: f32[8,256], index: 3, kind: output, shape index: {}]  }
   0x1   :  { %s1031_s14 = smov 0  }
   0x2 LB: > { %s25_s15 = sadd.s32 1, %s999_s13  ;;  %p818_p0 = scmp.ge.s32.totalorder %s1003_s14, 1  ;;  %s1003_s14 = sphi %s1031_s14, %s13_s14   ;;  %s999_s13 = sphi %s1029_s13, %s1134_s13   ;;  %s995_s12 = sphi %s1027_s12, %s1133_s12  }
   0x3   : > { %p26_p1 = scmp.ge.s32.totalorder %s25_s15, 3  ;;  %p194_p2 = scmp.lt.s32.totalorder %s1003_s14, 4 }
   0x5   : > { %s1136_s15 = smov (%p26_p1, %s25_s15), 0  ;;  %p195_p3 = pnand %p818_p0, %p194_p2 }
   0x6   : > { %s240_s16 = smul.u32 (!%p195_p3), 3, %s995_s12  ;;  %p822_p6 = scmp.ne.s32.totalorder (!%p195_p3), %s995_s12, 0 }
   0x7   : > { %198 = sbr.rel (%p195_p3) target bundleno = 319 (0x13f), region = 32 }
   0x8   : > { %s250_s17 = smul.u32 (!%p195_p3), 48, %s995_s12  ;;  %p243_p4 = scmp.lt.s32.totalorder (!%p195_p3), %s240_s16, 8 }
   0xa   : > { %p252_p5 = scmp.lt.s32.totalorder (!%p195_p3), %s250_s17, 143 }
   0xe   : > { %s1138_s16 = smov (!%p243_p4, %s240_s16), 8  ;;  %s1140_s17 = smov (!%p252_p5, %s250_s17), 143 }
   0xf   : > { %s819_s18 = sshll.u32 %s1138_s16, 2  ;;  %s879_s22 = sshll.u32 %s1140_s17, 3  ;;  %v1005_v0 = vmov (!%p822_p6), 0.0  }
  0x10   : > { %s1052_s21 = scalar_lea.vmem %s1129_s0, %s819_s18  ;;  %s1057_s25 = scalar_lea.vmem %s1130_s1, %s879_s22  ;;  %282 = vst [vmem:[#allocation2] sm:$0xff] (!%p822_p6), %v1005_v0  ;;  %283 = vst [vmem:[#allocation2 + $0x8] sm:$0xff] (!%p822_p6), %v1005_v0 }
  0x11   : > { %281 = sbr.rel (%p822_p6) target bundleno = 24 (0x18), region = 36 }
  0x18 PF: > { %v906_v1 = vld [vmem:[%s1057_s25 + $0x4] ss:$8 sps:$4 sm:$0xff]   ;;  %v908_v2 = vld [vmem:[%s1057_s25] ss:$8 sps:$4 sm:$0xff]   ;;  %v1006_v3 = vmov 0   ;;  %p874_p7 = scmp.ne.s32.totalorder %s995_s12, 2 }
  0x19   : > { %660 = vmatprep.mubr.bf16.mxu1 %v1006_v3  ;;  %587 = vmatprep.subr.bf16.mxu0 %v906_v1  ;;  %v909_v4 = vld [vmem:[%s1057_s25 + $0x14] ss:$8 sps:$4 sm:$0xff]   ;;  %v911_v5 = vld [vmem:[%s1057_s25 + $0x10] ss:$8 sps:$4 sm:$0xff]   ;;  %v912_v6 = vld [vmem:[%s1057_s25 + $0x24] ss:$8 sps:$4 sm:$0xff]  }
  0x1a   : > { %588 = vmatpush1.bf16.msra.mxu0 %v908_v2  ;;  %v914_v7 = vld [vmem:[%s1057_s25 + $0x20] ss:$8 sps:$4 sm:$0xff]   ;;  %v915_v8 = vld [vmem:[%s1057_s25 + $0x34] ss:$8 sps:$4 sm:$0xff]   ;;  %v917_v9 = vld [vmem:[%s1057_s25 + $0x30] ss:$8 sps:$4 sm:$0xff]  }
  0x1b   : > { %589 = vmatprep.subr.bf16.mxu0 %v909_v4  ;;  %v930_v10 = vld [vmem:[%s1057_s25 + $0x104] ss:$8 sps:$4 sm:$0xff]   ;;  %v932_v11 = vld [vmem:[%s1057_s25 + $0x100] ss:$8 sps:$4 sm:$0xff]   ;;  %v936_v13 = vld [vmem:[%s1057_s25 + $0x114] ss:$8 sps:$4 sm:$0xff]   ;;  %v681_v4 = vlaneseq (!%p874_p7) }
  0x1c   : > { %v918_v12 = vld [vmem:[%s1057_s25 + $0x44] ss:$8 sps:$4 sm:$0xff]   ;;  %628 = vmatprep.subr.bf16.mxu1 %v930_v10  ;;  %v938_v14 = vld [vmem:[%s1057_s25 + $0x110] ss:$8 sps:$4 sm:$0xff]   ;;  %v920_v15 = vld [vmem:[%s1057_s25 + $0x40] ss:$8 sps:$4 sm:$0xff]  }
  0x1d   : > { %629 = vmatpush1.bf16.msra.mxu1 %v932_v11  ;;  %v921_v16 = vld [vmem:[%s1057_s25 + $0x54] ss:$8 sps:$4 sm:$0xff]   ;;  %v942_v17 = vld [vmem:[%s1057_s25 + $0x124] ss:$8 sps:$4 sm:$0xff]   ;;  %v944_v18 = vld [vmem:[%s1057_s25 + $0x120] ss:$8 sps:$4 sm:$0xff]  }
  0x1e   : > { %590 = vmatpush1.bf16.msra.mxu0 %v911_v5  ;;  %630 = vmatprep.subr.bf16.mxu1 %v936_v13  ;;  %v923_v19 = vld [vmem:[%s1057_s25 + $0x50] ss:$8 sps:$4 sm:$0xff]   ;;  %v948_v20 = vld [vmem:[%s1057_s25 + $0x134] ss:$8 sps:$4 sm:$0xff]   ;;  %v924_v21 = vld [vmem:[%s1057_s25 + $0x64] ss:$8 sps:$4 sm:$0xff]  }
  0x1f   : > { %591 = vmatprep.subr.bf16.mxu0 %v912_v6  ;;  %v950_v22 = vld [vmem:[%s1057_s25 + $0x130] ss:$8 sps:$4 sm:$0xff]   ;;  %v926_v23 = vld [vmem:[%s1057_s25 + $0x60] ss:$8 sps:$4 sm:$0xff]   ;;  %v954_v24 = vld [vmem:[%s1057_s25 + $0x144] ss:$8 sps:$4 sm:$0xff]  }
  0x20   : > { %v927_v25 = vld [vmem:[%s1057_s25 + $0x74] ss:$8 sps:$4 sm:$0xff]   ;;  %v956_v26 = vld [vmem:[%s1057_s25 + $0x140] ss:$8 sps:$4 sm:$0xff]   ;;  %v929_v27 = vld [vmem:[%s1057_s25 + $0x70] ss:$8 sps:$4 sm:$0xff]  }
  0x21   : > { %631 = vmatpush1.bf16.msra.mxu1 %v938_v14  ;;  %v960_v28 = vld [vmem:[%s1057_s25 + $0x154] ss:$8 sps:$4 sm:$0xff]   ;;  %v933_v29 = vld [vmem:[%s1057_s25 + $0x84] ss:$8 sps:$4 sm:$0xff]   ;;  %v962_v30 = vld [vmem:[%s1057_s25 + $0x150] ss:$8 sps:$4 sm:$0xff]  }
  0x22   : > { %592 = vmatpush1.bf16.msra.mxu0 %v914_v7  ;;  %632 = vmatprep.subr.bf16.mxu1 %v942_v17  ;;  %v935_v31 = vld [vmem:[%s1057_s25 + $0x80] ss:$8 sps:$4 sm:$0xff]   ;;  %v966_v32 = vld [vmem:[%s1057_s25 + $0x164] ss:$8 sps:$4 sm:$0xff]   ;;  %v939_v33 = vld [vmem:[%s1057_s25 + $0x94] ss:$8 sps:$4 sm:$0xff]  }
  0x23   : > { %593 = vmatprep.subr.bf16.mxu0 %v915_v8  ;;  %v286_v34 = vld [vmem:[%s1052_s21] sm:$0xff]  ;;  %v941_v37 = vld [vmem:[%s1057_s25 + $0x90] ss:$8 sps:$4 sm:$0xff]   ;;  %v972_v38 = vld [vmem:[%s1057_s25 + $0x174] ss:$8 sps:$4 sm:$0xff]   ;;  %v682_v5 = vshrl.u32 (!%p874_p7), %v681_v4, 7 }
  0x24   : > { %v824_v35 = vcombine.high %v286_v34, %v286_v34  ;;  %v968_v36 = vld [vmem:[%s1057_s25 + $0x160] ss:$8 sps:$4 sm:$0xff]   ;;  %v945_v39 = vld [vmem:[%s1057_s25 + $0xa4] ss:$8 sps:$4 sm:$0xff]   ;;  %v974_v40 = vld [vmem:[%s1057_s25 + $0x170] ss:$8 sps:$4 sm:$0xff]   ;;  %v823_v53 = vcombine.low %v286_v34, %v286_v34 }
  0x25   : > { %633 = vmatpush1.bf16.msra.mxu1 %v944_v18  ;;  %v947_v41 = vld [vmem:[%s1057_s25 + $0xa0] ss:$8 sps:$4 sm:$0xff]   ;;  %v951_v42 = vld [vmem:[%s1057_s25 + $0xb4] ss:$8 sps:$4 sm:$0xff]   ;;  %v953_v44 = vld [vmem:[%s1057_s25 + $0xb0] ss:$8 sps:$4 sm:$0xff]  }
  0x26   : > { %594 = vmatpush1.bf16.msra.mxu0 %v917_v9  ;;  %634 = vmatprep.subr.bf16.mxu1 %v948_v20  ;;  %v978_v43 = vld [vmem:[%s1052_s21 + $0x8] ss:$0 sps:$4 sm:$0xff]   ;;  %v957_v45 = vld [vmem:[%s1057_s25 + $0xc4] ss:$8 sps:$4 sm:$0xff]   ;;  %v963_v47 = vld [vmem:[%s1057_s25 + $0xd4] ss:$8 sps:$4 sm:$0xff]  }
  0x27   : > { %595 = vmatprep.subr.bf16.mxu0 %v918_v12  ;;  %619 = vmatprep.mubr.bf16.mxu0 %v824_v35  ;;  %v959_v46 = vld [vmem:[%s1057_s25 + $0xc0] ss:$8 sps:$4 sm:$0xff]   ;;  %v965_v48 = vld [vmem:[%s1057_s25 + $0xd0] ss:$8 sps:$4 sm:$0xff]   ;;  %v969_v49 = vld [vmem:[%s1057_s25 + $0xe4] ss:$8 sps:$4 sm:$0xff]  }
  0x28   : > { %v971_v50 = vld [vmem:[%s1057_s25 + $0xe0] ss:$8 sps:$4 sm:$0xff]   ;;  %v975_v51 = vld [vmem:[%s1057_s25 + $0xf4] ss:$8 sps:$4 sm:$0xff]   ;;  %v977_v52 = vld [vmem:[%s1057_s25 + $0xf0] ss:$8 sps:$4 sm:$0xff]  }
  0x29   : > { %635 = vmatpush1.bf16.msra.mxu1 %v950_v22  ;;  %v284_v58 = vld [vmem:[#allocation2] sm:$0xff]  ;;  %v285_v61 = vld [vmem:[#allocation2 + $0x8] sm:$0xff]  ;;  %v683_v7 = vsub.s32 (!%p874_p7), 0, %v682_v5  ;;  %v687_v8 = vsub.s32 (!%p874_p7), 1, %v682_v5 }
  0x2a   : > { %596 = vmatpush1.bf16.msra.mxu0 %v920_v15  ;;  %636 = vmatprep.subr.bf16.mxu1 %v954_v24  ;;  %v679_v6 = vld [vmem:[%s1131_s2] sm:$0x3] (!%p874_p7) }
  0x2b   : > { %597 = vmatprep.subr.bf16.mxu0 %v921_v16  ;;  %v684_v11 = vrot.slane (!%p874_p7), %v679_v6, %v683_v7  ;;  %v688_v12 = vrot.slane (!%p874_p7), %v679_v6, %v687_v8 }
  0x2d   : > { %637 = vmatpush1.bf16.msra.mxu1 %v956_v26 }
  0x2e   : > { %598 = vmatpush1.bf16.msra.mxu0 %v923_v19  ;;  %638 = vmatprep.subr.bf16.mxu1 %v960_v28 }
  0x2f   : > { %599 = vmatprep.subr.bf16.mxu0 %v924_v21 }
  0x31   : > { %639 = vmatpush1.bf16.msra.mxu1 %v962_v30 }
  0x32   : > { %600 = vmatpush1.bf16.msra.mxu0 %v926_v23  ;;  %640 = vmatprep.subr.bf16.mxu1 %v966_v32 }
  0x33   : > { %601 = vmatprep.subr.bf16.mxu0 %v927_v25 }
  0x35   : > { %641 = vmatpush1.bf16.msra.mxu1 %v968_v36 }
  0x36   : > { %602 = vmatpush1.bf16.msra.mxu0 %v929_v27  ;;  %642 = vmatprep.subr.bf16.mxu1 %v972_v38 }
  0x37   : > { %603 = vmatprep.subr.bf16.mxu0 %v933_v29 }
  0x39   : > { %643 = vmatpush1.bf16.msra.mxu1 %v974_v40 }
  0x3a   : > { %604 = vmatpush1.bf16.msra.mxu0 %v935_v31 }
  0x3b   : > { %605 = vmatprep.subr.bf16.mxu0 %v939_v33 }
  0x3c   : > { %661 = vmatmul.mubr.bf16.vlgmr.msra.gmra.mrb[0].mxu1 %v978_v43 }
  0x3e   : > { %606 = vmatpush1.bf16.msra.mxu0 %v941_v37 }
  0x3f   : > { %607 = vmatprep.subr.bf16.mxu0 %v945_v39 }
  0x42   : > { %608 = vmatpush1.bf16.msra.mxu0 %v947_v41 }
  0x43   : > { %609 = vmatprep.subr.bf16.mxu0 %v951_v42 }
  0x46   : > { %610 = vmatpush1.bf16.msra.mxu0 %v953_v44 }
  0x47   : > { %611 = vmatprep.subr.bf16.mxu0 %v957_v45 }
  0x4a   : > { %612 = vmatpush1.bf16.msra.mxu0 %v959_v46 }
  0x4b   : > { %613 = vmatprep.subr.bf16.mxu0 %v963_v47 }
  0x4e   : > { %614 = vmatpush1.bf16.msra.mxu0 %v965_v48 }
  0x4f   : > { %615 = vmatprep.subr.bf16.mxu0 %v969_v49 }
  0x52   : > { %616 = vmatpush1.bf16.msra.mxu0 %v971_v50 }
  0x53   : > { %617 = vmatprep.subr.bf16.mxu0 %v975_v51 }
  0x56   : > { %618 = vmatpush1.bf16.msra.mxu0 %v977_v52 }
  0x59   : > { %620 = vmatmul.mubr.bf16.vlgmr.msra.gmra.mrb[0].mxu0 %v823_v53 }
 0x10f   : > { %v662_v54 = vpop.f32.mrb[0].mxu1 }
 0x110   : > { %v664_v55 = vpop.f32.mrb[1].mxu1 }
 0x111   : > { %v666_v56 = vpop.f32.mrb[2].mxu1 }
 0x112   : > { %v667_v57 = vpop.f32.mrb[3].mxu1 }
 0x12c   : > { %v621_v59 = vpop.f32.mrb[0].mxu0  ;;  %676 = sbr.rel (%p874_p7) target bundleno = 319 (0x13f), region = 40 }
 0x12d   : > { %v663_v60 = vadd.f32 %v662_v54, %v621_v59  ;;  %v623_v62 = vpop.f32.mrb[1].mxu0 }
 0x12e   : > { %v665_v63 = vadd.f32 %v664_v55, %v623_v62  ;;  %v625_v0 = vpop.f32.mrb[2].mxu0 }
 0x12f   : > { %v669_v1 = vadd.f32 %v663_v60, %v284_v58  ;;  %v626_v2 = vpop.f32.mrb[3].mxu0 }
 0x130   : > { %v670_v3 = vadd.f32 %v665_v63, %v285_v61 }
 0x131   : > { %671 = vst [vmem:[#allocation2] sm:$0xff] %v669_v1 }
 0x132   : > { %672 = vst [vmem:[#allocation2 + $0x8] sm:$0xff] %v670_v3 }
 0x138   : > { %v677_v9 = vld [vmem:[#allocation2] sm:$0xff] }
 0x139   : > { %v678_v10 = vld [vmem:[#allocation2 + $0x8] sm:$0xff]  ;;  %v691_v13 = vadd.f32 %v684_v11, %v677_v9 }
 0x13a   : > { %v692_v14 = vadd.f32 %v688_v12, %v678_v10 }
 0x13b   : > { %v693_v15 = vmax.f32 %v691_v13, 0.0 }
 0x13c   : > { %v694_v16 = vmax.f32 %v692_v14, 0.0 }
 0x13d   : > { %695 = vst [vmem:[%s1132_s3] sm:$0xff] %v693_v15 }
 0x13e   : > { %696 = vst [vmem:[%s1132_s3 + $0x8] sm:$0xff] %v694_v16 }
 0x13f PF: > { %s13_s14 = sadd.s32 1, %s1003_s14   ;;  %s1133_s12 = smov %s999_s13 }
 0x140   : > { %p10_p8 = scmp.ge.s32.totalorder %s13_s14, 5   ;;  %s1134_s13 = smov %s1136_s15 }
 0x142   :  { %12 = sbr.rel (!%p10_p8) target bundleno = 2 (0x2), region = 76 }

// kernel: forward.60
= control target key start
LH: loop header
LB: loop body
LE: loop exit
PB: predicated region body
PF: predicated region fallthrough
CT: control target
= control target key end

     0   :  { %v231_v1 = vmov 0   ;;  %v172_v18 = vlaneseq  ;;  %s312_s1 = inlined_call_operand.vmem [shape: bf16[128,256], index: 1, kind: input, shape index: {}]   ;;  %s313_s0 = inlined_call_operand.vmem [shape: bf16[8,128], index: 0, kind: input, shape index: {}]   ;;  %s314_s2 = inlined_call_operand.vmem [shape: f32[1,256], index: 2, kind: input, shape index: {}]   ;;  %s315_s3 = inlined_call_operand.vmem [shape: f32[8,256], index: 3, kind: output, shape index: {}]  }
   0x1   :  { %v207_v0 = vld [vmem:[%s312_s1 + $0x4] ss:$8 sps:$4 sm:$0xff]   ;;  %152 = vmatprep.mubr.bf16.mxu0 %v231_v1  ;;  %v209_v2 = vld [vmem:[%s312_s1] ss:$8 sps:$4 sm:$0xff]   ;;  %v210_v3 = vld [vmem:[%s312_s1 + $0x14] ss:$8 sps:$4 sm:$0xff]  }
   0x2   :  { %120 = vmatprep.subr.bf16.mxu0 %v207_v0  ;;  %v212_v4 = vld [vmem:[%s312_s1 + $0x10] ss:$8 sps:$4 sm:$0xff]   ;;  %v213_v5 = vld [vmem:[%s312_s1 + $0x24] ss:$8 sps:$4 sm:$0xff]   ;;  %v215_v6 = vld [vmem:[%s312_s1 + $0x20] ss:$8 sps:$4 sm:$0xff]  }
   0x3   :  { %121 = vmatpush1.bf16.msra.mxu0 %v209_v2  ;;  %v216_v7 = vld [vmem:[%s312_s1 + $0x34] ss:$8 sps:$4 sm:$0xff]   ;;  %v218_v8 = vld [vmem:[%s312_s1 + $0x30] ss:$8 sps:$4 sm:$0xff]   ;;  %v219_v9 = vld [vmem:[%s312_s1 + $0x44] ss:$8 sps:$4 sm:$0xff]  }
   0x4   :  { %122 = vmatprep.subr.bf16.mxu0 %v210_v3  ;;  %v221_v10 = vld [vmem:[%s312_s1 + $0x40] ss:$8 sps:$4 sm:$0xff]   ;;  %v222_v11 = vld [vmem:[%s312_s1 + $0x54] ss:$8 sps:$4 sm:$0xff]   ;;  %v224_v12 = vld [vmem:[%s312_s1 + $0x50] ss:$8 sps:$4 sm:$0xff]  }
   0x5   :  { %v225_v13 = vld [vmem:[%s312_s1 + $0x64] ss:$8 sps:$4 sm:$0xff]   ;;  %v227_v14 = vld [vmem:[%s312_s1 + $0x60] ss:$8 sps:$4 sm:$0xff]   ;;  %v228_v15 = vld [vmem:[%s312_s1 + $0x74] ss:$8 sps:$4 sm:$0xff]  }
   0x6   :  { %v230_v16 = vld [vmem:[%s312_s1 + $0x70] ss:$8 sps:$4 sm:$0xff]   ;;  %v23_v17 = vld [vmem:[%s313_s0] sm:$0xf]  ;;  %v173_v19 = vshrl.u32 %v172_v18, 7 }
   0x7   :  { %123 = vmatpush1.bf16.msra.mxu0 %v212_v4  ;;  %v170_v21 = vld [vmem:[%s314_s2] sm:$0x3] }
   0x8   :  { %124 = vmatprep.subr.bf16.mxu0 %v213_v5  ;;  %v174_v20 = vsub.s32 0, %v173_v19  ;;  %v178_v22 = vsub.s32 1, %v173_v19 }
   0xa   :  { %v175_v23 = vrot.slane %v170_v21, %v174_v20  ;;  %v179_v24 = vrot.slane %v170_v21, %v178_v22 }
   0xb   :  { %125 = vmatpush1.bf16.msra.mxu0 %v215_v6 }
   0xc   :  { %126 = vmatprep.subr.bf16.mxu0 %v216_v7 }
   0xf   :  { %127 = vmatpush1.bf16.msra.mxu0 %v218_v8 }
  0x10   :  { %128 = vmatprep.subr.bf16.mxu0 %v219_v9 }
  0x13   :  { %129 = vmatpush1.bf16.msra.mxu0 %v221_v10 }
  0x14   :  { %130 = vmatprep.subr.bf16.mxu0 %v222_v11 }
  0x17   :  { %131 = vmatpush1.bf16.msra.mxu0 %v224_v12 }
  0x18   :  { %132 = vmatprep.subr.bf16.mxu0 %v225_v13 }
  0x1b   :  { %133 = vmatpush1.bf16.msra.mxu0 %v227_v14 }
  0x1c   :  { %134 = vmatprep.subr.bf16.mxu0 %v228_v15 }
  0x1f   :  { %135 = vmatpush1.bf16.msra.mxu0 %v230_v16 }
  0x22   :  { %153 = vmatmul.mubr.bf16.vlgmr.msra.gmra.mrb[0].mxu0 %v23_v17 }
  0xf5   :  { %v154_v25 = vpop.f32.mrb[0].mxu0 }
  0xf6   :  { %v182_v26 = vadd.f32 %v175_v23, %v154_v25  ;;  %v156_v27 = vpop.f32.mrb[1].mxu0 }
  0xf7   :  { %v183_v28 = vadd.f32 %v179_v24, %v156_v27  ;;  %v158_v29 = vpop.f32.mrb[2].mxu0 }
  0xf8   :  { %184 = vst [vmem:[%s315_s3] sm:$0xff] %v182_v26  ;;  %v159_v30 = vpop.f32.mrb[3].mxu0 }
  0xf9   :  { %185 = vst [vmem:[%s315_s3 + $0x8] sm:$0xff] %v183_v28 }

// kernel: forward.62
= control target key start
LH: loop header
LB: loop body
LE: loop exit
PB: predicated region body
PF: predicated region fallthrough
CT: control target
= control target key end

     0   :  { %s1027_s12 = smov 0   ;;  %s1029_s13 = smov 0   ;;  %s1129_s0 = inlined_call_operand.vmem [shape: bf16[8,2304], index: 0, kind: input, shape index: {}]   ;;  %s1130_s1 = inlined_call_operand.vmem [shape: bf16[2304,256], index: 1, kind: input, shape index: {}]   ;;  %s1131_s2 = inlined_call_operand.vmem [shape: f32[1,256], index: 2, kind: input, shape index: {}]   ;;  %s1132_s3 = inlined_call_operand.vmem [shape: f32[8,256], index: 3, kind: output, shape index: {}]  }
   0x1   :  { %s1031_s14 = smov 0  }
   0x2 LB: > { %s25_s15 = sadd.s32 1, %s999_s13  ;;  %p818_p0 = scmp.ge.s32.totalorder %s1003_s14, 1  ;;  %s1003_s14 = sphi %s1031_s14, %s13_s14   ;;  %s999_s13 = sphi %s1029_s13, %s1134_s13   ;;  %s995_s12 = sphi %s1027_s12, %s1133_s12  }
   0x3   : > { %p26_p1 = scmp.ge.s32.totalorder %s25_s15, 6  ;;  %p194_p2 = scmp.lt.s32.totalorder %s1003_s14, 7 }
   0x5   : > { %s1136_s15 = smov (%p26_p1, %s25_s15), 0  ;;  %p195_p3 = pnand %p818_p0, %p194_p2 }
   0x6   : > { %s240_s16 = smul.u32 (!%p195_p3), 3, %s995_s12  ;;  %p822_p6 = scmp.ne.s32.totalorder (!%p195_p3), %s995_s12, 0 }
   0x7   : > { %198 = sbr.rel (%p195_p3) target bundleno = 319 (0x13f), region = 32 }
   0x8   : > { %s250_s17 = smul.u32 (!%p195_p3), 48, %s995_s12  ;;  %p243_p4 = scmp.lt.s32.totalorder (!%p195_p3), %s240_s16, 17 }
   0xa   : > { %p252_p5 = scmp.lt.s32.totalorder (!%p195_p3), %s250_s17, 287 }
   0xe   : > { %s1138_s16 = smov (!%p243_p4, %s240_s16), 17  ;;  %s1140_s17 = smov (!%p252_p5, %s250_s17), 287 }
   0xf   : > { %s819_s18 = sshll.u32 %s1138_s16, 2  ;;  %s879_s22 = sshll.u32 %s1140_s17, 3  ;;  %v1005_v0 = vmov (!%p822_p6), 0.0  }
  0x10   : > { %s1052_s21 = scalar_lea.vmem %s1129_s0, %s819_s18  ;;  %s1057_s25 = scalar_lea.vmem %s1130_s1, %s879_s22  ;;  %282 = vst [vmem:[#allocation2] sm:$0xff] (!%p822_p6), %v1005_v0  ;;  %283 = vst [vmem:[#allocation2 + $0x8] sm:$0xff] (!%p822_p6), %v1005_v0 }
  0x11   : > { %281 = sbr.rel (%p822_p6) target bundleno = 24 (0x18), region = 36 }
  0x18 PF: > { %v906_v1 = vld [vmem:[%s1057_s25 + $0x4] ss:$8 sps:$4 sm:$0xff]   ;;  %v908_v2 = vld [vmem:[%s1057_s25] ss:$8 sps:$4 sm:$0xff]   ;;  %v1006_v3 = vmov 0   ;;  %p874_p7 = scmp.ne.s32.totalorder %s995_s12, 5 }
  0x19   : > { %660 = vmatprep.mubr.bf16.mxu1 %v1006_v3  ;;  %587 = vmatprep.subr.bf16.mxu0 %v906_v1  ;;  %v909_v4 = vld [vmem:[%s1057_s25 + $0x14] ss:$8 sps:$4 sm:$0xff]   ;;  %v911_v5 = vld [vmem:[%s1057_s25 + $0x10] ss:$8 sps:$4 sm:$0xff]   ;;  %v912_v6 = vld [vmem:[%s1057_s25 + $0x24] ss:$8 sps:$4 sm:$0xff]  }
  0x1a   : > { %588 = vmatpush1.bf16.msra.mxu0 %v908_v2  ;;  %v914_v7 = vld [vmem:[%s1057_s25 + $0x20] ss:$8 sps:$4 sm:$0xff]   ;;  %v915_v8 = vld [vmem:[%s1057_s25 + $0x34] ss:$8 sps:$4 sm:$0xff]   ;;  %v917_v9 = vld [vmem:[%s1057_s25 + $0x30] ss:$8 sps:$4 sm:$0xff]  }
  0x1b   : > { %589 = vmatprep.subr.bf16.mxu0 %v909_v4  ;;  %v930_v10 = vld [vmem:[%s1057_s25 + $0x104] ss:$8 sps:$4 sm:$0xff]   ;;  %v932_v11 = vld [vmem:[%s1057_s25 + $0x100] ss:$8 sps:$4 sm:$0xff]   ;;  %v936_v13 = vld [vmem:[%s1057_s25 + $0x114] ss:$8 sps:$4 sm:$0xff]   ;;  %v681_v4 = vlaneseq (!%p874_p7) }
  0x1c   : > { %v918_v12 = vld [vmem:[%s1057_s25 + $0x44] ss:$8 sps:$4 sm:$0xff]   ;;  %628 = vmatprep.subr.bf16.mxu1 %v930_v10  ;;  %v938_v14 = vld [vmem:[%s1057_s25 + $0x110] ss:$8 sps:$4 sm:$0xff]   ;;  %v920_v15 = vld [vmem:[%s1057_s25 + $0x40] ss:$8 sps:$4 sm:$0xff]  }
  0x1d   : > { %629 = vmatpush1.bf16.msra.mxu1 %v932_v11  ;;  %v921_v16 = vld [vmem:[%s1057_s25 + $0x54] ss:$8 sps:$4 sm:$0xff]   ;;  %v942_v17 = vld [vmem:[%s1057_s25 + $0x124] ss:$8 sps:$4 sm:$0xff]   ;;  %v944_v18 = vld [vmem:[%s1057_s25 + $0x120] ss:$8 sps:$4 sm:$0xff]  }
  0x1e   : > { %590 = vmatpush1.bf16.msra.mxu0 %v911_v5  ;;  %630 = vmatprep.subr.bf16.mxu1 %v936_v13  ;;  %v923_v19 = vld [vmem:[%s1057_s25 + $0x50] ss:$8 sps:$4 sm:$0xff]   ;;  %v948_v20 = vld [vmem:[%s1057_s25 + $0x134] ss:$8 sps:$4 sm:$0xff]   ;;  %v924_v21 = vld [vmem:[%s1057_s25 + $0x64] ss:$8 sps:$4 sm:$0xff]  }
  0x1f   : > { %591 = vmatprep.subr.bf16.mxu0 %v912_v6  ;;  %v950_v22 = vld [vmem:[%s1057_s25 + $0x130] ss:$8 sps:$4 sm:$0xff]   ;;  %v926_v23 = vld [vmem:[%s1057_s25 + $0x60] ss:$8 sps:$4 sm:$0xff]   ;;  %v954_v24 = vld [vmem:[%s1057_s25 + $0x144] ss:$8 sps:$4 sm:$0xff]  }
  0x20   : > { %v927_v25 = vld [vmem:[%s1057_s25 + $0x74] ss:$8 sps:$4 sm:$0xff]   ;;  %v956_v26 = vld [vmem:[%s1057_s25 + $0x140] ss:$8 sps:$4 sm:$0xff]   ;;  %v929_v27 = vld [vmem:[%s1057_s25 + $0x70] ss:$8 sps:$4 sm:$0xff]  }
  0x21   : > { %631 = vmatpush1.bf16.msra.mxu1 %v938_v14  ;;  %v960_v28 = vld [vmem:[%s1057_s25 + $0x154] ss:$8 sps:$4 sm:$0xff]   ;;  %v933_v29 = vld [vmem:[%s1057_s25 + $0x84] ss:$8 sps:$4 sm:$0xff]   ;;  %v962_v30 = vld [vmem:[%s1057_s25 + $0x150] ss:$8 sps:$4 sm:$0xff]  }
  0x22   : > { %592 = vmatpush1.bf16.msra.mxu0 %v914_v7  ;;  %632 = vmatprep.subr.bf16.mxu1 %v942_v17  ;;  %v935_v31 = vld [vmem:[%s1057_s25 + $0x80] ss:$8 sps:$4 sm:$0xff]   ;;  %v966_v32 = vld [vmem:[%s1057_s25 + $0x164] ss:$8 sps:$4 sm:$0xff]   ;;  %v939_v33 = vld [vmem:[%s1057_s25 + $0x94] ss:$8 sps:$4 sm:$0xff]  }
  0x23   : > { %593 = vmatprep.subr.bf16.mxu0 %v915_v8  ;;  %v286_v34 = vld [vmem:[%s1052_s21] sm:$0xff]  ;;  %v941_v37 = vld [vmem:[%s1057_s25 + $0x90] ss:$8 sps:$4 sm:$0xff]   ;;  %v972_v38 = vld [vmem:[%s1057_s25 + $0x174] ss:$8 sps:$4 sm:$0xff]   ;;  %v682_v5 = vshrl.u32 (!%p874_p7), %v681_v4, 7 }
  0x24   : > { %v824_v35 = vcombine.high %v286_v34, %v286_v34  ;;  %v968_v36 = vld [vmem:[%s1057_s25 + $0x160] ss:$8 sps:$4 sm:$0xff]   ;;  %v945_v39 = vld [vmem:[%s1057_s25 + $0xa4] ss:$8 sps:$4 sm:$0xff]   ;;  %v974_v40 = vld [vmem:[%s1057_s25 + $0x170] ss:$8 sps:$4 sm:$0xff]   ;;  %v823_v53 = vcombine.low %v286_v34, %v286_v34 }
  0x25   : > { %633 = vmatpush1.bf16.msra.mxu1 %v944_v18  ;;  %v947_v41 = vld [vmem:[%s1057_s25 + $0xa0] ss:$8 sps:$4 sm:$0xff]   ;;  %v951_v42 = vld [vmem:[%s1057_s25 + $0xb4] ss:$8 sps:$4 sm:$0xff]   ;;  %v953_v44 = vld [vmem:[%s1057_s25 + $0xb0] ss:$8 sps:$4 sm:$0xff]  }
  0x26   : > { %594 = vmatpush1.bf16.msra.mxu0 %v917_v9  ;;  %634 = vmatprep.subr.bf16.mxu1 %v948_v20  ;;  %v978_v43 = vld [vmem:[%s1052_s21 + $0x8] ss:$0 sps:$4 sm:$0xff]   ;;  %v957_v45 = vld [vmem:[%s1057_s25 + $0xc4] ss:$8 sps:$4 sm:$0xff]   ;;  %v963_v47 = vld [vmem:[%s1057_s25 + $0xd4] ss:$8 sps:$4 sm:$0xff]  }
  0x27   : > { %595 = vmatprep.subr.bf16.mxu0 %v918_v12  ;;  %619 = vmatprep.mubr.bf16.mxu0 %v824_v35  ;;  %v959_v46 = vld [vmem:[%s1057_s25 + $0xc0] ss:$8 sps:$4 sm:$0xff]   ;;  %v965_v48 = vld [vmem:[%s1057_s25 + $0xd0] ss:$8 sps:$4 sm:$0xff]   ;;  %v969_v49 = vld [vmem:[%s1057_s25 + $0xe4] ss:$8 sps:$4 sm:$0xff]  }
  0x28   : > { %v971_v50 = vld [vmem:[%s1057_s25 + $0xe0] ss:$8 sps:$4 sm:$0xff]   ;;  %v975_v51 = vld [vmem:[%s1057_s25 + $0xf4] ss:$8 sps:$4 sm:$0xff]   ;;  %v977_v52 = vld [vmem:[%s1057_s25 + $0xf0] ss:$8 sps:$4 sm:$0xff]  }
  0x29   : > { %635 = vmatpush1.bf16.msra.mxu1 %v950_v22  ;;  %v284_v58 = vld [vmem:[#allocation2] sm:$0xff]  ;;  %v285_v61 = vld [vmem:[#allocation2 + $0x8] sm:$0xff]  ;;  %v683_v7 = vsub.s32 (!%p874_p7), 0, %v682_v5  ;;  %v687_v8 = vsub.s32 (!%p874_p7), 1, %v682_v5 }
  0x2a   : > { %596 = vmatpush1.bf16.msra.mxu0 %v920_v15  ;;  %636 = vmatprep.subr.bf16.mxu1 %v954_v24  ;;  %v679_v6 = vld [vmem:[%s1131_s2] sm:$0x3] (!%p874_p7) }
  0x2b   : > { %597 = vmatprep.subr.bf16.mxu0 %v921_v16  ;;  %v684_v11 = vrot.slane (!%p874_p7), %v679_v6, %v683_v7  ;;  %v688_v12 = vrot.slane (!%p874_p7), %v679_v6, %v687_v8 }
  0x2d   : > { %637 = vmatpush1.bf16.msra.mxu1 %v956_v26 }
  0x2e   : > { %598 = vmatpush1.bf16.msra.mxu0 %v923_v19  ;;  %638 = vmatprep.subr.bf16.mxu1 %v960_v28 }
  0x2f   : > { %599 = vmatprep.subr.bf16.mxu0 %v924_v21 }
  0x31   : > { %639 = vmatpush1.bf16.msra.mxu1 %v962_v30 }
  0x32   : > { %600 = vmatpush1.bf16.msra.mxu0 %v926_v23  ;;  %640 = vmatprep.subr.bf16.mxu1 %v966_v32 }
  0x33   : > { %601 = vmatprep.subr.bf16.mxu0 %v927_v25 }
  0x35   : > { %641 = vmatpush1.bf16.msra.mxu1 %v968_v36 }
  0x36   : > { %602 = vmatpush1.bf16.msra.mxu0 %v929_v27  ;;  %642 = vmatprep.subr.bf16.mxu1 %v972_v38 }
  0x37   : > { %603 = vmatprep.subr.bf16.mxu0 %v933_v29 }
  0x39   : > { %643 = vmatpush1.bf16.msra.mxu1 %v974_v40 }
  0x3a   : > { %604 = vmatpush1.bf16.msra.mxu0 %v935_v31 }
  0x3b   : > { %605 = vmatprep.subr.bf16.mxu0 %v939_v33 }
  0x3c   : > { %661 = vmatmul.mubr.bf16.vlgmr.msra.gmra.mrb[0].mxu1 %v978_v43 }
  0x3e   : > { %606 = vmatpush1.bf16.msra.mxu0 %v941_v37 }
  0x3f   : > { %607 = vmatprep.subr.bf16.mxu0 %v945_v39 }
  0x42   : > { %608 = vmatpush1.bf16.msra.mxu0 %v947_v41 }
  0x43   : > { %609 = vmatprep.subr.bf16.mxu0 %v951_v42 }
  0x46   : > { %610 = vmatpush1.bf16.msra.mxu0 %v953_v44 }
  0x47   : > { %611 = vmatprep.subr.bf16.mxu0 %v957_v45 }
  0x4a   : > { %612 = vmatpush1.bf16.msra.mxu0 %v959_v46 }
  0x4b   : > { %613 = vmatprep.subr.bf16.mxu0 %v963_v47 }
  0x4e   : > { %614 = vmatpush1.bf16.msra.mxu0 %v965_v48 }
  0x4f   : > { %615 = vmatprep.subr.bf16.mxu0 %v969_v49 }
  0x52   : > { %616 = vmatpush1.bf16.msra.mxu0 %v971_v50 }
  0x53   : > { %617 = vmatprep.subr.bf16.mxu0 %v975_v51 }
  0x56   : > { %618 = vmatpush1.bf16.msra.mxu0 %v977_v52 }
  0x59   : > { %620 = vmatmul.mubr.bf16.vlgmr.msra.gmra.mrb[0].mxu0 %v823_v53 }
 0x10f   : > { %v662_v54 = vpop.f32.mrb[0].mxu1 }
 0x110   : > { %v664_v55 = vpop.f32.mrb[1].mxu1 }
 0x111   : > { %v666_v56 = vpop.f32.mrb[2].mxu1 }
 0x112   : > { %v667_v57 = vpop.f32.mrb[3].mxu1 }
 0x12c   : > { %v621_v59 = vpop.f32.mrb[0].mxu0  ;;  %676 = sbr.rel (%p874_p7) target bundleno = 319 (0x13f), region = 40 }
 0x12d   : > { %v663_v60 = vadd.f32 %v662_v54, %v621_v59  ;;  %v623_v62 = vpop.f32.mrb[1].mxu0 }
 0x12e   : > { %v665_v63 = vadd.f32 %v664_v55, %v623_v62  ;;  %v625_v0 = vpop.f32.mrb[2].mxu0 }
 0x12f   : > { %v669_v1 = vadd.f32 %v663_v60, %v284_v58  ;;  %v626_v2 = vpop.f32.mrb[3].mxu0 }
 0x130   : > { %v670_v3 = vadd.f32 %v665_v63, %v285_v61 }
 0x131   : > { %671 = vst [vmem:[#allocation2] sm:$0xff] %v669_v1 }
 0x132   : > { %672 = vst [vmem:[#allocation2 + $0x8] sm:$0xff] %v670_v3 }
 0x138   : > { %v677_v9 = vld [vmem:[#allocation2] sm:$0xff] }
 0x139   : > { %v678_v10 = vld [vmem:[#allocation2 + $0x8] sm:$0xff]  ;;  %v691_v13 = vadd.f32 %v684_v11, %v677_v9 }
 0x13a   : > { %v692_v14 = vadd.f32 %v688_v12, %v678_v10 }
 0x13b   : > { %v693_v15 = vmax.f32 %v691_v13, 0.0 }
 0x13c   : > { %v694_v16 = vmax.f32 %v692_v14, 0.0 }
 0x13d   : > { %695 = vst [vmem:[%s1132_s3] sm:$0xff] %v693_v15 }
 0x13e   : > { %696 = vst [vmem:[%s1132_s3 + $0x8] sm:$0xff] %v694_v16 }
 0x13f PF: > { %s13_s14 = sadd.s32 1, %s1003_s14   ;;  %s1133_s12 = smov %s999_s13 }
 0x140   : > { %p10_p8 = scmp.ge.s32.totalorder %s13_s14, 8   ;;  %s1134_s13 = smov %s1136_s15 }
 0x142   :  { %12 = sbr.rel (!%p10_p8) target bundleno = 2 (0x2), region = 76 }

// kernel: forward.61
= control target key start
LH: loop header
LB: loop body
LE: loop exit
PB: predicated region body
PF: predicated region fallthrough
CT: control target
= control target key end

     0   :  { %s1121_s15 = smov 0   ;;  %s1123_s16 = smov 0   ;;  %s1229_s0 = inlined_call_operand.vmem [shape: bf16[8,2304], index: 0, kind: input, shape index: {}]   ;;  %s1230_s1 = inlined_call_operand.vmem [shape: bf16[2304,256], index: 1, kind: input, shape index: {}]   ;;  %s1231_s2 = inlined_call_operand.vmem [shape: f32[1,256], index: 2, kind: input, shape index: {}]   ;;  %s1232_s3 = inlined_call_operand.vmem [shape: f32[8,256], index: 3, kind: input, shape index: {}]   ;;  %s1233_s4 = inlined_call_operand.vmem [shape: f32[8,256], index: 4, kind: output, shape index: {}]  }
   0x1   :  { %s1125_s17 = smov 0  }
   0x2 LB: > { %s26_s18 = sadd.s32 1, %s1088_s16  ;;  %p907_p0 = scmp.ge.s32.totalorder %s1092_s17, 1  ;;  %s1092_s17 = sphi %s1125_s17, %s14_s17   ;;  %s1088_s16 = sphi %s1123_s16, %s1235_s16   ;;  %s1084_s15 = sphi %s1121_s15, %s1234_s15  }
   0x3   : > { %p27_p1 = scmp.ge.s32.totalorder %s26_s18, 6  ;;  %p236_p2 = scmp.lt.s32.totalorder %s1092_s17, 7 }
   0x5   : > { %s1237_s18 = smov (%p27_p1, %s26_s18), 0  ;;  %p237_p3 = pnand %p907_p0, %p236_p2 }
   0x6   : > { %s293_s19 = smul.u32 (!%p237_p3), 3, %s1084_s15  ;;  %p911_p6 = scmp.ne.s32.totalorder (!%p237_p3), %s1084_s15, 0 }
   0x7   : > { %240 = sbr.rel (%p237_p3) target bundleno = 321 (0x141), region = 36 }
   0x8   : > { %s303_s20 = smul.u32 (!%p237_p3), 48, %s1084_s15  ;;  %p296_p4 = scmp.lt.s32.totalorder (!%p237_p3), %s293_s19, 17 }
   0xa   : > { %p305_p5 = scmp.lt.s32.totalorder (!%p237_p3), %s303_s20, 287 }
   0xe   : > { %s1239_s19 = smov (!%p296_p4, %s293_s19), 17  ;;  %s1241_s20 = smov (!%p305_p5, %s303_s20), 287 }
   0xf   : > { %s908_s21 = sshll.u32 %s1239_s19, 2  ;;  %s968_s25 = sshll.u32 %s1241_s20, 3  ;;  %v1094_v0 = vmov (!%p911_p6), 0.0  }
  0x10   : > { %s1146_s24 = scalar_lea.vmem %s1229_s0, %s908_s21  ;;  %s1151_s28 = scalar_lea.vmem %s1230_s1, %s968_s25  ;;  %345 = vst [vmem:[#allocation2] sm:$0xff] (!%p911_p6), %v1094_v0  ;;  %346 = vst [vmem:[#allocation2 + $0x8] sm:$0xff] (!%p911_p6), %v1094_v0 }
  0x11   : > { %344 = sbr.rel (%p911_p6) target bundleno = 24 (0x18), region = 40 }
  0x18 PF: > { %v995_v1 = vld [vmem:[%s1151_s28 + $0x4] ss:$8 sps:$4 sm:$0xff]   ;;  %v997_v2 = vld [vmem:[%s1151_s28] ss:$8 sps:$4 sm:$0xff]   ;;  %v1095_v3 = vmov 0   ;;  %p963_p7 = scmp.ne.s32.totalorder %s1084_s15, 5 }
  0x19   : > { %723 = vmatprep.mubr.bf16.mxu1 %v1095_v3  ;;  %650 = vmatprep.subr.bf16.mxu0 %v995_v1  ;;  %v998_v4 = vld [vmem:[%s1151_s28 + $0x14] ss:$8 sps:$4 sm:$0xff]   ;;  %v1000_v5 = vld [vmem:[%s1151_s28 + $0x10] ss:$8 sps:$4 sm:$0xff]   ;;  %v1001_v6 = vld [vmem:[%s1151_s28 + $0x24] ss:$8 sps:$4 sm:$0xff]  }
  0x1a   : > { %651 = vmatpush1.bf16.msra.mxu0 %v997_v2  ;;  %v1003_v7 = vld [vmem:[%s1151_s28 + $0x20] ss:$8 sps:$4 sm:$0xff]   ;;  %v1004_v8 = vld [vmem:[%s1151_s28 + $0x34] ss:$8 sps:$4 sm:$0xff]   ;;  %v1006_v9 = vld [vmem:[%s1151_s28 + $0x30] ss:$8 sps:$4 sm:$0xff]  }
  0x1b   : > { %652 = vmatprep.subr.bf16.mxu0 %v998_v4  ;;  %v1019_v10 = vld [vmem:[%s1151_s28 + $0x104] ss:$8 sps:$4 sm:$0xff]   ;;  %v1021_v11 = vld [vmem:[%s1151_s28 + $0x100] ss:$8 sps:$4 sm:$0xff]   ;;  %v1025_v13 = vld [vmem:[%s1151_s28 + $0x114] ss:$8 sps:$4 sm:$0xff]   ;;  %v744_v4 = vlaneseq (!%p963_p7) }
  0x1c   : > { %v1007_v12 = vld [vmem:[%s1151_s28 + $0x44] ss:$8 sps:$4 sm:$0xff]   ;;  %691 = vmatprep.subr.bf16.mxu1 %v1019_v10  ;;  %v1027_v14 = vld [vmem:[%s1151_s28 + $0x110] ss:$8 sps:$4 sm:$0xff]   ;;  %v1009_v15 = vld [vmem:[%s1151_s28 + $0x40] ss:$8 sps:$4 sm:$0xff]  }
  0x1d   : > { %692 = vmatpush1.bf16.msra.mxu1 %v1021_v11  ;;  %v1010_v16 = vld [vmem:[%s1151_s28 + $0x54] ss:$8 sps:$4 sm:$0xff]   ;;  %v1031_v17 = vld [vmem:[%s1151_s28 + $0x124] ss:$8 sps:$4 sm:$0xff]   ;;  %v1033_v18 = vld [vmem:[%s1151_s28 + $0x120] ss:$8 sps:$4 sm:$0xff]  }
  0x1e   : > { %653 = vmatpush1.bf16.msra.mxu0 %v1000_v5  ;;  %693 = vmatprep.subr.bf16.mxu1 %v1025_v13  ;;  %v1012_v19 = vld [vmem:[%s1151_s28 + $0x50] ss:$8 sps:$4 sm:$0xff]   ;;  %v1037_v20 = vld [vmem:[%s1151_s28 + $0x134] ss:$8 sps:$4 sm:$0xff]   ;;  %v1013_v21 = vld [vmem:[%s1151_s28 + $0x64] ss:$8 sps:$4 sm:$0xff]  }
  0x1f   : > { %654 = vmatprep.subr.bf16.mxu0 %v1001_v6  ;;  %v1039_v22 = vld [vmem:[%s1151_s28 + $0x130] ss:$8 sps:$4 sm:$0xff]   ;;  %v1015_v23 = vld [vmem:[%s1151_s28 + $0x60] ss:$8 sps:$4 sm:$0xff]   ;;  %v1043_v24 = vld [vmem:[%s1151_s28 + $0x144] ss:$8 sps:$4 sm:$0xff]  }
  0x20   : > { %v1016_v25 = vld [vmem:[%s1151_s28 + $0x74] ss:$8 sps:$4 sm:$0xff]   ;;  %v1045_v26 = vld [vmem:[%s1151_s28 + $0x140] ss:$8 sps:$4 sm:$0xff]   ;;  %v1018_v27 = vld [vmem:[%s1151_s28 + $0x70] ss:$8 sps:$4 sm:$0xff]  }
  0x21   : > { %694 = vmatpush1.bf16.msra.mxu1 %v1027_v14  ;;  %v1049_v28 = vld [vmem:[%s1151_s28 + $0x154] ss:$8 sps:$4 sm:$0xff]   ;;  %v1022_v29 = vld [vmem:[%s1151_s28 + $0x84] ss:$8 sps:$4 sm:$0xff]   ;;  %v1051_v30 = vld [vmem:[%s1151_s28 + $0x150] ss:$8 sps:$4 sm:$0xff]  }
  0x22   : > { %655 = vmatpush1.bf16.msra.mxu0 %v1003_v7  ;;  %695 = vmatprep.subr.bf16.mxu1 %v1031_v17  ;;  %v1024_v31 = vld [vmem:[%s1151_s28 + $0x80] ss:$8 sps:$4 sm:$0xff]   ;;  %v1055_v32 = vld [vmem:[%s1151_s28 + $0x164] ss:$8 sps:$4 sm:$0xff]   ;;  %v1028_v33 = vld [vmem:[%s1151_s28 + $0x94] ss:$8 sps:$4 sm:$0xff]  }
  0x23   : > { %656 = vmatprep.subr.bf16.mxu0 %v1004_v8  ;;  %v349_v34 = vld [vmem:[%s1146_s24] sm:$0xff]  ;;  %v1030_v37 = vld [vmem:[%s1151_s28 + $0x90] ss:$8 sps:$4 sm:$0xff]   ;;  %v1061_v38 = vld [vmem:[%s1151_s28 + $0x174] ss:$8 sps:$4 sm:$0xff]   ;;  %v745_v5 = vshrl.u32 (!%p963_p7), %v744_v4, 7 }
  0x24   : > { %v913_v35 = vcombine.high %v349_v34, %v349_v34  ;;  %v1057_v36 = vld [vmem:[%s1151_s28 + $0x160] ss:$8 sps:$4 sm:$0xff]   ;;  %v1034_v39 = vld [vmem:[%s1151_s28 + $0xa4] ss:$8 sps:$4 sm:$0xff]   ;;  %v1063_v40 = vld [vmem:[%s1151_s28 + $0x170] ss:$8 sps:$4 sm:$0xff]   ;;  %v912_v53 = vcombine.low %v349_v34, %v349_v34 }
  0x25   : > { %696 = vmatpush1.bf16.msra.mxu1 %v1033_v18  ;;  %v1036_v41 = vld [vmem:[%s1151_s28 + $0xa0] ss:$8 sps:$4 sm:$0xff]   ;;  %v1040_v42 = vld [vmem:[%s1151_s28 + $0xb4] ss:$8 sps:$4 sm:$0xff]   ;;  %v1042_v44 = vld [vmem:[%s1151_s28 + $0xb0] ss:$8 sps:$4 sm:$0xff]  }
  0x26   : > { %657 = vmatpush1.bf16.msra.mxu0 %v1006_v9  ;;  %697 = vmatprep.subr.bf16.mxu1 %v1037_v20  ;;  %v1067_v43 = vld [vmem:[%s1146_s24 + $0x8] ss:$0 sps:$4 sm:$0xff]   ;;  %v1046_v45 = vld [vmem:[%s1151_s28 + $0xc4] ss:$8 sps:$4 sm:$0xff]   ;;  %v1052_v47 = vld [vmem:[%s1151_s28 + $0xd4] ss:$8 sps:$4 sm:$0xff]  }
  0x27   : > { %658 = vmatprep.subr.bf16.mxu0 %v1007_v12  ;;  %682 = vmatprep.mubr.bf16.mxu0 %v913_v35  ;;  %v1048_v46 = vld [vmem:[%s1151_s28 + $0xc0] ss:$8 sps:$4 sm:$0xff]   ;;  %v1054_v48 = vld [vmem:[%s1151_s28 + $0xd0] ss:$8 sps:$4 sm:$0xff]   ;;  %v1058_v49 = vld [vmem:[%s1151_s28 + $0xe4] ss:$8 sps:$4 sm:$0xff]  }
  0x28   : > { %v1060_v50 = vld [vmem:[%s1151_s28 + $0xe0] ss:$8 sps:$4 sm:$0xff]   ;;  %v1064_v51 = vld [vmem:[%s1151_s28 + $0xf4] ss:$8 sps:$4 sm:$0xff]   ;;  %v1066_v52 = vld [vmem:[%s1151_s28 + $0xf0] ss:$8 sps:$4 sm:$0xff]  }
  0x29   : > { %698 = vmatpush1.bf16.msra.mxu1 %v1039_v22  ;;  %v347_v58 = vld [vmem:[#allocation2] sm:$0xff]  ;;  %v348_v61 = vld [vmem:[#allocation2 + $0x8] sm:$0xff]  ;;  %v746_v7 = vsub.s32 (!%p963_p7), 0, %v745_v5  ;;  %v750_v8 = vsub.s32 (!%p963_p7), 1, %v745_v5 }
  0x2a   : > { %659 = vmatpush1.bf16.msra.mxu0 %v1009_v15  ;;  %699 = vmatprep.subr.bf16.mxu1 %v1043_v24  ;;  %v742_v6 = vld [vmem:[%s1231_s2] sm:$0x3] (!%p963_p7)  ;;  %v757_v14 = vld [vmem:[%s1232_s3 + $0x8] sm:$0xff] (!%p963_p7) }
  0x2b   : > { %660 = vmatprep.subr.bf16.mxu0 %v1010_v16  ;;  %v747_v11 = vrot.slane (!%p963_p7), %v742_v6, %v746_v7  ;;  %v751_v12 = vrot.slane (!%p963_p7), %v742_v6, %v750_v8  ;;  %v756_v13 = vld [vmem:[%s1232_s3] sm:$0xff] (!%p963_p7) }
  0x2d   : > { %700 = vmatpush1.bf16.msra.mxu1 %v1045_v26 }
  0x2e   : > { %661 = vmatpush1.bf16.msra.mxu0 %v1012_v19  ;;  %701 = vmatprep.subr.bf16.mxu1 %v1049_v28 }
  0x2f   : > { %662 = vmatprep.subr.bf16.mxu0 %v1013_v21 }
  0x31   : > { %702 = vmatpush1.bf16.msra.mxu1 %v1051_v30 }
  0x32   : > { %663 = vmatpush1.bf16.msra.mxu0 %v1015_v23  ;;  %703 = vmatprep.subr.bf16.mxu1 %v1055_v32 }
  0x33   : > { %664 = vmatprep.subr.bf16.mxu0 %v1016_v25 }
  0x35   : > { %704 = vmatpush1.bf16.msra.mxu1 %v1057_v36 }
  0x36   : > { %665 = vmatpush1.bf16.msra.mxu0 %v1018_v27  ;;  %705 = vmatprep.subr.bf16.mxu1 %v1061_v38 }
  0x37   : > { %666 = vmatprep.subr.bf16.mxu0 %v1022_v29 }
  0x39   : > { %706 = vmatpush1.bf16.msra.mxu1 %v1063_v40 }
  0x3a   : > { %667 = vmatpush1.bf16.msra.mxu0 %v1024_v31 }
  0x3b   : > { %668 = vmatprep.subr.bf16.mxu0 %v1028_v33 }
  0x3c   : > { %724 = vmatmul.mubr.bf16.vlgmr.msra.gmra.mrb[0].mxu1 %v1067_v43 }
  0x3e   : > { %669 = vmatpush1.bf16.msra.mxu0 %v1030_v37 }
  0x3f   : > { %670 = vmatprep.subr.bf16.mxu0 %v1034_v39 }
  0x42   : > { %671 = vmatpush1.bf16.msra.mxu0 %v1036_v41 }
  0x43   : > { %672 = vmatprep.subr.bf16.mxu0 %v1040_v42 }
  0x46   : > { %673 = vmatpush1.bf16.msra.mxu0 %v1042_v44 }
  0x47   : > { %674 = vmatprep.subr.bf16.mxu0 %v1046_v45 }
  0x4a   : > { %675 = vmatpush1.bf16.msra.mxu0 %v1048_v46 }
  0x4b   : > { %676 = vmatprep.subr.bf16.mxu0 %v1052_v47 }
  0x4e   : > { %677 = vmatpush1.bf16.msra.mxu0 %v1054_v48 }
  0x4f   : > { %678 = vmatprep.subr.bf16.mxu0 %v1058_v49 }
  0x52   : > { %679 = vmatpush1.bf16.msra.mxu0 %v1060_v50 }
  0x53   : > { %680 = vmatprep.subr.bf16.mxu0 %v1064_v51 }
  0x56   : > { %681 = vmatpush1.bf16.msra.mxu0 %v1066_v52 }
  0x59   : > { %683 = vmatmul.mubr.bf16.vlgmr.msra.gmra.mrb[0].mxu0 %v912_v53 }
 0x10f   : > { %v725_v54 = vpop.f32.mrb[0].mxu1 }
 0x110   : > { %v727_v55 = vpop.f32.mrb[1].mxu1 }
 0x111   : > { %v729_v56 = vpop.f32.mrb[2].mxu1 }
 0x112   : > { %v730_v57 = vpop.f32.mrb[3].mxu1 }
 0x12c   : > { %v684_v59 = vpop.f32.mrb[0].mxu0  ;;  %739 = sbr.rel (%p963_p7) target bundleno = 321 (0x141), region = 44 }
 0x12d   : > { %v726_v60 = vadd.f32 %v725_v54, %v684_v59  ;;  %v686_v62 = vpop.f32.mrb[1].mxu0 }
 0x12e   : > { %v728_v63 = vadd.f32 %v727_v55, %v686_v62  ;;  %v688_v0 = vpop.f32.mrb[2].mxu0 }
 0x12f   : > { %v732_v1 = vadd.f32 %v726_v60, %v347_v58  ;;  %v689_v2 = vpop.f32.mrb[3].mxu0 }
 0x130   : > { %v733_v3 = vadd.f32 %v728_v63, %v348_v61 }
 0x131   : > { %734 = vst [vmem:[#allocation2] sm:$0xff] %v732_v1 }
 0x132   : > { %735 = vst [vmem:[#allocation2 + $0x8] sm:$0xff] %v733_v3 }
 0x138   : > { %v740_v9 = vld [vmem:[#allocation2] sm:$0xff] }
 0x139   : > { %v741_v10 = vld [vmem:[#allocation2 + $0x8] sm:$0xff]  ;;  %v754_v15 = vadd.f32 %v747_v11, %v740_v9 }
 0x13a   : > { %v755_v16 = vadd.f32 %v751_v12, %v741_v10 }
 0x13b   : > { %v758_v17 = vadd.f32 %v756_v13, %v754_v15 }
 0x13c   : > { %v759_v18 = vadd.f32 %v757_v14, %v755_v16 }
 0x13d   : > { %v760_v19 = vmax.f32 %v758_v17, 0.0 }
 0x13e   : > { %v761_v20 = vmax.f32 %v759_v18, 0.0 }
 0x13f   : > { %762 = vst [vmem:[%s1233_s4] sm:$0xff] %v760_v19 }
 0x140   : > { %763 = vst [vmem:[%s1233_s4 + $0x8] sm:$0xff] %v761_v20 }
 0x141 PF: > { %s14_s17 = sadd.s32 1, %s1092_s17   ;;  %s1234_s15 = smov %s1088_s16 }
 0x142   : > { %p11_p8 = scmp.ge.s32.totalorder %s14_s17, 8   ;;  %s1235_s16 = smov %s1237_s18 }
 0x144   :  { %13 = sbr.rel (!%p11_p8) target bundleno = 2 (0x2), region = 83 }

// kernel: forward.72
= control target key start
LH: loop header
LB: loop body
LE: loop exit
PB: predicated region body
PF: predicated region fallthrough
CT: control target
= control target key end

     0   :  { %s1310_s12 = smov 0   ;;  %s1312_s13 = smov 0   ;;  %s1574_s0 = inlined_call_operand.vmem [shape: bf16[8,2304], index: 0, kind: input, shape index: {}]   ;;  %s1575_s1 = inlined_call_operand.vmem [shape: bf16[2304,512], index: 1, kind: input, shape index: {}]   ;;  %s1576_s2 = inlined_call_operand.vmem [shape: f32[1,512], index: 2, kind: input, shape index: {}]   ;;  %s1577_s3 = inlined_call_operand.vmem [shape: f32[8,512], index: 3, kind: output, shape index: {}]  }
   0x1   :  { %s1314_s14 = smov 0   ;;  %s1316_s15 = smov 0  }
   0x2   :  { %s1318_s16 = smov 0   ;;  %s1320_s17 = smov 0  }
   0x3   :  { %s1322_s18 = smov 0  }
   0x4 LB: > { %s25_s19 = sadd.s32 1, %s1278_s16  ;;  %s28_s20 = sadd.s32 1, %s1282_s17  ;;  %s1286_s18 = sphi %s1322_s18, %s13_s18   ;;  %s1282_s17 = sphi %s1320_s17, %s1583_s17   ;;  %s1278_s16 = sphi %s1318_s16, %s1582_s16   ;;  %s1274_s15 = sphi %s1316_s15, %s1581_s15   ;;  %s1270_s14 = sphi %s1314_s14, %s1580_s14   ;;  %s1266_s13 = sphi %s1312_s13, %s1579_s13   ;;  %s1262_s12 = sphi %s1310_s12, %s1578_s12  }
   0x5   : > { %p26_p0 = scmp.ge.s32.totalorder %s25_s19, 6  ;;  %p76_p1 = scmp.ne.s32.totalorder %s1266_s13, %s1262_s12 }
   0x6   : > { %p77_p2 = scmp.eq.s32.totalorder %s1286_s18, 0  ;;  %s69_s24 = sadd.s32 1, %s1266_s13 }
   0x7   : > { %s1585_s19 = smov (%p26_p0, %s25_s19), 0  ;;  %s1587_s20 = smov (!%p26_p0, %s28_s20), %s1282_s17 }
   0x8   : > { %p78_p3 = por %p77_p2, %p76_p1  ;;  %p30_p4 = scmp.ge.s32.totalorder %s1587_s20, 2 }
   0x9   : > { %s64_s21 = ssub.s32 %s1278_s16, %s1585_s19  ;;  %p1032_p6 = scmp.ge.s32.totalorder %s1286_s18, 12 }
   0xa   : > { %s1589_s20 = smov (%p30_p4, %s1587_s20), 0 }
   0xb   : > { %s65_s22 = ssub.s32 %s1282_s17, %s1589_s20  ;;  %156 = sbr.rel (%p1032_p6) target bundleno = 50 (0x32), region = 16 }
   0xc   : > { %s66_s23 = sor.u32 %s65_s22, %s64_s21 }
   0xd   : > { %p67_p5 = scmp.eq.s32.totalorder %s66_s23, 0 }
   0xf   : > { %s1361_s25 = scalar_select %p67_p5, %s1266_s13, %s69_s24  }
  0x12   : > { %172 = sbr.rel (!%p78_p3) target bundleno = 50 (0x32), region = 24  ;;  %s174_s26 = sand.u32 (%p78_p3), 1, %s1266_s13  }
  0x13   : > { %s1097_s27 = smul.u32 (%p78_p3), 384, %s174_s26  ;;  %s1033_s28 = sshll.u32 (%p78_p3), %s1282_s17, 1 }
  0x14   : > { %s1096_s29 = smul.u32 (%p78_p3), 192, %s1278_s16 }
  0x15   : > { %s1375_s8 = scalar_lea.vmem (%p78_p3), [#allocation3], %s1097_s27 }
  0x16   : > { %s180_s30 = sadd.s32 (%p78_p3), %s1096_s29, %s1033_s28 }
  0x17   : > { %s1035_s4 = sshll.u32 (%p78_p3), %s180_s30, 2 }
  0x18   : > { %s1370_s7 = scalar_lea.vmem (%p78_p3), %s1575_s1, %s1035_s4 }
  0x19   : > { %v304_v0 = vld [vmem:[%s1370_s7] sm:$0xff]  ;;  %v306_v1 = vld [vmem:[%s1370_s7 + $0x10] sm:$0xff] }
  0x1a   : > { %v308_v2 = vld [vmem:[%s1370_s7 + $0x20] sm:$0xff]  ;;  %305 = vst [vmem:[%s1375_s8] sm:$0xff] %v304_v0  ;;  %307 = vst [vmem:[%s1375_s8 + $0x8] sm:$0xff] %v306_v1  ;;  %v310_v3 = vld [vmem:[%s1370_s7 + $0x30] sm:$0xff] }
  0x1b   : > { %309 = vst [vmem:[%s1375_s8 + $0x10] sm:$0xff] %v308_v2  ;;  %v312_v4 = vld [vmem:[%s1370_s7 + $0x40] sm:$0xff]  ;;  %v314_v5 = vld [vmem:[%s1370_s7 + $0x50] sm:$0xff]  ;;  %311 = vst [vmem:[%s1375_s8 + $0x18] sm:$0xff] %v310_v3 }
  0x1c   : > { %313 = vst [vmem:[%s1375_s8 + $0x20] sm:$0xff] %v312_v4  ;;  %315 = vst [vmem:[%s1375_s8 + $0x28] sm:$0xff] %v314_v5  ;;  %v316_v6 = vld [vmem:[%s1370_s7 + $0x60] sm:$0xff]  ;;  %v318_v7 = vld [vmem:[%s1370_s7 + $0x70] sm:$0xff] }
  0x1d   : > { %v320_v8 = vld [vmem:[%s1370_s7 + $0x80] sm:$0xff]  ;;  %317 = vst [vmem:[%s1375_s8 + $0x30] sm:$0xff] %v316_v6  ;;  %319 = vst [vmem:[%s1375_s8 + $0x38] sm:$0xff] %v318_v7  ;;  %v322_v9 = vld [vmem:[%s1370_s7 + $0x90] sm:$0xff] }
  0x1e   : > { %321 = vst [vmem:[%s1375_s8 + $0x40] sm:$0xff] %v320_v8  ;;  %v324_v10 = vld [vmem:[%s1370_s7 + $0xa0] sm:$0xff]  ;;  %v326_v11 = vld [vmem:[%s1370_s7 + $0xb0] sm:$0xff]  ;;  %323 = vst [vmem:[%s1375_s8 + $0x48] sm:$0xff] %v322_v9 }
  0x1f   : > { %325 = vst [vmem:[%s1375_s8 + $0x50] sm:$0xff] %v324_v10  ;;  %327 = vst [vmem:[%s1375_s8 + $0x58] sm:$0xff] %v326_v11  ;;  %v328_v12 = vld [vmem:[%s1370_s7 + $0xc0] sm:$0xff]  ;;  %v330_v13 = vld [vmem:[%s1370_s7 + $0xd0] sm:$0xff] }
  0x20   : > { %v332_v14 = vld [vmem:[%s1370_s7 + $0xe0] sm:$0xff]  ;;  %329 = vst [vmem:[%s1375_s8 + $0x60] sm:$0xff] %v328_v12  ;;  %331 = vst [vmem:[%s1375_s8 + $0x68] sm:$0xff] %v330_v13  ;;  %v334_v15 = vld [vmem:[%s1370_s7 + $0xf0] sm:$0xff] }
  0x21   : > { %333 = vst [vmem:[%s1375_s8 + $0x70] sm:$0xff] %v332_v14  ;;  %v336_v16 = vld [vmem:[%s1370_s7 + $0x100] sm:$0xff]  ;;  %v338_v17 = vld [vmem:[%s1370_s7 + $0x110] sm:$0xff]  ;;  %335 = vst [vmem:[%s1375_s8 + $0x78] sm:$0xff] %v334_v15 }
  0x22   : > { %337 = vst [vmem:[%s1375_s8 + $0x80] sm:$0xff] %v336_v16  ;;  %339 = vst [vmem:[%s1375_s8 + $0x88] sm:$0xff] %v338_v17  ;;  %v340_v18 = vld [vmem:[%s1370_s7 + $0x120] sm:$0xff]  ;;  %v342_v19 = vld [vmem:[%s1370_s7 + $0x130] sm:$0xff] }
  0x23   : > { %v344_v20 = vld [vmem:[%s1370_s7 + $0x140] sm:$0xff]  ;;  %341 = vst [vmem:[%s1375_s8 + $0x90] sm:$0xff] %v340_v18  ;;  %343 = vst [vmem:[%s1375_s8 + $0x98] sm:$0xff] %v342_v19  ;;  %v346_v21 = vld [vmem:[%s1370_s7 + $0x150] sm:$0xff] }
  0x24   : > { %345 = vst [vmem:[%s1375_s8 + $0xa0] sm:$0xff] %v344_v20  ;;  %v348_v22 = vld [vmem:[%s1370_s7 + $0x160] sm:$0xff]  ;;  %v350_v23 = vld [vmem:[%s1370_s7 + $0x170] sm:$0xff]  ;;  %347 = vst [vmem:[%s1375_s8 + $0xa8] sm:$0xff] %v346_v21 }
  0x25   : > { %349 = vst [vmem:[%s1375_s8 + $0xb0] sm:$0xff] %v348_v22  ;;  %351 = vst [vmem:[%s1375_s8 + $0xb8] sm:$0xff] %v350_v23  ;;  %v352_v24 = vld [vmem:[%s1370_s7 + $0x180] sm:$0xff]  ;;  %v354_v25 = vld [vmem:[%s1370_s7 + $0x190] sm:$0xff] }
  0x26   : > { %v356_v26 = vld [vmem:[%s1370_s7 + $0x1a0] sm:$0xff]  ;;  %353 = vst [vmem:[%s1375_s8 + $0xc0] sm:$0xff] %v352_v24  ;;  %355 = vst [vmem:[%s1375_s8 + $0xc8] sm:$0xff] %v354_v25  ;;  %v358_v27 = vld [vmem:[%s1370_s7 + $0x1b0] sm:$0xff] }
  0x27   : > { %357 = vst [vmem:[%s1375_s8 + $0xd0] sm:$0xff] %v356_v26  ;;  %v360_v28 = vld [vmem:[%s1370_s7 + $0x1c0] sm:$0xff]  ;;  %v362_v29 = vld [vmem:[%s1370_s7 + $0x1d0] sm:$0xff]  ;;  %359 = vst [vmem:[%s1375_s8 + $0xd8] sm:$0xff] %v358_v27 }
  0x28   : > { %361 = vst [vmem:[%s1375_s8 + $0xe0] sm:$0xff] %v360_v28  ;;  %363 = vst [vmem:[%s1375_s8 + $0xe8] sm:$0xff] %v362_v29  ;;  %v364_v30 = vld [vmem:[%s1370_s7 + $0x1e0] sm:$0xff]  ;;  %v366_v31 = vld [vmem:[%s1370_s7 + $0x1f0] sm:$0xff] }
  0x29   : > { %v368_v32 = vld [vmem:[%s1370_s7 + $0x200] sm:$0xff]  ;;  %365 = vst [vmem:[%s1375_s8 + $0xf0] sm:$0xff] %v364_v30  ;;  %367 = vst [vmem:[%s1375_s8 + $0xf8] sm:$0xff] %v366_v31  ;;  %v370_v33 = vld [vmem:[%s1370_s7 + $0x210] sm:$0xff] }
  0x2a   : > { %369 = vst [vmem:[%s1375_s8 + $0x100] sm:$0xff] %v368_v32  ;;  %v372_v34 = vld [vmem:[%s1370_s7 + $0x220] sm:$0xff]  ;;  %v374_v35 = vld [vmem:[%s1370_s7 + $0x230] sm:$0xff]  ;;  %371 = vst [vmem:[%s1375_s8 + $0x108] sm:$0xff] %v370_v33 }
  0x2b   : > { %373 = vst [vmem:[%s1375_s8 + $0x110] sm:$0xff] %v372_v34  ;;  %375 = vst [vmem:[%s1375_s8 + $0x118] sm:$0xff] %v374_v35  ;;  %v376_v36 = vld [vmem:[%s1370_s7 + $0x240] sm:$0xff]  ;;  %v378_v37 = vld [vmem:[%s1370_s7 + $0x250] sm:$0xff] }
  0x2c   : > { %v380_v38 = vld [vmem:[%s1370_s7 + $0x260] sm:$0xff]  ;;  %377 = vst [vmem:[%s1375_s8 + $0x120] sm:$0xff] %v376_v36  ;;  %379 = vst [vmem:[%s1375_s8 + $0x128] sm:$0xff] %v378_v37  ;;  %v382_v39 = vld [vmem:[%s1370_s7 + $0x270] sm:$0xff] }
  0x2d   : > { %381 = vst [vmem:[%s1375_s8 + $0x130] sm:$0xff] %v380_v38  ;;  %v384_v40 = vld [vmem:[%s1370_s7 + $0x280] sm:$0xff]  ;;  %v386_v41 = vld [vmem:[%s1370_s7 + $0x290] sm:$0xff]  ;;  %383 = vst [vmem:[%s1375_s8 + $0x138] sm:$0xff] %v382_v39 }
  0x2e   : > { %385 = vst [vmem:[%s1375_s8 + $0x140] sm:$0xff] %v384_v40  ;;  %387 = vst [vmem:[%s1375_s8 + $0x148] sm:$0xff] %v386_v41  ;;  %v388_v42 = vld [vmem:[%s1370_s7 + $0x2a0] sm:$0xff]  ;;  %v390_v43 = vld [vmem:[%s1370_s7 + $0x2b0] sm:$0xff] }
  0x2f   : > { %v392_v44 = vld [vmem:[%s1370_s7 + $0x2c0] sm:$0xff]  ;;  %389 = vst [vmem:[%s1375_s8 + $0x150] sm:$0xff] %v388_v42  ;;  %391 = vst [vmem:[%s1375_s8 + $0x158] sm:$0xff] %v390_v43  ;;  %v394_v45 = vld [vmem:[%s1370_s7 + $0x2d0] sm:$0xff] }
  0x30   : > { %393 = vst [vmem:[%s1375_s8 + $0x160] sm:$0xff] %v392_v44  ;;  %v396_v46 = vld [vmem:[%s1370_s7 + $0x2e0] sm:$0xff]  ;;  %v398_v47 = vld [vmem:[%s1370_s7 + $0x2f0] sm:$0xff]  ;;  %395 = vst [vmem:[%s1375_s8 + $0x168] sm:$0xff] %v394_v45 }
  0x31   : > { %397 = vst [vmem:[%s1375_s8 + $0x170] sm:$0xff] %v396_v46  ;;  %399 = vst [vmem:[%s1375_s8 + $0x178] sm:$0xff] %v398_v47 }
  0x32 PF: > { %p1036_p7 = scmp.ge.s32.totalorder %s1286_s18, 1  ;;  %p412_p8 = scmp.lt.s32.totalorder %s1286_s18, 13 }
  0x34   : > { %p413_p9 = pnand %p1036_p7, %p412_p8 }
  0x35   : > { %s419_s9 = sand.u32 (!%p413_p9), 1, %s1262_s12   ;;  %s459_s10 = smul.u32 (!%p413_p9), 3, %s1270_s14 }
  0x36   : > { %416 = sbr.rel (%p413_p9) target bundleno = 366 (0x16e), region = 66  ;;  %s1038_s21 = sshll.u32 (!%p413_p9), %s1274_s15, 1 }
  0x37   : > { %s1098_s11 = smul.u32 (!%p413_p9), 384, %s419_s9  ;;  %p462_p10 = scmp.lt.s32.totalorder (!%p413_p9), %s459_s10, 17 }
  0x38   : > { %p472_p11 = scmp.lt.s32.totalorder (!%p413_p9), %s1038_s21, 3  ;;  %p1041_p12 = scmp.ne.s32.totalorder (!%p413_p9), %s1270_s14, 0 }
  0x39   : > { %s1492_s5 = scalar_lea.vmem (!%p413_p9), [#allocation3], %s1098_s11 }
  0x3d   : > { %s1591_s10 = smov (!%p462_p10, %s459_s10), 17  ;;  %s1593_s21 = smov (!%p472_p11, %s1038_s21), 3 }
  0x3e   : > { %s1037_s22 = sshll.u32 %s1591_s10, 2  ;;  %s474_s12 = scalar_lea.vmem %s1576_s2, %s1593_s21  ;;  %v1288_v48 = vmov (!%p1041_p12), 0.0  }
  0x3f   : > { %s1480_s26 = scalar_lea.vmem %s1574_s0, %s1037_s22  ;;  %s1040_s29 = sshll.u32 %s1593_s21, 3  ;;  %491 = vst [vmem:[#allocation2] sm:$0xff] (!%p1041_p12), %v1288_v48  ;;  %492 = vst [vmem:[#allocation2 + $0x8] sm:$0xff] (!%p1041_p12), %v1288_v48 }
  0x40   : > { %s1490_s4 = scalar_lea.vmem %s1577_s3, %s1040_s29  ;;  %490 = sbr.rel (%p1041_p12) target bundleno = 71 (0x47), region = 74 }
  0x47 PF: > { %v1157_v49 = vld [vmem:[%s1492_s5 + $0x4] ss:$8 sps:$4 sm:$0xff]   ;;  %v1159_v50 = vld [vmem:[%s1492_s5] ss:$8 sps:$4 sm:$0xff]   ;;  %v1289_v51 = vmov 0   ;;  %v495_v18 = vld [vmem:[%s1480_s26] sm:$0xff] }
  0x48   : > { %869 = vmatprep.mubr.bf16.mxu1 %v1289_v51  ;;  %796 = vmatprep.subr.bf16.mxu0 %v1157_v49  ;;  %v1160_v52 = vld [vmem:[%s1492_s5 + $0x14] ss:$8 sps:$4 sm:$0xff]   ;;  %v1162_v53 = vld [vmem:[%s1492_s5 + $0x10] ss:$8 sps:$4 sm:$0xff]   ;;  %v1163_v54 = vld [vmem:[%s1492_s5 + $0x24] ss:$8 sps:$4 sm:$0xff]   ;;  %v1043_v19 = vcombine.high %v495_v18, %v495_v18  ;;  %v1042_v37 = vcombine.low %v495_v18, %v495_v18 }
  0x49   : > { %797 = vmatpush1.bf16.msra.mxu0 %v1159_v50  ;;  %v1165_v55 = vld [vmem:[%s1492_s5 + $0x20] ss:$8 sps:$4 sm:$0xff]   ;;  %v1166_v56 = vld [vmem:[%s1492_s5 + $0x34] ss:$8 sps:$4 sm:$0xff]   ;;  %v1168_v57 = vld [vmem:[%s1492_s5 + $0x30] ss:$8 sps:$4 sm:$0xff]  }
  0x4a   : > { %798 = vmatprep.subr.bf16.mxu0 %v1160_v52  ;;  %v1181_v58 = vld [vmem:[%s1492_s5 + $0x104] ss:$8 sps:$4 sm:$0xff]   ;;  %v1183_v59 = vld [vmem:[%s1492_s5 + $0x100] ss:$8 sps:$4 sm:$0xff]   ;;  %v1187_v61 = vld [vmem:[%s1492_s5 + $0x114] ss:$8 sps:$4 sm:$0xff]   ;;  %828 = vmatprep.mubr.bf16.mxu0 %v1043_v19 }
  0x4b   : > { %v1169_v60 = vld [vmem:[%s1492_s5 + $0x44] ss:$8 sps:$4 sm:$0xff]   ;;  %837 = vmatprep.subr.bf16.mxu1 %v1181_v58  ;;  %v1189_v62 = vld [vmem:[%s1492_s5 + $0x110] ss:$8 sps:$4 sm:$0xff]   ;;  %v1171_v63 = vld [vmem:[%s1492_s5 + $0x40] ss:$8 sps:$4 sm:$0xff]  }
  0x4c   : > { %838 = vmatpush1.bf16.msra.mxu1 %v1183_v59  ;;  %v1172_v0 = vld [vmem:[%s1492_s5 + $0x54] ss:$8 sps:$4 sm:$0xff]   ;;  %v1193_v1 = vld [vmem:[%s1492_s5 + $0x124] ss:$8 sps:$4 sm:$0xff]   ;;  %v1195_v2 = vld [vmem:[%s1492_s5 + $0x120] ss:$8 sps:$4 sm:$0xff]  }
  0x4d   : > { %799 = vmatpush1.bf16.msra.mxu0 %v1162_v53  ;;  %839 = vmatprep.subr.bf16.mxu1 %v1187_v61  ;;  %v1174_v3 = vld [vmem:[%s1492_s5 + $0x50] ss:$8 sps:$4 sm:$0xff]   ;;  %v1199_v4 = vld [vmem:[%s1492_s5 + $0x134] ss:$8 sps:$4 sm:$0xff]   ;;  %v1175_v5 = vld [vmem:[%s1492_s5 + $0x64] ss:$8 sps:$4 sm:$0xff]  }
  0x4e   : > { %800 = vmatprep.subr.bf16.mxu0 %v1163_v54  ;;  %v1201_v6 = vld [vmem:[%s1492_s5 + $0x130] ss:$8 sps:$4 sm:$0xff]   ;;  %v1177_v7 = vld [vmem:[%s1492_s5 + $0x60] ss:$8 sps:$4 sm:$0xff]   ;;  %v1205_v8 = vld [vmem:[%s1492_s5 + $0x144] ss:$8 sps:$4 sm:$0xff]  }
  0x4f   : > { %v1178_v9 = vld [vmem:[%s1492_s5 + $0x74] ss:$8 sps:$4 sm:$0xff]   ;;  %v1207_v10 = vld [vmem:[%s1492_s5 + $0x140] ss:$8 sps:$4 sm:$0xff]   ;;  %v1180_v11 = vld [vmem:[%s1492_s5 + $0x70] ss:$8 sps:$4 sm:$0xff]  }
  0x50   : > { %840 = vmatpush1.bf16.msra.mxu1 %v1189_v62  ;;  %v1211_v12 = vld [vmem:[%s1492_s5 + $0x154] ss:$8 sps:$4 sm:$0xff]   ;;  %v1184_v13 = vld [vmem:[%s1492_s5 + $0x84] ss:$8 sps:$4 sm:$0xff]   ;;  %v1213_v14 = vld [vmem:[%s1492_s5 + $0x150] ss:$8 sps:$4 sm:$0xff]  }
  0x51   : > { %801 = vmatpush1.bf16.msra.mxu0 %v1165_v55  ;;  %841 = vmatprep.subr.bf16.mxu1 %v1193_v1  ;;  %v1186_v15 = vld [vmem:[%s1492_s5 + $0x80] ss:$8 sps:$4 sm:$0xff]   ;;  %v1217_v16 = vld [vmem:[%s1492_s5 + $0x164] ss:$8 sps:$4 sm:$0xff]   ;;  %v1190_v17 = vld [vmem:[%s1492_s5 + $0x94] ss:$8 sps:$4 sm:$0xff]  }
  0x52   : > { %802 = vmatprep.subr.bf16.mxu0 %v1166_v56  ;;  %v1219_v20 = vld [vmem:[%s1492_s5 + $0x160] ss:$8 sps:$4 sm:$0xff]   ;;  %v1192_v21 = vld [vmem:[%s1492_s5 + $0x90] ss:$8 sps:$4 sm:$0xff]   ;;  %v1223_v22 = vld [vmem:[%s1492_s5 + $0x174] ss:$8 sps:$4 sm:$0xff]  }
  0x53   : > { %v1196_v23 = vld [vmem:[%s1492_s5 + $0xa4] ss:$8 sps:$4 sm:$0xff]   ;;  %v1225_v24 = vld [vmem:[%s1492_s5 + $0x170] ss:$8 sps:$4 sm:$0xff]   ;;  %v1198_v25 = vld [vmem:[%s1492_s5 + $0xa0] ss:$8 sps:$4 sm:$0xff]  }
  0x54   : > { %842 = vmatpush1.bf16.msra.mxu1 %v1195_v2  ;;  %v1202_v26 = vld [vmem:[%s1492_s5 + $0xb4] ss:$8 sps:$4 sm:$0xff]   ;;  %v1229_v27 = vld [vmem:[%s1480_s26 + $0x8] ss:$0 sps:$4 sm:$0xff]   ;;  %v1208_v29 = vld [vmem:[%s1492_s5 + $0xc4] ss:$8 sps:$4 sm:$0xff]  }
  0x55   : > { %803 = vmatpush1.bf16.msra.mxu0 %v1168_v57  ;;  %843 = vmatprep.subr.bf16.mxu1 %v1199_v4  ;;  %v1204_v28 = vld [vmem:[%s1492_s5 + $0xb0] ss:$8 sps:$4 sm:$0xff]   ;;  %v1210_v30 = vld [vmem:[%s1492_s5 + $0xc0] ss:$8 sps:$4 sm:$0xff]   ;;  %v1214_v31 = vld [vmem:[%s1492_s5 + $0xd4] ss:$8 sps:$4 sm:$0xff]  }
  0x56   : > { %804 = vmatprep.subr.bf16.mxu0 %v1169_v60  ;;  %v1216_v32 = vld [vmem:[%s1492_s5 + $0xd0] ss:$8 sps:$4 sm:$0xff]   ;;  %v1220_v33 = vld [vmem:[%s1492_s5 + $0xe4] ss:$8 sps:$4 sm:$0xff]   ;;  %v1222_v34 = vld [vmem:[%s1492_s5 + $0xe0] ss:$8 sps:$4 sm:$0xff]  }
  0x57   : > { %v1226_v35 = vld [vmem:[%s1492_s5 + $0xf4] ss:$8 sps:$4 sm:$0xff]   ;;  %v1228_v36 = vld [vmem:[%s1492_s5 + $0xf0] ss:$8 sps:$4 sm:$0xff]   ;;  %p1093_p13 = scmp.ne.s32.totalorder %s1270_s14, 5 }
  0x58   : > { %844 = vmatpush1.bf16.msra.mxu1 %v1201_v6  ;;  %v493_v42 = vld [vmem:[#allocation2] sm:$0xff]  ;;  %v494_v45 = vld [vmem:[#allocation2 + $0x8] sm:$0xff]  ;;  %v890_v52 = vlaneseq (!%p1093_p13) }
  0x59   : > { %805 = vmatpush1.bf16.msra.mxu0 %v1171_v63  ;;  %845 = vmatprep.subr.bf16.mxu1 %v1205_v8  ;;  %v888_v54 = vld [vmem:[%s474_s12] sm:$0x3] (!%p1093_p13) }
  0x5a   : > { %806 = vmatprep.subr.bf16.mxu0 %v1172_v0  ;;  %v891_v53 = vshrl.u32 (!%p1093_p13), %v890_v52, 7 }
  0x5c   : > { %846 = vmatpush1.bf16.msra.mxu1 %v1207_v10  ;;  %v892_v55 = vsub.s32 (!%p1093_p13), 0, %v891_v53  ;;  %v896_v56 = vsub.s32 (!%p1093_p13), 1, %v891_v53 }
  0x5d   : > { %807 = vmatpush1.bf16.msra.mxu0 %v1174_v3  ;;  %847 = vmatprep.subr.bf16.mxu1 %v1211_v12 }
  0x5e   : > { %808 = vmatprep.subr.bf16.mxu0 %v1175_v5  ;;  %v893_v59 = vrot.slane (!%p1093_p13), %v888_v54, %v892_v55  ;;  %v897_v60 = vrot.slane (!%p1093_p13), %v888_v54, %v896_v56 }
  0x60   : > { %848 = vmatpush1.bf16.msra.mxu1 %v1213_v14 }
  0x61   : > { %809 = vmatpush1.bf16.msra.mxu0 %v1177_v7  ;;  %849 = vmatprep.subr.bf16.mxu1 %v1217_v16 }
  0x62   : > { %810 = vmatprep.subr.bf16.mxu0 %v1178_v9 }
  0x64   : > { %850 = vmatpush1.bf16.msra.mxu1 %v1219_v20 }
  0x65   : > { %811 = vmatpush1.bf16.msra.mxu0 %v1180_v11  ;;  %851 = vmatprep.subr.bf16.mxu1 %v1223_v22 }
  0x66   : > { %812 = vmatprep.subr.bf16.mxu0 %v1184_v13 }
  0x68   : > { %852 = vmatpush1.bf16.msra.mxu1 %v1225_v24 }
  0x69   : > { %813 = vmatpush1.bf16.msra.mxu0 %v1186_v15 }
  0x6a   : > { %814 = vmatprep.subr.bf16.mxu0 %v1190_v17 }
  0x6b   : > { %870 = vmatmul.mubr.bf16.vlgmr.msra.gmra.mrb[0].mxu1 %v1229_v27 }
  0x6d   : > { %815 = vmatpush1.bf16.msra.mxu0 %v1192_v21 }
  0x6e   : > { %816 = vmatprep.subr.bf16.mxu0 %v1196_v23 }
  0x71   : > { %817 = vmatpush1.bf16.msra.mxu0 %v1198_v25 }
  0x72   : > { %818 = vmatprep.subr.bf16.mxu0 %v1202_v26 }
  0x75   : > { %819 = vmatpush1.bf16.msra.mxu0 %v1204_v28 }
  0x76   : > { %820 = vmatprep.subr.bf16.mxu0 %v1208_v29 }
  0x79   : > { %821 = vmatpush1.bf16.msra.mxu0 %v1210_v30 }
  0x7a   : > { %822 = vmatprep.subr.bf16.mxu0 %v1214_v31 }
  0x7d   : > { %823 = vmatpush1.bf16.msra.mxu0 %v1216_v32 }
  0x7e   : > { %824 = vmatprep.subr.bf16.mxu0 %v1220_v33 }
  0x81   : > { %825 = vmatpush1.bf16.msra.mxu0 %v1222_v34 }
  0x82   : > { %826 = vmatprep.subr.bf16.mxu0 %v1226_v35 }
  0x85   : > { %827 = vmatpush1.bf16.msra.mxu0 %v1228_v36 }
  0x88   : > { %829 = vmatmul.mubr.bf16.vlgmr.msra.gmra.mrb[0].mxu0 %v1042_v37 }
 0x13e   : > { %v871_v38 = vpop.f32.mrb[0].mxu1 }
 0x13f   : > { %v873_v39 = vpop.f32.mrb[1].mxu1 }
 0x140   : > { %v875_v40 = vpop.f32.mrb[2].mxu1 }
 0x141   : > { %v876_v41 = vpop.f32.mrb[3].mxu1 }
 0x15b   : > { %v830_v43 = vpop.f32.mrb[0].mxu0  ;;  %885 = sbr.rel (%p1093_p13) target bundleno = 366 (0x16e), region = 78 }
 0x15c   : > { %v872_v44 = vadd.f32 %v871_v38, %v830_v43  ;;  %v832_v46 = vpop.f32.mrb[1].mxu0 }
 0x15d   : > { %v874_v47 = vadd.f32 %v873_v39, %v832_v46  ;;  %v834_v48 = vpop.f32.mrb[2].mxu0 }
 0x15e   : > { %v878_v49 = vadd.f32 %v872_v44, %v493_v42  ;;  %v835_v50 = vpop.f32.mrb[3].mxu0 }
 0x15f   : > { %v879_v51 = vadd.f32 %v874_v47, %v494_v45 }
 0x160   : > { %880 = vst [vmem:[#allocation2] sm:$0xff] %v878_v49 }
 0x161   : > { %881 = vst [vmem:[#allocation2 + $0x8] sm:$0xff] %v879_v51 }
 0x167   : > { %v886_v57 = vld [vmem:[#allocation2] sm:$0xff] }
 0x168   : > { %v887_v58 = vld [vmem:[#allocation2 + $0x8] sm:$0xff]  ;;  %v900_v61 = vadd.f32 %v893_v59, %v886_v57 }
 0x169   : > { %v901_v62 = vadd.f32 %v897_v60, %v887_v58 }
 0x16a   : > { %v902_v63 = vmax.f32 %v900_v61, 0.0 }
 0x16b   : > { %v903_v0 = vmax.f32 %v901_v62, 0.0 }
 0x16c   : > { %904 = vst [vmem:[%s1490_s4] sm:$0xff] %v902_v63 }
 0x16d   : > { %905 = vst [vmem:[%s1490_s4 + $0x8] sm:$0xff] %v903_v0 }
 0x16e PF: > { %s13_s18 = sadd.s32 1, %s1286_s18   ;;  %s1578_s12 = smov %s1266_s13 }
 0x16f   : > { %p10_p0 = scmp.ge.s32.totalorder %s13_s18, 14   ;;  %s1579_s13 = smov %s1361_s25 }
 0x170   : > { %s1580_s14 = smov %s1278_s16  ;;  %s1581_s15 = smov %s1282_s17 }
 0x171   : > { %s1582_s16 = smov %s1585_s19  ;;  %s1583_s17 = smov %s1589_s20 }
 0x172   :  { %12 = sbr.rel (!%p10_p0) target bundleno = 4 (0x4), region = 119 }

// kernel: forward.74
= control target key start
LH: loop header
LB: loop body
LE: loop exit
PB: predicated region body
PF: predicated region fallthrough
CT: control target
= control target key end

     0   :  { %s1606_s15 = smov 0   ;;  %s1608_s16 = smov 0   ;;  %s1925_s0 = inlined_call_operand.vmem [shape: bf16[8,4608], index: 0, kind: input, shape index: {}]   ;;  %s1926_s1 = inlined_call_operand.vmem [shape: bf16[4608,512], index: 1, kind: input, shape index: {}]   ;;  %s1927_s2 = inlined_call_operand.vmem [shape: f32[1,512], index: 2, kind: input, shape index: {}]   ;;  %s1928_s3 = inlined_call_operand.vmem [shape: f32[8,512], index: 3, kind: input, shape index: {}]   ;;  %s1929_s4 = inlined_call_operand.vmem [shape: f32[8,512], index: 4, kind: output, shape index: {}]  }
   0x1   :  { %s1610_s17 = smov 0   ;;  %s1612_s18 = smov 0  }
   0x2   :  { %s1614_s19 = smov 0   ;;  %s1616_s20 = smov 0  }
   0x3   :  { %s1618_s21 = smov 0  }
   0x4 LB: > { %s26_s22 = sadd.s32 1, %s1570_s19  ;;  %s29_s23 = sadd.s32 1, %s1574_s20  ;;  %s1578_s21 = sphi %s1618_s21, %s14_s21   ;;  %s1574_s20 = sphi %s1616_s20, %s1935_s20   ;;  %s1570_s19 = sphi %s1614_s19, %s1934_s19   ;;  %s1566_s18 = sphi %s1612_s18, %s1933_s18   ;;  %s1562_s17 = sphi %s1610_s17, %s1932_s17   ;;  %s1558_s16 = sphi %s1608_s16, %s1931_s16   ;;  %s1554_s15 = sphi %s1606_s15, %s1930_s15  }
   0x5   : > { %p27_p0 = scmp.ge.s32.totalorder %s26_s22, 9  ;;  %p77_p1 = scmp.ne.s32.totalorder %s1558_s16, %s1554_s15 }
   0x6   : > { %p78_p2 = scmp.eq.s32.totalorder %s1578_s21, 0  ;;  %s70_s27 = sadd.s32 1, %s1558_s16 }
   0x7   : > { %s1937_s22 = smov (%p27_p0, %s26_s22), 0  ;;  %s1939_s23 = smov (!%p27_p0, %s29_s23), %s1574_s20 }
   0x8   : > { %p79_p3 = por %p78_p2, %p77_p1  ;;  %p31_p4 = scmp.ge.s32.totalorder %s1939_s23, 2 }
   0x9   : > { %s65_s24 = ssub.s32 %s1570_s19, %s1937_s22  ;;  %p1279_p6 = scmp.ge.s32.totalorder %s1578_s21, 18 }
   0xa   : > { %s1941_s23 = smov (%p31_p4, %s1939_s23), 0 }
   0xb   : > { %s66_s25 = ssub.s32 %s1574_s20, %s1941_s23  ;;  %185 = sbr.rel (%p1279_p6) target bundleno = 57 (0x39), region = 16 }
   0xc   : > { %s67_s26 = sor.u32 %s66_s25, %s65_s24 }
   0xd   : > { %p68_p5 = scmp.eq.s32.totalorder %s67_s26, 0 }
   0xf   : > { %s1657_s28 = scalar_select %p68_p5, %s1558_s16, %s70_s27  }
  0x12   : > { %201 = sbr.rel (!%p79_p3) target bundleno = 57 (0x39), region = 24  ;;  %s203_s29 = sand.u32 (%p79_p3), 1, %s1558_s16  }
  0x13   : > { %s1282_s30 = sshll.u32 (%p79_p3), %s1574_s20, 1  ;;  %s1280_s5 = sshll.u32 (%p79_p3), %s203_s29, 9 }
  0x14   : > { %s1366_s6 = sshll.u32 (%p79_p3), %s1570_s19, 8  ;;  %s1671_s12 = scalar_lea.vmem (%p79_p3), [#allocation3], %s1280_s5 }
  0x15   : > { %s209_s7 = sadd.s32 (%p79_p3), %s1366_s6, %s1282_s30 }
  0x16   : > { %s1284_s8 = sshll.u32 (%p79_p3), %s209_s7, 2 }
  0x17   : > { %s1666_s11 = scalar_lea.vmem (%p79_p3), %s1926_s1, %s1284_s8 }
  0x18   : > { %v365_v0 = vld [vmem:[%s1666_s11] sm:$0xff] (%p79_p3)  ;;  %v367_v1 = vld [vmem:[%s1666_s11 + $0x10] sm:$0xff] (%p79_p3) }
  0x19   : > { %v369_v2 = vld [vmem:[%s1666_s11 + $0x20] sm:$0xff]  ;;  %366 = vst [vmem:[%s1671_s12] sm:$0xff] %v365_v0  ;;  %368 = vst [vmem:[%s1671_s12 + $0x8] sm:$0xff] %v367_v1  ;;  %v371_v3 = vld [vmem:[%s1666_s11 + $0x30] sm:$0xff] }
  0x1a   : > { %370 = vst [vmem:[%s1671_s12 + $0x10] sm:$0xff] %v369_v2  ;;  %v373_v4 = vld [vmem:[%s1666_s11 + $0x40] sm:$0xff]  ;;  %v375_v5 = vld [vmem:[%s1666_s11 + $0x50] sm:$0xff]  ;;  %372 = vst [vmem:[%s1671_s12 + $0x18] sm:$0xff] %v371_v3 }
  0x1b   : > { %374 = vst [vmem:[%s1671_s12 + $0x20] sm:$0xff] %v373_v4  ;;  %376 = vst [vmem:[%s1671_s12 + $0x28] sm:$0xff] %v375_v5  ;;  %v377_v6 = vld [vmem:[%s1666_s11 + $0x60] sm:$0xff]  ;;  %v379_v7 = vld [vmem:[%s1666_s11 + $0x70] sm:$0xff] }
  0x1c   : > { %v381_v8 = vld [vmem:[%s1666_s11 + $0x80] sm:$0xff]  ;;  %378 = vst [vmem:[%s1671_s12 + $0x30] sm:$0xff] %v377_v6  ;;  %380 = vst [vmem:[%s1671_s12 + $0x38] sm:$0xff] %v379_v7  ;;  %v383_v9 = vld [vmem:[%s1666_s11 + $0x90] sm:$0xff] }
  0x1d   : > { %382 = vst [vmem:[%s1671_s12 + $0x40] sm:$0xff] %v381_v8  ;;  %v385_v10 = vld [vmem:[%s1666_s11 + $0xa0] sm:$0xff]  ;;  %v387_v11 = vld [vmem:[%s1666_s11 + $0xb0] sm:$0xff]  ;;  %384 = vst [vmem:[%s1671_s12 + $0x48] sm:$0xff] %v383_v9 }
  0x1e   : > { %386 = vst [vmem:[%s1671_s12 + $0x50] sm:$0xff] %v385_v10  ;;  %388 = vst [vmem:[%s1671_s12 + $0x58] sm:$0xff] %v387_v11  ;;  %v389_v12 = vld [vmem:[%s1666_s11 + $0xc0] sm:$0xff]  ;;  %v391_v13 = vld [vmem:[%s1666_s11 + $0xd0] sm:$0xff] }
  0x1f   : > { %v393_v14 = vld [vmem:[%s1666_s11 + $0xe0] sm:$0xff]  ;;  %390 = vst [vmem:[%s1671_s12 + $0x60] sm:$0xff] %v389_v12  ;;  %392 = vst [vmem:[%s1671_s12 + $0x68] sm:$0xff] %v391_v13  ;;  %v395_v15 = vld [vmem:[%s1666_s11 + $0xf0] sm:$0xff] }
  0x20   : > { %394 = vst [vmem:[%s1671_s12 + $0x70] sm:$0xff] %v393_v14  ;;  %v397_v16 = vld [vmem:[%s1666_s11 + $0x100] sm:$0xff]  ;;  %v399_v17 = vld [vmem:[%s1666_s11 + $0x110] sm:$0xff]  ;;  %396 = vst [vmem:[%s1671_s12 + $0x78] sm:$0xff] %v395_v15 }
  0x21   : > { %398 = vst [vmem:[%s1671_s12 + $0x80] sm:$0xff] %v397_v16  ;;  %400 = vst [vmem:[%s1671_s12 + $0x88] sm:$0xff] %v399_v17  ;;  %v401_v18 = vld [vmem:[%s1666_s11 + $0x120] sm:$0xff]  ;;  %v403_v19 = vld [vmem:[%s1666_s11 + $0x130] sm:$0xff] }
  0x22   : > { %v405_v20 = vld [vmem:[%s1666_s11 + $0x140] sm:$0xff]  ;;  %402 = vst [vmem:[%s1671_s12 + $0x90] sm:$0xff] %v401_v18  ;;  %404 = vst [vmem:[%s1671_s12 + $0x98] sm:$0xff] %v403_v19  ;;  %v407_v21 = vld [vmem:[%s1666_s11 + $0x150] sm:$0xff] }
  0x23   : > { %406 = vst [vmem:[%s1671_s12 + $0xa0] sm:$0xff] %v405_v20  ;;  %v409_v22 = vld [vmem:[%s1666_s11 + $0x160] sm:$0xff]  ;;  %v411_v23 = vld [vmem:[%s1666_s11 + $0x170] sm:$0xff]  ;;  %408 = vst [vmem:[%s1671_s12 + $0xa8] sm:$0xff] %v407_v21 }
  0x24   : > { %410 = vst [vmem:[%s1671_s12 + $0xb0] sm:$0xff] %v409_v22  ;;  %412 = vst [vmem:[%s1671_s12 + $0xb8] sm:$0xff] %v411_v23  ;;  %v413_v24 = vld [vmem:[%s1666_s11 + $0x180] sm:$0xff]  ;;  %v415_v25 = vld [vmem:[%s1666_s11 + $0x190] sm:$0xff] }
  0x25   : > { %v417_v26 = vld [vmem:[%s1666_s11 + $0x1a0] sm:$0xff]  ;;  %414 = vst [vmem:[%s1671_s12 + $0xc0] sm:$0xff] %v413_v24  ;;  %416 = vst [vmem:[%s1671_s12 + $0xc8] sm:$0xff] %v415_v25  ;;  %v419_v27 = vld [vmem:[%s1666_s11 + $0x1b0] sm:$0xff] }
  0x26   : > { %418 = vst [vmem:[%s1671_s12 + $0xd0] sm:$0xff] %v417_v26  ;;  %v421_v28 = vld [vmem:[%s1666_s11 + $0x1c0] sm:$0xff]  ;;  %v423_v29 = vld [vmem:[%s1666_s11 + $0x1d0] sm:$0xff]  ;;  %420 = vst [vmem:[%s1671_s12 + $0xd8] sm:$0xff] %v419_v27 }
  0x27   : > { %422 = vst [vmem:[%s1671_s12 + $0xe0] sm:$0xff] %v421_v28  ;;  %424 = vst [vmem:[%s1671_s12 + $0xe8] sm:$0xff] %v423_v29  ;;  %v425_v30 = vld [vmem:[%s1666_s11 + $0x1e0] sm:$0xff]  ;;  %v427_v31 = vld [vmem:[%s1666_s11 + $0x1f0] sm:$0xff] }
  0x28   : > { %v429_v32 = vld [vmem:[%s1666_s11 + $0x200] sm:$0xff]  ;;  %426 = vst [vmem:[%s1671_s12 + $0xf0] sm:$0xff] %v425_v30  ;;  %428 = vst [vmem:[%s1671_s12 + $0xf8] sm:$0xff] %v427_v31  ;;  %v431_v33 = vld [vmem:[%s1666_s11 + $0x210] sm:$0xff] }
  0x29   : > { %430 = vst [vmem:[%s1671_s12 + $0x100] sm:$0xff] %v429_v32  ;;  %v433_v34 = vld [vmem:[%s1666_s11 + $0x220] sm:$0xff]  ;;  %v435_v35 = vld [vmem:[%s1666_s11 + $0x230] sm:$0xff]  ;;  %432 = vst [vmem:[%s1671_s12 + $0x108] sm:$0xff] %v431_v33 }
  0x2a   : > { %434 = vst [vmem:[%s1671_s12 + $0x110] sm:$0xff] %v433_v34  ;;  %436 = vst [vmem:[%s1671_s12 + $0x118] sm:$0xff] %v435_v35  ;;  %v437_v36 = vld [vmem:[%s1666_s11 + $0x240] sm:$0xff]  ;;  %v439_v37 = vld [vmem:[%s1666_s11 + $0x250] sm:$0xff] }
  0x2b   : > { %v441_v38 = vld [vmem:[%s1666_s11 + $0x260] sm:$0xff]  ;;  %438 = vst [vmem:[%s1671_s12 + $0x120] sm:$0xff] %v437_v36  ;;  %440 = vst [vmem:[%s1671_s12 + $0x128] sm:$0xff] %v439_v37  ;;  %v443_v39 = vld [vmem:[%s1666_s11 + $0x270] sm:$0xff] }
  0x2c   : > { %442 = vst [vmem:[%s1671_s12 + $0x130] sm:$0xff] %v441_v38  ;;  %v445_v40 = vld [vmem:[%s1666_s11 + $0x280] sm:$0xff]  ;;  %v447_v41 = vld [vmem:[%s1666_s11 + $0x290] sm:$0xff]  ;;  %444 = vst [vmem:[%s1671_s12 + $0x138] sm:$0xff] %v443_v39 }
  0x2d   : > { %446 = vst [vmem:[%s1671_s12 + $0x140] sm:$0xff] %v445_v40  ;;  %448 = vst [vmem:[%s1671_s12 + $0x148] sm:$0xff] %v447_v41  ;;  %v449_v42 = vld [vmem:[%s1666_s11 + $0x2a0] sm:$0xff]  ;;  %v451_v43 = vld [vmem:[%s1666_s11 + $0x2b0] sm:$0xff] }
  0x2e   : > { %v453_v44 = vld [vmem:[%s1666_s11 + $0x2c0] sm:$0xff]  ;;  %450 = vst [vmem:[%s1671_s12 + $0x150] sm:$0xff] %v449_v42  ;;  %452 = vst [vmem:[%s1671_s12 + $0x158] sm:$0xff] %v451_v43  ;;  %v455_v45 = vld [vmem:[%s1666_s11 + $0x2d0] sm:$0xff] }
  0x2f   : > { %454 = vst [vmem:[%s1671_s12 + $0x160] sm:$0xff] %v453_v44  ;;  %v457_v46 = vld [vmem:[%s1666_s11 + $0x2e0] sm:$0xff]  ;;  %v459_v47 = vld [vmem:[%s1666_s11 + $0x2f0] sm:$0xff]  ;;  %456 = vst [vmem:[%s1671_s12 + $0x168] sm:$0xff] %v455_v45 }
  0x30   : > { %458 = vst [vmem:[%s1671_s12 + $0x170] sm:$0xff] %v457_v46  ;;  %460 = vst [vmem:[%s1671_s12 + $0x178] sm:$0xff] %v459_v47  ;;  %v461_v48 = vld [vmem:[%s1666_s11 + $0x300] sm:$0xff]  ;;  %v463_v49 = vld [vmem:[%s1666_s11 + $0x310] sm:$0xff] }
  0x31   : > { %v465_v50 = vld [vmem:[%s1666_s11 + $0x320] sm:$0xff]  ;;  %462 = vst [vmem:[%s1671_s12 + $0x180] sm:$0xff] %v461_v48  ;;  %464 = vst [vmem:[%s1671_s12 + $0x188] sm:$0xff] %v463_v49  ;;  %v467_v51 = vld [vmem:[%s1666_s11 + $0x330] sm:$0xff] }
  0x32   : > { %466 = vst [vmem:[%s1671_s12 + $0x190] sm:$0xff] %v465_v50  ;;  %v469_v52 = vld [vmem:[%s1666_s11 + $0x340] sm:$0xff]  ;;  %v471_v53 = vld [vmem:[%s1666_s11 + $0x350] sm:$0xff]  ;;  %468 = vst [vmem:[%s1671_s12 + $0x198] sm:$0xff] %v467_v51 }
  0x33   : > { %470 = vst [vmem:[%s1671_s12 + $0x1a0] sm:$0xff] %v469_v52  ;;  %472 = vst [vmem:[%s1671_s12 + $0x1a8] sm:$0xff] %v471_v53  ;;  %v473_v54 = vld [vmem:[%s1666_s11 + $0x360] sm:$0xff]  ;;  %v475_v55 = vld [vmem:[%s1666_s11 + $0x370] sm:$0xff] }
  0x34   : > { %v477_v56 = vld [vmem:[%s1666_s11 + $0x380] sm:$0xff]  ;;  %474 = vst [vmem:[%s1671_s12 + $0x1b0] sm:$0xff] %v473_v54  ;;  %476 = vst [vmem:[%s1671_s12 + $0x1b8] sm:$0xff] %v475_v55  ;;  %v479_v57 = vld [vmem:[%s1666_s11 + $0x390] sm:$0xff] }
  0x35   : > { %478 = vst [vmem:[%s1671_s12 + $0x1c0] sm:$0xff] %v477_v56  ;;  %v481_v58 = vld [vmem:[%s1666_s11 + $0x3a0] sm:$0xff]  ;;  %v483_v59 = vld [vmem:[%s1666_s11 + $0x3b0] sm:$0xff]  ;;  %480 = vst [vmem:[%s1671_s12 + $0x1c8] sm:$0xff] %v479_v57 }
  0x36   : > { %482 = vst [vmem:[%s1671_s12 + $0x1d0] sm:$0xff] %v481_v58  ;;  %484 = vst [vmem:[%s1671_s12 + $0x1d8] sm:$0xff] %v483_v59  ;;  %v485_v60 = vld [vmem:[%s1666_s11 + $0x3c0] sm:$0xff]  ;;  %v487_v61 = vld [vmem:[%s1666_s11 + $0x3d0] sm:$0xff] }
  0x37   : > { %v489_v62 = vld [vmem:[%s1666_s11 + $0x3e0] sm:$0xff]  ;;  %486 = vst [vmem:[%s1671_s12 + $0x1e0] sm:$0xff] %v485_v60  ;;  %488 = vst [vmem:[%s1671_s12 + $0x1e8] sm:$0xff] %v487_v61  ;;  %v491_v63 = vld [vmem:[%s1666_s11 + $0x3f0] sm:$0xff] }
  0x38   : > { %490 = vst [vmem:[%s1671_s12 + $0x1f0] sm:$0xff] %v489_v62  ;;  %492 = vst [vmem:[%s1671_s12 + $0x1f8] sm:$0xff] %v491_v63 }
  0x39 PF: > { %p1285_p7 = scmp.ge.s32.totalorder %s1578_s21, 1  ;;  %p518_p8 = scmp.lt.s32.totalorder %s1578_s21, 19 }
  0x3b   : > { %p519_p9 = pnand %p1285_p7, %p518_p8 }
  0x3c   : > { %s525_s13 = sand.u32 (!%p519_p9), 1, %s1554_s15   ;;  %s1287_s14 = sshll.u32 (!%p519_p9), %s1562_s17, 2 }
  0x3d   : > { %522 = sbr.rel (%p519_p9) target bundleno = 377 (0x179), region = 70  ;;  %s1286_s24 = sshll.u32 (!%p519_p9), %s525_s13, 9 }
  0x3e   : > { %p579_p10 = scmp.lt.s32.totalorder (!%p519_p9), %s1287_s14, 35  ;;  %s1289_s25 = sshll.u32 (!%p519_p9), %s1566_s18, 1 }
  0x3f   : > { %p589_p11 = scmp.lt.s32.totalorder (!%p519_p9), %s1289_s25, 3  ;;  %s1825_s13 = scalar_lea.vmem (!%p519_p9), [#allocation3], %s1286_s24 }
  0x40   : > { %p1294_p12 = scmp.ne.s32.totalorder (!%p519_p9), %s1562_s17, 0 }
  0x44   : > { %s1943_s14 = smov (!%p579_p10, %s1287_s14), 35  ;;  %s1945_s25 = smov (!%p589_p11, %s1289_s25), 3 }
  0x45   : > { %s1288_s26 = sshll.u32 %s1943_s14, 2  ;;  %s591_s15 = scalar_lea.vmem %s1927_s2, %s1945_s25  ;;  %v1580_v0 = vmov (!%p1294_p12), 0.0  }
  0x46   : > { %s1806_s30 = scalar_lea.vmem %s1925_s0, %s1288_s26  ;;  %s1291_s7 = sshll.u32 %s1945_s25, 3  ;;  %617 = vst [vmem:[#allocation2] sm:$0xff] (!%p1294_p12), %v1580_v0  ;;  %618 = vst [vmem:[#allocation2 + $0x8] sm:$0xff] (!%p1294_p12), %v1580_v0 }
  0x47   : > { %s1818_s18 = scalar_lea.vmem %s1928_s3, %s1291_s7  ;;  %s1823_s12 = scalar_lea.vmem %s1929_s4, %s1291_s7 }
  0x48   : > { %616 = sbr.rel (%p1294_p12) target bundleno = 79 (0x4f), region = 78 }
  0x4f PF: > { %v1424_v1 = vld [vmem:[%s1825_s13 + $0x4] ss:$8 sps:$4 sm:$0xff]   ;;  %v1428_v3 = vld [vmem:[%s1825_s13] ss:$8 sps:$4 sm:$0xff]   ;;  %v1430_v5 = vld [vmem:[%s1825_s13 + $0x14] ss:$8 sps:$4 sm:$0xff]  }
  0x50   : > { %v1426_v2 = vld [vmem:[%s1825_s13 + $0x104] ss:$8 sps:$4 sm:$0xff]   ;;  %1021 = vmatprep.subr.bf16.mxu0 %v1424_v1  ;;  %v1429_v4 = vld [vmem:[%s1825_s13 + $0x100] ss:$8 sps:$4 sm:$0xff]   ;;  %v1432_v6 = vld [vmem:[%s1825_s13 + $0x114] ss:$8 sps:$4 sm:$0xff]  }
  0x51   : > { %1062 = vmatprep.subr.bf16.mxu1 %v1426_v2  ;;  %1022 = vmatpush1.bf16.msra.mxu0 %v1428_v3  ;;  %v1434_v7 = vld [vmem:[%s1825_s13 + $0x10] ss:$8 sps:$4 sm:$0xff]   ;;  %v1436_v9 = vld [vmem:[%s1825_s13 + $0x24] ss:$8 sps:$4 sm:$0xff]   ;;  %v1440_v11 = vld [vmem:[%s1825_s13 + $0x20] ss:$8 sps:$4 sm:$0xff]  }
  0x52   : > { %1063 = vmatpush1.bf16.msra.mxu1 %v1429_v4  ;;  %1023 = vmatprep.subr.bf16.mxu0 %v1430_v5  ;;  %v1435_v8 = vld [vmem:[%s1825_s13 + $0x110] ss:$8 sps:$4 sm:$0xff]   ;;  %v1438_v10 = vld [vmem:[%s1825_s13 + $0x124] ss:$8 sps:$4 sm:$0xff]   ;;  %v1441_v12 = vld [vmem:[%s1825_s13 + $0x120] ss:$8 sps:$4 sm:$0xff]  }
  0x53   : > { %1064 = vmatprep.subr.bf16.mxu1 %v1432_v6  ;;  %v1442_v13 = vld [vmem:[%s1825_s13 + $0x34] ss:$8 sps:$4 sm:$0xff]   ;;  %v1446_v15 = vld [vmem:[%s1825_s13 + $0x30] ss:$8 sps:$4 sm:$0xff]   ;;  %v1448_v17 = vld [vmem:[%s1825_s13 + $0x44] ss:$8 sps:$4 sm:$0xff]  }
  0x54   : > { %v1444_v14 = vld [vmem:[%s1825_s13 + $0x134] ss:$8 sps:$4 sm:$0xff]   ;;  %v1447_v16 = vld [vmem:[%s1825_s13 + $0x130] ss:$8 sps:$4 sm:$0xff]   ;;  %v1450_v18 = vld [vmem:[%s1825_s13 + $0x144] ss:$8 sps:$4 sm:$0xff]  }
  0x55   : > { %1024 = vmatpush1.bf16.msra.mxu0 %v1434_v7  ;;  %v1452_v19 = vld [vmem:[%s1825_s13 + $0x40] ss:$8 sps:$4 sm:$0xff]   ;;  %v1454_v21 = vld [vmem:[%s1825_s13 + $0x54] ss:$8 sps:$4 sm:$0xff]   ;;  %v1458_v23 = vld [vmem:[%s1825_s13 + $0x50] ss:$8 sps:$4 sm:$0xff]  }
  0x56   : > { %1065 = vmatpush1.bf16.msra.mxu1 %v1435_v8  ;;  %1025 = vmatprep.subr.bf16.mxu0 %v1436_v9  ;;  %v1453_v20 = vld [vmem:[%s1825_s13 + $0x140] ss:$8 sps:$4 sm:$0xff]   ;;  %v1456_v22 = vld [vmem:[%s1825_s13 + $0x154] ss:$8 sps:$4 sm:$0xff]   ;;  %v1459_v24 = vld [vmem:[%s1825_s13 + $0x150] ss:$8 sps:$4 sm:$0xff]  }
  0x57   : > { %1066 = vmatprep.subr.bf16.mxu1 %v1438_v10  ;;  %v1460_v25 = vld [vmem:[%s1825_s13 + $0x64] ss:$8 sps:$4 sm:$0xff]   ;;  %v1464_v27 = vld [vmem:[%s1825_s13 + $0x60] ss:$8 sps:$4 sm:$0xff]   ;;  %v1466_v29 = vld [vmem:[%s1825_s13 + $0x74] ss:$8 sps:$4 sm:$0xff]  }
  0x58   : > { %v1462_v26 = vld [vmem:[%s1825_s13 + $0x164] ss:$8 sps:$4 sm:$0xff]   ;;  %v1465_v28 = vld [vmem:[%s1825_s13 + $0x160] ss:$8 sps:$4 sm:$0xff]   ;;  %v1468_v30 = vld [vmem:[%s1825_s13 + $0x174] ss:$8 sps:$4 sm:$0xff]  }
  0x59   : > { %1026 = vmatpush1.bf16.msra.mxu0 %v1440_v11  ;;  %v1470_v31 = vld [vmem:[%s1825_s13 + $0x70] ss:$8 sps:$4 sm:$0xff]   ;;  %v1472_v33 = vld [vmem:[%s1825_s13 + $0x84] ss:$8 sps:$4 sm:$0xff]   ;;  %v1476_v35 = vld [vmem:[%s1825_s13 + $0x80] ss:$8 sps:$4 sm:$0xff]  }
  0x5a   : > { %1067 = vmatpush1.bf16.msra.mxu1 %v1441_v12  ;;  %1027 = vmatprep.subr.bf16.mxu0 %v1442_v13  ;;  %v1471_v32 = vld [vmem:[%s1825_s13 + $0x170] ss:$8 sps:$4 sm:$0xff]   ;;  %v1474_v34 = vld [vmem:[%s1825_s13 + $0x184] ss:$8 sps:$4 sm:$0xff]   ;;  %v1477_v36 = vld [vmem:[%s1825_s13 + $0x180] ss:$8 sps:$4 sm:$0xff]  }
  0x5b   : > { %1068 = vmatprep.subr.bf16.mxu1 %v1444_v14  ;;  %v1478_v37 = vld [vmem:[%s1825_s13 + $0x94] ss:$8 sps:$4 sm:$0xff]   ;;  %v1482_v39 = vld [vmem:[%s1825_s13 + $0x90] ss:$8 sps:$4 sm:$0xff]   ;;  %v1484_v41 = vld [vmem:[%s1825_s13 + $0xa4] ss:$8 sps:$4 sm:$0xff]  }
  0x5c   : > { %v1480_v38 = vld [vmem:[%s1825_s13 + $0x194] ss:$8 sps:$4 sm:$0xff]   ;;  %v1483_v40 = vld [vmem:[%s1825_s13 + $0x190] ss:$8 sps:$4 sm:$0xff]   ;;  %v1486_v42 = vld [vmem:[%s1825_s13 + $0x1a4] ss:$8 sps:$4 sm:$0xff]  }
  0x5d   : > { %1028 = vmatpush1.bf16.msra.mxu0 %v1446_v15  ;;  %v1488_v43 = vld [vmem:[%s1825_s13 + $0xa0] ss:$8 sps:$4 sm:$0xff]   ;;  %v1490_v45 = vld [vmem:[%s1825_s13 + $0xb4] ss:$8 sps:$4 sm:$0xff]   ;;  %v1494_v50 = vld [vmem:[%s1825_s13 + $0xb0] ss:$8 sps:$4 sm:$0xff]  }
  0x5e   : > { %1069 = vmatpush1.bf16.msra.mxu1 %v1447_v16  ;;  %1029 = vmatprep.subr.bf16.mxu0 %v1448_v17  ;;  %v1489_v44 = vld [vmem:[%s1825_s13 + $0x1a0] ss:$8 sps:$4 sm:$0xff]   ;;  %v1492_v46 = vld [vmem:[%s1825_s13 + $0x1b4] ss:$8 sps:$4 sm:$0xff]   ;;  %v1495_v51 = vld [vmem:[%s1825_s13 + $0x1b0] ss:$8 sps:$4 sm:$0xff]  }
  0x5f   : > { %1070 = vmatprep.subr.bf16.mxu1 %v1450_v18  ;;  %v621_v47 = vld [vmem:[%s1806_s30] sm:$0xff]  ;;  %v622_v49 = vld [vmem:[%s1806_s30 + $0x8] sm:$0xff]  ;;  %v1496_v53 = vld [vmem:[%s1825_s13 + $0xc4] ss:$8 sps:$4 sm:$0xff]   ;;  %p1363_p13 = scmp.ne.s32.totalorder %s1562_s17, 8 }
  0x60   : > { %v1296_v48 = vcombine.high %v621_v47, %v621_v47  ;;  %v1298_v52 = vcombine.high %v622_v49, %v622_v49  ;;  %v1498_v54 = vld [vmem:[%s1825_s13 + $0x1c4] ss:$8 sps:$4 sm:$0xff]   ;;  %v1500_v55 = vld [vmem:[%s1825_s13 + $0xc0] ss:$8 sps:$4 sm:$0xff]   ;;  %v1502_v57 = vld [vmem:[%s1825_s13 + $0xd4] ss:$8 sps:$4 sm:$0xff]   ;;  %v1295_v5 = vcombine.low %v621_v47, %v621_v47  ;;  %v1297_v6 = vcombine.low %v622_v49, %v622_v49 }
  0x61   : > { %1030 = vmatpush1.bf16.msra.mxu0 %v1452_v19  ;;  %v1501_v56 = vld [vmem:[%s1825_s13 + $0x1c0] ss:$8 sps:$4 sm:$0xff]   ;;  %v1504_v58 = vld [vmem:[%s1825_s13 + $0x1d4] ss:$8 sps:$4 sm:$0xff]   ;;  %v1506_v59 = vld [vmem:[%s1825_s13 + $0xd0] ss:$8 sps:$4 sm:$0xff]  }
  0x62   : > { %1071 = vmatpush1.bf16.msra.mxu1 %v1453_v20  ;;  %1031 = vmatprep.subr.bf16.mxu0 %v1454_v21  ;;  %v1507_v60 = vld [vmem:[%s1825_s13 + $0x1d0] ss:$8 sps:$4 sm:$0xff]   ;;  %v1508_v61 = vld [vmem:[%s1825_s13 + $0xe4] ss:$8 sps:$4 sm:$0xff]   ;;  %v1512_v63 = vld [vmem:[%s1825_s13 + $0xe0] ss:$8 sps:$4 sm:$0xff]   ;;  %v1115_v21 = vlaneseq (!%p1363_p13) }
  0x63   : > { %1072 = vmatprep.subr.bf16.mxu1 %v1456_v22  ;;  %1053 = vmatprep.mubr.bf16.mxu0 %v1296_v48  ;;  %v1510_v62 = vld [vmem:[%s1825_s13 + $0x1e4] ss:$8 sps:$4 sm:$0xff]   ;;  %v1513_v0 = vld [vmem:[%s1825_s13 + $0x1e0] ss:$8 sps:$4 sm:$0xff]   ;;  %v1514_v1 = vld [vmem:[%s1825_s13 + $0xf4] ss:$8 sps:$4 sm:$0xff]  }
  0x64   : > { %1094 = vmatprep.mubr.bf16.mxu1 %v1298_v52  ;;  %v1516_v2 = vld [vmem:[%s1825_s13 + $0x1f4] ss:$8 sps:$4 sm:$0xff]   ;;  %v1518_v3 = vld [vmem:[%s1825_s13 + $0xf0] ss:$8 sps:$4 sm:$0xff]   ;;  %v1116_v22 = vshrl.u32 (!%p1363_p13), %v1115_v21, 7 }
  0x65   : > { %1032 = vmatpush1.bf16.msra.mxu0 %v1458_v23  ;;  %v1519_v4 = vld [vmem:[%s1825_s13 + $0x1f0] ss:$8 sps:$4 sm:$0xff]  }
  0x66   : > { %1073 = vmatpush1.bf16.msra.mxu1 %v1459_v24  ;;  %1033 = vmatprep.subr.bf16.mxu0 %v1460_v25  ;;  %v619_v8 = vld [vmem:[#allocation2] sm:$0xff]  ;;  %v620_v12 = vld [vmem:[#allocation2 + $0x8] sm:$0xff]  ;;  %v1117_v24 = vsub.s32 (!%p1363_p13), 0, %v1116_v22  ;;  %v1121_v25 = vsub.s32 (!%p1363_p13), 1, %v1116_v22 }
  0x67   : > { %1074 = vmatprep.subr.bf16.mxu1 %v1462_v26  ;;  %v1113_v23 = vld [vmem:[%s591_s15] sm:$0x3] (!%p1363_p13) }
  0x69   : > { %1034 = vmatpush1.bf16.msra.mxu0 %v1464_v27 }
  0x6a   : > { %1075 = vmatpush1.bf16.msra.mxu1 %v1465_v28  ;;  %1035 = vmatprep.subr.bf16.mxu0 %v1466_v29  ;;  %v1118_v28 = vrot.slane (!%p1363_p13), %v1113_v23, %v1117_v24  ;;  %v1122_v29 = vrot.slane (!%p1363_p13), %v1113_v23, %v1121_v25 }
  0x6b   : > { %1076 = vmatprep.subr.bf16.mxu1 %v1468_v30  ;;  %v1127_v30 = vld [vmem:[%s1818_s18] sm:$0xff] (!%p1363_p13) }
  0x6d   : > { %1036 = vmatpush1.bf16.msra.mxu0 %v1470_v31  ;;  %v1128_v31 = vld [vmem:[%s1818_s18 + $0x8] sm:$0xff] (!%p1363_p13) }
  0x6e   : > { %1077 = vmatpush1.bf16.msra.mxu1 %v1471_v32  ;;  %1037 = vmatprep.subr.bf16.mxu0 %v1472_v33 }
  0x6f   : > { %1078 = vmatprep.subr.bf16.mxu1 %v1474_v34 }
  0x71   : > { %1038 = vmatpush1.bf16.msra.mxu0 %v1476_v35 }
  0x72   : > { %1079 = vmatpush1.bf16.msra.mxu1 %v1477_v36  ;;  %1039 = vmatprep.subr.bf16.mxu0 %v1478_v37 }
  0x73   : > { %1080 = vmatprep.subr.bf16.mxu1 %v1480_v38 }
  0x75   : > { %1040 = vmatpush1.bf16.msra.mxu0 %v1482_v39 }
  0x76   : > { %1081 = vmatpush1.bf16.msra.mxu1 %v1483_v40  ;;  %1041 = vmatprep.subr.bf16.mxu0 %v1484_v41 }
  0x77   : > { %1082 = vmatprep.subr.bf16.mxu1 %v1486_v42 }
  0x79   : > { %1042 = vmatpush1.bf16.msra.mxu0 %v1488_v43 }
  0x7a   : > { %1083 = vmatpush1.bf16.msra.mxu1 %v1489_v44  ;;  %1043 = vmatprep.subr.bf16.mxu0 %v1490_v45 }
  0x7b   : > { %1084 = vmatprep.subr.bf16.mxu1 %v1492_v46 }
  0x7d   : > { %1044 = vmatpush1.bf16.msra.mxu0 %v1494_v50 }
  0x7e   : > { %1085 = vmatpush1.bf16.msra.mxu1 %v1495_v51  ;;  %1045 = vmatprep.subr.bf16.mxu0 %v1496_v53 }
  0x7f   : > { %1086 = vmatprep.subr.bf16.mxu1 %v1498_v54 }
  0x81   : > { %1046 = vmatpush1.bf16.msra.mxu0 %v1500_v55 }
  0x82   : > { %1087 = vmatpush1.bf16.msra.mxu1 %v1501_v56  ;;  %1047 = vmatprep.subr.bf16.mxu0 %v1502_v57 }
  0x83   : > { %1088 = vmatprep.subr.bf16.mxu1 %v1504_v58 }
  0x85   : > { %1048 = vmatpush1.bf16.msra.mxu0 %v1506_v59 }
  0x86   : > { %1089 = vmatpush1.bf16.msra.mxu1 %v1507_v60  ;;  %1049 = vmatprep.subr.bf16.mxu0 %v1508_v61 }
  0x87   : > { %1090 = vmatprep.subr.bf16.mxu1 %v1510_v62 }
  0x89   : > { %1050 = vmatpush1.bf16.msra.mxu0 %v1512_v63 }
  0x8a   : > { %1091 = vmatpush1.bf16.msra.mxu1 %v1513_v0  ;;  %1051 = vmatprep.subr.bf16.mxu0 %v1514_v1 }
  0x8b   : > { %1092 = vmatprep.subr.bf16.mxu1 %v1516_v2 }
  0x8d   : > { %1052 = vmatpush1.bf16.msra.mxu0 %v1518_v3 }
  0x8e   : > { %1093 = vmatpush1.bf16.msra.mxu1 %v1519_v4 }
  0x90   : > { %1054 = vmatmul.mubr.bf16.vlgmr.msra.gmra.mrb[0].mxu0 %v1295_v5 }
  0x91   : > { %1095 = vmatmul.mubr.bf16.vlgmr.msra.gmra.mrb[0].mxu1 %v1297_v6 }
 0x163   : > { %v1055_v7 = vpop.f32.mrb[0].mxu0 }
 0x164   : > { %v1096_v9 = vpop.f32.mrb[0].mxu1  ;;  %v1057_v11 = vpop.f32.mrb[1].mxu0  ;;  %1110 = sbr.rel (%p1363_p13) target bundleno = 377 (0x179), region = 82 }
 0x165   : > { %v1097_v10 = vadd.f32 %v1096_v9, %v1055_v7  ;;  %v1098_v13 = vpop.f32.mrb[1].mxu1  ;;  %v1059_v15 = vpop.f32.mrb[2].mxu0 }
 0x166   : > { %v1099_v14 = vadd.f32 %v1098_v13, %v1057_v11  ;;  %v1100_v16 = vpop.f32.mrb[2].mxu1  ;;  %v1060_v18 = vpop.f32.mrb[3].mxu0 }
 0x167   : > { %v1103_v17 = vadd.f32 %v1097_v10, %v619_v8  ;;  %v1101_v19 = vpop.f32.mrb[3].mxu1 }
 0x168   : > { %v1104_v20 = vadd.f32 %v1099_v14, %v620_v12 }
 0x169   : > { %1105 = vst [vmem:[#allocation2] sm:$0xff] %v1103_v17 }
 0x16a   : > { %1106 = vst [vmem:[#allocation2 + $0x8] sm:$0xff] %v1104_v20 }
 0x170   : > { %v1111_v26 = vld [vmem:[#allocation2] sm:$0xff] }
 0x171   : > { %v1112_v27 = vld [vmem:[#allocation2 + $0x8] sm:$0xff]  ;;  %v1125_v32 = vadd.f32 %v1118_v28, %v1111_v26 }
 0x172   : > { %v1126_v33 = vadd.f32 %v1122_v29, %v1112_v27 }
 0x173   : > { %v1129_v34 = vadd.f32 %v1127_v30, %v1125_v32 }
 0x174   : > { %v1130_v35 = vadd.f32 %v1128_v31, %v1126_v33 }
 0x175   : > { %v1131_v36 = vmax.f32 %v1129_v34, 0.0 }
 0x176   : > { %v1132_v37 = vmax.f32 %v1130_v35, 0.0 }
 0x177   : > { %1133 = vst [vmem:[%s1823_s12] sm:$0xff] %v1131_v36 }
 0x178   : > { %1134 = vst [vmem:[%s1823_s12 + $0x8] sm:$0xff] %v1132_v37 }
 0x179 PF: > { %s14_s21 = sadd.s32 1, %s1578_s21   ;;  %s1930_s15 = smov %s1558_s16 }
 0x17a   : > { %p11_p0 = scmp.ge.s32.totalorder %s14_s21, 20   ;;  %s1931_s16 = smov %s1657_s28 }
 0x17b   : > { %s1932_s17 = smov %s1570_s19  ;;  %s1933_s18 = smov %s1574_s20 }
 0x17c   : > { %s1934_s19 = smov %s1937_s22  ;;  %s1935_s20 = smov %s1941_s23 }
 0x17d   :  { %13 = sbr.rel (!%p11_p0) target bundleno = 4 (0x4), region = 126 }

// kernel: forward.73
= control target key start
LH: loop header
LB: loop body
LE: loop exit
PB: predicated region body
PF: predicated region fallthrough
CT: control target
= control target key end

     0   :  { %s1019_s12 = smov 0   ;;  %s1021_s13 = smov 0   ;;  %s1198_s0 = inlined_call_operand.vmem [shape: bf16[8,256], index: 0, kind: input, shape index: {}]   ;;  %s1199_s1 = inlined_call_operand.vmem [shape: bf16[256,512], index: 1, kind: input, shape index: {}]   ;;  %s1200_s2 = inlined_call_operand.vmem [shape: f32[1,512], index: 2, kind: input, shape index: {}]   ;;  %s1201_s3 = inlined_call_operand.vmem [shape: f32[8,512], index: 3, kind: output, shape index: {}]  }
   0x1   :  { %s1023_s14 = smov 0   ;;  %s1025_s15 = smov 0  }
   0x2   :  { %s1027_s16 = smov 0  }
   0x3 LB: > { %s28_s17 = sadd.s32 1, %s993_s15  ;;  %p76_p1 = scmp.ne.s32.totalorder %s985_s13, %s981_s12  ;;  %s997_s16 = sphi %s1027_s16, %s13_s16   ;;  %s993_s15 = sphi %s1025_s15, %s1205_s15   ;;  %s989_s14 = sphi %s1023_s14, %s1204_s14   ;;  %s985_s13 = sphi %s1021_s13, %s1203_s13   ;;  %s981_s12 = sphi %s1019_s12, %s1202_s12  }
   0x4   : > { %p30_p0 = scmp.ge.s32.totalorder %s28_s17, 2  ;;  %p77_p2 = scmp.eq.s32.totalorder %s997_s16, 0 }
   0x5   : > { %s69_s19 = sadd.s32 1, %s985_s13  ;;  %p823_p5 = scmp.ge.s32.totalorder %s997_s16, 2 }
   0x6   : > { %s1207_s17 = smov (%p30_p0, %s28_s17), 0  ;;  %p78_p3 = por %p77_p2, %p76_p1 }
   0x7   : > { %s65_s18 = ssub.s32 %s993_s15, %s1207_s17  ;;  %169 = sbr.rel (%p823_p5) target bundleno = 34 (0x22), region = 20 }
   0x8   : > { %p67_p4 = scmp.eq.s32.totalorder %s65_s18, 0 }
   0xa   : > { %s1054_s20 = scalar_select %p67_p4, %s985_s13, %s69_s19  }
   0xe   : > { %172 = sbr.rel (!%p78_p3) target bundleno = 34 (0x22), region = 24  ;;  %s174_s21 = sand.u32 (%p78_p3), 1, %s985_s13  }
   0xf   : > { %s868_s22 = sshll.u32 (%p78_p3), %s993_s15, 3  ;;  %s824_s23 = sshll.u32 (%p78_p3), %s174_s21, 8 }
  0x10   : > { %s1062_s26 = scalar_lea.vmem (%p78_p3), %s1199_s1, %s868_s22  ;;  %s1067_s27 = scalar_lea.vmem (%p78_p3), [#allocation3], %s824_s23 }
  0x11   : > { %v272_v0 = vld [vmem:[%s1062_s26] sm:$0xff] (%p78_p3)  ;;  %v274_v1 = vld [vmem:[%s1062_s26 + $0x10] sm:$0xff] (%p78_p3) }
  0x12   : > { %v276_v2 = vld [vmem:[%s1062_s26 + $0x20] sm:$0xff] (%p78_p3)  ;;  %273 = vst [vmem:[%s1067_s27] sm:$0xff] (%p78_p3), %v272_v0  ;;  %275 = vst [vmem:[%s1067_s27 + $0x8] sm:$0xff] (%p78_p3), %v274_v1  ;;  %v278_v3 = vld [vmem:[%s1062_s26 + $0x30] sm:$0xff] (%p78_p3) }
  0x13   : > { %277 = vst [vmem:[%s1067_s27 + $0x10] sm:$0xff] (%p78_p3), %v276_v2  ;;  %v280_v4 = vld [vmem:[%s1062_s26 + $0x40] sm:$0xff] (%p78_p3)  ;;  %v282_v5 = vld [vmem:[%s1062_s26 + $0x50] sm:$0xff] (%p78_p3)  ;;  %279 = vst [vmem:[%s1067_s27 + $0x18] sm:$0xff] (%p78_p3), %v278_v3 }
  0x14   : > { %281 = vst [vmem:[%s1067_s27 + $0x20] sm:$0xff] (%p78_p3), %v280_v4  ;;  %283 = vst [vmem:[%s1067_s27 + $0x28] sm:$0xff] (%p78_p3), %v282_v5  ;;  %v284_v6 = vld [vmem:[%s1062_s26 + $0x60] sm:$0xff] (%p78_p3)  ;;  %v286_v7 = vld [vmem:[%s1062_s26 + $0x70] sm:$0xff] (%p78_p3) }
  0x15   : > { %v288_v8 = vld [vmem:[%s1062_s26 + $0x80] sm:$0xff]  ;;  %285 = vst [vmem:[%s1067_s27 + $0x30] sm:$0xff] %v284_v6  ;;  %287 = vst [vmem:[%s1067_s27 + $0x38] sm:$0xff] %v286_v7  ;;  %v290_v9 = vld [vmem:[%s1062_s26 + $0x90] sm:$0xff] }
  0x16   : > { %289 = vst [vmem:[%s1067_s27 + $0x40] sm:$0xff] %v288_v8  ;;  %v292_v10 = vld [vmem:[%s1062_s26 + $0xa0] sm:$0xff]  ;;  %v294_v11 = vld [vmem:[%s1062_s26 + $0xb0] sm:$0xff]  ;;  %291 = vst [vmem:[%s1067_s27 + $0x48] sm:$0xff] %v290_v9 }
  0x17   : > { %293 = vst [vmem:[%s1067_s27 + $0x50] sm:$0xff] %v292_v10  ;;  %295 = vst [vmem:[%s1067_s27 + $0x58] sm:$0xff] %v294_v11  ;;  %v296_v12 = vld [vmem:[%s1062_s26 + $0xc0] sm:$0xff]  ;;  %v298_v13 = vld [vmem:[%s1062_s26 + $0xd0] sm:$0xff] }
  0x18   : > { %v300_v14 = vld [vmem:[%s1062_s26 + $0xe0] sm:$0xff]  ;;  %297 = vst [vmem:[%s1067_s27 + $0x60] sm:$0xff] %v296_v12  ;;  %299 = vst [vmem:[%s1067_s27 + $0x68] sm:$0xff] %v298_v13  ;;  %v302_v15 = vld [vmem:[%s1062_s26 + $0xf0] sm:$0xff] }
  0x19   : > { %301 = vst [vmem:[%s1067_s27 + $0x70] sm:$0xff] %v300_v14  ;;  %v304_v16 = vld [vmem:[%s1062_s26 + $0x100] sm:$0xff]  ;;  %v306_v17 = vld [vmem:[%s1062_s26 + $0x110] sm:$0xff]  ;;  %303 = vst [vmem:[%s1067_s27 + $0x78] sm:$0xff] %v302_v15 }
  0x1a   : > { %305 = vst [vmem:[%s1067_s27 + $0x80] sm:$0xff] %v304_v16  ;;  %307 = vst [vmem:[%s1067_s27 + $0x88] sm:$0xff] %v306_v17  ;;  %v308_v18 = vld [vmem:[%s1062_s26 + $0x120] sm:$0xff]  ;;  %v310_v19 = vld [vmem:[%s1062_s26 + $0x130] sm:$0xff] }
  0x1b   : > { %v312_v20 = vld [vmem:[%s1062_s26 + $0x140] sm:$0xff]  ;;  %309 = vst [vmem:[%s1067_s27 + $0x90] sm:$0xff] %v308_v18  ;;  %311 = vst [vmem:[%s1067_s27 + $0x98] sm:$0xff] %v310_v19  ;;  %v314_v21 = vld [vmem:[%s1062_s26 + $0x150] sm:$0xff] }
  0x1c   : > { %313 = vst [vmem:[%s1067_s27 + $0xa0] sm:$0xff] %v312_v20  ;;  %v316_v22 = vld [vmem:[%s1062_s26 + $0x160] sm:$0xff]  ;;  %v318_v23 = vld [vmem:[%s1062_s26 + $0x170] sm:$0xff]  ;;  %315 = vst [vmem:[%s1067_s27 + $0xa8] sm:$0xff] %v314_v21 }
  0x1d   : > { %317 = vst [vmem:[%s1067_s27 + $0xb0] sm:$0xff] %v316_v22  ;;  %319 = vst [vmem:[%s1067_s27 + $0xb8] sm:$0xff] %v318_v23  ;;  %v320_v24 = vld [vmem:[%s1062_s26 + $0x180] sm:$0xff]  ;;  %v322_v25 = vld [vmem:[%s1062_s26 + $0x190] sm:$0xff] }
  0x1e   : > { %v324_v26 = vld [vmem:[%s1062_s26 + $0x1a0] sm:$0xff]  ;;  %321 = vst [vmem:[%s1067_s27 + $0xc0] sm:$0xff] %v320_v24  ;;  %323 = vst [vmem:[%s1067_s27 + $0xc8] sm:$0xff] %v322_v25  ;;  %v326_v27 = vld [vmem:[%s1062_s26 + $0x1b0] sm:$0xff] }
  0x1f   : > { %325 = vst [vmem:[%s1067_s27 + $0xd0] sm:$0xff] %v324_v26  ;;  %v328_v28 = vld [vmem:[%s1062_s26 + $0x1c0] sm:$0xff]  ;;  %v330_v29 = vld [vmem:[%s1062_s26 + $0x1d0] sm:$0xff]  ;;  %327 = vst [vmem:[%s1067_s27 + $0xd8] sm:$0xff] %v326_v27 }
  0x20   : > { %329 = vst [vmem:[%s1067_s27 + $0xe0] sm:$0xff] %v328_v28  ;;  %331 = vst [vmem:[%s1067_s27 + $0xe8] sm:$0xff] %v330_v29  ;;  %v332_v30 = vld [vmem:[%s1062_s26 + $0x1e0] sm:$0xff]  ;;  %v334_v31 = vld [vmem:[%s1062_s26 + $0x1f0] sm:$0xff] }
  0x21   : > { %333 = vst [vmem:[%s1067_s27 + $0xf0] sm:$0xff] %v332_v30  ;;  %335 = vst [vmem:[%s1067_s27 + $0xf8] sm:$0xff] %v334_v31 }
  0x22 PF: > { %p827_p6 = scmp.ge.s32.totalorder %s997_s16, 1  ;;  %p348_p7 = scmp.lt.s32.totalorder %s997_s16, 3 }
  0x24   : > { %p349_p8 = pnand %p827_p6, %p348_p7 }
  0x25   : > { %s355_s28 = sand.u32 (!%p349_p8), 1, %s981_s12   ;;  %v1136_v32 = vld [vmem:[%s1198_s0] sm:$0xff] (!%p349_p8)  ;;  %s829_s6 = sshll.u32 (!%p349_p8), %s989_s14, 1  ;;  %v682_v3 = vlaneseq (!%p349_p8) }
  0x26   : > { %352 = sbr.rel (%p349_p8) target bundleno = 321 (0x141), region = 66  ;;  %s828_s4 = sshll.u32 (!%p349_p8), %s355_s28, 8  ;;  %v833_v33 = vcombine.high (!%p349_p8), %v1136_v32, %v1136_v32  ;;  %v832_v2 = vcombine.low (!%p349_p8), %v1136_v32, %v1136_v32 }
  0x27   : > { %s1140_s5 = scalar_lea.vmem (!%p349_p8), [#allocation3], %s828_s4  ;;  %p408_p9 = scmp.lt.s32.totalorder (!%p349_p8), %s829_s6, 3  ;;  %v683_v4 = vshrl.u32 (!%p349_p8), %v682_v3, 7 }
  0x28   : > { %v909_v34 = vld [vmem:[%s1140_s5 + $0x4] ss:$8 sps:$4 sm:$0xff] (!%p349_p8)   ;;  %662 = vmatprep.mubr.bf16.mxu0 (!%p349_p8), %v833_v33  ;;  %v911_v35 = vld [vmem:[%s1140_s5] ss:$8 sps:$4 sm:$0xff] (!%p349_p8)   ;;  %v912_v36 = vld [vmem:[%s1140_s5 + $0x14] ss:$8 sps:$4 sm:$0xff] (!%p349_p8)  }
  0x29   : > { %630 = vmatprep.subr.bf16.mxu0 (!%p349_p8), %v909_v34  ;;  %v914_v37 = vld [vmem:[%s1140_s5 + $0x10] ss:$8 sps:$4 sm:$0xff] (!%p349_p8)   ;;  %v915_v38 = vld [vmem:[%s1140_s5 + $0x24] ss:$8 sps:$4 sm:$0xff] (!%p349_p8)   ;;  %v917_v39 = vld [vmem:[%s1140_s5 + $0x20] ss:$8 sps:$4 sm:$0xff] (!%p349_p8)  }
  0x2a   : > { %631 = vmatpush1.bf16.msra.mxu0 (!%p349_p8), %v911_v35  ;;  %v918_v40 = vld [vmem:[%s1140_s5 + $0x34] ss:$8 sps:$4 sm:$0xff] (!%p349_p8)   ;;  %v920_v41 = vld [vmem:[%s1140_s5 + $0x30] ss:$8 sps:$4 sm:$0xff] (!%p349_p8)   ;;  %v921_v42 = vld [vmem:[%s1140_s5 + $0x44] ss:$8 sps:$4 sm:$0xff] (!%p349_p8)  }
  0x2b   : > { %632 = vmatprep.subr.bf16.mxu0 (!%p349_p8), %v912_v36  ;;  %v923_v43 = vld [vmem:[%s1140_s5 + $0x40] ss:$8 sps:$4 sm:$0xff] (!%p349_p8)   ;;  %v924_v44 = vld [vmem:[%s1140_s5 + $0x54] ss:$8 sps:$4 sm:$0xff] (!%p349_p8)   ;;  %v926_v45 = vld [vmem:[%s1140_s5 + $0x50] ss:$8 sps:$4 sm:$0xff] (!%p349_p8)  }
  0x2c   : > { %v927_v46 = vld [vmem:[%s1140_s5 + $0x64] ss:$8 sps:$4 sm:$0xff] (!%p349_p8)   ;;  %v929_v47 = vld [vmem:[%s1140_s5 + $0x60] ss:$8 sps:$4 sm:$0xff] (!%p349_p8)   ;;  %v930_v48 = vld [vmem:[%s1140_s5 + $0x74] ss:$8 sps:$4 sm:$0xff] (!%p349_p8)  }
  0x2d   : > { %v932_v49 = vld [vmem:[%s1140_s5 + $0x70] ss:$8 sps:$4 sm:$0xff]   ;;  %v933_v50 = vld [vmem:[%s1140_s5 + $0x84] ss:$8 sps:$4 sm:$0xff]   ;;  %v935_v51 = vld [vmem:[%s1140_s5 + $0x80] ss:$8 sps:$4 sm:$0xff]  }
  0x2e   : > { %633 = vmatpush1.bf16.msra.mxu0 %v914_v37  ;;  %v936_v52 = vld [vmem:[%s1140_s5 + $0x94] ss:$8 sps:$4 sm:$0xff]   ;;  %v938_v53 = vld [vmem:[%s1140_s5 + $0x90] ss:$8 sps:$4 sm:$0xff]   ;;  %v939_v54 = vld [vmem:[%s1140_s5 + $0xa4] ss:$8 sps:$4 sm:$0xff]  }
  0x2f   : > { %634 = vmatprep.subr.bf16.mxu0 %v915_v38  ;;  %v941_v55 = vld [vmem:[%s1140_s5 + $0xa0] ss:$8 sps:$4 sm:$0xff]   ;;  %v942_v56 = vld [vmem:[%s1140_s5 + $0xb4] ss:$8 sps:$4 sm:$0xff]   ;;  %v944_v57 = vld [vmem:[%s1140_s5 + $0xb0] ss:$8 sps:$4 sm:$0xff]  }
  0x30   : > { %v945_v58 = vld [vmem:[%s1140_s5 + $0xc4] ss:$8 sps:$4 sm:$0xff]   ;;  %v947_v59 = vld [vmem:[%s1140_s5 + $0xc0] ss:$8 sps:$4 sm:$0xff]   ;;  %v948_v60 = vld [vmem:[%s1140_s5 + $0xd4] ss:$8 sps:$4 sm:$0xff]  }
  0x31   : > { %v950_v61 = vld [vmem:[%s1140_s5 + $0xd0] ss:$8 sps:$4 sm:$0xff]   ;;  %v951_v62 = vld [vmem:[%s1140_s5 + $0xe4] ss:$8 sps:$4 sm:$0xff]   ;;  %v953_v63 = vld [vmem:[%s1140_s5 + $0xe0] ss:$8 sps:$4 sm:$0xff]  }
  0x32   : > { %635 = vmatpush1.bf16.msra.mxu0 %v917_v39  ;;  %v954_v0 = vld [vmem:[%s1140_s5 + $0xf4] ss:$8 sps:$4 sm:$0xff]   ;;  %v956_v1 = vld [vmem:[%s1140_s5 + $0xf0] ss:$8 sps:$4 sm:$0xff]   ;;  %s1209_s6 = smov (!%p408_p9, %s829_s6), 3  ;;  %v684_v5 = vsub.s32 0, %v683_v4 }
  0x33   : > { %636 = vmatprep.subr.bf16.mxu0 %v918_v40  ;;  %s410_s9 = scalar_lea.vmem %s1200_s2, %s1209_s6  ;;  %v688_v7 = vsub.s32 1, %v683_v4  ;;  %s831_s10 = sshll.u32 %s1209_s6, 3 }
  0x34   : > { %v680_v6 = vld [vmem:[%s410_s9] sm:$0x3]  ;;  %s420_s18 = scalar_lea.vmem %s1201_s3, %s831_s10 }
  0x35   : > { %v685_v8 = vrot.slane %v680_v6, %v684_v5  ;;  %v689_v9 = vrot.slane %v680_v6, %v688_v7 }
  0x36   : > { %637 = vmatpush1.bf16.msra.mxu0 %v920_v41 }
  0x37   : > { %638 = vmatprep.subr.bf16.mxu0 %v921_v42 }
  0x3a   : > { %639 = vmatpush1.bf16.msra.mxu0 %v923_v43 }
  0x3b   : > { %640 = vmatprep.subr.bf16.mxu0 %v924_v44 }
  0x3e   : > { %641 = vmatpush1.bf16.msra.mxu0 %v926_v45 }
  0x3f   : > { %642 = vmatprep.subr.bf16.mxu0 %v927_v46 }
  0x42   : > { %643 = vmatpush1.bf16.msra.mxu0 %v929_v47 }
  0x43   : > { %644 = vmatprep.subr.bf16.mxu0 %v930_v48 }
  0x46   : > { %645 = vmatpush1.bf16.msra.mxu0 %v932_v49 }
  0x47   : > { %646 = vmatprep.subr.bf16.mxu0 %v933_v50 }
  0x4a   : > { %647 = vmatpush1.bf16.msra.mxu0 %v935_v51 }
  0x4b   : > { %648 = vmatprep.subr.bf16.mxu0 %v936_v52 }
  0x4e   : > { %649 = vmatpush1.bf16.msra.mxu0 %v938_v53 }
  0x4f   : > { %650 = vmatprep.subr.bf16.mxu0 %v939_v54 }
  0x52   : > { %651 = vmatpush1.bf16.msra.mxu0 %v941_v55 }
  0x53   : > { %652 = vmatprep.subr.bf16.mxu0 %v942_v56 }
  0x56   : > { %653 = vmatpush1.bf16.msra.mxu0 %v944_v57 }
  0x57   : > { %654 = vmatprep.subr.bf16.mxu0 %v945_v58 }
  0x5a   : > { %655 = vmatpush1.bf16.msra.mxu0 %v947_v59 }
  0x5b   : > { %656 = vmatprep.subr.bf16.mxu0 %v948_v60 }
  0x5e   : > { %657 = vmatpush1.bf16.msra.mxu0 %v950_v61 }
  0x5f   : > { %658 = vmatprep.subr.bf16.mxu0 %v951_v62 }
  0x62   : > { %659 = vmatpush1.bf16.msra.mxu0 %v953_v63 }
  0x63   : > { %660 = vmatprep.subr.bf16.mxu0 %v954_v0 }
  0x66   : > { %661 = vmatpush1.bf16.msra.mxu0 %v956_v1 }
  0x69   : > { %663 = vmatmul.mubr.bf16.vlgmr.msra.gmra.mrb[0].mxu0 %v832_v2 }
 0x13c   : > { %v664_v10 = vpop.f32.mrb[0].mxu0 }
 0x13d   : > { %v692_v11 = vadd.f32 %v685_v8, %v664_v10  ;;  %v666_v12 = vpop.f32.mrb[1].mxu0 }
 0x13e   : > { %v693_v13 = vadd.f32 %v689_v9, %v666_v12  ;;  %v668_v14 = vpop.f32.mrb[2].mxu0 }
 0x13f   : > { %694 = vst [vmem:[%s420_s18] sm:$0xff] %v692_v11  ;;  %v669_v15 = vpop.f32.mrb[3].mxu0 }
 0x140   : > { %695 = vst [vmem:[%s420_s18 + $0x8] sm:$0xff] %v693_v13 }
 0x141 PF: > { %s13_s16 = sadd.s32 1, %s997_s16   ;;  %s1202_s12 = smov %s985_s13 }
 0x142   : > { %p10_p10 = scmp.ge.s32.totalorder %s13_s16, 4   ;;  %s1203_s13 = smov %s1054_s20 }
 0x143   : > { %s1204_s14 = smov %s993_s15  ;;  %s1205_s15 = smov %s1207_s17 }
 0x144   :  { %12 = sbr.rel (!%p10_p10) target bundleno = 3 (0x3), region = 119 }

// kernel: forward.80
= control target key start
LH: loop header
LB: loop body
LE: loop exit
PB: predicated region body
PF: predicated region fallthrough
CT: control target
= control target key end

     0   :  { %s1167_s12 = smov 0   ;;  %s1169_s13 = smov 0   ;;  %s1285_s0 = inlined_call_operand.vmem [shape: bf16[8,4608], index: 0, kind: input, shape index: {}]   ;;  %s1286_s1 = inlined_call_operand.vmem [shape: bf16[4608,256], index: 1, kind: input, shape index: {}]   ;;  %s1287_s2 = inlined_call_operand.vmem [shape: f32[1,256], index: 2, kind: input, shape index: {}]   ;;  %s1288_s3 = inlined_call_operand.vmem [shape: f32[8,256], index: 3, kind: output, shape index: {}]  }
   0x1   :  { %s1171_s14 = smov 0  }
   0x2 LB: > { %s25_s15 = sadd.s32 1, %s1140_s13  ;;  %p916_p0 = scmp.ge.s32.totalorder %s1144_s14, 1  ;;  %s1144_s14 = sphi %s1171_s14, %s13_s14   ;;  %s1140_s13 = sphi %s1169_s13, %s1290_s13   ;;  %s1136_s12 = sphi %s1167_s12, %s1289_s12  }
   0x3   : > { %p26_p1 = scmp.ge.s32.totalorder %s25_s15, 9  ;;  %p194_p2 = scmp.lt.s32.totalorder %s1144_s14, 10 }
   0x5   : > { %s1292_s15 = smov (%p26_p1, %s25_s15), 0  ;;  %p195_p3 = pnand %p916_p0, %p194_p2 }
   0x6   : > { %s917_s16 = sshll.u32 (!%p195_p3), %s1136_s12, 2  ;;  %s919_s17 = sshll.u32 (!%p195_p3), %s1136_s12, 6 }
   0x7   : > { %198 = sbr.rel (%p195_p3) target bundleno = 320 (0x140), region = 32  ;;  %p243_p4 = scmp.lt.s32.totalorder (!%p195_p3), %s917_s16, 35 }
   0x8   : > { %p252_p5 = scmp.lt.s32.totalorder (!%p195_p3), %s919_s17, 575  ;;  %p922_p6 = scmp.ne.s32.totalorder (!%p195_p3), %s1136_s12, 0 }
   0xe   : > { %s1294_s16 = smov (!%p243_p4, %s917_s16), 35  ;;  %s1296_s17 = smov (!%p252_p5, %s919_s17), 575 }
   0xf   : > { %s918_s18 = sshll.u32 %s1294_s16, 2  ;;  %s996_s22 = sshll.u32 %s1296_s17, 3  ;;  %v1146_v0 = vmov (!%p922_p6), 0.0  }
  0x10   : > { %s1192_s21 = scalar_lea.vmem %s1285_s0, %s918_s18  ;;  %s1197_s25 = scalar_lea.vmem %s1286_s1, %s996_s22  ;;  %281 = vst [vmem:[#allocation2] sm:$0xff] (!%p922_p6), %v1146_v0  ;;  %282 = vst [vmem:[#allocation2 + $0x8] sm:$0xff] (!%p922_p6), %v1146_v0 }
  0x11   : > { %280 = sbr.rel (%p922_p6) target bundleno = 24 (0x18), region = 36 }
  0x18 PF: > { %v1022_v1 = vld [vmem:[%s1197_s25 + $0x4] ss:$8 sps:$4 sm:$0xff]   ;;  %v1026_v3 = vld [vmem:[%s1197_s25] ss:$8 sps:$4 sm:$0xff]   ;;  %v1028_v5 = vld [vmem:[%s1197_s25 + $0x14] ss:$8 sps:$4 sm:$0xff]  }
  0x19   : > { %v1024_v2 = vld [vmem:[%s1197_s25 + $0x104] ss:$8 sps:$4 sm:$0xff]   ;;  %685 = vmatprep.subr.bf16.mxu0 %v1022_v1  ;;  %v1027_v4 = vld [vmem:[%s1197_s25 + $0x100] ss:$8 sps:$4 sm:$0xff]   ;;  %v1030_v6 = vld [vmem:[%s1197_s25 + $0x114] ss:$8 sps:$4 sm:$0xff]  }
  0x1a   : > { %726 = vmatprep.subr.bf16.mxu1 %v1024_v2  ;;  %686 = vmatpush1.bf16.msra.mxu0 %v1026_v3  ;;  %v1032_v7 = vld [vmem:[%s1197_s25 + $0x10] ss:$8 sps:$4 sm:$0xff]   ;;  %v1034_v9 = vld [vmem:[%s1197_s25 + $0x24] ss:$8 sps:$4 sm:$0xff]   ;;  %v1038_v11 = vld [vmem:[%s1197_s25 + $0x20] ss:$8 sps:$4 sm:$0xff]  }
  0x1b   : > { %727 = vmatpush1.bf16.msra.mxu1 %v1027_v4  ;;  %687 = vmatprep.subr.bf16.mxu0 %v1028_v5  ;;  %v1033_v8 = vld [vmem:[%s1197_s25 + $0x110] ss:$8 sps:$4 sm:$0xff]   ;;  %v1036_v10 = vld [vmem:[%s1197_s25 + $0x124] ss:$8 sps:$4 sm:$0xff]   ;;  %v1039_v12 = vld [vmem:[%s1197_s25 + $0x120] ss:$8 sps:$4 sm:$0xff]  }
  0x1c   : > { %728 = vmatprep.subr.bf16.mxu1 %v1030_v6  ;;  %v1040_v13 = vld [vmem:[%s1197_s25 + $0x34] ss:$8 sps:$4 sm:$0xff]   ;;  %v1044_v15 = vld [vmem:[%s1197_s25 + $0x30] ss:$8 sps:$4 sm:$0xff]   ;;  %v1046_v17 = vld [vmem:[%s1197_s25 + $0x44] ss:$8 sps:$4 sm:$0xff]  }
  0x1d   : > { %v1042_v14 = vld [vmem:[%s1197_s25 + $0x134] ss:$8 sps:$4 sm:$0xff]   ;;  %v1045_v16 = vld [vmem:[%s1197_s25 + $0x130] ss:$8 sps:$4 sm:$0xff]   ;;  %v1048_v18 = vld [vmem:[%s1197_s25 + $0x144] ss:$8 sps:$4 sm:$0xff]  }
  0x1e   : > { %688 = vmatpush1.bf16.msra.mxu0 %v1032_v7  ;;  %v1050_v19 = vld [vmem:[%s1197_s25 + $0x40] ss:$8 sps:$4 sm:$0xff]   ;;  %v1052_v21 = vld [vmem:[%s1197_s25 + $0x54] ss:$8 sps:$4 sm:$0xff]   ;;  %v1056_v23 = vld [vmem:[%s1197_s25 + $0x50] ss:$8 sps:$4 sm:$0xff]  }
  0x1f   : > { %729 = vmatpush1.bf16.msra.mxu1 %v1033_v8  ;;  %689 = vmatprep.subr.bf16.mxu0 %v1034_v9  ;;  %v1051_v20 = vld [vmem:[%s1197_s25 + $0x140] ss:$8 sps:$4 sm:$0xff]   ;;  %v1054_v22 = vld [vmem:[%s1197_s25 + $0x154] ss:$8 sps:$4 sm:$0xff]   ;;  %v1057_v24 = vld [vmem:[%s1197_s25 + $0x150] ss:$8 sps:$4 sm:$0xff]  }
  0x20   : > { %730 = vmatprep.subr.bf16.mxu1 %v1036_v10  ;;  %v1058_v25 = vld [vmem:[%s1197_s25 + $0x64] ss:$8 sps:$4 sm:$0xff]   ;;  %v1062_v27 = vld [vmem:[%s1197_s25 + $0x60] ss:$8 sps:$4 sm:$0xff]   ;;  %v1064_v29 = vld [vmem:[%s1197_s25 + $0x74] ss:$8 sps:$4 sm:$0xff]  }
  0x21   : > { %v1060_v26 = vld [vmem:[%s1197_s25 + $0x164] ss:$8 sps:$4 sm:$0xff]   ;;  %v1063_v28 = vld [vmem:[%s1197_s25 + $0x160] ss:$8 sps:$4 sm:$0xff]   ;;  %v1066_v30 = vld [vmem:[%s1197_s25 + $0x174] ss:$8 sps:$4 sm:$0xff]  }
  0x22   : > { %690 = vmatpush1.bf16.msra.mxu0 %v1038_v11  ;;  %v1068_v31 = vld [vmem:[%s1197_s25 + $0x70] ss:$8 sps:$4 sm:$0xff]   ;;  %v1070_v33 = vld [vmem:[%s1197_s25 + $0x84] ss:$8 sps:$4 sm:$0xff]   ;;  %v1074_v35 = vld [vmem:[%s1197_s25 + $0x80] ss:$8 sps:$4 sm:$0xff]  }
  0x23   : > { %731 = vmatpush1.bf16.msra.mxu1 %v1039_v12  ;;  %691 = vmatprep.subr.bf16.mxu0 %v1040_v13  ;;  %v1069_v32 = vld [vmem:[%s1197_s25 + $0x170] ss:$8 sps:$4 sm:$0xff]   ;;  %v1072_v34 = vld [vmem:[%s1197_s25 + $0x184] ss:$8 sps:$4 sm:$0xff]   ;;  %v1075_v36 = vld [vmem:[%s1197_s25 + $0x180] ss:$8 sps:$4 sm:$0xff]  }
  0x24   : > { %732 = vmatprep.subr.bf16.mxu1 %v1042_v14  ;;  %v1076_v37 = vld [vmem:[%s1197_s25 + $0x94] ss:$8 sps:$4 sm:$0xff]   ;;  %v1080_v39 = vld [vmem:[%s1197_s25 + $0x90] ss:$8 sps:$4 sm:$0xff]   ;;  %v1082_v41 = vld [vmem:[%s1197_s25 + $0xa4] ss:$8 sps:$4 sm:$0xff]  }
  0x25   : > { %v1078_v38 = vld [vmem:[%s1197_s25 + $0x194] ss:$8 sps:$4 sm:$0xff]   ;;  %v1081_v40 = vld [vmem:[%s1197_s25 + $0x190] ss:$8 sps:$4 sm:$0xff]   ;;  %v1084_v42 = vld [vmem:[%s1197_s25 + $0x1a4] ss:$8 sps:$4 sm:$0xff]  }
  0x26   : > { %692 = vmatpush1.bf16.msra.mxu0 %v1044_v15  ;;  %v1086_v43 = vld [vmem:[%s1197_s25 + $0xa0] ss:$8 sps:$4 sm:$0xff]   ;;  %v1088_v45 = vld [vmem:[%s1197_s25 + $0xb4] ss:$8 sps:$4 sm:$0xff]   ;;  %v1092_v50 = vld [vmem:[%s1197_s25 + $0xb0] ss:$8 sps:$4 sm:$0xff]  }
  0x27   : > { %733 = vmatpush1.bf16.msra.mxu1 %v1045_v16  ;;  %693 = vmatprep.subr.bf16.mxu0 %v1046_v17  ;;  %v1087_v44 = vld [vmem:[%s1197_s25 + $0x1a0] ss:$8 sps:$4 sm:$0xff]   ;;  %v1090_v46 = vld [vmem:[%s1197_s25 + $0x1b4] ss:$8 sps:$4 sm:$0xff]   ;;  %v1093_v51 = vld [vmem:[%s1197_s25 + $0x1b0] ss:$8 sps:$4 sm:$0xff]  }
  0x28   : > { %734 = vmatprep.subr.bf16.mxu1 %v1048_v18  ;;  %v285_v47 = vld [vmem:[%s1192_s21] sm:$0xff]  ;;  %v286_v49 = vld [vmem:[%s1192_s21 + $0x8] sm:$0xff]  ;;  %v1100_v57 = vld [vmem:[%s1197_s25 + $0xd4] ss:$8 sps:$4 sm:$0xff]   ;;  %p991_p7 = scmp.ne.s32.totalorder %s1136_s12, 8 }
  0x29   : > { %v924_v48 = vcombine.high %v285_v47, %v285_v47  ;;  %v926_v52 = vcombine.high %v286_v49, %v286_v49  ;;  %v1094_v53 = vld [vmem:[%s1197_s25 + $0xc4] ss:$8 sps:$4 sm:$0xff]   ;;  %v1098_v55 = vld [vmem:[%s1197_s25 + $0xc0] ss:$8 sps:$4 sm:$0xff]   ;;  %v1102_v58 = vld [vmem:[%s1197_s25 + $0x1d4] ss:$8 sps:$4 sm:$0xff]   ;;  %v923_v5 = vcombine.low %v285_v47, %v285_v47  ;;  %v925_v6 = vcombine.low %v286_v49, %v286_v49 }
  0x2a   : > { %694 = vmatpush1.bf16.msra.mxu0 %v1050_v19  ;;  %v1096_v54 = vld [vmem:[%s1197_s25 + $0x1c4] ss:$8 sps:$4 sm:$0xff]   ;;  %v1099_v56 = vld [vmem:[%s1197_s25 + $0x1c0] ss:$8 sps:$4 sm:$0xff]   ;;  %v1104_v59 = vld [vmem:[%s1197_s25 + $0xd0] ss:$8 sps:$4 sm:$0xff]  }
  0x2b   : > { %735 = vmatpush1.bf16.msra.mxu1 %v1051_v20  ;;  %695 = vmatprep.subr.bf16.mxu0 %v1052_v21  ;;  %v1105_v60 = vld [vmem:[%s1197_s25 + $0x1d0] ss:$8 sps:$4 sm:$0xff]   ;;  %v1106_v61 = vld [vmem:[%s1197_s25 + $0xe4] ss:$8 sps:$4 sm:$0xff]   ;;  %v1110_v63 = vld [vmem:[%s1197_s25 + $0xe0] ss:$8 sps:$4 sm:$0xff]   ;;  %v779_v21 = vlaneseq (!%p991_p7) }
  0x2c   : > { %736 = vmatprep.subr.bf16.mxu1 %v1054_v22  ;;  %717 = vmatprep.mubr.bf16.mxu0 %v924_v48  ;;  %v1108_v62 = vld [vmem:[%s1197_s25 + $0x1e4] ss:$8 sps:$4 sm:$0xff]   ;;  %v1111_v0 = vld [vmem:[%s1197_s25 + $0x1e0] ss:$8 sps:$4 sm:$0xff]   ;;  %v1112_v1 = vld [vmem:[%s1197_s25 + $0xf4] ss:$8 sps:$4 sm:$0xff]  }
  0x2d   : > { %758 = vmatprep.mubr.bf16.mxu1 %v926_v52  ;;  %v1114_v2 = vld [vmem:[%s1197_s25 + $0x1f4] ss:$8 sps:$4 sm:$0xff]   ;;  %v1116_v3 = vld [vmem:[%s1197_s25 + $0xf0] ss:$8 sps:$4 sm:$0xff]   ;;  %v283_v8 = vld [vmem:[#allocation2] sm:$0xff]  ;;  %v780_v22 = vshrl.u32 (!%p991_p7), %v779_v21, 7 }
  0x2e   : > { %696 = vmatpush1.bf16.msra.mxu0 %v1056_v23  ;;  %v1117_v4 = vld [vmem:[%s1197_s25 + $0x1f0] ss:$8 sps:$4 sm:$0xff]   ;;  %v284_v12 = vld [vmem:[#allocation2 + $0x8] sm:$0xff]  ;;  %v777_v23 = vld [vmem:[%s1287_s2] sm:$0x3] (!%p991_p7) }
  0x2f   : > { %737 = vmatpush1.bf16.msra.mxu1 %v1057_v24  ;;  %697 = vmatprep.subr.bf16.mxu0 %v1058_v25  ;;  %v781_v24 = vsub.s32 (!%p991_p7), 0, %v780_v22  ;;  %v785_v25 = vsub.s32 (!%p991_p7), 1, %v780_v22 }
  0x30   : > { %738 = vmatprep.subr.bf16.mxu1 %v1060_v26 }
  0x32   : > { %698 = vmatpush1.bf16.msra.mxu0 %v1062_v27 }
  0x33   : > { %739 = vmatpush1.bf16.msra.mxu1 %v1063_v28  ;;  %699 = vmatprep.subr.bf16.mxu0 %v1064_v29  ;;  %v782_v28 = vrot.slane (!%p991_p7), %v777_v23, %v781_v24  ;;  %v786_v29 = vrot.slane (!%p991_p7), %v777_v23, %v785_v25 }
  0x34   : > { %740 = vmatprep.subr.bf16.mxu1 %v1066_v30 }
  0x36   : > { %700 = vmatpush1.bf16.msra.mxu0 %v1068_v31 }
  0x37   : > { %741 = vmatpush1.bf16.msra.mxu1 %v1069_v32  ;;  %701 = vmatprep.subr.bf16.mxu0 %v1070_v33 }
  0x38   : > { %742 = vmatprep.subr.bf16.mxu1 %v1072_v34 }
  0x3a   : > { %702 = vmatpush1.bf16.msra.mxu0 %v1074_v35 }
  0x3b   : > { %743 = vmatpush1.bf16.msra.mxu1 %v1075_v36  ;;  %703 = vmatprep.subr.bf16.mxu0 %v1076_v37 }
  0x3c   : > { %744 = vmatprep.subr.bf16.mxu1 %v1078_v38 }
  0x3e   : > { %704 = vmatpush1.bf16.msra.mxu0 %v1080_v39 }
  0x3f   : > { %745 = vmatpush1.bf16.msra.mxu1 %v1081_v40  ;;  %705 = vmatprep.subr.bf16.mxu0 %v1082_v41 }
  0x40   : > { %746 = vmatprep.subr.bf16.mxu1 %v1084_v42 }
  0x42   : > { %706 = vmatpush1.bf16.msra.mxu0 %v1086_v43 }
  0x43   : > { %747 = vmatpush1.bf16.msra.mxu1 %v1087_v44  ;;  %707 = vmatprep.subr.bf16.mxu0 %v1088_v45 }
  0x44   : > { %748 = vmatprep.subr.bf16.mxu1 %v1090_v46 }
  0x46   : > { %708 = vmatpush1.bf16.msra.mxu0 %v1092_v50 }
  0x47   : > { %749 = vmatpush1.bf16.msra.mxu1 %v1093_v51  ;;  %709 = vmatprep.subr.bf16.mxu0 %v1094_v53 }
  0x48   : > { %750 = vmatprep.subr.bf16.mxu1 %v1096_v54 }
  0x4a   : > { %710 = vmatpush1.bf16.msra.mxu0 %v1098_v55 }
  0x4b   : > { %751 = vmatpush1.bf16.msra.mxu1 %v1099_v56  ;;  %711 = vmatprep.subr.bf16.mxu0 %v1100_v57 }
  0x4c   : > { %752 = vmatprep.subr.bf16.mxu1 %v1102_v58 }
  0x4e   : > { %712 = vmatpush1.bf16.msra.mxu0 %v1104_v59 }
  0x4f   : > { %753 = vmatpush1.bf16.msra.mxu1 %v1105_v60  ;;  %713 = vmatprep.subr.bf16.mxu0 %v1106_v61 }
  0x50   : > { %754 = vmatprep.subr.bf16.mxu1 %v1108_v62 }
  0x52   : > { %714 = vmatpush1.bf16.msra.mxu0 %v1110_v63 }
  0x53   : > { %755 = vmatpush1.bf16.msra.mxu1 %v1111_v0  ;;  %715 = vmatprep.subr.bf16.mxu0 %v1112_v1 }
  0x54   : > { %756 = vmatprep.subr.bf16.mxu1 %v1114_v2 }
  0x56   : > { %716 = vmatpush1.bf16.msra.mxu0 %v1116_v3 }
  0x57   : > { %757 = vmatpush1.bf16.msra.mxu1 %v1117_v4 }
  0x59   : > { %718 = vmatmul.mubr.bf16.vlgmr.msra.gmra.mrb[0].mxu0 %v923_v5 }
  0x5a   : > { %759 = vmatmul.mubr.bf16.vlgmr.msra.gmra.mrb[0].mxu1 %v925_v6 }
 0x12c   : > { %v719_v7 = vpop.f32.mrb[0].mxu0 }
 0x12d   : > { %v760_v9 = vpop.f32.mrb[0].mxu1  ;;  %v721_v11 = vpop.f32.mrb[1].mxu0  ;;  %774 = sbr.rel (%p991_p7) target bundleno = 320 (0x140), region = 40 }
 0x12e   : > { %v761_v10 = vadd.f32 %v760_v9, %v719_v7  ;;  %v762_v13 = vpop.f32.mrb[1].mxu1  ;;  %v723_v15 = vpop.f32.mrb[2].mxu0 }
 0x12f   : > { %v763_v14 = vadd.f32 %v762_v13, %v721_v11  ;;  %v764_v16 = vpop.f32.mrb[2].mxu1  ;;  %v724_v18 = vpop.f32.mrb[3].mxu0 }
 0x130   : > { %v767_v17 = vadd.f32 %v761_v10, %v283_v8  ;;  %v765_v19 = vpop.f32.mrb[3].mxu1 }
 0x131   : > { %v768_v20 = vadd.f32 %v763_v14, %v284_v12 }
 0x132   : > { %769 = vst [vmem:[#allocation2] sm:$0xff] %v767_v17 }
 0x133   : > { %770 = vst [vmem:[#allocation2 + $0x8] sm:$0xff] %v768_v20 }
 0x139   : > { %v775_v26 = vld [vmem:[#allocation2] sm:$0xff] }
 0x13a   : > { %v776_v27 = vld [vmem:[#allocation2 + $0x8] sm:$0xff]  ;;  %v789_v30 = vadd.f32 %v782_v28, %v775_v26 }
 0x13b   : > { %v790_v31 = vadd.f32 %v786_v29, %v776_v27 }
 0x13c   : > { %v791_v32 = vmax.f32 %v789_v30, 0.0 }
 0x13d   : > { %v792_v33 = vmax.f32 %v790_v31, 0.0 }
 0x13e   : > { %793 = vst [vmem:[%s1288_s3] sm:$0xff] %v791_v32 }
 0x13f   : > { %794 = vst [vmem:[%s1288_s3 + $0x8] sm:$0xff] %v792_v33 }
 0x140 PF: > { %s13_s14 = sadd.s32 1, %s1144_s14   ;;  %s1289_s12 = smov %s1140_s13 }
 0x141   : > { %p10_p8 = scmp.ge.s32.totalorder %s13_s14, 11   ;;  %s1290_s13 = smov %s1292_s15 }
 0x143   :  { %12 = sbr.rel (!%p10_p8) target bundleno = 2 (0x2), region = 76 }

// kernel: forward.75
= control target key start
LH: loop header
LB: loop body
LE: loop exit
PB: predicated region body
PF: predicated region fallthrough
CT: control target
= control target key end

     0   :  { %s1514_s12 = smov 0   ;;  %s1516_s13 = smov 0   ;;  %s1826_s0 = inlined_call_operand.vmem [shape: bf16[8,4608], index: 0, kind: input, shape index: {}]   ;;  %s1827_s1 = inlined_call_operand.vmem [shape: bf16[4608,512], index: 1, kind: input, shape index: {}]   ;;  %s1828_s2 = inlined_call_operand.vmem [shape: f32[1,512], index: 2, kind: input, shape index: {}]   ;;  %s1829_s3 = inlined_call_operand.vmem [shape: f32[8,512], index: 3, kind: output, shape index: {}]  }
   0x1   :  { %s1518_s14 = smov 0   ;;  %s1520_s15 = smov 0  }
   0x2   :  { %s1522_s16 = smov 0   ;;  %s1524_s17 = smov 0  }
   0x3   :  { %s1526_s18 = smov 0  }
   0x4 LB: > { %s25_s19 = sadd.s32 1, %s1483_s16  ;;  %s28_s20 = sadd.s32 1, %s1487_s17  ;;  %s1491_s18 = sphi %s1526_s18, %s13_s18   ;;  %s1487_s17 = sphi %s1524_s17, %s1835_s17   ;;  %s1483_s16 = sphi %s1522_s16, %s1834_s16   ;;  %s1479_s15 = sphi %s1520_s15, %s1833_s15   ;;  %s1475_s14 = sphi %s1518_s14, %s1832_s14   ;;  %s1471_s13 = sphi %s1516_s13, %s1831_s13   ;;  %s1467_s12 = sphi %s1514_s12, %s1830_s12  }
   0x5   : > { %p26_p0 = scmp.ge.s32.totalorder %s25_s19, 9  ;;  %p76_p1 = scmp.ne.s32.totalorder %s1471_s13, %s1467_s12 }
   0x6   : > { %p77_p2 = scmp.eq.s32.totalorder %s1491_s18, 0  ;;  %s69_s24 = sadd.s32 1, %s1471_s13 }
   0x7   : > { %s1837_s19 = smov (%p26_p0, %s25_s19), 0  ;;  %s1839_s20 = smov (!%p26_p0, %s28_s20), %s1487_s17 }
   0x8   : > { %p78_p3 = por %p77_p2, %p76_p1  ;;  %p30_p4 = scmp.ge.s32.totalorder %s1839_s20, 2 }
   0x9   : > { %s64_s21 = ssub.s32 %s1483_s16, %s1837_s19  ;;  %p1194_p6 = scmp.ge.s32.totalorder %s1491_s18, 18 }
   0xa   : > { %s1841_s20 = smov (%p30_p4, %s1839_s20), 0 }
   0xb   : > { %s65_s22 = ssub.s32 %s1487_s17, %s1841_s20  ;;  %156 = sbr.rel (%p1194_p6) target bundleno = 57 (0x39), region = 16 }
   0xc   : > { %s66_s23 = sor.u32 %s65_s22, %s64_s21 }
   0xd   : > { %p67_p5 = scmp.eq.s32.totalorder %s66_s23, 0 }
   0xf   : > { %s1565_s25 = scalar_select %p67_p5, %s1471_s13, %s69_s24  }
  0x12   : > { %172 = sbr.rel (!%p78_p3) target bundleno = 57 (0x39), region = 24  ;;  %s174_s26 = sand.u32 (%p78_p3), 1, %s1471_s13  }
  0x13   : > { %s1197_s27 = sshll.u32 (%p78_p3), %s1487_s17, 1  ;;  %s1195_s28 = sshll.u32 (%p78_p3), %s174_s26, 9 }
  0x14   : > { %s1279_s29 = sshll.u32 (%p78_p3), %s1483_s16, 8  ;;  %s1579_s8 = scalar_lea.vmem (%p78_p3), [#allocation3], %s1195_s28 }
  0x15   : > { %s180_s30 = sadd.s32 (%p78_p3), %s1279_s29, %s1197_s27 }
  0x16   : > { %s1199_s4 = sshll.u32 (%p78_p3), %s180_s30, 2 }
  0x17   : > { %s1574_s7 = scalar_lea.vmem (%p78_p3), %s1827_s1, %s1199_s4 }
  0x18   : > { %v336_v0 = vld [vmem:[%s1574_s7] sm:$0xff] (%p78_p3)  ;;  %v338_v1 = vld [vmem:[%s1574_s7 + $0x10] sm:$0xff] (%p78_p3) }
  0x19   : > { %v340_v2 = vld [vmem:[%s1574_s7 + $0x20] sm:$0xff]  ;;  %337 = vst [vmem:[%s1579_s8] sm:$0xff] %v336_v0  ;;  %339 = vst [vmem:[%s1579_s8 + $0x8] sm:$0xff] %v338_v1  ;;  %v342_v3 = vld [vmem:[%s1574_s7 + $0x30] sm:$0xff] }
  0x1a   : > { %341 = vst [vmem:[%s1579_s8 + $0x10] sm:$0xff] %v340_v2  ;;  %v344_v4 = vld [vmem:[%s1574_s7 + $0x40] sm:$0xff]  ;;  %v346_v5 = vld [vmem:[%s1574_s7 + $0x50] sm:$0xff]  ;;  %343 = vst [vmem:[%s1579_s8 + $0x18] sm:$0xff] %v342_v3 }
  0x1b   : > { %345 = vst [vmem:[%s1579_s8 + $0x20] sm:$0xff] %v344_v4  ;;  %347 = vst [vmem:[%s1579_s8 + $0x28] sm:$0xff] %v346_v5  ;;  %v348_v6 = vld [vmem:[%s1574_s7 + $0x60] sm:$0xff]  ;;  %v350_v7 = vld [vmem:[%s1574_s7 + $0x70] sm:$0xff] }
  0x1c   : > { %v352_v8 = vld [vmem:[%s1574_s7 + $0x80] sm:$0xff]  ;;  %349 = vst [vmem:[%s1579_s8 + $0x30] sm:$0xff] %v348_v6  ;;  %351 = vst [vmem:[%s1579_s8 + $0x38] sm:$0xff] %v350_v7  ;;  %v354_v9 = vld [vmem:[%s1574_s7 + $0x90] sm:$0xff] }
  0x1d   : > { %353 = vst [vmem:[%s1579_s8 + $0x40] sm:$0xff] %v352_v8  ;;  %v356_v10 = vld [vmem:[%s1574_s7 + $0xa0] sm:$0xff]  ;;  %v358_v11 = vld [vmem:[%s1574_s7 + $0xb0] sm:$0xff]  ;;  %355 = vst [vmem:[%s1579_s8 + $0x48] sm:$0xff] %v354_v9 }
  0x1e   : > { %357 = vst [vmem:[%s1579_s8 + $0x50] sm:$0xff] %v356_v10  ;;  %359 = vst [vmem:[%s1579_s8 + $0x58] sm:$0xff] %v358_v11  ;;  %v360_v12 = vld [vmem:[%s1574_s7 + $0xc0] sm:$0xff]  ;;  %v362_v13 = vld [vmem:[%s1574_s7 + $0xd0] sm:$0xff] }
  0x1f   : > { %v364_v14 = vld [vmem:[%s1574_s7 + $0xe0] sm:$0xff]  ;;  %361 = vst [vmem:[%s1579_s8 + $0x60] sm:$0xff] %v360_v12  ;;  %363 = vst [vmem:[%s1579_s8 + $0x68] sm:$0xff] %v362_v13  ;;  %v366_v15 = vld [vmem:[%s1574_s7 + $0xf0] sm:$0xff] }
  0x20   : > { %365 = vst [vmem:[%s1579_s8 + $0x70] sm:$0xff] %v364_v14  ;;  %v368_v16 = vld [vmem:[%s1574_s7 + $0x100] sm:$0xff]  ;;  %v370_v17 = vld [vmem:[%s1574_s7 + $0x110] sm:$0xff]  ;;  %367 = vst [vmem:[%s1579_s8 + $0x78] sm:$0xff] %v366_v15 }
  0x21   : > { %369 = vst [vmem:[%s1579_s8 + $0x80] sm:$0xff] %v368_v16  ;;  %371 = vst [vmem:[%s1579_s8 + $0x88] sm:$0xff] %v370_v17  ;;  %v372_v18 = vld [vmem:[%s1574_s7 + $0x120] sm:$0xff]  ;;  %v374_v19 = vld [vmem:[%s1574_s7 + $0x130] sm:$0xff] }
  0x22   : > { %v376_v20 = vld [vmem:[%s1574_s7 + $0x140] sm:$0xff]  ;;  %373 = vst [vmem:[%s1579_s8 + $0x90] sm:$0xff] %v372_v18  ;;  %375 = vst [vmem:[%s1579_s8 + $0x98] sm:$0xff] %v374_v19  ;;  %v378_v21 = vld [vmem:[%s1574_s7 + $0x150] sm:$0xff] }
  0x23   : > { %377 = vst [vmem:[%s1579_s8 + $0xa0] sm:$0xff] %v376_v20  ;;  %v380_v22 = vld [vmem:[%s1574_s7 + $0x160] sm:$0xff]  ;;  %v382_v23 = vld [vmem:[%s1574_s7 + $0x170] sm:$0xff]  ;;  %379 = vst [vmem:[%s1579_s8 + $0xa8] sm:$0xff] %v378_v21 }
  0x24   : > { %381 = vst [vmem:[%s1579_s8 + $0xb0] sm:$0xff] %v380_v22  ;;  %383 = vst [vmem:[%s1579_s8 + $0xb8] sm:$0xff] %v382_v23  ;;  %v384_v24 = vld [vmem:[%s1574_s7 + $0x180] sm:$0xff]  ;;  %v386_v25 = vld [vmem:[%s1574_s7 + $0x190] sm:$0xff] }
  0x25   : > { %v388_v26 = vld [vmem:[%s1574_s7 + $0x1a0] sm:$0xff]  ;;  %385 = vst [vmem:[%s1579_s8 + $0xc0] sm:$0xff] %v384_v24  ;;  %387 = vst [vmem:[%s1579_s8 + $0xc8] sm:$0xff] %v386_v25  ;;  %v390_v27 = vld [vmem:[%s1574_s7 + $0x1b0] sm:$0xff] }
  0x26   : > { %389 = vst [vmem:[%s1579_s8 + $0xd0] sm:$0xff] %v388_v26  ;;  %v392_v28 = vld [vmem:[%s1574_s7 + $0x1c0] sm:$0xff]  ;;  %v394_v29 = vld [vmem:[%s1574_s7 + $0x1d0] sm:$0xff]  ;;  %391 = vst [vmem:[%s1579_s8 + $0xd8] sm:$0xff] %v390_v27 }
  0x27   : > { %393 = vst [vmem:[%s1579_s8 + $0xe0] sm:$0xff] %v392_v28  ;;  %395 = vst [vmem:[%s1579_s8 + $0xe8] sm:$0xff] %v394_v29  ;;  %v396_v30 = vld [vmem:[%s1574_s7 + $0x1e0] sm:$0xff]  ;;  %v398_v31 = vld [vmem:[%s1574_s7 + $0x1f0] sm:$0xff] }
  0x28   : > { %v400_v32 = vld [vmem:[%s1574_s7 + $0x200] sm:$0xff]  ;;  %397 = vst [vmem:[%s1579_s8 + $0xf0] sm:$0xff] %v396_v30  ;;  %399 = vst [vmem:[%s1579_s8 + $0xf8] sm:$0xff] %v398_v31  ;;  %v402_v33 = vld [vmem:[%s1574_s7 + $0x210] sm:$0xff] }
  0x29   : > { %401 = vst [vmem:[%s1579_s8 + $0x100] sm:$0xff] %v400_v32  ;;  %v404_v34 = vld [vmem:[%s1574_s7 + $0x220] sm:$0xff]  ;;  %v406_v35 = vld [vmem:[%s1574_s7 + $0x230] sm:$0xff]  ;;  %403 = vst [vmem:[%s1579_s8 + $0x108] sm:$0xff] %v402_v33 }
  0x2a   : > { %405 = vst [vmem:[%s1579_s8 + $0x110] sm:$0xff] %v404_v34  ;;  %407 = vst [vmem:[%s1579_s8 + $0x118] sm:$0xff] %v406_v35  ;;  %v408_v36 = vld [vmem:[%s1574_s7 + $0x240] sm:$0xff]  ;;  %v410_v37 = vld [vmem:[%s1574_s7 + $0x250] sm:$0xff] }
  0x2b   : > { %v412_v38 = vld [vmem:[%s1574_s7 + $0x260] sm:$0xff]  ;;  %409 = vst [vmem:[%s1579_s8 + $0x120] sm:$0xff] %v408_v36  ;;  %411 = vst [vmem:[%s1579_s8 + $0x128] sm:$0xff] %v410_v37  ;;  %v414_v39 = vld [vmem:[%s1574_s7 + $0x270] sm:$0xff] }
  0x2c   : > { %413 = vst [vmem:[%s1579_s8 + $0x130] sm:$0xff] %v412_v38  ;;  %v416_v40 = vld [vmem:[%s1574_s7 + $0x280] sm:$0xff]  ;;  %v418_v41 = vld [vmem:[%s1574_s7 + $0x290] sm:$0xff]  ;;  %415 = vst [vmem:[%s1579_s8 + $0x138] sm:$0xff] %v414_v39 }
  0x2d   : > { %417 = vst [vmem:[%s1579_s8 + $0x140] sm:$0xff] %v416_v40  ;;  %419 = vst [vmem:[%s1579_s8 + $0x148] sm:$0xff] %v418_v41  ;;  %v420_v42 = vld [vmem:[%s1574_s7 + $0x2a0] sm:$0xff]  ;;  %v422_v43 = vld [vmem:[%s1574_s7 + $0x2b0] sm:$0xff] }
  0x2e   : > { %v424_v44 = vld [vmem:[%s1574_s7 + $0x2c0] sm:$0xff]  ;;  %421 = vst [vmem:[%s1579_s8 + $0x150] sm:$0xff] %v420_v42  ;;  %423 = vst [vmem:[%s1579_s8 + $0x158] sm:$0xff] %v422_v43  ;;  %v426_v45 = vld [vmem:[%s1574_s7 + $0x2d0] sm:$0xff] }
  0x2f   : > { %425 = vst [vmem:[%s1579_s8 + $0x160] sm:$0xff] %v424_v44  ;;  %v428_v46 = vld [vmem:[%s1574_s7 + $0x2e0] sm:$0xff]  ;;  %v430_v47 = vld [vmem:[%s1574_s7 + $0x2f0] sm:$0xff]  ;;  %427 = vst [vmem:[%s1579_s8 + $0x168] sm:$0xff] %v426_v45 }
  0x30   : > { %429 = vst [vmem:[%s1579_s8 + $0x170] sm:$0xff] %v428_v46  ;;  %431 = vst [vmem:[%s1579_s8 + $0x178] sm:$0xff] %v430_v47  ;;  %v432_v48 = vld [vmem:[%s1574_s7 + $0x300] sm:$0xff]  ;;  %v434_v49 = vld [vmem:[%s1574_s7 + $0x310] sm:$0xff] }
  0x31   : > { %v436_v50 = vld [vmem:[%s1574_s7 + $0x320] sm:$0xff]  ;;  %433 = vst [vmem:[%s1579_s8 + $0x180] sm:$0xff] %v432_v48  ;;  %435 = vst [vmem:[%s1579_s8 + $0x188] sm:$0xff] %v434_v49  ;;  %v438_v51 = vld [vmem:[%s1574_s7 + $0x330] sm:$0xff] }
  0x32   : > { %437 = vst [vmem:[%s1579_s8 + $0x190] sm:$0xff] %v436_v50  ;;  %v440_v52 = vld [vmem:[%s1574_s7 + $0x340] sm:$0xff]  ;;  %v442_v53 = vld [vmem:[%s1574_s7 + $0x350] sm:$0xff]  ;;  %439 = vst [vmem:[%s1579_s8 + $0x198] sm:$0xff] %v438_v51 }
  0x33   : > { %441 = vst [vmem:[%s1579_s8 + $0x1a0] sm:$0xff] %v440_v52  ;;  %443 = vst [vmem:[%s1579_s8 + $0x1a8] sm:$0xff] %v442_v53  ;;  %v444_v54 = vld [vmem:[%s1574_s7 + $0x360] sm:$0xff]  ;;  %v446_v55 = vld [vmem:[%s1574_s7 + $0x370] sm:$0xff] }
  0x34   : > { %v448_v56 = vld [vmem:[%s1574_s7 + $0x380] sm:$0xff]  ;;  %445 = vst [vmem:[%s1579_s8 + $0x1b0] sm:$0xff] %v444_v54  ;;  %447 = vst [vmem:[%s1579_s8 + $0x1b8] sm:$0xff] %v446_v55  ;;  %v450_v57 = vld [vmem:[%s1574_s7 + $0x390] sm:$0xff] }
  0x35   : > { %449 = vst [vmem:[%s1579_s8 + $0x1c0] sm:$0xff] %v448_v56  ;;  %v452_v58 = vld [vmem:[%s1574_s7 + $0x3a0] sm:$0xff]  ;;  %v454_v59 = vld [vmem:[%s1574_s7 + $0x3b0] sm:$0xff]  ;;  %451 = vst [vmem:[%s1579_s8 + $0x1c8] sm:$0xff] %v450_v57 }
  0x36   : > { %453 = vst [vmem:[%s1579_s8 + $0x1d0] sm:$0xff] %v452_v58  ;;  %455 = vst [vmem:[%s1579_s8 + $0x1d8] sm:$0xff] %v454_v59  ;;  %v456_v60 = vld [vmem:[%s1574_s7 + $0x3c0] sm:$0xff]  ;;  %v458_v61 = vld [vmem:[%s1574_s7 + $0x3d0] sm:$0xff] }
  0x37   : > { %v460_v62 = vld [vmem:[%s1574_s7 + $0x3e0] sm:$0xff]  ;;  %457 = vst [vmem:[%s1579_s8 + $0x1e0] sm:$0xff] %v456_v60  ;;  %459 = vst [vmem:[%s1579_s8 + $0x1e8] sm:$0xff] %v458_v61  ;;  %v462_v63 = vld [vmem:[%s1574_s7 + $0x3f0] sm:$0xff] }
  0x38   : > { %461 = vst [vmem:[%s1579_s8 + $0x1f0] sm:$0xff] %v460_v62  ;;  %463 = vst [vmem:[%s1579_s8 + $0x1f8] sm:$0xff] %v462_v63 }
  0x39 PF: > { %p1200_p7 = scmp.ge.s32.totalorder %s1491_s18, 1  ;;  %p476_p8 = scmp.lt.s32.totalorder %s1491_s18, 19 }
  0x3b   : > { %p477_p9 = pnand %p1200_p7, %p476_p8 }
  0x3c   : > { %s483_s9 = sand.u32 (!%p477_p9), 1, %s1467_s12   ;;  %s1202_s10 = sshll.u32 (!%p477_p9), %s1475_s14, 2 }
  0x3d   : > { %480 = sbr.rel (%p477_p9) target bundleno = 374 (0x176), region = 66  ;;  %s1201_s11 = sshll.u32 (!%p477_p9), %s483_s9, 9 }
  0x3e   : > { %p526_p10 = scmp.lt.s32.totalorder (!%p477_p9), %s1202_s10, 35  ;;  %s1204_s21 = sshll.u32 (!%p477_p9), %s1479_s15, 1 }
  0x3f   : > { %p536_p11 = scmp.lt.s32.totalorder (!%p477_p9), %s1204_s21, 3  ;;  %s1728_s5 = scalar_lea.vmem (!%p477_p9), [#allocation3], %s1201_s11 }
  0x40   : > { %p1207_p12 = scmp.ne.s32.totalorder (!%p477_p9), %s1475_s14, 0 }
  0x44   : > { %s1843_s10 = smov (!%p526_p10, %s1202_s10), 35  ;;  %s1845_s21 = smov (!%p536_p11, %s1204_s21), 3 }
  0x45   : > { %s1203_s22 = sshll.u32 %s1843_s10, 2  ;;  %s538_s12 = scalar_lea.vmem %s1828_s2, %s1845_s21  ;;  %v1493_v0 = vmov (!%p1207_p12), 0.0  }
  0x46   : > { %s1714_s26 = scalar_lea.vmem %s1826_s0, %s1203_s22  ;;  %s1206_s29 = sshll.u32 %s1845_s21, 3  ;;  %554 = vst [vmem:[#allocation2] sm:$0xff] (!%p1207_p12), %v1493_v0  ;;  %555 = vst [vmem:[#allocation2 + $0x8] sm:$0xff] (!%p1207_p12), %v1493_v0 }
  0x47   : > { %s1726_s15 = scalar_lea.vmem %s1829_s3, %s1206_s29  ;;  %553 = sbr.rel (%p1207_p12) target bundleno = 78 (0x4e), region = 74 }
  0x4e PF: > { %v1337_v1 = vld [vmem:[%s1728_s5 + $0x4] ss:$8 sps:$4 sm:$0xff]   ;;  %v1341_v3 = vld [vmem:[%s1728_s5] ss:$8 sps:$4 sm:$0xff]   ;;  %v1343_v5 = vld [vmem:[%s1728_s5 + $0x14] ss:$8 sps:$4 sm:$0xff]  }
  0x4f   : > { %v1339_v2 = vld [vmem:[%s1728_s5 + $0x104] ss:$8 sps:$4 sm:$0xff]   ;;  %958 = vmatprep.subr.bf16.mxu0 %v1337_v1  ;;  %v1342_v4 = vld [vmem:[%s1728_s5 + $0x100] ss:$8 sps:$4 sm:$0xff]   ;;  %v1345_v6 = vld [vmem:[%s1728_s5 + $0x114] ss:$8 sps:$4 sm:$0xff]  }
  0x50   : > { %999 = vmatprep.subr.bf16.mxu1 %v1339_v2  ;;  %959 = vmatpush1.bf16.msra.mxu0 %v1341_v3  ;;  %v1347_v7 = vld [vmem:[%s1728_s5 + $0x10] ss:$8 sps:$4 sm:$0xff]   ;;  %v1349_v9 = vld [vmem:[%s1728_s5 + $0x24] ss:$8 sps:$4 sm:$0xff]   ;;  %v1353_v11 = vld [vmem:[%s1728_s5 + $0x20] ss:$8 sps:$4 sm:$0xff]  }
  0x51   : > { %1000 = vmatpush1.bf16.msra.mxu1 %v1342_v4  ;;  %960 = vmatprep.subr.bf16.mxu0 %v1343_v5  ;;  %v1348_v8 = vld [vmem:[%s1728_s5 + $0x110] ss:$8 sps:$4 sm:$0xff]   ;;  %v1351_v10 = vld [vmem:[%s1728_s5 + $0x124] ss:$8 sps:$4 sm:$0xff]   ;;  %v1354_v12 = vld [vmem:[%s1728_s5 + $0x120] ss:$8 sps:$4 sm:$0xff]  }
  0x52   : > { %1001 = vmatprep.subr.bf16.mxu1 %v1345_v6  ;;  %v1355_v13 = vld [vmem:[%s1728_s5 + $0x34] ss:$8 sps:$4 sm:$0xff]   ;;  %v1359_v15 = vld [vmem:[%s1728_s5 + $0x30] ss:$8 sps:$4 sm:$0xff]   ;;  %v1361_v17 = vld [vmem:[%s1728_s5 + $0x44] ss:$8 sps:$4 sm:$0xff]  }
  0x53   : > { %v1357_v14 = vld [vmem:[%s1728_s5 + $0x134] ss:$8 sps:$4 sm:$0xff]   ;;  %v1360_v16 = vld [vmem:[%s1728_s5 + $0x130] ss:$8 sps:$4 sm:$0xff]   ;;  %v1363_v18 = vld [vmem:[%s1728_s5 + $0x144] ss:$8 sps:$4 sm:$0xff]  }
  0x54   : > { %961 = vmatpush1.bf16.msra.mxu0 %v1347_v7  ;;  %v1365_v19 = vld [vmem:[%s1728_s5 + $0x40] ss:$8 sps:$4 sm:$0xff]   ;;  %v1367_v21 = vld [vmem:[%s1728_s5 + $0x54] ss:$8 sps:$4 sm:$0xff]   ;;  %v1371_v23 = vld [vmem:[%s1728_s5 + $0x50] ss:$8 sps:$4 sm:$0xff]  }
  0x55   : > { %1002 = vmatpush1.bf16.msra.mxu1 %v1348_v8  ;;  %962 = vmatprep.subr.bf16.mxu0 %v1349_v9  ;;  %v1366_v20 = vld [vmem:[%s1728_s5 + $0x140] ss:$8 sps:$4 sm:$0xff]   ;;  %v1369_v22 = vld [vmem:[%s1728_s5 + $0x154] ss:$8 sps:$4 sm:$0xff]   ;;  %v1372_v24 = vld [vmem:[%s1728_s5 + $0x150] ss:$8 sps:$4 sm:$0xff]  }
  0x56   : > { %1003 = vmatprep.subr.bf16.mxu1 %v1351_v10  ;;  %v1373_v25 = vld [vmem:[%s1728_s5 + $0x64] ss:$8 sps:$4 sm:$0xff]   ;;  %v1377_v27 = vld [vmem:[%s1728_s5 + $0x60] ss:$8 sps:$4 sm:$0xff]   ;;  %v1379_v29 = vld [vmem:[%s1728_s5 + $0x74] ss:$8 sps:$4 sm:$0xff]  }
  0x57   : > { %v1375_v26 = vld [vmem:[%s1728_s5 + $0x164] ss:$8 sps:$4 sm:$0xff]   ;;  %v1378_v28 = vld [vmem:[%s1728_s5 + $0x160] ss:$8 sps:$4 sm:$0xff]   ;;  %v1381_v30 = vld [vmem:[%s1728_s5 + $0x174] ss:$8 sps:$4 sm:$0xff]  }
  0x58   : > { %963 = vmatpush1.bf16.msra.mxu0 %v1353_v11  ;;  %v1383_v31 = vld [vmem:[%s1728_s5 + $0x70] ss:$8 sps:$4 sm:$0xff]   ;;  %v1385_v33 = vld [vmem:[%s1728_s5 + $0x84] ss:$8 sps:$4 sm:$0xff]   ;;  %v1389_v35 = vld [vmem:[%s1728_s5 + $0x80] ss:$8 sps:$4 sm:$0xff]  }
  0x59   : > { %1004 = vmatpush1.bf16.msra.mxu1 %v1354_v12  ;;  %964 = vmatprep.subr.bf16.mxu0 %v1355_v13  ;;  %v1384_v32 = vld [vmem:[%s1728_s5 + $0x170] ss:$8 sps:$4 sm:$0xff]   ;;  %v1387_v34 = vld [vmem:[%s1728_s5 + $0x184] ss:$8 sps:$4 sm:$0xff]   ;;  %v1390_v36 = vld [vmem:[%s1728_s5 + $0x180] ss:$8 sps:$4 sm:$0xff]  }
  0x5a   : > { %1005 = vmatprep.subr.bf16.mxu1 %v1357_v14  ;;  %v1391_v37 = vld [vmem:[%s1728_s5 + $0x94] ss:$8 sps:$4 sm:$0xff]   ;;  %v1395_v39 = vld [vmem:[%s1728_s5 + $0x90] ss:$8 sps:$4 sm:$0xff]   ;;  %v1397_v41 = vld [vmem:[%s1728_s5 + $0xa4] ss:$8 sps:$4 sm:$0xff]  }
  0x5b   : > { %v1393_v38 = vld [vmem:[%s1728_s5 + $0x194] ss:$8 sps:$4 sm:$0xff]   ;;  %v1396_v40 = vld [vmem:[%s1728_s5 + $0x190] ss:$8 sps:$4 sm:$0xff]   ;;  %v1399_v42 = vld [vmem:[%s1728_s5 + $0x1a4] ss:$8 sps:$4 sm:$0xff]  }
  0x5c   : > { %965 = vmatpush1.bf16.msra.mxu0 %v1359_v15  ;;  %v1401_v43 = vld [vmem:[%s1728_s5 + $0xa0] ss:$8 sps:$4 sm:$0xff]   ;;  %v1403_v45 = vld [vmem:[%s1728_s5 + $0xb4] ss:$8 sps:$4 sm:$0xff]   ;;  %v1407_v50 = vld [vmem:[%s1728_s5 + $0xb0] ss:$8 sps:$4 sm:$0xff]  }
  0x5d   : > { %1006 = vmatpush1.bf16.msra.mxu1 %v1360_v16  ;;  %966 = vmatprep.subr.bf16.mxu0 %v1361_v17  ;;  %v1402_v44 = vld [vmem:[%s1728_s5 + $0x1a0] ss:$8 sps:$4 sm:$0xff]   ;;  %v1405_v46 = vld [vmem:[%s1728_s5 + $0x1b4] ss:$8 sps:$4 sm:$0xff]   ;;  %v1408_v51 = vld [vmem:[%s1728_s5 + $0x1b0] ss:$8 sps:$4 sm:$0xff]  }
  0x5e   : > { %1007 = vmatprep.subr.bf16.mxu1 %v1363_v18  ;;  %v558_v47 = vld [vmem:[%s1714_s26] sm:$0xff]  ;;  %v559_v49 = vld [vmem:[%s1714_s26 + $0x8] sm:$0xff]  ;;  %v1409_v53 = vld [vmem:[%s1728_s5 + $0xc4] ss:$8 sps:$4 sm:$0xff]   ;;  %p1276_p13 = scmp.ne.s32.totalorder %s1475_s14, 8 }
  0x5f   : > { %v1209_v48 = vcombine.high %v558_v47, %v558_v47  ;;  %v1211_v52 = vcombine.high %v559_v49, %v559_v49  ;;  %v1411_v54 = vld [vmem:[%s1728_s5 + $0x1c4] ss:$8 sps:$4 sm:$0xff]   ;;  %v1413_v55 = vld [vmem:[%s1728_s5 + $0xc0] ss:$8 sps:$4 sm:$0xff]   ;;  %v1415_v57 = vld [vmem:[%s1728_s5 + $0xd4] ss:$8 sps:$4 sm:$0xff]   ;;  %v1208_v5 = vcombine.low %v558_v47, %v558_v47  ;;  %v1210_v6 = vcombine.low %v559_v49, %v559_v49 }
  0x60   : > { %967 = vmatpush1.bf16.msra.mxu0 %v1365_v19  ;;  %v1414_v56 = vld [vmem:[%s1728_s5 + $0x1c0] ss:$8 sps:$4 sm:$0xff]   ;;  %v1417_v58 = vld [vmem:[%s1728_s5 + $0x1d4] ss:$8 sps:$4 sm:$0xff]   ;;  %v1419_v59 = vld [vmem:[%s1728_s5 + $0xd0] ss:$8 sps:$4 sm:$0xff]  }
  0x61   : > { %1008 = vmatpush1.bf16.msra.mxu1 %v1366_v20  ;;  %968 = vmatprep.subr.bf16.mxu0 %v1367_v21  ;;  %v1420_v60 = vld [vmem:[%s1728_s5 + $0x1d0] ss:$8 sps:$4 sm:$0xff]   ;;  %v1421_v61 = vld [vmem:[%s1728_s5 + $0xe4] ss:$8 sps:$4 sm:$0xff]   ;;  %v1425_v63 = vld [vmem:[%s1728_s5 + $0xe0] ss:$8 sps:$4 sm:$0xff]   ;;  %v1052_v21 = vlaneseq (!%p1276_p13) }
  0x62   : > { %1009 = vmatprep.subr.bf16.mxu1 %v1369_v22  ;;  %990 = vmatprep.mubr.bf16.mxu0 %v1209_v48  ;;  %v1423_v62 = vld [vmem:[%s1728_s5 + $0x1e4] ss:$8 sps:$4 sm:$0xff]   ;;  %v1426_v0 = vld [vmem:[%s1728_s5 + $0x1e0] ss:$8 sps:$4 sm:$0xff]   ;;  %v1427_v1 = vld [vmem:[%s1728_s5 + $0xf4] ss:$8 sps:$4 sm:$0xff]  }
  0x63   : > { %1031 = vmatprep.mubr.bf16.mxu1 %v1211_v52  ;;  %v1429_v2 = vld [vmem:[%s1728_s5 + $0x1f4] ss:$8 sps:$4 sm:$0xff]   ;;  %v1431_v3 = vld [vmem:[%s1728_s5 + $0xf0] ss:$8 sps:$4 sm:$0xff]   ;;  %v1053_v22 = vshrl.u32 (!%p1276_p13), %v1052_v21, 7 }
  0x64   : > { %969 = vmatpush1.bf16.msra.mxu0 %v1371_v23  ;;  %v1432_v4 = vld [vmem:[%s1728_s5 + $0x1f0] ss:$8 sps:$4 sm:$0xff]  }
  0x65   : > { %1010 = vmatpush1.bf16.msra.mxu1 %v1372_v24  ;;  %970 = vmatprep.subr.bf16.mxu0 %v1373_v25  ;;  %v556_v8 = vld [vmem:[#allocation2] sm:$0xff]  ;;  %v557_v12 = vld [vmem:[#allocation2 + $0x8] sm:$0xff]  ;;  %v1054_v24 = vsub.s32 (!%p1276_p13), 0, %v1053_v22  ;;  %v1058_v25 = vsub.s32 (!%p1276_p13), 1, %v1053_v22 }
  0x66   : > { %1011 = vmatprep.subr.bf16.mxu1 %v1375_v26  ;;  %v1050_v23 = vld [vmem:[%s538_s12] sm:$0x3] (!%p1276_p13) }
  0x68   : > { %971 = vmatpush1.bf16.msra.mxu0 %v1377_v27 }
  0x69   : > { %1012 = vmatpush1.bf16.msra.mxu1 %v1378_v28  ;;  %972 = vmatprep.subr.bf16.mxu0 %v1379_v29  ;;  %v1055_v28 = vrot.slane (!%p1276_p13), %v1050_v23, %v1054_v24  ;;  %v1059_v29 = vrot.slane (!%p1276_p13), %v1050_v23, %v1058_v25 }
  0x6a   : > { %1013 = vmatprep.subr.bf16.mxu1 %v1381_v30 }
  0x6c   : > { %973 = vmatpush1.bf16.msra.mxu0 %v1383_v31 }
  0x6d   : > { %1014 = vmatpush1.bf16.msra.mxu1 %v1384_v32  ;;  %974 = vmatprep.subr.bf16.mxu0 %v1385_v33 }
  0x6e   : > { %1015 = vmatprep.subr.bf16.mxu1 %v1387_v34 }
  0x70   : > { %975 = vmatpush1.bf16.msra.mxu0 %v1389_v35 }
  0x71   : > { %1016 = vmatpush1.bf16.msra.mxu1 %v1390_v36  ;;  %976 = vmatprep.subr.bf16.mxu0 %v1391_v37 }
  0x72   : > { %1017 = vmatprep.subr.bf16.mxu1 %v1393_v38 }
  0x74   : > { %977 = vmatpush1.bf16.msra.mxu0 %v1395_v39 }
  0x75   : > { %1018 = vmatpush1.bf16.msra.mxu1 %v1396_v40  ;;  %978 = vmatprep.subr.bf16.mxu0 %v1397_v41 }
  0x76   : > { %1019 = vmatprep.subr.bf16.mxu1 %v1399_v42 }
  0x78   : > { %979 = vmatpush1.bf16.msra.mxu0 %v1401_v43 }
  0x79   : > { %1020 = vmatpush1.bf16.msra.mxu1 %v1402_v44  ;;  %980 = vmatprep.subr.bf16.mxu0 %v1403_v45 }
  0x7a   : > { %1021 = vmatprep.subr.bf16.mxu1 %v1405_v46 }
  0x7c   : > { %981 = vmatpush1.bf16.msra.mxu0 %v1407_v50 }
  0x7d   : > { %1022 = vmatpush1.bf16.msra.mxu1 %v1408_v51  ;;  %982 = vmatprep.subr.bf16.mxu0 %v1409_v53 }
  0x7e   : > { %1023 = vmatprep.subr.bf16.mxu1 %v1411_v54 }
  0x80   : > { %983 = vmatpush1.bf16.msra.mxu0 %v1413_v55 }
  0x81   : > { %1024 = vmatpush1.bf16.msra.mxu1 %v1414_v56  ;;  %984 = vmatprep.subr.bf16.mxu0 %v1415_v57 }
  0x82   : > { %1025 = vmatprep.subr.bf16.mxu1 %v1417_v58 }
  0x84   : > { %985 = vmatpush1.bf16.msra.mxu0 %v1419_v59 }
  0x85   : > { %1026 = vmatpush1.bf16.msra.mxu1 %v1420_v60  ;;  %986 = vmatprep.subr.bf16.mxu0 %v1421_v61 }
  0x86   : > { %1027 = vmatprep.subr.bf16.mxu1 %v1423_v62 }
  0x88   : > { %987 = vmatpush1.bf16.msra.mxu0 %v1425_v63 }
  0x89   : > { %1028 = vmatpush1.bf16.msra.mxu1 %v1426_v0  ;;  %988 = vmatprep.subr.bf16.mxu0 %v1427_v1 }
  0x8a   : > { %1029 = vmatprep.subr.bf16.mxu1 %v1429_v2 }
  0x8c   : > { %989 = vmatpush1.bf16.msra.mxu0 %v1431_v3 }
  0x8d   : > { %1030 = vmatpush1.bf16.msra.mxu1 %v1432_v4 }
  0x8f   : > { %991 = vmatmul.mubr.bf16.vlgmr.msra.gmra.mrb[0].mxu0 %v1208_v5 }
  0x90   : > { %1032 = vmatmul.mubr.bf16.vlgmr.msra.gmra.mrb[0].mxu1 %v1210_v6 }
 0x162   : > { %v992_v7 = vpop.f32.mrb[0].mxu0 }
 0x163   : > { %v1033_v9 = vpop.f32.mrb[0].mxu1  ;;  %v994_v11 = vpop.f32.mrb[1].mxu0  ;;  %1047 = sbr.rel (%p1276_p13) target bundleno = 374 (0x176), region = 78 }
 0x164   : > { %v1034_v10 = vadd.f32 %v1033_v9, %v992_v7  ;;  %v1035_v13 = vpop.f32.mrb[1].mxu1  ;;  %v996_v15 = vpop.f32.mrb[2].mxu0 }
 0x165   : > { %v1036_v14 = vadd.f32 %v1035_v13, %v994_v11  ;;  %v1037_v16 = vpop.f32.mrb[2].mxu1  ;;  %v997_v18 = vpop.f32.mrb[3].mxu0 }
 0x166   : > { %v1040_v17 = vadd.f32 %v1034_v10, %v556_v8  ;;  %v1038_v19 = vpop.f32.mrb[3].mxu1 }
 0x167   : > { %v1041_v20 = vadd.f32 %v1036_v14, %v557_v12 }
 0x168   : > { %1042 = vst [vmem:[#allocation2] sm:$0xff] %v1040_v17 }
 0x169   : > { %1043 = vst [vmem:[#allocation2 + $0x8] sm:$0xff] %v1041_v20 }
 0x16f   : > { %v1048_v26 = vld [vmem:[#allocation2] sm:$0xff] }
 0x170   : > { %v1049_v27 = vld [vmem:[#allocation2 + $0x8] sm:$0xff]  ;;  %v1062_v30 = vadd.f32 %v1055_v28, %v1048_v26 }
 0x171   : > { %v1063_v31 = vadd.f32 %v1059_v29, %v1049_v27 }
 0x172   : > { %v1064_v32 = vmax.f32 %v1062_v30, 0.0 }
 0x173   : > { %v1065_v33 = vmax.f32 %v1063_v31, 0.0 }
 0x174   : > { %1066 = vst [vmem:[%s1726_s15] sm:$0xff] %v1064_v32 }
 0x175   : > { %1067 = vst [vmem:[%s1726_s15 + $0x8] sm:$0xff] %v1065_v33 }
 0x176 PF: > { %s13_s18 = sadd.s32 1, %s1491_s18   ;;  %s1830_s12 = smov %s1471_s13 }
 0x177   : > { %p10_p0 = scmp.ge.s32.totalorder %s13_s18, 20   ;;  %s1831_s13 = smov %s1565_s25 }
 0x178   : > { %s1832_s14 = smov %s1483_s16  ;;  %s1833_s15 = smov %s1487_s17 }
 0x179   : > { %s1834_s16 = smov %s1837_s19  ;;  %s1835_s17 = smov %s1841_s20 }
 0x17a   :  { %12 = sbr.rel (!%p10_p0) target bundleno = 4 (0x4), region = 119 }

// kernel: forward.79
= control target key start
LH: loop header
LB: loop body
LE: loop exit
PB: predicated region body
PF: predicated region fallthrough
CT: control target
= control target key end

     0   :  { %s930_s1 = inlined_call_operand.vmem [shape: bf16[512,256], index: 1, kind: input, shape index: {}]   ;;  %s931_s0 = inlined_call_operand.vmem [shape: bf16[8,512], index: 0, kind: input, shape index: {}]   ;;  %s932_s2 = inlined_call_operand.vmem [shape: f32[1,256], index: 2, kind: input, shape index: {}]   ;;  %s933_s3 = inlined_call_operand.vmem [shape: f32[8,256], index: 3, kind: output, shape index: {}]  }
   0x1   :  { %v603_v0 = vld [vmem:[%s930_s1 + $0x4] ss:$8 sps:$4 sm:$0xff]   ;;  %v607_v2 = vld [vmem:[%s930_s1] ss:$8 sps:$4 sm:$0xff]   ;;  %v609_v4 = vld [vmem:[%s930_s1 + $0x14] ss:$8 sps:$4 sm:$0xff]  }
   0x2   :  { %v605_v1 = vld [vmem:[%s930_s1 + $0x104] ss:$8 sps:$4 sm:$0xff]   ;;  %422 = vmatprep.subr.bf16.mxu0 %v603_v0  ;;  %v608_v3 = vld [vmem:[%s930_s1 + $0x100] ss:$8 sps:$4 sm:$0xff]   ;;  %v611_v5 = vld [vmem:[%s930_s1 + $0x114] ss:$8 sps:$4 sm:$0xff]  }
   0x3   :  { %463 = vmatprep.subr.bf16.mxu1 %v605_v1  ;;  %423 = vmatpush1.bf16.msra.mxu0 %v607_v2  ;;  %v613_v6 = vld [vmem:[%s930_s1 + $0x10] ss:$8 sps:$4 sm:$0xff]   ;;  %v615_v8 = vld [vmem:[%s930_s1 + $0x24] ss:$8 sps:$4 sm:$0xff]   ;;  %v619_v10 = vld [vmem:[%s930_s1 + $0x20] ss:$8 sps:$4 sm:$0xff]  }
   0x4   :  { %464 = vmatpush1.bf16.msra.mxu1 %v608_v3  ;;  %424 = vmatprep.subr.bf16.mxu0 %v609_v4  ;;  %v614_v7 = vld [vmem:[%s930_s1 + $0x110] ss:$8 sps:$4 sm:$0xff]   ;;  %v617_v9 = vld [vmem:[%s930_s1 + $0x124] ss:$8 sps:$4 sm:$0xff]   ;;  %v620_v11 = vld [vmem:[%s930_s1 + $0x120] ss:$8 sps:$4 sm:$0xff]  }
   0x5   :  { %465 = vmatprep.subr.bf16.mxu1 %v611_v5  ;;  %v621_v12 = vld [vmem:[%s930_s1 + $0x34] ss:$8 sps:$4 sm:$0xff]   ;;  %v625_v14 = vld [vmem:[%s930_s1 + $0x30] ss:$8 sps:$4 sm:$0xff]   ;;  %v627_v16 = vld [vmem:[%s930_s1 + $0x44] ss:$8 sps:$4 sm:$0xff]  }
   0x6   :  { %v623_v13 = vld [vmem:[%s930_s1 + $0x134] ss:$8 sps:$4 sm:$0xff]   ;;  %v626_v15 = vld [vmem:[%s930_s1 + $0x130] ss:$8 sps:$4 sm:$0xff]   ;;  %v629_v17 = vld [vmem:[%s930_s1 + $0x144] ss:$8 sps:$4 sm:$0xff]  }
   0x7   :  { %425 = vmatpush1.bf16.msra.mxu0 %v613_v6  ;;  %v631_v18 = vld [vmem:[%s930_s1 + $0x40] ss:$8 sps:$4 sm:$0xff]   ;;  %v633_v20 = vld [vmem:[%s930_s1 + $0x54] ss:$8 sps:$4 sm:$0xff]   ;;  %v637_v22 = vld [vmem:[%s930_s1 + $0x50] ss:$8 sps:$4 sm:$0xff]   ;;  %v515_v6 = vlaneseq }
   0x8   :  { %466 = vmatpush1.bf16.msra.mxu1 %v614_v7  ;;  %426 = vmatprep.subr.bf16.mxu0 %v615_v8  ;;  %v632_v19 = vld [vmem:[%s930_s1 + $0x140] ss:$8 sps:$4 sm:$0xff]   ;;  %v635_v21 = vld [vmem:[%s930_s1 + $0x154] ss:$8 sps:$4 sm:$0xff]   ;;  %v638_v23 = vld [vmem:[%s930_s1 + $0x150] ss:$8 sps:$4 sm:$0xff]  }
   0x9   :  { %467 = vmatprep.subr.bf16.mxu1 %v617_v9  ;;  %v639_v24 = vld [vmem:[%s930_s1 + $0x64] ss:$8 sps:$4 sm:$0xff]   ;;  %v643_v26 = vld [vmem:[%s930_s1 + $0x60] ss:$8 sps:$4 sm:$0xff]   ;;  %v645_v28 = vld [vmem:[%s930_s1 + $0x74] ss:$8 sps:$4 sm:$0xff]  }
   0xa   :  { %v641_v25 = vld [vmem:[%s930_s1 + $0x164] ss:$8 sps:$4 sm:$0xff]   ;;  %v644_v27 = vld [vmem:[%s930_s1 + $0x160] ss:$8 sps:$4 sm:$0xff]   ;;  %v647_v29 = vld [vmem:[%s930_s1 + $0x174] ss:$8 sps:$4 sm:$0xff]  }
   0xb   :  { %427 = vmatpush1.bf16.msra.mxu0 %v619_v10  ;;  %v649_v30 = vld [vmem:[%s930_s1 + $0x70] ss:$8 sps:$4 sm:$0xff]   ;;  %v651_v32 = vld [vmem:[%s930_s1 + $0x84] ss:$8 sps:$4 sm:$0xff]   ;;  %v655_v34 = vld [vmem:[%s930_s1 + $0x80] ss:$8 sps:$4 sm:$0xff]  }
   0xc   :  { %468 = vmatpush1.bf16.msra.mxu1 %v620_v11  ;;  %428 = vmatprep.subr.bf16.mxu0 %v621_v12  ;;  %v650_v31 = vld [vmem:[%s930_s1 + $0x170] ss:$8 sps:$4 sm:$0xff]   ;;  %v653_v33 = vld [vmem:[%s930_s1 + $0x184] ss:$8 sps:$4 sm:$0xff]   ;;  %v656_v35 = vld [vmem:[%s930_s1 + $0x180] ss:$8 sps:$4 sm:$0xff]  }
   0xd   :  { %469 = vmatprep.subr.bf16.mxu1 %v623_v13  ;;  %v657_v36 = vld [vmem:[%s930_s1 + $0x94] ss:$8 sps:$4 sm:$0xff]   ;;  %v661_v38 = vld [vmem:[%s930_s1 + $0x90] ss:$8 sps:$4 sm:$0xff]   ;;  %v663_v40 = vld [vmem:[%s930_s1 + $0xa4] ss:$8 sps:$4 sm:$0xff]  }
   0xe   :  { %v659_v37 = vld [vmem:[%s930_s1 + $0x194] ss:$8 sps:$4 sm:$0xff]   ;;  %v662_v39 = vld [vmem:[%s930_s1 + $0x190] ss:$8 sps:$4 sm:$0xff]   ;;  %v665_v41 = vld [vmem:[%s930_s1 + $0x1a4] ss:$8 sps:$4 sm:$0xff]  }
   0xf   :  { %429 = vmatpush1.bf16.msra.mxu0 %v625_v14  ;;  %v667_v42 = vld [vmem:[%s930_s1 + $0xa0] ss:$8 sps:$4 sm:$0xff]   ;;  %v669_v44 = vld [vmem:[%s930_s1 + $0xb4] ss:$8 sps:$4 sm:$0xff]   ;;  %v673_v49 = vld [vmem:[%s930_s1 + $0xb0] ss:$8 sps:$4 sm:$0xff]  }
  0x10   :  { %470 = vmatpush1.bf16.msra.mxu1 %v626_v15  ;;  %430 = vmatprep.subr.bf16.mxu0 %v627_v16  ;;  %v668_v43 = vld [vmem:[%s930_s1 + $0x1a0] ss:$8 sps:$4 sm:$0xff]   ;;  %v671_v45 = vld [vmem:[%s930_s1 + $0x1b4] ss:$8 sps:$4 sm:$0xff]   ;;  %v674_v50 = vld [vmem:[%s930_s1 + $0x1b0] ss:$8 sps:$4 sm:$0xff]  }
  0x11   :  { %471 = vmatprep.subr.bf16.mxu1 %v629_v17  ;;  %v22_v46 = vld [vmem:[%s931_s0] sm:$0xff]  ;;  %v23_v48 = vld [vmem:[%s931_s0 + $0x8] sm:$0xff]  ;;  %v681_v56 = vld [vmem:[%s930_s1 + $0xd4] ss:$8 sps:$4 sm:$0xff]   ;;  %v516_v7 = vshrl.u32 %v515_v6, 7 }
  0x12   :  { %v536_v47 = vcombine.high %v22_v46, %v22_v46  ;;  %v538_v51 = vcombine.high %v23_v48, %v23_v48  ;;  %v675_v52 = vld [vmem:[%s930_s1 + $0xc4] ss:$8 sps:$4 sm:$0xff]   ;;  %v679_v54 = vld [vmem:[%s930_s1 + $0xc0] ss:$8 sps:$4 sm:$0xff]   ;;  %v683_v57 = vld [vmem:[%s930_s1 + $0x1d4] ss:$8 sps:$4 sm:$0xff]   ;;  %v535_v4 = vcombine.low %v22_v46, %v22_v46  ;;  %v537_v5 = vcombine.low %v23_v48, %v23_v48 }
  0x13   :  { %431 = vmatpush1.bf16.msra.mxu0 %v631_v18  ;;  %v677_v53 = vld [vmem:[%s930_s1 + $0x1c4] ss:$8 sps:$4 sm:$0xff]   ;;  %v680_v55 = vld [vmem:[%s930_s1 + $0x1c0] ss:$8 sps:$4 sm:$0xff]   ;;  %v685_v58 = vld [vmem:[%s930_s1 + $0xd0] ss:$8 sps:$4 sm:$0xff]  }
  0x14   :  { %472 = vmatpush1.bf16.msra.mxu1 %v632_v19  ;;  %432 = vmatprep.subr.bf16.mxu0 %v633_v20  ;;  %v686_v59 = vld [vmem:[%s930_s1 + $0x1d0] ss:$8 sps:$4 sm:$0xff]   ;;  %v687_v60 = vld [vmem:[%s930_s1 + $0xe4] ss:$8 sps:$4 sm:$0xff]   ;;  %v691_v62 = vld [vmem:[%s930_s1 + $0xe0] ss:$8 sps:$4 sm:$0xff]  }
  0x15   :  { %473 = vmatprep.subr.bf16.mxu1 %v635_v21  ;;  %454 = vmatprep.mubr.bf16.mxu0 %v536_v47  ;;  %v689_v61 = vld [vmem:[%s930_s1 + $0x1e4] ss:$8 sps:$4 sm:$0xff]   ;;  %v692_v63 = vld [vmem:[%s930_s1 + $0x1e0] ss:$8 sps:$4 sm:$0xff]   ;;  %v693_v0 = vld [vmem:[%s930_s1 + $0xf4] ss:$8 sps:$4 sm:$0xff]  }
  0x16   :  { %495 = vmatprep.mubr.bf16.mxu1 %v538_v51  ;;  %v695_v1 = vld [vmem:[%s930_s1 + $0x1f4] ss:$8 sps:$4 sm:$0xff]   ;;  %v697_v2 = vld [vmem:[%s930_s1 + $0xf0] ss:$8 sps:$4 sm:$0xff]   ;;  %v517_v8 = vsub.s32 0, %v516_v7  ;;  %v521_v10 = vsub.s32 1, %v516_v7 }
  0x17   :  { %433 = vmatpush1.bf16.msra.mxu0 %v637_v22  ;;  %v698_v3 = vld [vmem:[%s930_s1 + $0x1f0] ss:$8 sps:$4 sm:$0xff]   ;;  %v513_v9 = vld [vmem:[%s932_s2] sm:$0x3] }
  0x18   :  { %474 = vmatpush1.bf16.msra.mxu1 %v638_v23  ;;  %434 = vmatprep.subr.bf16.mxu0 %v639_v24  ;;  %v518_v11 = vrot.slane %v513_v9, %v517_v8  ;;  %v522_v14 = vrot.slane %v513_v9, %v521_v10 }
  0x19   :  { %475 = vmatprep.subr.bf16.mxu1 %v641_v25 }
  0x1b   :  { %435 = vmatpush1.bf16.msra.mxu0 %v643_v26 }
  0x1c   :  { %476 = vmatpush1.bf16.msra.mxu1 %v644_v27  ;;  %436 = vmatprep.subr.bf16.mxu0 %v645_v28 }
  0x1d   :  { %477 = vmatprep.subr.bf16.mxu1 %v647_v29 }
  0x1f   :  { %437 = vmatpush1.bf16.msra.mxu0 %v649_v30 }
  0x20   :  { %478 = vmatpush1.bf16.msra.mxu1 %v650_v31  ;;  %438 = vmatprep.subr.bf16.mxu0 %v651_v32 }
  0x21   :  { %479 = vmatprep.subr.bf16.mxu1 %v653_v33 }
  0x23   :  { %439 = vmatpush1.bf16.msra.mxu0 %v655_v34 }
  0x24   :  { %480 = vmatpush1.bf16.msra.mxu1 %v656_v35  ;;  %440 = vmatprep.subr.bf16.mxu0 %v657_v36 }
  0x25   :  { %481 = vmatprep.subr.bf16.mxu1 %v659_v37 }
  0x27   :  { %441 = vmatpush1.bf16.msra.mxu0 %v661_v38 }
  0x28   :  { %482 = vmatpush1.bf16.msra.mxu1 %v662_v39  ;;  %442 = vmatprep.subr.bf16.mxu0 %v663_v40 }
  0x29   :  { %483 = vmatprep.subr.bf16.mxu1 %v665_v41 }
  0x2b   :  { %443 = vmatpush1.bf16.msra.mxu0 %v667_v42 }
  0x2c   :  { %484 = vmatpush1.bf16.msra.mxu1 %v668_v43  ;;  %444 = vmatprep.subr.bf16.mxu0 %v669_v44 }
  0x2d   :  { %485 = vmatprep.subr.bf16.mxu1 %v671_v45 }
  0x2f   :  { %445 = vmatpush1.bf16.msra.mxu0 %v673_v49 }
  0x30   :  { %486 = vmatpush1.bf16.msra.mxu1 %v674_v50  ;;  %446 = vmatprep.subr.bf16.mxu0 %v675_v52 }
  0x31   :  { %487 = vmatprep.subr.bf16.mxu1 %v677_v53 }
  0x33   :  { %447 = vmatpush1.bf16.msra.mxu0 %v679_v54 }
  0x34   :  { %488 = vmatpush1.bf16.msra.mxu1 %v680_v55  ;;  %448 = vmatprep.subr.bf16.mxu0 %v681_v56 }
  0x35   :  { %489 = vmatprep.subr.bf16.mxu1 %v683_v57 }
  0x37   :  { %449 = vmatpush1.bf16.msra.mxu0 %v685_v58 }
  0x38   :  { %490 = vmatpush1.bf16.msra.mxu1 %v686_v59  ;;  %450 = vmatprep.subr.bf16.mxu0 %v687_v60 }
  0x39   :  { %491 = vmatprep.subr.bf16.mxu1 %v689_v61 }
  0x3b   :  { %451 = vmatpush1.bf16.msra.mxu0 %v691_v62 }
  0x3c   :  { %492 = vmatpush1.bf16.msra.mxu1 %v692_v63  ;;  %452 = vmatprep.subr.bf16.mxu0 %v693_v0 }
  0x3d   :  { %493 = vmatprep.subr.bf16.mxu1 %v695_v1 }
  0x3f   :  { %453 = vmatpush1.bf16.msra.mxu0 %v697_v2 }
  0x40   :  { %494 = vmatpush1.bf16.msra.mxu1 %v698_v3 }
  0x42   :  { %455 = vmatmul.mubr.bf16.vlgmr.msra.gmra.mrb[0].mxu0 %v535_v4 }
  0x43   :  { %496 = vmatmul.mubr.bf16.vlgmr.msra.gmra.mrb[0].mxu1 %v537_v5 }
 0x115   :  { %v456_v12 = vpop.f32.mrb[0].mxu0 }
 0x116   :  { %v497_v13 = vpop.f32.mrb[0].mxu1  ;;  %v458_v16 = vpop.f32.mrb[1].mxu0 }
 0x117   :  { %v498_v15 = vadd.f32 %v497_v13, %v456_v12  ;;  %v499_v17 = vpop.f32.mrb[1].mxu1  ;;  %v460_v19 = vpop.f32.mrb[2].mxu0 }
 0x118   :  { %v500_v18 = vadd.f32 %v499_v17, %v458_v16  ;;  %v501_v20 = vpop.f32.mrb[2].mxu1  ;;  %v461_v22 = vpop.f32.mrb[3].mxu0 }
 0x119   :  { %v525_v21 = vadd.f32 %v518_v11, %v498_v15  ;;  %v502_v23 = vpop.f32.mrb[3].mxu1 }
 0x11a   :  { %v526_v24 = vadd.f32 %v522_v14, %v500_v18 }
 0x11b   :  { %v527_v25 = vmax.f32 %v525_v21, 0.0 }
 0x11c   :  { %v528_v26 = vmax.f32 %v526_v24, 0.0 }
 0x11d   :  { %529 = vst [vmem:[%s933_s3] sm:$0xff] %v527_v25 }
 0x11e   :  { %530 = vst [vmem:[%s933_s3 + $0x8] sm:$0xff] %v528_v26 }

// kernel: forward.84
= control target key start
LH: loop header
LB: loop body
LE: loop exit
PB: predicated region body
PF: predicated region fallthrough
CT: control target
= control target key end

     0   :  { %s842_s12 = smov 0   ;;  %s844_s13 = smov 0   ;;  %s927_s0 = inlined_call_operand.vmem [shape: bf16[8,1280], index: 0, kind: input, shape index: {}]   ;;  %s928_s1 = inlined_call_operand.vmem [shape: bf16[1280,256], index: 1, kind: input, shape index: {}]   ;;  %s929_s2 = inlined_call_operand.vmem [shape: f32[1,256], index: 2, kind: input, shape index: {}]   ;;  %s930_s3 = inlined_call_operand.vmem [shape: f32[8,256], index: 3, kind: output, shape index: {}]  }
   0x1   :  { %s846_s14 = smov 0  }
   0x2 LB: > { %s25_s15 = sadd.s32 1, %s815_s13  ;;  %p675_p0 = scmp.ge.s32.totalorder %s819_s14, 1  ;;  %s819_s14 = sphi %s846_s14, %s13_s14   ;;  %s815_s13 = sphi %s844_s13, %s932_s13   ;;  %s811_s12 = sphi %s842_s12, %s931_s12  }
   0x3   : > { %p26_p1 = scmp.ge.s32.totalorder %s25_s15, 5  ;;  %p194_p2 = scmp.lt.s32.totalorder %s819_s14, 6 }
   0x5   : > { %s934_s15 = smov (%p26_p1, %s25_s15), 0  ;;  %p195_p3 = pnand %p675_p0, %p194_p2 }
   0x6   : > { %s676_s16 = sshll.u32 (!%p195_p3), %s811_s12, 1  ;;  %s678_s17 = sshll.u32 (!%p195_p3), %s811_s12, 5 }
   0x7   : > { %198 = sbr.rel (%p195_p3) target bundleno = 317 (0x13d), region = 32  ;;  %p243_p4 = scmp.lt.s32.totalorder (!%p195_p3), %s676_s16, 9 }
   0x8   : > { %p252_p5 = scmp.lt.s32.totalorder (!%p195_p3), %s678_s17, 159  ;;  %p681_p6 = scmp.ne.s32.totalorder (!%p195_p3), %s811_s12, 0 }
   0xe   : > { %s936_s16 = smov (!%p243_p4, %s676_s16), 9  ;;  %s938_s17 = smov (!%p252_p5, %s678_s17), 159 }
   0xf   : > { %s677_s18 = sshll.u32 %s936_s16, 2  ;;  %s721_s22 = sshll.u32 %s938_s17, 3  ;;  %v821_v0 = vmov (!%p681_p6), 0.0  }
  0x10   : > { %s867_s21 = scalar_lea.vmem %s927_s0, %s677_s18  ;;  %s872_s25 = scalar_lea.vmem %s928_s1, %s721_s22  ;;  %281 = vst [vmem:[#allocation2] sm:$0xff] (!%p681_p6), %v821_v0  ;;  %282 = vst [vmem:[#allocation2 + $0x8] sm:$0xff] (!%p681_p6), %v821_v0 }
  0x11   : > { %280 = sbr.rel (%p681_p6) target bundleno = 24 (0x18), region = 36 }
  0x18 PF: > { %v747_v1 = vld [vmem:[%s872_s25 + $0x4] ss:$8 sps:$4 sm:$0xff]   ;;  %v749_v2 = vld [vmem:[%s872_s25] ss:$8 sps:$4 sm:$0xff]   ;;  %v750_v3 = vld [vmem:[%s872_s25 + $0x14] ss:$8 sps:$4 sm:$0xff]  }
  0x19   : > { %485 = vmatprep.subr.bf16.mxu0 %v747_v1  ;;  %v752_v4 = vld [vmem:[%s872_s25 + $0x10] ss:$8 sps:$4 sm:$0xff]   ;;  %v753_v5 = vld [vmem:[%s872_s25 + $0x24] ss:$8 sps:$4 sm:$0xff]   ;;  %v755_v6 = vld [vmem:[%s872_s25 + $0x20] ss:$8 sps:$4 sm:$0xff]  }
  0x1a   : > { %486 = vmatpush1.bf16.msra.mxu0 %v749_v2  ;;  %v756_v7 = vld [vmem:[%s872_s25 + $0x34] ss:$8 sps:$4 sm:$0xff]   ;;  %v758_v8 = vld [vmem:[%s872_s25 + $0x30] ss:$8 sps:$4 sm:$0xff]   ;;  %v759_v9 = vld [vmem:[%s872_s25 + $0x44] ss:$8 sps:$4 sm:$0xff]  }
  0x1b   : > { %487 = vmatprep.subr.bf16.mxu0 %v750_v3  ;;  %v761_v10 = vld [vmem:[%s872_s25 + $0x40] ss:$8 sps:$4 sm:$0xff]   ;;  %v762_v11 = vld [vmem:[%s872_s25 + $0x54] ss:$8 sps:$4 sm:$0xff]   ;;  %v764_v12 = vld [vmem:[%s872_s25 + $0x50] ss:$8 sps:$4 sm:$0xff]  }
  0x1c   : > { %v765_v13 = vld [vmem:[%s872_s25 + $0x64] ss:$8 sps:$4 sm:$0xff]   ;;  %v767_v16 = vld [vmem:[%s872_s25 + $0x60] ss:$8 sps:$4 sm:$0xff]   ;;  %v768_v17 = vld [vmem:[%s872_s25 + $0x74] ss:$8 sps:$4 sm:$0xff]  }
  0x1d   : > { %v285_v14 = vld [vmem:[%s867_s21] sm:$0xff]  ;;  %v770_v18 = vld [vmem:[%s872_s25 + $0x70] ss:$8 sps:$4 sm:$0xff]   ;;  %v774_v21 = vld [vmem:[%s872_s25 + $0x94] ss:$8 sps:$4 sm:$0xff]   ;;  %p716_p7 = scmp.ne.s32.totalorder %s811_s12, 4 }
  0x1e   : > { %488 = vmatpush1.bf16.msra.mxu0 %v752_v4  ;;  %v683_v15 = vcombine.high %v285_v14, %v285_v14  ;;  %v771_v19 = vld [vmem:[%s872_s25 + $0x84] ss:$8 sps:$4 sm:$0xff]   ;;  %v773_v20 = vld [vmem:[%s872_s25 + $0x80] ss:$8 sps:$4 sm:$0xff]   ;;  %v776_v22 = vld [vmem:[%s872_s25 + $0x90] ss:$8 sps:$4 sm:$0xff]   ;;  %v682_v35 = vcombine.low %v285_v14, %v285_v14  ;;  %v538_v44 = vlaneseq (!%p716_p7) }
  0x1f   : > { %489 = vmatprep.subr.bf16.mxu0 %v753_v5  ;;  %v777_v23 = vld [vmem:[%s872_s25 + $0xa4] ss:$8 sps:$4 sm:$0xff]   ;;  %v779_v24 = vld [vmem:[%s872_s25 + $0xa0] ss:$8 sps:$4 sm:$0xff]   ;;  %v780_v25 = vld [vmem:[%s872_s25 + $0xb4] ss:$8 sps:$4 sm:$0xff]  }
  0x20   : > { %517 = vmatprep.mubr.bf16.mxu0 %v683_v15  ;;  %v782_v26 = vld [vmem:[%s872_s25 + $0xb0] ss:$8 sps:$4 sm:$0xff]   ;;  %v783_v27 = vld [vmem:[%s872_s25 + $0xc4] ss:$8 sps:$4 sm:$0xff]   ;;  %v785_v28 = vld [vmem:[%s872_s25 + $0xc0] ss:$8 sps:$4 sm:$0xff]  }
  0x21   : > { %v786_v29 = vld [vmem:[%s872_s25 + $0xd4] ss:$8 sps:$4 sm:$0xff]   ;;  %v788_v30 = vld [vmem:[%s872_s25 + $0xd0] ss:$8 sps:$4 sm:$0xff]   ;;  %v789_v31 = vld [vmem:[%s872_s25 + $0xe4] ss:$8 sps:$4 sm:$0xff]  }
  0x22   : > { %490 = vmatpush1.bf16.msra.mxu0 %v755_v6  ;;  %v791_v32 = vld [vmem:[%s872_s25 + $0xe0] ss:$8 sps:$4 sm:$0xff]   ;;  %v792_v33 = vld [vmem:[%s872_s25 + $0xf4] ss:$8 sps:$4 sm:$0xff]   ;;  %v794_v34 = vld [vmem:[%s872_s25 + $0xf0] ss:$8 sps:$4 sm:$0xff]  }
  0x23   : > { %491 = vmatprep.subr.bf16.mxu0 %v756_v7  ;;  %v283_v36 = vld [vmem:[#allocation2] sm:$0xff]  ;;  %v284_v37 = vld [vmem:[#allocation2 + $0x8] sm:$0xff]  ;;  %v539_v45 = vshrl.u32 (!%p716_p7), %v538_v44, 7 }
  0x24   : > { %v536_v46 = vld [vmem:[%s929_s2] sm:$0x3] (!%p716_p7) }
  0x25   : > { %v540_v47 = vsub.s32 (!%p716_p7), 0, %v539_v45  ;;  %v544_v48 = vsub.s32 (!%p716_p7), 1, %v539_v45 }
  0x26   : > { %492 = vmatpush1.bf16.msra.mxu0 %v758_v8 }
  0x27   : > { %493 = vmatprep.subr.bf16.mxu0 %v759_v9  ;;  %v541_v51 = vrot.slane (!%p716_p7), %v536_v46, %v540_v47  ;;  %v545_v52 = vrot.slane (!%p716_p7), %v536_v46, %v544_v48 }
  0x2a   : > { %494 = vmatpush1.bf16.msra.mxu0 %v761_v10 }
  0x2b   : > { %495 = vmatprep.subr.bf16.mxu0 %v762_v11 }
  0x2e   : > { %496 = vmatpush1.bf16.msra.mxu0 %v764_v12 }
  0x2f   : > { %497 = vmatprep.subr.bf16.mxu0 %v765_v13 }
  0x32   : > { %498 = vmatpush1.bf16.msra.mxu0 %v767_v16 }
  0x33   : > { %499 = vmatprep.subr.bf16.mxu0 %v768_v17 }
  0x36   : > { %500 = vmatpush1.bf16.msra.mxu0 %v770_v18 }
  0x37   : > { %501 = vmatprep.subr.bf16.mxu0 %v771_v19 }
  0x3a   : > { %502 = vmatpush1.bf16.msra.mxu0 %v773_v20 }
  0x3b   : > { %503 = vmatprep.subr.bf16.mxu0 %v774_v21 }
  0x3e   : > { %504 = vmatpush1.bf16.msra.mxu0 %v776_v22 }
  0x3f   : > { %505 = vmatprep.subr.bf16.mxu0 %v777_v23 }
  0x42   : > { %506 = vmatpush1.bf16.msra.mxu0 %v779_v24 }
  0x43   : > { %507 = vmatprep.subr.bf16.mxu0 %v780_v25 }
  0x46   : > { %508 = vmatpush1.bf16.msra.mxu0 %v782_v26 }
  0x47   : > { %509 = vmatprep.subr.bf16.mxu0 %v783_v27 }
  0x4a   : > { %510 = vmatpush1.bf16.msra.mxu0 %v785_v28 }
  0x4b   : > { %511 = vmatprep.subr.bf16.mxu0 %v786_v29 }
  0x4e   : > { %512 = vmatpush1.bf16.msra.mxu0 %v788_v30 }
  0x4f   : > { %513 = vmatprep.subr.bf16.mxu0 %v789_v31 }
  0x52   : > { %514 = vmatpush1.bf16.msra.mxu0 %v791_v32 }
  0x53   : > { %515 = vmatprep.subr.bf16.mxu0 %v792_v33 }
  0x56   : > { %516 = vmatpush1.bf16.msra.mxu0 %v794_v34 }
  0x59   : > { %518 = vmatmul.mubr.bf16.vlgmr.msra.gmra.mrb[0].mxu0 %v682_v35 }
 0x12a   : > { %533 = sbr.rel (%p716_p7) target bundleno = 317 (0x13d), region = 40 }
 0x12c   : > { %v519_v38 = vpop.f32.mrb[0].mxu0 }
 0x12d   : > { %v526_v39 = vadd.f32 %v519_v38, %v283_v36  ;;  %v521_v40 = vpop.f32.mrb[1].mxu0 }
 0x12e   : > { %v527_v41 = vadd.f32 %v521_v40, %v284_v37  ;;  %v523_v42 = vpop.f32.mrb[2].mxu0 }
 0x12f   : > { %528 = vst [vmem:[#allocation2] sm:$0xff] %v526_v39  ;;  %v524_v43 = vpop.f32.mrb[3].mxu0 }
 0x130   : > { %529 = vst [vmem:[#allocation2 + $0x8] sm:$0xff] %v527_v41 }
 0x136   : > { %v534_v49 = vld [vmem:[#allocation2] sm:$0xff] }
 0x137   : > { %v535_v50 = vld [vmem:[#allocation2 + $0x8] sm:$0xff]  ;;  %v548_v53 = vadd.f32 %v541_v51, %v534_v49 }
 0x138   : > { %v549_v54 = vadd.f32 %v545_v52, %v535_v50 }
 0x139   : > { %v550_v55 = vmax.f32 %v548_v53, 0.0 }
 0x13a   : > { %v551_v56 = vmax.f32 %v549_v54, 0.0 }
 0x13b   : > { %552 = vst [vmem:[%s930_s3] sm:$0xff] %v550_v55 }
 0x13c   : > { %553 = vst [vmem:[%s930_s3 + $0x8] sm:$0xff] %v551_v56 }
 0x13d PF: > { %s13_s14 = sadd.s32 1, %s819_s14   ;;  %s931_s12 = smov %s815_s13 }
 0x13e   : > { %p10_p8 = scmp.ge.s32.totalorder %s13_s14, 7   ;;  %s932_s13 = smov %s934_s15 }
 0x140   :  { %12 = sbr.rel (!%p10_p8) target bundleno = 2 (0x2), region = 76 }

// kernel: forward.83
= control target key start
LH: loop header
LB: loop body
LE: loop exit
PB: predicated region body
PF: predicated region fallthrough
CT: control target
= control target key end

     0   :  { %s930_s1 = inlined_call_operand.vmem [shape: bf16[512,256], index: 1, kind: input, shape index: {}]   ;;  %s931_s0 = inlined_call_operand.vmem [shape: bf16[8,512], index: 0, kind: input, shape index: {}]   ;;  %s932_s2 = inlined_call_operand.vmem [shape: f32[1,256], index: 2, kind: input, shape index: {}]   ;;  %s933_s3 = inlined_call_operand.vmem [shape: f32[8,256], index: 3, kind: output, shape index: {}]  }
   0x1   :  { %v603_v0 = vld [vmem:[%s930_s1 + $0x4] ss:$8 sps:$4 sm:$0xff]   ;;  %v607_v2 = vld [vmem:[%s930_s1] ss:$8 sps:$4 sm:$0xff]   ;;  %v609_v4 = vld [vmem:[%s930_s1 + $0x14] ss:$8 sps:$4 sm:$0xff]  }
   0x2   :  { %v605_v1 = vld [vmem:[%s930_s1 + $0x104] ss:$8 sps:$4 sm:$0xff]   ;;  %422 = vmatprep.subr.bf16.mxu0 %v603_v0  ;;  %v608_v3 = vld [vmem:[%s930_s1 + $0x100] ss:$8 sps:$4 sm:$0xff]   ;;  %v611_v5 = vld [vmem:[%s930_s1 + $0x114] ss:$8 sps:$4 sm:$0xff]  }
   0x3   :  { %463 = vmatprep.subr.bf16.mxu1 %v605_v1  ;;  %423 = vmatpush1.bf16.msra.mxu0 %v607_v2  ;;  %v613_v6 = vld [vmem:[%s930_s1 + $0x10] ss:$8 sps:$4 sm:$0xff]   ;;  %v615_v8 = vld [vmem:[%s930_s1 + $0x24] ss:$8 sps:$4 sm:$0xff]   ;;  %v619_v10 = vld [vmem:[%s930_s1 + $0x20] ss:$8 sps:$4 sm:$0xff]  }
   0x4   :  { %464 = vmatpush1.bf16.msra.mxu1 %v608_v3  ;;  %424 = vmatprep.subr.bf16.mxu0 %v609_v4  ;;  %v614_v7 = vld [vmem:[%s930_s1 + $0x110] ss:$8 sps:$4 sm:$0xff]   ;;  %v617_v9 = vld [vmem:[%s930_s1 + $0x124] ss:$8 sps:$4 sm:$0xff]   ;;  %v620_v11 = vld [vmem:[%s930_s1 + $0x120] ss:$8 sps:$4 sm:$0xff]  }
   0x5   :  { %465 = vmatprep.subr.bf16.mxu1 %v611_v5  ;;  %v621_v12 = vld [vmem:[%s930_s1 + $0x34] ss:$8 sps:$4 sm:$0xff]   ;;  %v625_v14 = vld [vmem:[%s930_s1 + $0x30] ss:$8 sps:$4 sm:$0xff]   ;;  %v627_v16 = vld [vmem:[%s930_s1 + $0x44] ss:$8 sps:$4 sm:$0xff]  }
   0x6   :  { %v623_v13 = vld [vmem:[%s930_s1 + $0x134] ss:$8 sps:$4 sm:$0xff]   ;;  %v626_v15 = vld [vmem:[%s930_s1 + $0x130] ss:$8 sps:$4 sm:$0xff]   ;;  %v629_v17 = vld [vmem:[%s930_s1 + $0x144] ss:$8 sps:$4 sm:$0xff]  }
   0x7   :  { %425 = vmatpush1.bf16.msra.mxu0 %v613_v6  ;;  %v631_v18 = vld [vmem:[%s930_s1 + $0x40] ss:$8 sps:$4 sm:$0xff]   ;;  %v633_v20 = vld [vmem:[%s930_s1 + $0x54] ss:$8 sps:$4 sm:$0xff]   ;;  %v637_v22 = vld [vmem:[%s930_s1 + $0x50] ss:$8 sps:$4 sm:$0xff]   ;;  %v515_v6 = vlaneseq }
   0x8   :  { %466 = vmatpush1.bf16.msra.mxu1 %v614_v7  ;;  %426 = vmatprep.subr.bf16.mxu0 %v615_v8  ;;  %v632_v19 = vld [vmem:[%s930_s1 + $0x140] ss:$8 sps:$4 sm:$0xff]   ;;  %v635_v21 = vld [vmem:[%s930_s1 + $0x154] ss:$8 sps:$4 sm:$0xff]   ;;  %v638_v23 = vld [vmem:[%s930_s1 + $0x150] ss:$8 sps:$4 sm:$0xff]  }
   0x9   :  { %467 = vmatprep.subr.bf16.mxu1 %v617_v9  ;;  %v639_v24 = vld [vmem:[%s930_s1 + $0x64] ss:$8 sps:$4 sm:$0xff]   ;;  %v643_v26 = vld [vmem:[%s930_s1 + $0x60] ss:$8 sps:$4 sm:$0xff]   ;;  %v645_v28 = vld [vmem:[%s930_s1 + $0x74] ss:$8 sps:$4 sm:$0xff]  }
   0xa   :  { %v641_v25 = vld [vmem:[%s930_s1 + $0x164] ss:$8 sps:$4 sm:$0xff]   ;;  %v644_v27 = vld [vmem:[%s930_s1 + $0x160] ss:$8 sps:$4 sm:$0xff]   ;;  %v647_v29 = vld [vmem:[%s930_s1 + $0x174] ss:$8 sps:$4 sm:$0xff]  }
   0xb   :  { %427 = vmatpush1.bf16.msra.mxu0 %v619_v10  ;;  %v649_v30 = vld [vmem:[%s930_s1 + $0x70] ss:$8 sps:$4 sm:$0xff]   ;;  %v651_v32 = vld [vmem:[%s930_s1 + $0x84] ss:$8 sps:$4 sm:$0xff]   ;;  %v655_v34 = vld [vmem:[%s930_s1 + $0x80] ss:$8 sps:$4 sm:$0xff]  }
   0xc   :  { %468 = vmatpush1.bf16.msra.mxu1 %v620_v11  ;;  %428 = vmatprep.subr.bf16.mxu0 %v621_v12  ;;  %v650_v31 = vld [vmem:[%s930_s1 + $0x170] ss:$8 sps:$4 sm:$0xff]   ;;  %v653_v33 = vld [vmem:[%s930_s1 + $0x184] ss:$8 sps:$4 sm:$0xff]   ;;  %v656_v35 = vld [vmem:[%s930_s1 + $0x180] ss:$8 sps:$4 sm:$0xff]  }
   0xd   :  { %469 = vmatprep.subr.bf16.mxu1 %v623_v13  ;;  %v657_v36 = vld [vmem:[%s930_s1 + $0x94] ss:$8 sps:$4 sm:$0xff]   ;;  %v661_v38 = vld [vmem:[%s930_s1 + $0x90] ss:$8 sps:$4 sm:$0xff]   ;;  %v663_v40 = vld [vmem:[%s930_s1 + $0xa4] ss:$8 sps:$4 sm:$0xff]  }
   0xe   :  { %v659_v37 = vld [vmem:[%s930_s1 + $0x194] ss:$8 sps:$4 sm:$0xff]   ;;  %v662_v39 = vld [vmem:[%s930_s1 + $0x190] ss:$8 sps:$4 sm:$0xff]   ;;  %v665_v41 = vld [vmem:[%s930_s1 + $0x1a4] ss:$8 sps:$4 sm:$0xff]  }
   0xf   :  { %429 = vmatpush1.bf16.msra.mxu0 %v625_v14  ;;  %v667_v42 = vld [vmem:[%s930_s1 + $0xa0] ss:$8 sps:$4 sm:$0xff]   ;;  %v669_v44 = vld [vmem:[%s930_s1 + $0xb4] ss:$8 sps:$4 sm:$0xff]   ;;  %v673_v49 = vld [vmem:[%s930_s1 + $0xb0] ss:$8 sps:$4 sm:$0xff]  }
  0x10   :  { %470 = vmatpush1.bf16.msra.mxu1 %v626_v15  ;;  %430 = vmatprep.subr.bf16.mxu0 %v627_v16  ;;  %v668_v43 = vld [vmem:[%s930_s1 + $0x1a0] ss:$8 sps:$4 sm:$0xff]   ;;  %v671_v45 = vld [vmem:[%s930_s1 + $0x1b4] ss:$8 sps:$4 sm:$0xff]   ;;  %v674_v50 = vld [vmem:[%s930_s1 + $0x1b0] ss:$8 sps:$4 sm:$0xff]  }
  0x11   :  { %471 = vmatprep.subr.bf16.mxu1 %v629_v17  ;;  %v22_v46 = vld [vmem:[%s931_s0] sm:$0xff]  ;;  %v23_v48 = vld [vmem:[%s931_s0 + $0x8] sm:$0xff]  ;;  %v681_v56 = vld [vmem:[%s930_s1 + $0xd4] ss:$8 sps:$4 sm:$0xff]   ;;  %v516_v7 = vshrl.u32 %v515_v6, 7 }
  0x12   :  { %v536_v47 = vcombine.high %v22_v46, %v22_v46  ;;  %v538_v51 = vcombine.high %v23_v48, %v23_v48  ;;  %v675_v52 = vld [vmem:[%s930_s1 + $0xc4] ss:$8 sps:$4 sm:$0xff]   ;;  %v679_v54 = vld [vmem:[%s930_s1 + $0xc0] ss:$8 sps:$4 sm:$0xff]   ;;  %v683_v57 = vld [vmem:[%s930_s1 + $0x1d4] ss:$8 sps:$4 sm:$0xff]   ;;  %v535_v4 = vcombine.low %v22_v46, %v22_v46  ;;  %v537_v5 = vcombine.low %v23_v48, %v23_v48 }
  0x13   :  { %431 = vmatpush1.bf16.msra.mxu0 %v631_v18  ;;  %v677_v53 = vld [vmem:[%s930_s1 + $0x1c4] ss:$8 sps:$4 sm:$0xff]   ;;  %v680_v55 = vld [vmem:[%s930_s1 + $0x1c0] ss:$8 sps:$4 sm:$0xff]   ;;  %v685_v58 = vld [vmem:[%s930_s1 + $0xd0] ss:$8 sps:$4 sm:$0xff]  }
  0x14   :  { %472 = vmatpush1.bf16.msra.mxu1 %v632_v19  ;;  %432 = vmatprep.subr.bf16.mxu0 %v633_v20  ;;  %v686_v59 = vld [vmem:[%s930_s1 + $0x1d0] ss:$8 sps:$4 sm:$0xff]   ;;  %v687_v60 = vld [vmem:[%s930_s1 + $0xe4] ss:$8 sps:$4 sm:$0xff]   ;;  %v691_v62 = vld [vmem:[%s930_s1 + $0xe0] ss:$8 sps:$4 sm:$0xff]  }
  0x15   :  { %473 = vmatprep.subr.bf16.mxu1 %v635_v21  ;;  %454 = vmatprep.mubr.bf16.mxu0 %v536_v47  ;;  %v689_v61 = vld [vmem:[%s930_s1 + $0x1e4] ss:$8 sps:$4 sm:$0xff]   ;;  %v692_v63 = vld [vmem:[%s930_s1 + $0x1e0] ss:$8 sps:$4 sm:$0xff]   ;;  %v693_v0 = vld [vmem:[%s930_s1 + $0xf4] ss:$8 sps:$4 sm:$0xff]  }
  0x16   :  { %495 = vmatprep.mubr.bf16.mxu1 %v538_v51  ;;  %v695_v1 = vld [vmem:[%s930_s1 + $0x1f4] ss:$8 sps:$4 sm:$0xff]   ;;  %v697_v2 = vld [vmem:[%s930_s1 + $0xf0] ss:$8 sps:$4 sm:$0xff]   ;;  %v517_v8 = vsub.s32 0, %v516_v7  ;;  %v521_v10 = vsub.s32 1, %v516_v7 }
  0x17   :  { %433 = vmatpush1.bf16.msra.mxu0 %v637_v22  ;;  %v698_v3 = vld [vmem:[%s930_s1 + $0x1f0] ss:$8 sps:$4 sm:$0xff]   ;;  %v513_v9 = vld [vmem:[%s932_s2] sm:$0x3] }
  0x18   :  { %474 = vmatpush1.bf16.msra.mxu1 %v638_v23  ;;  %434 = vmatprep.subr.bf16.mxu0 %v639_v24  ;;  %v518_v11 = vrot.slane %v513_v9, %v517_v8  ;;  %v522_v14 = vrot.slane %v513_v9, %v521_v10 }
  0x19   :  { %475 = vmatprep.subr.bf16.mxu1 %v641_v25 }
  0x1b   :  { %435 = vmatpush1.bf16.msra.mxu0 %v643_v26 }
  0x1c   :  { %476 = vmatpush1.bf16.msra.mxu1 %v644_v27  ;;  %436 = vmatprep.subr.bf16.mxu0 %v645_v28 }
  0x1d   :  { %477 = vmatprep.subr.bf16.mxu1 %v647_v29 }
  0x1f   :  { %437 = vmatpush1.bf16.msra.mxu0 %v649_v30 }
  0x20   :  { %478 = vmatpush1.bf16.msra.mxu1 %v650_v31  ;;  %438 = vmatprep.subr.bf16.mxu0 %v651_v32 }
  0x21   :  { %479 = vmatprep.subr.bf16.mxu1 %v653_v33 }
  0x23   :  { %439 = vmatpush1.bf16.msra.mxu0 %v655_v34 }
  0x24   :  { %480 = vmatpush1.bf16.msra.mxu1 %v656_v35  ;;  %440 = vmatprep.subr.bf16.mxu0 %v657_v36 }
  0x25   :  { %481 = vmatprep.subr.bf16.mxu1 %v659_v37 }
  0x27   :  { %441 = vmatpush1.bf16.msra.mxu0 %v661_v38 }
  0x28   :  { %482 = vmatpush1.bf16.msra.mxu1 %v662_v39  ;;  %442 = vmatprep.subr.bf16.mxu0 %v663_v40 }
  0x29   :  { %483 = vmatprep.subr.bf16.mxu1 %v665_v41 }
  0x2b   :  { %443 = vmatpush1.bf16.msra.mxu0 %v667_v42 }
  0x2c   :  { %484 = vmatpush1.bf16.msra.mxu1 %v668_v43  ;;  %444 = vmatprep.subr.bf16.mxu0 %v669_v44 }
  0x2d   :  { %485 = vmatprep.subr.bf16.mxu1 %v671_v45 }
  0x2f   :  { %445 = vmatpush1.bf16.msra.mxu0 %v673_v49 }
  0x30   :  { %486 = vmatpush1.bf16.msra.mxu1 %v674_v50  ;;  %446 = vmatprep.subr.bf16.mxu0 %v675_v52 }
  0x31   :  { %487 = vmatprep.subr.bf16.mxu1 %v677_v53 }
  0x33   :  { %447 = vmatpush1.bf16.msra.mxu0 %v679_v54 }
  0x34   :  { %488 = vmatpush1.bf16.msra.mxu1 %v680_v55  ;;  %448 = vmatprep.subr.bf16.mxu0 %v681_v56 }
  0x35   :  { %489 = vmatprep.subr.bf16.mxu1 %v683_v57 }
  0x37   :  { %449 = vmatpush1.bf16.msra.mxu0 %v685_v58 }
  0x38   :  { %490 = vmatpush1.bf16.msra.mxu1 %v686_v59  ;;  %450 = vmatprep.subr.bf16.mxu0 %v687_v60 }
  0x39   :  { %491 = vmatprep.subr.bf16.mxu1 %v689_v61 }
  0x3b   :  { %451 = vmatpush1.bf16.msra.mxu0 %v691_v62 }
  0x3c   :  { %492 = vmatpush1.bf16.msra.mxu1 %v692_v63  ;;  %452 = vmatprep.subr.bf16.mxu0 %v693_v0 }
  0x3d   :  { %493 = vmatprep.subr.bf16.mxu1 %v695_v1 }
  0x3f   :  { %453 = vmatpush1.bf16.msra.mxu0 %v697_v2 }
  0x40   :  { %494 = vmatpush1.bf16.msra.mxu1 %v698_v3 }
  0x42   :  { %455 = vmatmul.mubr.bf16.vlgmr.msra.gmra.mrb[0].mxu0 %v535_v4 }
  0x43   :  { %496 = vmatmul.mubr.bf16.vlgmr.msra.gmra.mrb[0].mxu1 %v537_v5 }
 0x115   :  { %v456_v12 = vpop.f32.mrb[0].mxu0 }
 0x116   :  { %v497_v13 = vpop.f32.mrb[0].mxu1  ;;  %v458_v16 = vpop.f32.mrb[1].mxu0 }
 0x117   :  { %v498_v15 = vadd.f32 %v497_v13, %v456_v12  ;;  %v499_v17 = vpop.f32.mrb[1].mxu1  ;;  %v460_v19 = vpop.f32.mrb[2].mxu0 }
 0x118   :  { %v500_v18 = vadd.f32 %v499_v17, %v458_v16  ;;  %v501_v20 = vpop.f32.mrb[2].mxu1  ;;  %v461_v22 = vpop.f32.mrb[3].mxu0 }
 0x119   :  { %v525_v21 = vadd.f32 %v518_v11, %v498_v15  ;;  %v502_v23 = vpop.f32.mrb[3].mxu1 }
 0x11a   :  { %v526_v24 = vadd.f32 %v522_v14, %v500_v18 }
 0x11b   :  { %v527_v25 = vmax.f32 %v525_v21, 0.0 }
 0x11c   :  { %v528_v26 = vmax.f32 %v526_v24, 0.0 }
 0x11d   :  { %529 = vst [vmem:[%s933_s3] sm:$0xff] %v527_v25 }
 0x11e   :  { %530 = vst [vmem:[%s933_s3 + $0x8] sm:$0xff] %v528_v26 }

</bundles_post_ra>
